<compile_context>
chip_gen: v6e
topology: v6e:2x2x1
jax: 0.10.0
libtpu: 0.0.40
codegen_flags: <defaults>
</compile_context>

<pallas_src>
import functools

import jax
import jax.numpy as jnp
import numpy as np
from jax.experimental import pallas as pl
from jax.experimental.pallas import tpu as pltpu


def _stn_kernel(ddf_ref, refg_ref, idx_ref, img_ref, grid_ref, warp_ref,
                acc_ref, *, D, H, W):
    """One (batch n, output tile t, source chunk k) grid step.

    ddf_ref : (1, 3, T)   displacement tile, channel order (d, h, w)
    refg_ref: (3, T)      normalized reference grid tile, channel order (d,h,w)
    idx_ref : (Sc, 3)     (z, y, x) voxel indices of this source chunk's rows
    img_ref : (1, C, Sc)  image chunk (flattened spatial), f32
    grid_ref: (1, 3, T)   output sampling grid tile, channel order (x, y, z)
    warp_ref: (1, C, T)   warped image tile (channels-first, lane-dense)
    acc_ref : (C, T)      f32 accumulator scratch (persists across k)
    """
    k = pl.program_id(2)
    last_k = pl.num_programs(2) - 1
    T = ddf_ref.shape[2]
    Sc = img_ref.shape[2]

    @pl.when(k == 0)
    def _init():
        acc_ref[...] = jnp.zeros_like(acc_ref)

    # Normalized sampling coordinates: grid = ddf + reference grid (norm=True).
    g = ddf_ref[0] + refg_ref[...]          # (3, T), channels (d, h, w)
    zc = g[0:1, :]                          # D-direction coord
    yc = g[1:2, :]                          # H-direction coord
    xc = g[2:3, :]                          # W-direction coord

    # align_corners=True un-normalization to voxel coordinates.
    fz = (zc + 1.0) * (0.5 * (D - 1))
    fy = (yc + 1.0) * (0.5 * (H - 1))
    fx = (xc + 1.0) * (0.5 * (W - 1))
    z0f = jnp.floor(fz); wz = fz - z0f; z0 = z0f.astype(jnp.int32)
    y0f = jnp.floor(fy); wy = fy - y0f; y0 = y0f.astype(jnp.int32)
    x0f = jnp.floor(fx); wx = fx - x0f; x0 = x0f.astype(jnp.int32)

    # Separable per-axis corner-weight maps a[i, t] (i indexes the source axis).
    # Out-of-range corner indices simply match no row -> weight 0, which is
    # exactly the padding_mode='zeros' semantics.
    def axis_w(n, i0, w1):
        rows = jax.lax.broadcasted_iota(jnp.int32, (n, T), 0)
        return (jnp.where(rows == i0, 1.0 - w1, 0.0)
                + jnp.where(rows == i0 + 1, w1, 0.0))

    az = axis_w(D, z0, wz)                  # (D, T)
    ay = axis_w(H, y0, wy)                  # (H, T)
    ax = axis_w(W, x0, wx)                  # (W, T)

    # Expand the axis maps to (Sc, T) with exact one-hot selector matmuls on
    # the (otherwise idle) MXU; 2 elementwise muls then build the trilinear
    # weight matrix m for this source chunk.
    def one_hot(col_idx, n):                # col_idx: (Sc, 1) int32
        cols = jax.lax.broadcasted_iota(jnp.int32, (Sc, n), 1)
        return (col_idx == cols).astype(jnp.float32)

    hi = jax.lax.Precision.HIGHEST
    az_e = jnp.dot(one_hot(idx_ref[:, 0:1], D), az, precision=hi,
                   preferred_element_type=jnp.float32)
    ay_e = jnp.dot(one_hot(idx_ref[:, 1:2], H), ay, precision=hi,
                   preferred_element_type=jnp.float32)
    ax_e = jnp.dot(one_hot(idx_ref[:, 2:3], W), ax, precision=hi,
                   preferred_element_type=jnp.float32)
    m = az_e * ay_e * ax_e                  # (Sc, T)

    # Gather + trilinear blend of this chunk = one MXU contraction.
    acc_ref[...] += jnp.dot(img_ref[0], m, precision=hi,
                            preferred_element_type=jnp.float32)

    @pl.when(k == last_k)
    def _finalize():
        # Module returns channel-reversed grid -> (x, y, z): direct row stores
        # (no sublane concat / relayout).
        grid_ref[0, 0:1, :] = xc.astype(grid_ref.dtype)
        grid_ref[0, 1:2, :] = yc.astype(grid_ref.dtype)
        grid_ref[0, 2:3, :] = zc.astype(grid_ref.dtype)
        warp_ref[0] = acc_ref[...].astype(warp_ref.dtype)


def stn_forward(image, ddf, *, tile=256, chunk=256):
    """STN.forward (norm=True, mode='bilinear', padding_mode='zeros').

    image: (N, C, D, H, W), ddf: (N, 3, D, H, W)
    returns (grid, warped): grid (N, D, H, W, 3), warped (N, C, D, H, W)
    """
    N, C, D, H, W = image.shape
    S = D * H * W
    tile = min(tile, S)
    chunk = min(chunk, S)
    assert S % tile == 0 and (tile % 128 == 0 or tile == S)
    assert S % chunk == 0 and (chunk % 128 == 0 or chunk == S)

    # Normalized reference grid (norm=True), channel order (d, h, w).
    ref = jnp.stack(
        jnp.meshgrid(jnp.linspace(-1.0, 1.0, D),
                     jnp.linspace(-1.0, 1.0, H),
                     jnp.linspace(-1.0, 1.0, W), indexing="ij"),
        axis=0).astype(jnp.float32).reshape(3, S)

    # Per-source-row (z, y, x) voxel indices: avoids any in-kernel integer
    # division and feeds the one-hot selector build.  Laid out (S, 3) so the
    # indices sit along sublanes inside the kernel (no relayout).
    zz, yy, xx = jnp.meshgrid(jnp.arange(D), jnp.arange(H), jnp.arange(W),
                              indexing="ij")
    src_idx = jnp.stack([zz, yy, xx], axis=-1).reshape(S, 3).astype(jnp.int32)

    # Cast hoisted out of the kernel (done once here, not per grid step).
    img_flat = image.reshape(N, C, S).astype(jnp.float32)
    ddf_flat = ddf.reshape(N, 3, S).astype(jnp.float32)

    steps = N * (S // tile) * (S // chunk)
    itemsize = jnp.dtype(image.dtype).itemsize
    flops = steps * chunk * tile * (2 * C + 2 * (D + H + W) + 5)
    bytes_accessed = (N * (S // tile) * (C * S * 4 + S * 3 * 4)   # image+idx streamed per out tile
                      + N * 3 * S * 4 + 3 * S * 4                 # ddf + ref grid
                      + N * 3 * S * 4 + N * C * S * itemsize)     # outputs
    cost = pl.CostEstimate(flops=flops, transcendentals=0,
                           bytes_accessed=bytes_accessed)

    kernel = functools.partial(_stn_kernel, D=D, H=H, W=W)
    grid_flat, warp_flat = pl.pallas_call(
        kernel,
        out_shape=(jax.ShapeDtypeStruct((N, 3, S), jnp.float32),
                   jax.ShapeDtypeStruct((N, C, S), image.dtype)),
        grid=(N, S // tile, S // chunk),
        in_specs=[
            pl.BlockSpec((1, 3, tile), lambda n, t, k: (n, 0, t)),
            pl.BlockSpec((3, tile), lambda n, t, k: (0, t)),
            pl.BlockSpec((chunk, 3), lambda n, t, k: (k, 0)),
            pl.BlockSpec((1, C, chunk), lambda n, t, k: (n, 0, k)),
        ],
        out_specs=(
            pl.BlockSpec((1, 3, tile), lambda n, t, k: (n, 0, t)),
            pl.BlockSpec((1, C, tile), lambda n, t, k: (n, 0, t)),
        ),
        scratch_shapes=[pltpu.VMEM((C, tile), jnp.float32)],
        compiler_params=pltpu.CompilerParams(
            dimension_semantics=("parallel", "parallel", "arbitrary")),
        cost_estimate=cost,
    )(ddf_flat, ref, src_idx, img_flat)

    # Only cheap, small reshapes/permutes here (3 channels) to match the
    # module's (N, D, H, W, 3) grid output layout.
    grid = grid_flat.reshape(N, 3, D, H, W).transpose(0, 2, 3, 4, 1)
    warped = warp_flat.reshape(N, C, D, H, W)
    return grid, warped


# ------------------------- pure-JAX reference -------------------------------

def _ref_stn(image, ddf):
    N, C, D, H, W = image.shape
    S = D * H * W
    ref = jnp.stack(
        jnp.meshgrid(jnp.linspace(-1.0, 1.0, D),
                     jnp.linspace(-1.0, 1.0, H),
                     jnp.linspace(-1.0, 1.0, W), indexing="ij"),
        axis=0).astype(jnp.float32)
    g = ddf + ref[None]                               # (N, 3, D, H, W)
    grid = jnp.moveaxis(g, 1, -1)[..., ::-1]          # (N, D, H, W, 3) [x,y,z]

    fx = (grid[..., 0] + 1.0) * 0.5 * (W - 1)
    fy = (grid[..., 1] + 1.0) * 0.5 * (H - 1)
    fz = (grid[..., 2] + 1.0) * 0.5 * (D - 1)
    x0f, y0f, z0f = jnp.floor(fx), jnp.floor(fy), jnp.floor(fz)
    wx1, wy1, wz1 = fx - x0f, fy - y0f, fz - z0f
    x0 = x0f.astype(jnp.int32)
    y0 = y0f.astype(jnp.int32)
    z0 = z0f.astype(jnp.int32)

    imf = image.reshape(N, C, S)
    out = jnp.zeros((N, C, D, H, W), jnp.float32)
    for dz in (0, 1):
        for dy in (0, 1):
            for dx in (0, 1):
                zz, yy, xx = z0 + dz, y0 + dy, x0 + dx
                w = ((wz1 if dz else 1.0 - wz1)
                     * (wy1 if dy else 1.0 - wy1)
                     * (wx1 if dx else 1.0 - wx1))
                valid = ((zz >= 0) & (zz < D) & (yy >= 0) & (yy < H)
                         & (xx >= 0) & (xx < W))
                lin = (jnp.clip(zz, 0, D - 1) * (H * W)
                       + jnp.clip(yy, 0, H - 1) * W
                       + jnp.clip(xx, 0, W - 1))
                idx = jnp.broadcast_to(lin.reshape(N, 1, S), (N, C, S))
                vals = jnp.take_along_axis(imf, idx, axis=2)
                vals = vals.reshape(N, C, D, H, W)
                out = out + jnp.where(valid, w, 0.0)[:, None] * vals
    return grid, out.astype(image.dtype)


if __name__ == "__main__":
    # Small shapes consistent with the module: a 3D volume with a dense
    # displacement field.  N=2 batch, C=2 channels, 8^3 spatial.
    N, C, D, H, W = 2, 2, 8, 8, 8

    key = jax.random.PRNGKey(0)
    k_img, k_ddf = jax.random.split(key)
    image = jax.random.normal(k_img, (N, C, D, H, W), jnp.float32)
    # Displacements large enough to push some samples out of bounds and
    # exercise the zeros-padding path.
    ddf = 0.3 * jax.random.normal(k_ddf, (N, 3, D, H, W), jnp.float32)

    grid, warped = stn_forward(image, ddf)
    grid, warped = jax.block_until_ready((grid, warped))

    grid_ref, warped_ref = jax.block_until_ready(_ref_stn(image, ddf))

    np.testing.assert_allclose(np.asarray(grid), np.asarray(grid_ref),
                               rtol=1e-5, atol=1e-5)
    np.testing.assert_allclose(np.asarray(warped), np.asarray(warped_ref),
                               rtol=2e-3, atol=2e-3)

    print("KERNEL_OK")
</pallas_src>

<mosaic_0001>
module attributes {stable_mosaic.version = 11 : i64} {
  func.func @_stn_kernel(%arg0: i32, %arg1: i32, %arg2: i32, %arg3: memref<1x3x256xf32, #tpu.memory_space<vmem>>, %arg4: memref<3x256xf32, #tpu.memory_space<vmem>>, %arg5: memref<256x3xi32, #tpu.memory_space<vmem>>, %arg6: memref<1x2x256xf32, #tpu.memory_space<vmem>>, %arg7: memref<1x3x256xf32, #tpu.memory_space<vmem>>, %arg8: memref<1x2x256xf32, #tpu.memory_space<vmem>>, %arg9: memref<2x256xf32, #tpu.memory_space<vmem>>) attributes {dimension_semantics = [#tpu.dimension_semantics<parallel>, #tpu.dimension_semantics<parallel>, #tpu.dimension_semantics<arbitrary>], iteration_bounds = array<i64: 2, 2, 2>, scalar_prefetch = 0 : i64, scratch_operands = 1 : i64, tpu.core_type = #tpu.core_type<tc>, window_params = [{transform_indices = @transform_0, window_bounds = array<i64: 1, 3, 256>}, {transform_indices = @transform_1, window_bounds = array<i64: 3, 256>}, {transform_indices = @transform_2, window_bounds = array<i64: 256, 3>}, {transform_indices = @transform_3, window_bounds = array<i64: 1, 2, 256>}, {transform_indices = @transform_4, window_bounds = array<i64: 1, 3, 256>}, {transform_indices = @transform_5, window_bounds = array<i64: 1, 2, 256>}]} {
    %c0_i32 = arith.constant 0 : i32
    %0 = arith.cmpi eq, %arg2, %c0_i32 : i32
    %1 = arith.extui %0 : i1 to i32
    %c0_i32_0 = arith.constant 0 : i32
    %2 = arith.cmpi ne, %1, %c0_i32_0 : i32
    scf.if %2 {
      %cst_38 = arith.constant 0.000000e+00 : f32
      %117 = vector.broadcast %cst_38 : f32 to vector<2x256xf32>
      %c0_39 = arith.constant 0 : index
      %c0_40 = arith.constant 0 : index
      %118 = vector.load %arg9[%c0_39, %c0_40] : memref<2x256xf32, #tpu.memory_space<vmem>>, vector<2x256xf32>
      tpu.vector_store %arg9[%c0_39, %c0_40], %117 {strides = array<i32>} : memref<2x256xf32, #tpu.memory_space<vmem>>, vector<2x256xf32>,
    } else {
    }
    %c0 = arith.constant 0 : index
    %c0_1 = arith.constant 0 : index
    %c0_2 = arith.constant 0 : index
    %3 = vector.load %arg3[%c0, %c0_1, %c0_2] : memref<1x3x256xf32, #tpu.memory_space<vmem>>, vector<1x3x256xf32>
    %4 = vector.shape_cast %3 : vector<1x3x256xf32> to vector<3x256xf32>
    %c0_3 = arith.constant 0 : index
    %c0_4 = arith.constant 0 : index
    %5 = vector.load %arg4[%c0_3, %c0_4] : memref<3x256xf32, #tpu.memory_space<vmem>>, vector<3x256xf32>
    %6 = arith.addf %4, %5 : vector<3x256xf32>
    %7 = vector.extract_strided_slice %6 {offsets = [0, 0], sizes = [1, 256], strides = [1, 1]} : vector<3x256xf32> to vector<1x256xf32>
    %8 = vector.extract_strided_slice %6 {offsets = [1, 0], sizes = [1, 256], strides = [1, 1]} : vector<3x256xf32> to vector<1x256xf32>
    %9 = vector.extract_strided_slice %6 {offsets = [2, 0], sizes = [1, 256], strides = [1, 1]} : vector<3x256xf32> to vector<1x256xf32>
    %cst = arith.constant 1.000000e+00 : f32
    %10 = vector.broadcast %cst : f32 to vector<1x256xf32>
    %11 = arith.addf %7, %10 : vector<1x256xf32>
    %cst_5 = arith.constant 3.500000e+00 : f32
    %12 = vector.broadcast %cst_5 : f32 to vector<1x256xf32>
    %13 = arith.mulf %11, %12 : vector<1x256xf32>
    %cst_6 = arith.constant 1.000000e+00 : f32
    %14 = vector.broadcast %cst_6 : f32 to vector<1x256xf32>
    %15 = arith.addf %8, %14 : vector<1x256xf32>
    %cst_7 = arith.constant 3.500000e+00 : f32
    %16 = vector.broadcast %cst_7 : f32 to vector<1x256xf32>
    %17 = arith.mulf %15, %16 : vector<1x256xf32>
    %cst_8 = arith.constant 1.000000e+00 : f32
    %18 = vector.broadcast %cst_8 : f32 to vector<1x256xf32>
    %19 = arith.addf %9, %18 : vector<1x256xf32>
    %cst_9 = arith.constant 3.500000e+00 : f32
    %20 = vector.broadcast %cst_9 : f32 to vector<1x256xf32>
    %21 = arith.mulf %19, %20 : vector<1x256xf32>
    %22 = math.floor %13 : vector<1x256xf32>
    %23 = arith.subf %13, %22 : vector<1x256xf32>
    %24 = arith.fptosi %22 : vector<1x256xf32> to vector<1x256xi32>
    %25 = math.floor %17 : vector<1x256xf32>
    %26 = arith.subf %17, %25 : vector<1x256xf32>
    %27 = arith.fptosi %25 : vector<1x256xf32> to vector<1x256xi32>
    %28 = math.floor %21 : vector<1x256xf32>
    %29 = arith.subf %21, %28 : vector<1x256xf32>
    %30 = arith.fptosi %28 : vector<1x256xf32> to vector<1x256xi32>
    %31 = tpu.iota {dimensions = array<i32: 0>} : vector<8x256xi32>
    %32 = vector.broadcast %24 : vector<1x256xi32> to vector<8x256xi32>
    %33 = arith.cmpi eq, %31, %32 : vector<8x256xi32>
    %cst_10 = arith.constant 1.000000e+00 : f32
    %34 = vector.broadcast %cst_10 : f32 to vector<1x256xf32>
    %35 = arith.subf %34, %23 : vector<1x256xf32>
    %cst_11 = arith.constant 0.000000e+00 : f32
    %36 = vector.shape_cast %35 : vector<1x256xf32> to vector<1x256xf32>
    %37 = vector.broadcast %36 : vector<1x256xf32> to vector<8x256xf32>
    %38 = vector.broadcast %cst_11 : f32 to vector<8x256xf32>
    %39 = arith.select %33, %37, %38 : vector<8x256xi1>, vector<8x256xf32>
    %c1_i32 = arith.constant 1 : i32
    %40 = vector.broadcast %c1_i32 : i32 to vector<1x256xi32>
    %41 = arith.addi %24, %40 : vector<1x256xi32>
    %42 = vector.broadcast %41 : vector<1x256xi32> to vector<8x256xi32>
    %43 = arith.cmpi eq, %31, %42 : vector<8x256xi32>
    %cst_12 = arith.constant 0.000000e+00 : f32
    %44 = vector.shape_cast %23 : vector<1x256xf32> to vector<1x256xf32>
    %45 = vector.broadcast %44 : vector<1x256xf32> to vector<8x256xf32>
    %46 = vector.broadcast %cst_12 : f32 to vector<8x256xf32>
    %47 = arith.select %43, %45, %46 : vector<8x256xi1>, vector<8x256xf32>
    %48 = arith.addf %39, %47 : vector<8x256xf32>
    %49 = tpu.iota {dimensions = array<i32: 0>} : vector<8x256xi32>
    %50 = vector.broadcast %27 : vector<1x256xi32> to vector<8x256xi32>
    %51 = arith.cmpi eq, %49, %50 : vector<8x256xi32>
    %cst_13 = arith.constant 1.000000e+00 : f32
    %52 = vector.broadcast %cst_13 : f32 to vector<1x256xf32>
    %53 = arith.subf %52, %26 : vector<1x256xf32>
    %cst_14 = arith.constant 0.000000e+00 : f32
    %54 = vector.shape_cast %53 : vector<1x256xf32> to vector<1x256xf32>
    %55 = vector.broadcast %54 : vector<1x256xf32> to vector<8x256xf32>
    %56 = vector.broadcast %cst_14 : f32 to vector<8x256xf32>
    %57 = arith.select %51, %55, %56 : vector<8x256xi1>, vector<8x256xf32>
    %c1_i32_15 = arith.constant 1 : i32
    %58 = vector.broadcast %c1_i32_15 : i32 to vector<1x256xi32>
    %59 = arith.addi %27, %58 : vector<1x256xi32>
    %60 = vector.broadcast %59 : vector<1x256xi32> to vector<8x256xi32>
    %61 = arith.cmpi eq, %49, %60 : vector<8x256xi32>
    %cst_16 = arith.constant 0.000000e+00 : f32
    %62 = vector.shape_cast %26 : vector<1x256xf32> to vector<1x256xf32>
    %63 = vector.broadcast %62 : vector<1x256xf32> to vector<8x256xf32>
    %64 = vector.broadcast %cst_16 : f32 to vector<8x256xf32>
    %65 = arith.select %61, %63, %64 : vector<8x256xi1>, vector<8x256xf32>
    %66 = arith.addf %57, %65 : vector<8x256xf32>
    %67 = tpu.iota {dimensions = array<i32: 0>} : vector<8x256xi32>
    %68 = vector.broadcast %30 : vector<1x256xi32> to vector<8x256xi32>
    %69 = arith.cmpi eq, %67, %68 : vector<8x256xi32>
    %cst_17 = arith.constant 1.000000e+00 : f32
    %70 = vector.broadcast %cst_17 : f32 to vector<1x256xf32>
    %71 = arith.subf %70, %29 : vector<1x256xf32>
    %cst_18 = arith.constant 0.000000e+00 : f32
    %72 = vector.shape_cast %71 : vector<1x256xf32> to vector<1x256xf32>
    %73 = vector.broadcast %72 : vector<1x256xf32> to vector<8x256xf32>
    %74 = vector.broadcast %cst_18 : f32 to vector<8x256xf32>
    %75 = arith.select %69, %73, %74 : vector<8x256xi1>, vector<8x256xf32>
    %c1_i32_19 = arith.constant 1 : i32
    %76 = vector.broadcast %c1_i32_19 : i32 to vector<1x256xi32>
    %77 = arith.addi %30, %76 : vector<1x256xi32>
    %78 = vector.broadcast %77 : vector<1x256xi32> to vector<8x256xi32>
    %79 = arith.cmpi eq, %67, %78 : vector<8x256xi32>
    %cst_20 = arith.constant 0.000000e+00 : f32
    %80 = vector.shape_cast %29 : vector<1x256xf32> to vector<1x256xf32>
    %81 = vector.broadcast %80 : vector<1x256xf32> to vector<8x256xf32>
    %82 = vector.broadcast %cst_20 : f32 to vector<8x256xf32>
    %83 = arith.select %79, %81, %82 : vector<8x256xi1>, vector<8x256xf32>
    %84 = arith.addf %75, %83 : vector<8x256xf32>
    %c0_21 = arith.constant 0 : index
    %c0_22 = arith.constant 0 : index
    %85 = vector.load %arg5[%c0_21, %c0_22] : memref<256x3xi32, #tpu.memory_space<vmem>>, vector<256x1xi32>
    %86 = tpu.iota {dimensions = array<i32: 1>} : vector<256x8xi32>
    %87 = vector.broadcast %85 : vector<256x1xi32> to vector<256x8xi32>
    %88 = arith.cmpi eq, %87, %86 : vector<256x8xi32>
    %89 = arith.extui %88 : vector<256x8xi1> to vector<256x8xi32>
    %90 = arith.sitofp %89 : vector<256x8xi32> to vector<256x8xf32>
    %cst_23 = arith.constant dense<0.000000e+00> : vector<256x256xf32>
    %91 = tpu.matmul %90, %48, %cst_23 {dimension_numbers = #tpu.dot_dimension_numbers<[1], [0], [0], [1], [0, 0, 1, 1], [], []>, precision = #tpu.contract_precision<fp32>} : vector<256x8xf32>, vector<8x256xf32>, vector<256x256xf32> -> vector<256x256xf32>
    %c0_24 = arith.constant 0 : index
    %c1 = arith.constant 1 : index
    %92 = vector.load %arg5[%c0_24, %c1] : memref<256x3xi32, #tpu.memory_space<vmem>>, vector<256x1xi32>
    %93 = tpu.iota {dimensions = array<i32: 1>} : vector<256x8xi32>
    %94 = vector.broadcast %92 : vector<256x1xi32> to vector<256x8xi32>
    %95 = arith.cmpi eq, %94, %93 : vector<256x8xi32>
    %96 = arith.extui %95 : vector<256x8xi1> to vector<256x8xi32>
    %97 = arith.sitofp %96 : vector<256x8xi32> to vector<256x8xf32>
    %cst_25 = arith.constant dense<0.000000e+00> : vector<256x256xf32>
    %98 = tpu.matmul %97, %66, %cst_25 {dimension_numbers = #tpu.dot_dimension_numbers<[1], [0], [0], [1], [0, 0, 1, 1], [], []>, precision = #tpu.contract_precision<fp32>} : vector<256x8xf32>, vector<8x256xf32>, vector<256x256xf32> -> vector<256x256xf32>
    %c0_26 = arith.constant 0 : index
    %c2 = arith.constant 2 : index
    %99 = vector.load %arg5[%c0_26, %c2] : memref<256x3xi32, #tpu.memory_space<vmem>>, vector<256x1xi32>
    %100 = tpu.iota {dimensions = array<i32: 1>} : vector<256x8xi32>
    %101 = vector.broadcast %99 : vector<256x1xi32> to vector<256x8xi32>
    %102 = arith.cmpi eq, %101, %100 : vector<256x8xi32>
    %103 = arith.extui %102 : vector<256x8xi1> to vector<256x8xi32>
    %104 = arith.sitofp %103 : vector<256x8xi32> to vector<256x8xf32>
    %cst_27 = arith.constant dense<0.000000e+00> : vector<256x256xf32>
    %105 = tpu.matmul %104, %84, %cst_27 {dimension_numbers = #tpu.dot_dimension_numbers<[1], [0], [0], [1], [0, 0, 1, 1], [], []>, precision = #tpu.contract_precision<fp32>} : vector<256x8xf32>, vector<8x256xf32>, vector<256x256xf32> -> vector<256x256xf32>
    %106 = arith.mulf %91, %98 : vector<256x256xf32>
    %107 = arith.mulf %106, %105 : vector<256x256xf32>
    %c0_28 = arith.constant 0 : index
    %c0_29 = arith.constant 0 : index
    %108 = vector.load %arg9[%c0_28, %c0_29] : memref<2x256xf32, #tpu.memory_space<vmem>>, vector<2x256xf32>
    %c0_30 = arith.constant 0 : index
    %c0_31 = arith.constant 0 : index
    %c0_32 = arith.constant 0 : index
    %109 = vector.load %arg6[%c0_30, %c0_31, %c0_32] : memref<1x2x256xf32, #tpu.memory_space<vmem>>, vector<1x2x256xf32>
    %110 = vector.shape_cast %109 : vector<1x2x256xf32> to vector<2x256xf32>
    %cst_33 = arith.constant dense<0.000000e+00> : vector<2x256xf32>
    %111 = tpu.matmul %110, %107, %cst_33 {dimension_numbers = #tpu.dot_dimension_numbers<[1], [0], [0], [1], [0, 0, 1, 1], [], []>, precision = #tpu.contract_precision<fp32>} : vector<2x256xf32>, vector<256x256xf32>, vector<2x256xf32> -> vector<2x256xf32>
    %112 = arith.addf %108, %111 : vector<2x256xf32>
    %c0_34 = arith.constant 0 : index
    %c0_35 = arith.constant 0 : index
    %113 = vector.load %arg9[%c0_34, %c0_35] : memref<2x256xf32, #tpu.memory_space<vmem>>, vector<2x256xf32>
    tpu.vector_store %arg9[%c0_34, %c0_35], %112 {strides = array<i32>} : memref<2x256xf32, #tpu.memory_space<vmem>>, vector<2x256xf32>,
    %c1_i32_36 = arith.constant 1 : i32
    %114 = arith.cmpi eq, %arg2, %c1_i32_36 : i32
    %115 = arith.extui %114 : i1 to i32
    %c0_i32_37 = arith.constant 0 : i32
    %116 = arith.cmpi ne, %115, %c0_i32_37 : i32
    scf.if %116 {
      %c0_38 = arith.constant 0 : index
      %c0_39 = arith.constant 0 : index
      %c0_40 = arith.constant 0 : index
      %117 = vector.load %arg7[%c0_38, %c0_39, %c0_40] : memref<1x3x256xf32, #tpu.memory_space<vmem>>, vector<1x1x256xf32>
      %118 = vector.shape_cast %117 : vector<1x1x256xf32> to vector<1x256xf32>
      %119 = vector.shape_cast %9 : vector<1x256xf32> to vector<1x1x256xf32>
      tpu.vector_store %arg7[%c0_38, %c0_39, %c0_40], %119 {strides = array<i32>} : memref<1x3x256xf32, #tpu.memory_space<vmem>>, vector<1x1x256xf32>,
      %c0_41 = arith.constant 0 : index
      %c1_42 = arith.constant 1 : index
      %c0_43 = arith.constant 0 : index
      %120 = vector.load %arg7[%c0_41, %c1_42, %c0_43] : memref<1x3x256xf32, #tpu.memory_space<vmem>>, vector<1x1x256xf32>
      %121 = vector.shape_cast %120 : vector<1x1x256xf32> to vector<1x256xf32>
      %122 = vector.shape_cast %8 : vector<1x256xf32> to vector<1x1x256xf32>
      tpu.vector_store %arg7[%c0_41, %c1_42, %c0_43], %122 {strides = array<i32>} : memref<1x3x256xf32, #tpu.memory_space<vmem>>, vector<1x1x256xf32>,
      %c0_44 = arith.constant 0 : index
      %c2_45 = arith.constant 2 : index
      %c0_46 = arith.constant 0 : index
      %123 = vector.load %arg7[%c0_44, %c2_45, %c0_46] : memref<1x3x256xf32, #tpu.memory_space<vmem>>, vector<1x1x256xf32>
      %124 = vector.shape_cast %123 : vector<1x1x256xf32> to vector<1x256xf32>
      %125 = vector.shape_cast %7 : vector<1x256xf32> to vector<1x1x256xf32>
      tpu.vector_store %arg7[%c0_44, %c2_45, %c0_46], %125 {strides = array<i32>} : memref<1x3x256xf32, #tpu.memory_space<vmem>>, vector<1x1x256xf32>,
      %c0_47 = arith.constant 0 : index
      %c0_48 = arith.constant 0 : index
      %126 = vector.load %arg9[%c0_47, %c0_48] : memref<2x256xf32, #tpu.memory_space<vmem>>, vector<2x256xf32>
      %c0_49 = arith.constant 0 : index
      %c0_50 = arith.constant 0 : index
      %c0_51 = arith.constant 0 : index
      %127 = vector.load %arg8[%c0_49, %c0_50, %c0_51] : memref<1x2x256xf32, #tpu.memory_space<vmem>>, vector<1x2x256xf32>
      %128 = vector.shape_cast %127 : vector<1x2x256xf32> to vector<2x256xf32>
      %129 = vector.shape_cast %126 : vector<2x256xf32> to vector<1x2x256xf32>
      tpu.vector_store %arg8[%c0_49, %c0_50, %c0_51], %129 {strides = array<i32>} : memref<1x2x256xf32, #tpu.memory_space<vmem>>, vector<1x2x256xf32>,
    } else {
    }
    return
  }
  func.func @transform_0(%arg0: i32, %arg1: i32, %arg2: i32) -> (i32, i32, i32) {
    %c0_i32 = arith.constant 0 : i32
    %c0_i32_0 = arith.constant 0 : i32
    return %arg0, %c0_i32, %arg1 : i32, i32, i32
  }
  func.func @transform_1(%arg0: i32, %arg1: i32, %arg2: i32) -> (i32, i32) {
    %c0_i32 = arith.constant 0 : i32
    %c0_i32_0 = arith.constant 0 : i32
    return %c0_i32, %arg1 : i32, i32
  }
  func.func @transform_2(%arg0: i32, %arg1: i32, %arg2: i32) -> (i32, i32) {
    %c0_i32 = arith.constant 0 : i32
    %c0_i32_0 = arith.constant 0 : i32
    return %arg2, %c0_i32 : i32, i32
  }
  func.func @transform_3(%arg0: i32, %arg1: i32, %arg2: i32) -> (i32, i32, i32) {
    %c0_i32 = arith.constant 0 : i32
    %c0_i32_0 = arith.constant 0 : i32
    return %arg0, %c0_i32, %arg2 : i32, i32, i32
  }
  func.func @transform_4(%arg0: i32, %arg1: i32, %arg2: i32) -> (i32, i32, i32) {
    %c0_i32 = arith.constant 0 : i32
    %c0_i32_0 = arith.constant 0 : i32
    return %arg0, %c0_i32, %arg1 : i32, i32, i32
  }
  func.func @transform_5(%arg0: i32, %arg1: i32, %arg2: i32) -> (i32, i32, i32) {
    %c0_i32 = arith.constant 0 : i32
    %c0_i32_0 = arith.constant 0 : i32
    return %arg0, %c0_i32, %arg1 : i32, i32, i32
  }
}

</mosaic_0001>

<bundles_post_ra>
// kernel: tpu_custom_call.1
= control target key start
LH: loop header
LB: loop body
LE: loop exit
PB: predicated region body
PF: predicated region fallthrough
CT: control target
= control target key end

     0   :  { %s16063_s0 = inlined_call_operand.vmem [shape: f32[2,3,512], index: 0, kind: input, shape index: {}]   ;;  %s16064_s1 = inlined_call_operand.vmem [shape: f32[3,512], index: 1, kind: input, shape index: {}]   ;;  %s16065_s2 = inlined_call_operand.vmem [shape: s32[512,3], index: 2, kind: input, shape index: {}]   ;;  %s16066_s3 = inlined_call_operand.vmem [shape: f32[2,2,512], index: 3, kind: input, shape index: {}]   ;;  %s16067_s4 = inlined_call_operand.vmem [shape: f32[2,3,512], index: 4, kind: output, shape index: {0}]   ;;  %s16068_s5 = inlined_call_operand.hbm [shape: f32[2,2,512], index: 5, kind: output, shape index: {1}]  }
   0x1   :  { %16559 = sst [smem:[#allocation151_spill]] %s16063_s0 }
   0x2   :  { %16560 = sst [smem:[#allocation152_spill]] %s16064_s1 }
   0x3   :  { %11 = vsyncpa [#allocation4], 0 }
   0x4   :  { %13 = vsyncpa [#allocation4 + $0x1], 0  ;;  %s9839_s18 = smov 0   ;;  %s9841_s19 = smov 0  }
   0x5   :  { %s9843_s20 = smov 0   ;;  %s9845_s21 = smov 0  }
   0x6   :  { %s9847_s22 = smov 0   ;;  %s9849_s23 = smov 0  }
   0x7   :  { %s9851_s24 = smov 0   ;;  %s9853_s25 = smov 0  }
   0x8   :  { %s9855_s26 = smov 0   ;;  %s9857_s27 = smov 0  }
   0x9 LB: > { %16561 = sst [smem:[#allocation6_spill]] %s9771_s20  ;;  %s9143_s28 = sadd.s32 4294967295, %s9799_s27   ;;  %s9799_s27 = sphi %s9857_s27, %s19_s27   ;;  %s9795_s26 = sphi %s9855_s26, %s18003_s26   ;;  %s9791_s25 = sphi %s9853_s25, %s18002_s25   ;;  %s9787_s24 = sphi %s9851_s24, %s18001_s24   ;;  %s9783_s23 = sphi %s9849_s23, %s18000_s23   ;;  %s9779_s22 = sphi %s9847_s22, %s17999_s22   ;;  %s9775_s21 = sphi %s9845_s21, %s17998_s21   ;;  %s9771_s20 = sphi %s9843_s20, %s17997_s20   ;;  %s9767_s19 = sphi %s9841_s19, %s18005_s19   ;;  %s9763_s18 = sphi %s9839_s18, %s18004_s18  }
   0xa   : > { %16562 = sst [smem:[#allocation7_spill]] %s9787_s24  ;;  %s9144_s29 = sadd.s32 4294967294, %s9799_s27  }
   0xb   : > { %16563 = sst [smem:[#allocation8_spill]] %s9791_s25  ;;  %s31_s30 = sadd.s32 1, %s9787_s24 }
   0xc   : > { %16564 = sst [smem:[#allocation9_spill]] %s9795_s26  ;;  %p32_p0 = scmp.ge.s32.totalorder %s31_s30, 2 }
   0xd   : > { %s34_s6 = sadd.s32 1, %s9791_s25  ;;  %s38_s7 = sadd.s32 1, %s9795_s26 }
   0xe   : > { %p193_p1 = scmp.ne.s32.totalorder %s9771_s20, %s9767_s19  ;;  %s18007_s30 = smov (%p32_p0, %s31_s30), 0 }
   0xf   : > { %16565 = sst [smem:[#allocation10_spill]] %s18007_s30  ;;  %s18009_s6 = smov (!%p32_p0, %s34_s6), %s9791_s25 }
  0x10   : > { %p194_p2 = scmp.eq.s32.totalorder %s9143_s28, 7  ;;  %p199_p3 = scmp.ne.s32.totalorder %s9767_s19, %s9763_s18 }
  0x11   : > { %p36_p4 = scmp.ge.s32.totalorder %s18009_s6, 2  ;;  %p200_p5 = scmp.eq.s32.totalorder %s9144_s29, 7 }
  0x12   : > { %p9901_p6 = por %p194_p2, %p193_p1  ;;  %p9147_p8 = scmp.ge.s32.totalorder %s9799_s27, 1 }
  0x13   : > { %s18011_s6 = smov (%p36_p4, %s18009_s6), 0  ;;  %s18013_s7 = smov (!%p36_p4, %s38_s7), %s9795_s26 }
  0x14   : > { %16567 = sst [smem:[#allocation11_spill]] %s18011_s6  ;;  %p9908_p7 = por %p200_p5, %p199_p3 }
  0x15   : > { %p40_p9 = scmp.ge.s32.totalorder %s18013_s7, 2  ;;  %p262_p10 = scmp.lt.s32.totalorder %s9799_s27, 9 }
  0x16   : > { %s16568_s9 = scalar_select %p9908_p7, 1, 0 }
  0x17   : > { %s179_s10 = ssub.s32 %s9791_s25, %s18011_s6  ;;  %s18015_s7 = smov (%p40_p9, %s18013_s7), 0 }
  0x18   : > { %16569 = sst [smem:[#allocation12_spill]] %s16568_s9  ;;  %p263_p11 = pnand %p9147_p8, %p262_p10 }
  0x19   : > { %16570 = sst [smem:[#allocation13_spill]] %s18015_s7  ;;  %s178_s11 = ssub.s32 %s9795_s26, %s18015_s7 }
  0x1a   : > { %s180_s12 = sor.u32 %s179_s10, %s178_s11  ;;  %s183_s13 = sadd.s32 1, %s9771_s20 }
  0x1b   : > { %p181_p12 = scmp.eq.s32.totalorder %s180_s12, 0  ;;  %266 = sbr.rel (%p263_p11) target bundleno = 1960 (0x7a8), region = 36 }
  0x1d   : > { %s9922_s14 = scalar_select %p181_p12, %s9771_s20, %s183_s13  }
  0x1f   : > { %16571 = sst [smem:[#allocation14_spill]] %s9922_s14 }
  0x20   : > { %s16073_s15 = sand.u32 1, %s9767_s19   ;;  %s9926_s16 = sshll.u32 %s9779_s22, 1 }
  0x21   : > { %s9930_s17 = sshll.u32 %s16073_s15, 2  ;;  %p323_p13 = scmp.lt.s32.totalorder %s9783_s23, 1 }
  0x22   : > { %p325_p0 = scmp.lt.s32.totalorder %s9926_s16, 3  ;;  %s9154_s11 = sshll.u32 %s9775_s21, 5 }
  0x23   : > { %s324_s28 = scalar_select %p323_p13, %s9783_s23, 1 }
  0x24   : > { %s326_s29 = scalar_select %p325_p0, %s9926_s16, 3 }
  0x25   : > { %s9150_s10 = sshll.u32 %s324_s28, 2  ;;  %s16572_s1 = sld [smem:[#allocation152_spill]] }
  0x26   : > { %s328_s12 = sadd.s32 %s9150_s10, %s326_s29  ;;  %s9153_s13 = sshll.u32 %s326_s29, 2 }
  0x27   : > { %s9151_s7 = sshll.u32 %s328_s12, 2  ;;  %s16573_s0 = sld [smem:[#allocation151_spill]] }
  0x28   : > { %p339_p1 = scmp.lt.s32.totalorder %s9154_s11, 63  ;;  %s9156_s24 = sshll.u32 %s9775_s21, 1 }
  0x29   : > { %s9951_s28 = scalar_lea.vmem %s16067_s4, %s9151_s7  ;;  %p347_p2 = scmp.lt.s32.totalorder %s9156_s24, 3 }
  0x2a   : > { %s18017_s11 = smov (!%p339_p1, %s9154_s11), 63  ;;  %p9162_p3 = scmp.ne.s32.totalorder %s9775_s21, 0 }
  0x2b   : > { %s9940_s22 = scalar_lea.vmem %s16572_s1, %s9153_s13  ;;  %s9155_s29 = sshll.u32 %s18017_s11, 3 }
  0x2c   : > { %s9956_s30 = scalar_lea.vmem %s16065_s2, %s9155_s29  ;;  %s18019_s24 = smov (!%p347_p2, %s9156_s24), 3 }
  0x2d   : > { %s9945_s15 = scalar_lea.vmem %s16573_s0, %s9151_s7  ;;  %s350_s6 = sadd.s32 %s9150_s10, %s18019_s24 }
  0x2e   : > { %s9158_s25 = sshll.u32 %s350_s6, 1  ;;  %s321_s1 = scalar_lea.vmem [#allocation3], %s9930_s17 }
  0x2f   : > { %s9961_s0 = scalar_lea.vmem %s16066_s3, %s9158_s25  ;;  %368 = sbr.rel (%p9162_p3) target bundleno = 54 (0x36), region = 40 }
  0x34   : > { %v9801_v0 = vmov 0.0  }
  0x35   : > { %369 = vst [vmem:[#allocation2] sm:$0xf] %v9801_v0 }
  0x36 PF: > { %v9966_v1 = vld [vmem:[%s9956_s30 + $0x10] sm:$0xff]  ;;  %v9969_v2 = vld [vmem:[%s9956_s30] sm:$0xff]  ;;  %v9802_v3 = vmov 0   ;;  %v9974_v4 = vld [vmem:[%s9956_s30 + $0x18] sm:$0xff]  ;;  %v16187_v6 = vmov 0.0   ;;  %v16077_v12 = vlaneseq  ;;  %vm844_vm4 = vcmask 64512  }
  0x37   : > { %9654 = vset.pattern.permute.xlu1 %v9802_v3  ;;  %9653 = vset.pattern.permute.xlu0 %v9802_v3  ;;  %v9977_v5 = vld [vmem:[%s9956_s30 + $0x8] sm:$0xff]  ;;  %v9987_v8 = vld [vmem:[%s9956_s30 + $0x20] sm:$0xff]  ;;  %v9993_v10 = vld [vmem:[%s9956_s30 + $0x38] sm:$0xff]  ;;  %p9548_p4 = scmp.ne.s32.totalorder %s9775_s21, 1 }
  0x38   : > { %659 = vperm.xlu1 %9654, %v9966_v1   ;;  %653 = vperm.xlu0 %9653, %v9969_v2   ;;  %v9984_v7 = vld [vmem:[%s9956_s30 + $0x28] sm:$0xff]  ;;  %v370_v9 = vld [vmem:[%s9945_s15] sm:$0x77]  ;;  %v9996_v11 = vld [vmem:[%s9956_s30 + $0x30] sm:$0xff]  ;;  %v10011_v18 = vshrl.u32 %v16077_v12, 7 }
  0x39   : > { %1434 = vmatprep.mubr.f32.mxu1 %v16187_v6  ;;  %1007 = vmatprep.mubr.f32.mxu0 %v16187_v6  ;;  %v371_v13 = vld [vmem:[%s9940_s22] sm:$0x77]  ;;  %v10005_v16 = vld [vmem:[%s9956_s30 + $0x48] sm:$0xff]  ;;  %v10016_v21 = vld [vmem:[%s9956_s30 + $0x58] sm:$0xff] }
  0x3a   : > { %v9999_v14 = vadd.f32 %v371_v13, %v370_v9  ;;  %v10008_v17 = vld [vmem:[%s9956_s30 + $0x40] sm:$0xff]  ;;  %16575 = vst [vmem:[#allocation16_spill] sm:$0xff] %v10011_v18  ;;  %v10019_v22 = vld [vmem:[%s9956_s30 + $0x50] sm:$0xff]  ;;  %v386_v23 = vsub.s32 4, %v10011_v18  ;;  %v382_v26 = vsub.s32 0, %v10011_v18  ;;  %v10033_v29 = vld [vmem:[%s9956_s30 + $0x68] sm:$0xff] }
  0x3b   : > { %v10036_v30 = vld [vmem:[%s9956_s30 + $0x60] sm:$0xff]  ;;  %v10051_v41 = vld [vmem:[%s9956_s30 + $0x78] sm:$0xff]  ;;  %v10054_v42 = vld [vmem:[%s9956_s30 + $0x70] sm:$0xff] }
  0x3c   : > { %662 = vperm.xlu1 %9654, %v9974_v4   ;;  %656 = vperm.xlu0 %9653, %v9977_v5   ;;  %16574 = vst [vmem:[#allocation15_spill] sm:$0xff] %v9999_v14  ;;  %v373_v15 = vadd.f32 1.0, %v9999_v14  ;;  %v10063_v52 = vld [vmem:[%s9956_s30 + $0x88] sm:$0xff]  ;;  %v10066_v53 = vld [vmem:[%s9956_s30 + $0x80] sm:$0xff]  ;;  %v10074_v59 = vld [vmem:[%s9956_s30 + $0x98] sm:$0xff] }
  0x3d   : > { %v10077_v60 = vld [vmem:[%s9956_s30 + $0x90] sm:$0xff]  ;;  %v10093_v3 = vld [vmem:[%s9956_s30 + $0xa8] sm:$0xff]  ;;  %v10096_v9 = vld [vmem:[%s9956_s30 + $0xa0] sm:$0xff] }
  0x3e   : > { %v374_v19 = vmul.f32 3.5, %v373_v15 }
  0x40   : > { %668 = vperm.xlu1 %9654, %v9984_v7   ;;  %665 = vperm.xlu0 %9653, %v9987_v8   ;;  %v375_v20 = vfloor.f32 %v374_v19 }
  0x42   : > { %v10022_v24 = vsub.f32 %v374_v19, %v375_v20  ;;  %v9557_v25 = vtrunc.f32 %v375_v20 }
  0x44   : > { %674 = vperm.xlu1 %9654, %v9993_v10   ;;  %671 = vperm.xlu0 %9653, %v9996_v11   ;;  %16576 = vst [vmem:[#allocation17_spill] sm:$0xff] %v10022_v24  ;;  %v10027_v27 = vcvt.f32.s32 %v9557_v25  ;;  %v10030_v28 = vsub.f32 1.0, %v10022_v24  ;;  %v447_v31 = vrot.slane %v10022_v24, %v386_v23  ;;  %v443_v35 = vrot.slane %v10022_v24, %v382_v26  ;;  %v10112_v25 = vld [vmem:[%s9956_s30 + $0xb0] sm:$0xff] }
  0x46   : > { %16577 = vst [vmem:[#allocation18_spill] sm:$0xff] %v10027_v27  ;;  %16578 = vst [vmem:[#allocation19_spill] sm:$0xff] %v10030_v28  ;;  %v387_v32 = vrot.slane %v10027_v27, %v386_v23  ;;  %v407_v33 = vrot.slane %v10030_v28, %v386_v23  ;;  %v10042_v34 = vadd.s32 1, %v10027_v27  ;;  %v383_v36 = vrot.slane %v10027_v27, %v382_v26 }
  0x47   : > { %v403_v37 = vrot.slane %v10030_v28, %v382_v26  ;;  %v457_v43 = vrot.slane %v447_v31, %v382_v26  ;;  %v453_v48 = vrot.slane %v443_v35, %v382_v26  ;;  %v10117_v31 = vld [vmem:[%s9956_s30 + $0xc8] sm:$0xff]  ;;  %v10129_v35 = vld [vmem:[%s9956_s30 + $0xd0] sm:$0xff] }
  0x48   : > { %680 = vperm.xlu1 %9654, %v10005_v16   ;;  %677 = vperm.xlu0 %9653, %v10008_v17   ;;  %16579 = vst [vmem:[#allocation20_spill] sm:$0xff] %v10042_v34  ;;  %v395_v38 = vrot.slane %v387_v32, %v382_v26  ;;  %v417_v39 = vrot.slane %v407_v33, %v382_v26  ;;  %v10120_v32 = vld [vmem:[%s9956_s30 + $0xc0] sm:$0xff]  ;;  %v10126_v33 = vld [vmem:[%s9956_s30 + $0xd8] sm:$0xff] }
  0x49   : > { %v428_v40 = vrot.slane %v10042_v34, %v386_v23  ;;  %v391_v44 = vrot.slane %v383_v36, %v382_v26  ;;  %v413_v45 = vrot.slane %v403_v37, %v382_v26  ;;  %v424_v46 = vrot.slane %v10042_v34, %v382_v26  ;;  %v10109_v23 = vld [vmem:[%s9956_s30 + $0xb8] sm:$0xff]  ;;  %v10134_v36 = vld [vmem:[%s9956_s30 + $0xe8] sm:$0xff]  ;;  %v10137_v37 = vld [vmem:[%s9956_s30 + $0xe0] sm:$0xff] }
  0x4a   : > { %vm397_vm0 = vcmp.eq.s32.totalorder %v10011_v18, %v395_v38  ;;  %v10142_v38 = vld [vmem:[%s9956_s30 + $0xf8] sm:$0xff] }
  0x4b   : > { %v436_v47 = vrot.slane %v428_v40, %v382_v26  ;;  %v419_v49 = vsel %vm397_vm0, %v417_v39, 0.0  ;;  %vm396_vm1 = vcmp.eq.s32.totalorder %v10011_v18, %v391_v44  ;;  %v432_v50 = vrot.slane %v424_v46, %v382_v26  ;;  %v10145_v39 = vld [vmem:[%s9956_s30 + $0xf0] sm:$0xff] }
  0x4c   : > { %686 = vperm.xlu1 %9654, %v10016_v21   ;;  %683 = vperm.xlu0 %9653, %v10019_v22   ;;  %v418_v51 = vsel %vm396_vm1, %v413_v45, 0.0  ;;  %v10150_v40 = vand.u32 127, %v16077_v12 }
  0x4d   : > { %vm438_vm2 = vcmp.eq.s32.totalorder %v10011_v18, %v436_v47  ;;  %vm437_vm3 = vcmp.eq.s32.totalorder %v10011_v18, %v432_v50 }
  0x4e   : > { %v459_v54 = vsel %vm438_vm2, %v457_v43, 0.0  ;;  %v458_v56 = vsel %vm437_vm3, %v453_v48, 0.0 }
  0x4f   : > { %v461_v55 = vadd.f32 %v459_v54, %v419_v49  ;;  %v460_v57 = vadd.f32 %v458_v56, %v418_v51 }
  0x50   : > { %692 = vperm.xlu1 %9654, %v10033_v29   ;;  %689 = vperm.xlu0 %9653, %v10036_v30  }
  0x51   : > { %v10071_v58 = vand.u32 4294901760, %v461_v55  ;;  %v10079_v61 = vand.u32 4294901760, %v460_v57 }
  0x53   : > { %v10082_v62 = vsub.f32 %v461_v55, %v10071_v58  ;;  %972 = vmatprep.subr.mxu0 %v10071_v58  ;;  %v10086_v63 = vsub.f32 %v460_v57, %v10079_v61 }
  0x54   : > { %698 = vperm.xlu1 %9654, %v10051_v41   ;;  %695 = vperm.xlu0 %9653, %v10054_v42  }
  0x55   : > { %974 = vmatpush1.msra.mxu0 %v10079_v61  ;;  %v1392_v0 = vand.u32 4294901760, %v10082_v62  ;;  %v16078_v13 = vand.u32 4294901760, %v10086_v63 }
  0x56   : > { %1691 = vmatprep.subr.mxu0 %v10082_v62 }
  0x57   : > { %v1393_v15 = vsub.f32 %v10082_v62, %v1392_v0  ;;  %v1399_v19 = vsub.f32 %v10086_v63, %v16078_v13 }
  0x58   : > { %704 = vperm.xlu1 %9654, %v10063_v52   ;;  %701 = vperm.xlu0 %9653, %v10066_v53  }
  0x59   : > { %v1394_v20 = vand.u32 4294901760, %v1393_v15  ;;  %v1400_v26 = vand.u32 4294901760, %v1399_v19 }
  0x5b   : > { %1395 = vmatprep.subr.mxu1 %v1394_v20 }
  0x5c   : > { %710 = vperm.xlu1 %9654, %v10074_v59   ;;  %707 = vperm.xlu0 %9653, %v10077_v60  }
  0x5d   : > { %1401 = vmatpush1.msra.mxu1 %v1400_v26 }
  0x5e   : > { %2015 = vmatprep.subr.mxu1 %v10071_v58 }
  0x60   : > { %716 = vperm.xlu1 %9654, %v10093_v3   ;;  %713 = vperm.xlu0 %9653, %v10096_v9  }
  0x64   : > { %722 = vperm.xlu1 %9654, %v10109_v23   ;;  %719 = vperm.xlu0 %9653, %v10112_v25  }
  0x68   : > { %728 = vperm.xlu1 %9654, %v10117_v31   ;;  %725 = vperm.xlu0 %9653, %v10120_v32  }
  0x6c   : > { %734 = vperm.xlu1 %9654, %v10126_v33   ;;  %731 = vperm.xlu0 %9653, %v10129_v35  }
  0x70   : > { %740 = vperm.xlu1 %9654, %v10134_v36   ;;  %737 = vperm.xlu0 %9653, %v10137_v37  }
  0x74   : > { %746 = vperm.xlu1 %9654, %v10142_v38   ;;  %743 = vperm.xlu0 %9653, %v10145_v39  }
  0xb3   : > { %v660_v43 = vpop.permute.xlu1 %659  ;;  %v654_v44 = vpop.permute.xlu0 %653 }
  0xb4   : > { %vm750_vm5 = vcmp.eq.s32.totalorder %v660_v43, %v10150_v40  ;;  %vm748_vm6 = vcmp.eq.s32.totalorder %v654_v44, %v10150_v40 }
  0xb5   : > { %v10155_v45 = vsel %vm750_vm5, 1.0, %v16187_v6  ;;  %v10158_v46 = vsel %vm748_vm6, 1.0, %v16187_v6 }
  0xb6   : > { %16580 = vst [vmem:[#allocation21_spill] sm:$0xff] %v10155_v45  ;;  %16581 = vst [vmem:[#allocation22_spill] sm:$0xff] %v10158_v46  ;;  %v852_v47 = vsel %vm844_vm4, %v10155_v45, 0  ;;  %v846_v48 = vsel %vm844_vm4, %v10158_v46, 0  ;;  %9195 = vmatmul.mubr.msk.f32.vlgmr.msra.gmra.mxu1 %vm844_vm4, %v10158_v46 }
  0xb7   : > { %v10166_v49 = vsub.f32 %v846_v48, %v846_v48  ;;  %v663_v50 = vpop.permute.xlu1 %662  ;;  %v657_v51 = vpop.permute.xlu0 %656  ;;  %1441 = vmatprep.mubr.f32.mxu1 %v16187_v6  ;;  %2017 = vmatpush1.msra.mxu1 %v10079_v61  ;;  %v10170_v54 = vsub.f32 %v852_v47, %v852_v47 }
  0xb8   : > { %vm751_vm7 = vcmp.eq.s32.totalorder %v663_v50, %v10150_v40  ;;  %vm749_vm8 = vcmp.eq.s32.totalorder %v657_v51, %v10150_v40  ;;  %2665 = vmatprep.subr.mxu1 %v10071_v58 }
  0xb9   : > { %v10176_v55 = vsel %vm751_vm7, 1.0, %v16187_v6  ;;  %v10179_v56 = vsel %vm749_vm8, 1.0, %v16187_v6  ;;  %v16079_v57 = vand.u32 4294901760, %v10166_v49  ;;  %v16080_v44 = vand.u32 4294901760, %v10170_v54 }
  0xba   : > { %16582 = vst [vmem:[#allocation23_spill] sm:$0xff] %v10176_v55  ;;  %16583 = vst [vmem:[#allocation24_spill] sm:$0xff] %v10179_v56  ;;  %v855_v15 = vsel %vm844_vm4, %v10176_v55, 0  ;;  %v849_v19 = vsel %vm844_vm4, %v10179_v56, 0  ;;  %9196 = vmatmul.mubr.msk.f32.gmra.mxu1 %vm844_vm4, %v10179_v56 }
  0xbb   : > { %v10188_v20 = vsub.f32 %v849_v19, %v849_v19  ;;  %v669_v58 = vpop.permute.xlu1 %668  ;;  %v666_v26 = vpop.permute.xlu0 %665  ;;  %1448 = vmatprep.mubr.f32.mxu1 %v16187_v6  ;;  %v1011_v43 = vsub.f32 %v10166_v49, %v16079_v57  ;;  %v10197_v47 = vsub.f32 %v855_v15, %v855_v15 }
  0xbc   : > { %vm753_vm9 = vcmp.eq.s32.totalorder %v669_v58, %v10150_v40  ;;  %vm752_vm10 = vcmp.eq.s32.totalorder %v666_v26, %v10150_v40 }
  0xbd   : > { %v10200_v48 = vsel %vm752_vm10, 1.0, %v16187_v6  ;;  %v1012_v50 = vand.u32 4294901760, %v1011_v43  ;;  %v16081_v51 = vand.u32 4294901760, %v10188_v20  ;;  %v10208_v58 = vsel %vm753_vm9, 1.0, %v16187_v6 }
  0xbe   : > { %16584 = vst [vmem:[#allocation25_spill] sm:$0xff] %v10200_v48  ;;  %v858_v19 = vsel %vm844_vm4, %v10200_v48, 0  ;;  %9197 = vmatmul.mubr.msk.f32.gmra.mxu1 %vm844_vm4, %v10155_v45  ;;  %16585 = vst [vmem:[#allocation26_spill] sm:$0xff] %v10208_v58  ;;  %v16083_v57 = vand.u32 4294901760, %v10197_v47 }
  0xbf   : > { %v672_v26 = vpop.permute.xlu0 %671  ;;  %1013 = vmatmul.mubr.f32.vlgmr.msra.gmra.mxu0 %v1012_v50  ;;  %1455 = vmatprep.mubr.f32.mxu1 %v16187_v6  ;;  %v1022_v15 = vsub.f32 %v10188_v20, %v16081_v51  ;;  %v10217_v43 = vsub.f32 %v858_v19, %v858_v19  ;;  %v675_v12 = vpop.permute.xlu1 %674  ;;  %v1033_v50 = vsub.f32 %v10170_v54, %v16080_v44 }
  0xc0   : > { %vm754_vm11 = vcmp.eq.s32.totalorder %v672_v26, %v10150_v40  ;;  %1018 = vmatprep.mubr.f32.mxu0 %v16187_v6  ;;  %1694 = vmatpush1.msra.mxu0 %v10086_v63  ;;  %v861_v26 = vsel %vm844_vm4, %v10208_v58, 0  ;;  %vm755_vm12 = vcmp.eq.s32.totalorder %v675_v12, %v10150_v40  ;;  %v1044_v44 = vsub.f32 %v10197_v47, %v16083_v57 }
  0xc1   : > { %v1023_v13 = vand.u32 4294901760, %v1022_v15  ;;  %2372 = vmatprep.subr.mxu0 %v1392_v0  ;;  %v10230_v19 = vsel %vm754_vm11, 1.0, %v16187_v6  ;;  %v10235_v15 = vsub.f32 %v861_v26, %v861_v26  ;;  %v1034_v0 = vand.u32 4294901760, %v1033_v50 }
  0xc2   : > { %9198 = vmatmul.mubr.msk.f32.gmra.mxu1 %vm844_vm4, %v10176_v55  ;;  %16586 = vst [vmem:[#allocation27_spill] sm:$0xff] %v10230_v19  ;;  %v16088_v51 = vand.u32 4294901760, %v10217_v43  ;;  %v864_v14 = vsel %vm844_vm4, %v10230_v19, 0  ;;  %v10246_v12 = vsel %vm755_vm12, 1.0, %v16187_v6  ;;  %v1045_v26 = vand.u32 4294901760, %v1044_v44 }
  0xc3   : > { %1024 = vmatmul.mubr.f32.gmra.mxu0 %v1023_v13  ;;  %1462 = vmatprep.mubr.f32.mxu1 %v16187_v6  ;;  %v678_v62 = vpop.permute.xlu0 %677  ;;  %16587 = vst [vmem:[#allocation28_spill] sm:$0xff] %v10246_v12  ;;  %v10251_v13 = vsub.f32 %v864_v14, %v864_v14  ;;  %v681_v50 = vpop.permute.xlu1 %680  ;;  %v867_v55 = vsel %vm844_vm4, %v10246_v12, 0 }
  0xc4   : > { %1029 = vmatprep.mubr.f32.mxu0 %v16187_v6  ;;  %vm756_vm13 = vcmp.eq.s32.totalorder %v678_v62, %v10150_v40  ;;  %v1055_v57 = vsub.f32 %v10217_v43, %v16088_v51  ;;  %vm757_vm14 = vcmp.eq.s32.totalorder %v681_v50, %v10150_v40  ;;  %v10267_v14 = vsub.f32 %v867_v55, %v867_v55 }
  0xc5   : > { %v10262_v62 = vsel %vm756_vm13, 1.0, %v16187_v6  ;;  %v10278_v50 = vsel %vm757_vm14, 1.0, %v16187_v6 }
  0xc6   : > { %9199 = vmatmul.mubr.msk.f32.gmra.mxu1 %vm844_vm4, %v10200_v48  ;;  %v16093_v48 = vand.u32 4294901760, %v10235_v15  ;;  %16588 = vst [vmem:[#allocation29_spill] sm:$0xff] %v10262_v62  ;;  %v870_v45 = vsel %vm844_vm4, %v10262_v62, 0  ;;  %16589 = vst [vmem:[#allocation30_spill] sm:$0xff] %v10278_v50  ;;  %v873_v56 = vsel %vm844_vm4, %v10278_v50, 0 }
  0xc7   : > { %1035 = vmatmul.mubr.f32.gmra.mxu0 %v1034_v0  ;;  %1469 = vmatprep.mubr.f32.mxu1 %v16187_v6  ;;  %v684_v44 = vpop.permute.xlu0 %683  ;;  %v1056_v0 = vand.u32 4294901760, %v1055_v57  ;;  %v10283_v55 = vsub.f32 %v870_v45, %v870_v45  ;;  %v687_v57 = vpop.permute.xlu1 %686  ;;  %v10299_v45 = vsub.f32 %v873_v56, %v873_v56 }
  0xc8   : > { %1040 = vmatprep.mubr.f32.mxu0 %v16187_v6  ;;  %v1066_v51 = vsub.f32 %v10235_v15, %v16093_v48  ;;  %vm758_vm15 = vcmp.eq.s32.totalorder %v684_v44, %v10150_v40  ;;  %vm759_vm0 = vcmp.eq.s32.totalorder %v687_v57, %v10150_v40 }
  0xc9   : > { %v10294_v44 = vsel %vm758_vm15, 1.0, %v16187_v6  ;;  %v10310_v57 = vsel %vm759_vm0, 1.0, %v16187_v6 }
  0xca   : > { %9200 = vmatmul.mubr.msk.f32.gmra.mxu1 %vm844_vm4, %v10208_v58  ;;  %v16098_v58 = vand.u32 4294901760, %v10251_v13  ;;  %16590 = vst [vmem:[#allocation31_spill] sm:$0xff] %v10294_v44  ;;  %v876_v46 = vsel %vm844_vm4, %v10294_v44, 0  ;;  %16591 = vst [vmem:[#allocation32_spill] sm:$0xff] %v10310_v57  ;;  %v879_v24 = vsel %vm844_vm4, %v10310_v57, 0 }
  0xcb   : > { %1046 = vmatmul.mubr.f32.gmra.mxu0 %v1045_v26  ;;  %1476 = vmatprep.mubr.f32.mxu1 %v16187_v6  ;;  %v1067_v26 = vand.u32 4294901760, %v1066_v51  ;;  %v690_v51 = vpop.permute.xlu0 %689  ;;  %v10315_v56 = vsub.f32 %v876_v46, %v876_v46  ;;  %v10331_v46 = vsub.f32 %v879_v24, %v879_v24 }
  0xcc   : > { %1051 = vmatprep.mubr.f32.mxu0 %v16187_v6  ;;  %v1077_v48 = vsub.f32 %v10251_v13, %v16098_v58  ;;  %vm760_vm1 = vcmp.eq.s32.totalorder %v690_v51, %v10150_v40 }
  0xcd   : > { %v10326_v51 = vsel %vm760_vm1, 1.0, %v16187_v6  ;;  %16593 = vst [vmem:[#allocation34_spill] sm:$0xff] %v10331_v46 }
  0xce   : > { %9201 = vmatmul.mubr.msk.f32.gmra.mxu1 %vm844_vm4, %v10230_v19  ;;  %v16103_v19 = vand.u32 4294901760, %v10267_v14  ;;  %16592 = vst [vmem:[#allocation33_spill] sm:$0xff] %v10326_v51  ;;  %v882_v34 = vsel %vm844_vm4, %v10326_v51, 0 }
  0xcf   : > { %1057 = vmatmul.mubr.f32.gmra.mxu0 %v1056_v0  ;;  %1483 = vmatprep.mubr.f32.mxu1 %v16187_v6  ;;  %v1078_v0 = vand.u32 4294901760, %v1077_v48  ;;  %v693_v48 = vpop.permute.xlu1 %692  ;;  %v10347_v24 = vsub.f32 %v882_v34, %v882_v34 }
  0xd0   : > { %1062 = vmatprep.mubr.f32.mxu0 %v16187_v6  ;;  %v1088_v58 = vsub.f32 %v10267_v14, %v16103_v19  ;;  %vm761_vm2 = vcmp.eq.s32.totalorder %v693_v48, %v10150_v40 }
  0xd1   : > { %v10342_v48 = vsel %vm761_vm2, 1.0, %v16187_v6  ;;  %16595 = vst [vmem:[#allocation36_spill] sm:$0xff] %v10347_v24 }
  0xd2   : > { %9202 = vmatmul.mubr.msk.f32.gmra.mxu1 %vm844_vm4, %v10246_v12  ;;  %v16108_v12 = vand.u32 4294901760, %v10283_v55  ;;  %16594 = vst [vmem:[#allocation35_spill] sm:$0xff] %v10342_v48  ;;  %v885_v28 = vsel %vm844_vm4, %v10342_v48, 0 }
  0xd3   : > { %1068 = vmatmul.mubr.f32.gmra.mxu0 %v1067_v26  ;;  %1490 = vmatprep.mubr.f32.mxu1 %v16187_v6  ;;  %v1089_v26 = vand.u32 4294901760, %v1088_v58  ;;  %v696_v58 = vpop.permute.xlu0 %695  ;;  %v10363_v34 = vsub.f32 %v885_v28, %v885_v28 }
  0xd4   : > { %1073 = vmatprep.mubr.f32.mxu0 %v16187_v6  ;;  %v1099_v19 = vsub.f32 %v10283_v55, %v16108_v12  ;;  %vm762_vm3 = vcmp.eq.s32.totalorder %v696_v58, %v10150_v40 }
  0xd5   : > { %v10358_v58 = vsel %vm762_vm3, 1.0, %v16187_v6  ;;  %16597 = vst [vmem:[#allocation38_spill] sm:$0xff] %v10363_v34 }
  0xd6   : > { %9203 = vmatmul.mubr.msk.f32.gmra.mxu1 %vm844_vm4, %v10262_v62  ;;  %v16113_v62 = vand.u32 4294901760, %v10299_v45  ;;  %16596 = vst [vmem:[#allocation37_spill] sm:$0xff] %v10358_v58  ;;  %v888_v27 = vsel %vm844_vm4, %v10358_v58, 0 }
  0xd7   : > { %1079 = vmatmul.mubr.f32.gmra.mxu0 %v1078_v0  ;;  %1497 = vmatprep.mubr.f32.mxu1 %v16187_v6  ;;  %v1100_v0 = vand.u32 4294901760, %v1099_v19  ;;  %v699_v19 = vpop.permute.xlu1 %698  ;;  %v10379_v28 = vsub.f32 %v888_v27, %v888_v27 }
  0xd8   : > { %1084 = vmatprep.mubr.f32.mxu0 %v16187_v6  ;;  %v1110_v12 = vsub.f32 %v10299_v45, %v16113_v62  ;;  %vm763_vm5 = vcmp.eq.s32.totalorder %v699_v19, %v10150_v40 }
  0xd9   : > { %v10374_v19 = vsel %vm763_vm5, 1.0, %v16187_v6  ;;  %16599 = vst [vmem:[#allocation40_spill] sm:$0xff] %v10379_v28 }
  0xda   : > { %9204 = vmatmul.mubr.msk.f32.gmra.mxu1 %vm844_vm4, %v10278_v50  ;;  %v16118_v50 = vand.u32 4294901760, %v10315_v56  ;;  %16598 = vst [vmem:[#allocation39_spill] sm:$0xff] %v10374_v19 }
  0xdb   : > { %1090 = vmatmul.mubr.f32.gmra.mxu0 %v1089_v26  ;;  %1504 = vmatprep.mubr.f32.mxu1 %v16187_v6  ;;  %v1111_v26 = vand.u32 4294901760, %v1110_v12  ;;  %v702_v12 = vpop.permute.xlu0 %701 }
  0xdc   : > { %1095 = vmatprep.mubr.f32.mxu0 %v16187_v6  ;;  %v1121_v62 = vsub.f32 %v10315_v56, %v16118_v50  ;;  %vm764_vm6 = vcmp.eq.s32.totalorder %v702_v12, %v10150_v40 }
  0xdd   : > { %v10390_v12 = vsel %vm764_vm6, 1.0, %v16187_v6 }
  0xde   : > { %9205 = vmatmul.mubr.msk.f32.gmra.mxu1 %vm844_vm4, %v10294_v44  ;;  %v16123_v44 = vand.u32 4294901760, %v10331_v46  ;;  %16600 = vst [vmem:[#allocation41_spill] sm:$0xff] %v10390_v12 }
  0xdf   : > { %1101 = vmatmul.mubr.f32.gmra.mxu0 %v1100_v0  ;;  %1511 = vmatprep.mubr.f32.mxu1 %v16187_v6  ;;  %v1122_v0 = vand.u32 4294901760, %v1121_v62  ;;  %v705_v62 = vpop.permute.xlu1 %704 }
  0xe0   : > { %1106 = vmatprep.mubr.f32.mxu0 %v16187_v6  ;;  %v1132_v50 = vsub.f32 %v10331_v46, %v16123_v44  ;;  %v891_v46 = vsel %vm844_vm4, %v10374_v19, 0  ;;  %vm765_vm7 = vcmp.eq.s32.totalorder %v705_v62, %v10150_v40 }
  0xe1   : > { %v10395_v27 = vsub.f32 %v891_v46, %v891_v46  ;;  %v10406_v62 = vsel %vm765_vm7, 1.0, %v16187_v6 }
  0xe2   : > { %9206 = vmatmul.mubr.msk.f32.gmra.mxu1 %vm844_vm4, %v10310_v57  ;;  %v16128_v57 = vand.u32 4294901760, %v10347_v24 }
  0xe3   : > { %1112 = vmatmul.mubr.f32.gmra.mxu0 %v1111_v26  ;;  %1518 = vmatprep.mubr.f32.mxu1 %v16187_v6  ;;  %v1133_v26 = vand.u32 4294901760, %v1132_v50  ;;  %16601 = vst [vmem:[#allocation42_spill] sm:$0xff] %v10395_v27  ;;  %v708_v50 = vpop.permute.xlu0 %707  ;;  %v711_v46 = vpop.permute.xlu1 %710 }
  0xe4   : > { %1117 = vmatprep.mubr.f32.mxu0 %v16187_v6  ;;  %v1143_v44 = vsub.f32 %v10347_v24, %v16128_v57  ;;  %v894_v24 = vsel %vm844_vm4, %v10390_v12, 0  ;;  %vm766_vm8 = vcmp.eq.s32.totalorder %v708_v50, %v10150_v40  ;;  %vm767_vm9 = vcmp.eq.s32.totalorder %v711_v46, %v10150_v40 }
  0xe5   : > { %v10422_v50 = vsel %vm766_vm8, 1.0, %v16187_v6  ;;  %v10438_v46 = vsel %vm767_vm9, 1.0, %v16187_v6 }
  0xe6   : > { %9207 = vmatmul.mubr.msk.f32.gmra.mxu1 %vm844_vm4, %v10326_v51  ;;  %v16133_v51 = vand.u32 4294901760, %v10363_v34 }
  0xe7   : > { %1123 = vmatmul.mubr.f32.gmra.mxu0 %v1122_v0  ;;  %1525 = vmatprep.mubr.f32.mxu1 %v16187_v6  ;;  %v1144_v0 = vand.u32 4294901760, %v1143_v44  ;;  %v10411_v44 = vsub.f32 %v894_v24, %v894_v24  ;;  %v714_v24 = vpop.permute.xlu0 %713 }
  0xe8   : > { %1128 = vmatprep.mubr.f32.mxu0 %v16187_v6  ;;  %v1154_v57 = vsub.f32 %v10363_v34, %v16133_v51  ;;  %v897_v34 = vsel %vm844_vm4, %v10406_v62, 0  ;;  %vm768_vm10 = vcmp.eq.s32.totalorder %v714_v24, %v10150_v40 }
  0xea   : > { %9208 = vmatmul.mubr.msk.f32.gmra.mxu1 %vm844_vm4, %v10342_v48  ;;  %v16138_v48 = vand.u32 4294901760, %v10379_v28 }
  0xeb   : > { %1134 = vmatmul.mubr.f32.gmra.mxu0 %v1133_v26  ;;  %1532 = vmatprep.mubr.f32.mxu1 %v16187_v6  ;;  %v1155_v26 = vand.u32 4294901760, %v1154_v57  ;;  %v10427_v57 = vsub.f32 %v897_v34, %v897_v34  ;;  %v717_v34 = vpop.permute.xlu1 %716 }
  0xec   : > { %1139 = vmatprep.mubr.f32.mxu0 %v16187_v6  ;;  %v1165_v51 = vsub.f32 %v10379_v28, %v16138_v48  ;;  %v900_v28 = vsel %vm844_vm4, %v10422_v50, 0  ;;  %vm769_vm11 = vcmp.eq.s32.totalorder %v717_v34, %v10150_v40 }
  0xee   : > { %9209 = vmatmul.mubr.msk.f32.gmra.mxu1 %vm844_vm4, %v10358_v58  ;;  %v16143_v58 = vand.u32 4294901760, %v10395_v27 }
  0xef   : > { %1145 = vmatmul.mubr.f32.gmra.mxu0 %v1144_v0  ;;  %1539 = vmatprep.mubr.f32.mxu1 %v16187_v6  ;;  %v1166_v0 = vand.u32 4294901760, %v1165_v51  ;;  %v10443_v51 = vsub.f32 %v900_v28, %v900_v28  ;;  %v10455_v28 = vsel %vm768_vm10, 1.0, %v16187_v6  ;;  %v723_v34 = vpop.permute.xlu1 %722 }
  0xf0   : > { %1150 = vmatprep.mubr.f32.mxu0 %v16187_v6  ;;  %v1176_v48 = vsub.f32 %v10395_v27, %v16143_v58  ;;  %v9804_v27 = vmov 1   ;;  %vm771_vm13 = vcmp.eq.s32.totalorder %v723_v34, %v10150_v40 }
  0xf1   : > { %9655 = vset.pattern.permute.xlu0 %v9804_v27  ;;  %9656 = vset.pattern.permute.xlu1 %v9804_v27  ;;  %v720_v27 = vpop.permute.xlu0 %719 }
  0xf2   : > { %9210 = vmatmul.mubr.msk.f32.gmra.mxu1 %vm844_vm4, %v10374_v19  ;;  %v16148_v19 = vand.u32 4294901760, %v10411_v44  ;;  %2926 = vperm.xlu0 %9655, %v9969_v2   ;;  %vm770_vm12 = vcmp.eq.s32.totalorder %v720_v27, %v10150_v40 }
  0xf3   : > { %1156 = vmatmul.mubr.f32.gmra.mxu0 %v1155_v26  ;;  %1546 = vmatprep.mubr.f32.mxu1 %v16187_v6  ;;  %v1177_v26 = vand.u32 4294901760, %v1176_v48 }
  0xf4   : > { %1161 = vmatprep.mubr.f32.mxu0 %v16187_v6  ;;  %v1187_v58 = vsub.f32 %v10411_v44, %v16148_v19  ;;  %2929 = vperm.xlu1 %9656, %v9977_v5   ;;  %v16150_v19 = vand.u32 4294901760, %v10443_v51  ;;  %v10473_v5 = vsel %vm769_vm11, 1.0, %v16187_v6 }
  0xf6   : > { %9211 = vmatmul.mubr.msk.f32.gmra.mxu1 %vm844_vm4, %v10390_v12  ;;  %v16149_v12 = vand.u32 4294901760, %v10427_v57  ;;  %v1188_v24 = vand.u32 4294901760, %v1187_v58  ;;  %2935 = vperm.xlu0 %9655, %v9974_v4   ;;  %v1209_v4 = vsub.f32 %v10443_v51, %v16150_v19 }
  0xf7   : > { %1167 = vmatmul.mubr.f32.gmra.mxu0 %v1166_v0  ;;  %1553 = vmatprep.mubr.f32.mxu1 %v16187_v6  ;;  %v903_v0 = vsel %vm844_vm4, %v10438_v46, 0 }
  0xf8   : > { %1172 = vmatprep.mubr.f32.mxu0 %v16187_v6  ;;  %v10461_v48 = vsub.f32 %v903_v0, %v903_v0  ;;  %v1198_v2 = vsub.f32 %v10427_v57, %v16149_v12  ;;  %2932 = vperm.xlu1 %9656, %v9966_v1   ;;  %v10491_v1 = vsel %vm770_vm12, 1.0, %v16187_v6 }
  0xfa   : > { %9212 = vmatmul.mubr.msk.f32.gmra.mxu1 %vm844_vm4, %v10406_v62  ;;  %v1199_v0 = vand.u32 4294901760, %v1198_v2  ;;  %v16151_v12 = vand.u32 4294901760, %v10461_v48  ;;  %2941 = vperm.xlu0 %9655, %v9984_v7   ;;  %v726_v2 = vpop.permute.xlu0 %725 }
  0xfb   : > { %1178 = vmatmul.mubr.f32.gmra.mxu0 %v1177_v26  ;;  %1560 = vmatprep.mubr.f32.mxu1 %v16187_v6  ;;  %v906_v26 = vsel %vm844_vm4, %v10455_v28, 0  ;;  %vm772_vm14 = vcmp.eq.s32.totalorder %v726_v2, %v10150_v40 }
  0xfc   : > { %1183 = vmatprep.mubr.f32.mxu0 %v16187_v6  ;;  %v10479_v58 = vsub.f32 %v906_v26, %v906_v26  ;;  %2938 = vperm.xlu1 %9656, %v9987_v8   ;;  %v1210_v26 = vand.u32 4294901760, %v1209_v4  ;;  %v1220_v7 = vsub.f32 %v10461_v48, %v16151_v12  ;;  %v10509_v8 = vsel %vm771_vm13, 1.0, %v16187_v6  ;;  %v729_v4 = vpop.permute.xlu1 %728 }
  0xfd   : > { %vm773_vm15 = vcmp.eq.s32.totalorder %v729_v4, %v10150_v40 }
  0xfe   : > { %9213 = vmatmul.mubr.msk.f32.gmra.mxu1 %vm844_vm4, %v10422_v50  ;;  %v16152_v19 = vand.u32 4294901760, %v10479_v58  ;;  %2947 = vperm.xlu0 %9655, %v9993_v10  }
  0xff   : > { %1189 = vmatmul.mubr.f32.gmra.mxu0 %v1188_v24  ;;  %1567 = vmatprep.mubr.f32.mxu1 %v16187_v6  ;;  %v909_v24 = vsel %vm844_vm4, %v10473_v5, 0 }
 0x100   : > { %1194 = vmatprep.mubr.f32.mxu0 %v16187_v6  ;;  %v10497_v27 = vsub.f32 %v909_v24, %v909_v24  ;;  %2944 = vperm.xlu1 %9656, %v9996_v11   ;;  %v1221_v24 = vand.u32 4294901760, %v1220_v7  ;;  %v1231_v10 = vsub.f32 %v10479_v58, %v16152_v19  ;;  %v10527_v11 = vsel %vm772_vm14, 1.0, %v16187_v6  ;;  %v732_v7 = vpop.permute.xlu0 %731 }
 0x101   : > { %vm774_vm0 = vcmp.eq.s32.totalorder %v732_v7, %v10150_v40 }
 0x102   : > { %9214 = vmatmul.mubr.msk.f32.gmra.mxu1 %vm844_vm4, %v10438_v46  ;;  %v16153_v12 = vand.u32 4294901760, %v10497_v27  ;;  %2953 = vperm.xlu0 %9655, %v10005_v16  }
 0x103   : > { %1200 = vmatmul.mubr.f32.gmra.mxu0 %v1199_v0  ;;  %1574 = vmatprep.mubr.f32.mxu1 %v16187_v6  ;;  %v912_v0 = vsel %vm844_vm4, %v10491_v1, 0 }
 0x104   : > { %1205 = vmatprep.mubr.f32.mxu0 %v16187_v6  ;;  %v10515_v34 = vsub.f32 %v912_v0, %v912_v0  ;;  %2950 = vperm.xlu1 %9656, %v10008_v17   ;;  %v1232_v0 = vand.u32 4294901760, %v1231_v10  ;;  %v1242_v16 = vsub.f32 %v10497_v27, %v16153_v12  ;;  %v10545_v17 = vsel %vm773_vm15, 1.0, %v16187_v6  ;;  %v735_v10 = vpop.permute.xlu1 %734 }
 0x105   : > { %vm775_vm1 = vcmp.eq.s32.totalorder %v735_v10, %v10150_v40 }
 0x106   : > { %9215 = vmatmul.mubr.msk.f32.gmra.mxu1 %vm844_vm4, %v10455_v28  ;;  %v16154_v19 = vand.u32 4294901760, %v10515_v34  ;;  %2959 = vperm.xlu0 %9655, %v10016_v21  }
 0x107   : > { %1211 = vmatmul.mubr.f32.gmra.mxu0 %v1210_v26  ;;  %1581 = vmatprep.mubr.f32.mxu1 %v16187_v6  ;;  %v915_v26 = vsel %vm844_vm4, %v10509_v8, 0 }
 0x108   : > { %1216 = vmatprep.mubr.f32.mxu0 %v16187_v6  ;;  %v10533_v2 = vsub.f32 %v915_v26, %v915_v26  ;;  %2956 = vperm.xlu1 %9656, %v10019_v22   ;;  %v1243_v26 = vand.u32 4294901760, %v1242_v16  ;;  %v1253_v21 = vsub.f32 %v10515_v34, %v16154_v19  ;;  %v10563_v22 = vsel %vm774_vm0, 1.0, %v16187_v6  ;;  %v738_v16 = vpop.permute.xlu0 %737 }
 0x109   : > { %vm776_vm2 = vcmp.eq.s32.totalorder %v738_v16, %v10150_v40 }
 0x10a   : > { %9216 = vmatmul.mubr.msk.f32.gmra.mxu1 %vm844_vm4, %v10473_v5  ;;  %v16155_v12 = vand.u32 4294901760, %v10533_v2  ;;  %2965 = vperm.xlu0 %9655, %v10033_v29  }
 0x10b   : > { %1222 = vmatmul.mubr.f32.gmra.mxu0 %v1221_v24  ;;  %1588 = vmatprep.mubr.f32.mxu1 %v16187_v6  ;;  %v918_v24 = vsel %vm844_vm4, %v10527_v11, 0 }
 0x10c   : > { %1227 = vmatprep.mubr.f32.mxu0 %v16187_v6  ;;  %v10551_v4 = vsub.f32 %v918_v24, %v918_v24  ;;  %2962 = vperm.xlu1 %9656, %v10036_v30   ;;  %v1254_v24 = vand.u32 4294901760, %v1253_v21  ;;  %v1264_v29 = vsub.f32 %v10533_v2, %v16155_v12  ;;  %v10581_v30 = vsel %vm775_vm1, 1.0, %v16187_v6  ;;  %v741_v21 = vpop.permute.xlu1 %740 }
 0x10d   : > { %vm777_vm3 = vcmp.eq.s32.totalorder %v741_v21, %v10150_v40 }
 0x10e   : > { %9217 = vmatmul.mubr.msk.f32.gmra.mxu1 %vm844_vm4, %v10491_v1  ;;  %v16156_v19 = vand.u32 4294901760, %v10551_v4  ;;  %2971 = vperm.xlu0 %9655, %v10051_v41  }
 0x10f   : > { %1233 = vmatmul.mubr.f32.gmra.mxu0 %v1232_v0  ;;  %1595 = vmatprep.mubr.f32.mxu1 %v16187_v6  ;;  %v921_v0 = vsel %vm844_vm4, %v10545_v17, 0 }
 0x110   : > { %1238 = vmatprep.mubr.f32.mxu0 %v16187_v6  ;;  %v10569_v7 = vsub.f32 %v921_v0, %v921_v0  ;;  %2968 = vperm.xlu1 %9656, %v10054_v42   ;;  %v1265_v0 = vand.u32 4294901760, %v1264_v29  ;;  %v1275_v41 = vsub.f32 %v10551_v4, %v16156_v19  ;;  %v10599_v42 = vsel %vm776_vm2, 1.0, %v16187_v6  ;;  %v744_v29 = vpop.permute.xlu0 %743 }
 0x111   : > { %vm778_vm5 = vcmp.eq.s32.totalorder %v744_v29, %v10150_v40 }
 0x112   : > { %9218 = vmatmul.mubr.msk.f32.gmra.mxu1 %vm844_vm4, %v10509_v8  ;;  %v16157_v12 = vand.u32 4294901760, %v10569_v7  ;;  %2977 = vperm.xlu0 %9655, %v10063_v52  }
 0x113   : > { %1244 = vmatmul.mubr.f32.gmra.mxu0 %v1243_v26  ;;  %1602 = vmatprep.mubr.f32.mxu1 %v16187_v6  ;;  %v924_v26 = vsel %vm844_vm4, %v10563_v22, 0 }
 0x114   : > { %1249 = vmatprep.mubr.f32.mxu0 %v16187_v6  ;;  %v10587_v10 = vsub.f32 %v924_v26, %v924_v26  ;;  %2974 = vperm.xlu1 %9656, %v10066_v53   ;;  %v1276_v26 = vand.u32 4294901760, %v1275_v41  ;;  %v1286_v52 = vsub.f32 %v10569_v7, %v16157_v12  ;;  %v10617_v53 = vsel %vm777_vm3, 1.0, %v16187_v6  ;;  %v747_v41 = vpop.permute.xlu1 %746 }
 0x115   : > { %vm779_vm6 = vcmp.eq.s32.totalorder %v747_v41, %v10150_v40 }
 0x116   : > { %9219 = vmatmul.mubr.msk.f32.gmra.mxu1 %vm844_vm4, %v10527_v11  ;;  %v16164_v19 = vand.u32 4294901760, %v10587_v10  ;;  %2983 = vperm.xlu0 %9655, %v10074_v59   ;;  %v10653_v41 = vsel %vm779_vm6, 1.0, %v16187_v6 }
 0x117   : > { %1255 = vmatmul.mubr.f32.gmra.mxu0 %v1254_v24  ;;  %1609 = vmatprep.mubr.f32.mxu1 %v16187_v6  ;;  %v927_v24 = vsel %vm844_vm4, %v10581_v30, 0  ;;  %16602 = vst [vmem:[#allocation43_spill] sm:$0xff] %v10653_v41 }
 0x118   : > { %1260 = vmatprep.mubr.f32.mxu0 %v16187_v6  ;;  %v10605_v16 = vsub.f32 %v927_v24, %v927_v24  ;;  %2980 = vperm.xlu1 %9656, %v10077_v60   ;;  %v1287_v24 = vand.u32 4294901760, %v1286_v52  ;;  %v1297_v59 = vsub.f32 %v10587_v10, %v16164_v19  ;;  %v10635_v60 = vsel %vm778_vm5, 1.0, %v16187_v6 }
 0x11a   : > { %9220 = vmatmul.mubr.msk.f32.gmra.mxu1 %vm844_vm4, %v10545_v17  ;;  %v16158_v12 = vand.u32 4294901760, %v10605_v16  ;;  %2989 = vperm.xlu0 %9655, %v10093_v3   ;;  %v1298_v52 = vand.u32 4294901760, %v1297_v59 }
 0x11b   : > { %1266 = vmatmul.mubr.f32.gmra.mxu0 %v1265_v0  ;;  %1616 = vmatprep.mubr.f32.mxu1 %v16187_v6  ;;  %v930_v0 = vsel %vm844_vm4, %v10599_v42, 0 }
 0x11c   : > { %1271 = vmatprep.mubr.f32.mxu0 %v16187_v6  ;;  %v10623_v21 = vsub.f32 %v930_v0, %v930_v0  ;;  %2986 = vperm.xlu1 %9656, %v10096_v9   ;;  %v1308_v0 = vsub.f32 %v10605_v16, %v16158_v12 }
 0x11e   : > { %9221 = vmatmul.mubr.msk.f32.gmra.mxu1 %vm844_vm4, %v10563_v22  ;;  %v16163_v3 = vand.u32 4294901760, %v10623_v21  ;;  %2995 = vperm.xlu0 %9655, %v10109_v23   ;;  %v1309_v59 = vand.u32 4294901760, %v1308_v0  ;;  %v939_v23 = vsel %vm844_vm4, %v10653_v41, 0 }
 0x11f   : > { %1277 = vmatmul.mubr.f32.gmra.mxu0 %v1276_v26  ;;  %1623 = vmatprep.mubr.f32.mxu1 %v16187_v6  ;;  %v933_v26 = vsel %vm844_vm4, %v10617_v53, 0 }
 0x120   : > { %1282 = vmatprep.mubr.f32.mxu0 %v16187_v6  ;;  %v10641_v29 = vsub.f32 %v933_v26, %v933_v26  ;;  %2992 = vperm.xlu1 %9656, %v10112_v25   ;;  %v1319_v26 = vsub.f32 %v10623_v21, %v16163_v3  ;;  %v10672_v25 = vsub.f32 %v939_v23, %v939_v23  ;;  %v16608_v23 = vand.u32 4294901760, %v10217_v43 }
 0x122   : > { %9222 = vmatmul.mubr.msk.f32.gmra.mxu1 %vm844_vm4, %v10581_v30  ;;  %v16162_v12 = vand.u32 4294901760, %v10641_v29  ;;  %3001 = vperm.xlu0 %9655, %v10117_v31  }
 0x123   : > { %1288 = vmatmul.mubr.f32.gmra.mxu0 %v1287_v24  ;;  %1630 = vmatprep.mubr.f32.mxu1 %v16187_v6  ;;  %v936_v24 = vsel %vm844_vm4, %v10635_v60, 0 }
 0x124   : > { %1293 = vmatprep.mubr.f32.mxu0 %v16187_v6  ;;  %v10658_v9 = vsub.f32 %v936_v24, %v936_v24  ;;  %2998 = vperm.xlu1 %9656, %v10120_v32   ;;  %v1330_v0 = vsub.f32 %v10641_v29, %v16162_v12  ;;  %v16638_v12 = vand.u32 4294901760, %v10551_v4 }
 0x126   : > { %9223 = vmatmul.mubr.msk.f32.gmra.mxu1 %vm844_vm4, %v10599_v42  ;;  %v16161_v24 = vand.u32 4294901760, %v10658_v9  ;;  %3007 = vperm.xlu0 %9655, %v10126_v33   ;;  %v1331_v31 = vand.u32 4294901760, %v1330_v0  ;;  %v16616_v0 = vld [vmem:[#allocation19_spill] sm:$0xff] }
 0x127   : > { %1299 = vmatmul.mubr.f32.gmra.mxu0 %v1298_v52  ;;  %1637 = vmatprep.mubr.f32.mxu1 %v16187_v6  ;;  %v1320_v52 = vand.u32 4294901760, %v1319_v26  ;;  %v16603_v26 = vand.u32 4294901760, %v10166_v49 }
 0x128   : > { %1304 = vmatprep.mubr.f32.mxu0 %v16187_v6  ;;  %3004 = vperm.xlu1 %9656, %v10129_v35   ;;  %v1341_v32 = vsub.f32 %v10658_v9, %v16161_v24 }
 0x12a   : > { %9224 = vmatmul.mubr.msk.f32.gmra.mxu1 %vm844_vm4, %v10617_v53  ;;  %3013 = vperm.xlu0 %9655, %v10134_v36   ;;  %v1342_v33 = vand.u32 4294901760, %v1341_v32  ;;  %v16617_v32 = vld [vmem:[#allocation20_spill] sm:$0xff] }
 0x12b   : > { %1310 = vmatmul.mubr.f32.gmra.mxu0 %v1309_v59  ;;  %1644 = vmatprep.mubr.f32.mxu1 %v16187_v6  ;;  %v16160_v59 = vand.u32 4294901760, %v10672_v25 }
 0x12c   : > { %1315 = vmatprep.mubr.f32.mxu0 %v16187_v6  ;;  %3010 = vperm.xlu1 %9656, %v10137_v37   ;;  %v16604_v37 = vand.u32 4294901760, %v10188_v20 }
 0x12d   : > { %v1352_v35 = vsub.f32 %v10672_v25, %v16160_v59 }
 0x12e   : > { %9225 = vmatmul.mubr.msk.f32.gmra.mxu1 %vm844_vm4, %v10635_v60  ;;  %3019 = vperm.xlu0 %9655, %v10142_v38   ;;  %v16605_v38 = vand.u32 4294901760, %v10170_v54 }
 0x12f   : > { %1321 = vmatmul.mubr.f32.gmra.mxu0 %v1320_v52  ;;  %1651 = vmatprep.mubr.f32.mxu1 %v16187_v6  ;;  %v1353_v36 = vand.u32 4294901760, %v1352_v35  ;;  %v16615_v52 = vld [vmem:[#allocation18_spill] sm:$0xff]  ;;  %v16618_v35 = vld [vmem:[#allocation17_spill] sm:$0xff] }
 0x130   : > { %1326 = vmatprep.mubr.f32.mxu0 %v16187_v6  ;;  %3016 = vperm.xlu1 %9656, %v10145_v39   ;;  %v16607_v39 = vand.u32 4294901760, %v10197_v47 }
 0x132   : > { %9226 = vmatmul.mubr.msk.f32.gmra.mxu1 %vm844_vm4, %v10653_v41 }
 0x133   : > { %1332 = vmatmul.mubr.f32.gmra.mxu0 %v1331_v31  ;;  %2050 = vmatprep.mubr.f32.mxu1 %v16187_v6 }
 0x134   : > { %1337 = vmatprep.mubr.f32.mxu0 %v16187_v6 }
 0x136   : > { %2054 = vmatmul.mubr.f32.vlgmr.msra.gmra.mxu1 %v16603_v26 }
 0x137   : > { %1343 = vmatmul.mubr.f32.gmra.mxu0 %v1342_v33  ;;  %2059 = vmatprep.mubr.f32.mxu1 %v16187_v6 }
 0x138   : > { %1348 = vmatprep.mubr.f32.mxu0 %v16187_v6  ;;  %2667 = vmatpush1.msra.mxu1 %v10079_v61  ;;  %v16606_v61 = vand.u32 4294901760, %v10086_v63  ;;  %v16609_v63 = vand.u32 4294901760, %v10235_v15 }
 0x13a   : > { %2063 = vmatmul.mubr.f32.gmra.mxu1 %v16604_v37 }
 0x13b   : > { %1354 = vmatmul.mubr.f32.gmra.mxu0 %v1353_v36  ;;  %2068 = vmatprep.mubr.f32.mxu1 %v16187_v6  ;;  %v16619_v36 = vld [vmem:[#allocation34_spill] sm:$0xff] }
 0x13c   : > { %1727 = vmatprep.mubr.f32.mxu0 %v16187_v6  ;;  %v16620_v37 = vand.u32 4294901760, %v16619_v36 }
 0x13e   : > { %2072 = vmatmul.mubr.f32.gmra.mxu1 %v16605_v38 }
 0x13f   : > { %1730 = vmatmul.mubr.f32.vlgmr.msra.gmra.mxu0 %v10166_v49  ;;  %2077 = vmatprep.mubr.f32.mxu1 %v16187_v6  ;;  %v16610_v49 = vand.u32 4294901760, %v10251_v13 }
 0x140   : > { %1735 = vmatprep.mubr.f32.mxu0 %v16187_v6  ;;  %2376 = vmatpush1.msra.mxu0 %v16606_v61 }
 0x142   : > { %2081 = vmatmul.mubr.f32.gmra.mxu1 %v16607_v39 }
 0x143   : > { %1738 = vmatmul.mubr.f32.gmra.mxu0 %v10188_v20  ;;  %2086 = vmatprep.mubr.f32.mxu1 %v16187_v6  ;;  %v16612_v20 = vand.u32 4294901760, %v10283_v55 }
 0x144   : > { %1743 = vmatprep.mubr.f32.mxu0 %v16187_v6 }
 0x146   : > { %2090 = vmatmul.mubr.f32.gmra.mxu1 %v16608_v23 }
 0x147   : > { %1746 = vmatmul.mubr.f32.gmra.mxu0 %v10170_v54  ;;  %2095 = vmatprep.mubr.f32.mxu1 %v16187_v6  ;;  %v16611_v54 = vand.u32 4294901760, %v10267_v14 }
 0x148   : > { %1751 = vmatprep.mubr.f32.mxu0 %v16187_v6 }
 0x14a   : > { %2099 = vmatmul.mubr.f32.gmra.mxu1 %v16609_v63 }
 0x14b   : > { %1754 = vmatmul.mubr.f32.gmra.mxu0 %v10197_v47  ;;  %2104 = vmatprep.mubr.f32.mxu1 %v16187_v6  ;;  %v16613_v47 = vand.u32 4294901760, %v10299_v45 }
 0x14c   : > { %1759 = vmatprep.mubr.f32.mxu0 %v16187_v6 }
 0x14e   : > { %2108 = vmatmul.mubr.f32.gmra.mxu1 %v16610_v49  ;;  %v16621_v49 = vld [vmem:[#allocation36_spill] sm:$0xff] }
 0x14f   : > { %1762 = vmatmul.mubr.f32.gmra.mxu0 %v10217_v43  ;;  %2113 = vmatprep.mubr.f32.mxu1 %v16187_v6  ;;  %v16614_v43 = vand.u32 4294901760, %v10315_v56 }
 0x150   : > { %1767 = vmatprep.mubr.f32.mxu0 %v16187_v6 }
 0x152   : > { %2117 = vmatmul.mubr.f32.gmra.mxu1 %v16611_v54  ;;  %v16622_v54 = vand.u32 4294901760, %v16621_v49 }
 0x153   : > { %1770 = vmatmul.mubr.f32.gmra.mxu0 %v10235_v15  ;;  %2122 = vmatprep.mubr.f32.mxu1 %v16187_v6  ;;  %v10753_v15 = vsub.s32 1, %v10011_v18 }
 0x154   : > { %1775 = vmatprep.mubr.f32.mxu0 %v16187_v6 }
 0x156   : > { %2126 = vmatmul.mubr.f32.gmra.mxu1 %v16612_v20 }
 0x157   : > { %1778 = vmatmul.mubr.f32.gmra.mxu0 %v10251_v13  ;;  %2131 = vmatprep.mubr.f32.mxu1 %v16187_v6  ;;  %v468_v13 = vsub.s32 5, %v10011_v18 }
 0x158   : > { %1783 = vmatprep.mubr.f32.mxu0 %v16187_v6 }
 0x159   : > { %v487_v31 = vrot.slane %v16616_v0, %v468_v13  ;;  %v507_v33 = vrot.slane %v16617_v32, %v468_v13  ;;  %v525_v26 = vrot.slane %v16618_v35, %v468_v13 }
 0x15a   : > { %2135 = vmatmul.mubr.f32.gmra.mxu1 %v16613_v47  ;;  %v16624_v47 = vld [vmem:[#allocation38_spill] sm:$0xff] }
 0x15b   : > { %1786 = vmatmul.mubr.f32.gmra.mxu0 %v10267_v14  ;;  %2140 = vmatprep.mubr.f32.mxu1 %v16187_v6  ;;  %v469_v14 = vrot.slane %v16615_v52, %v468_v13  ;;  %v497_v61 = vrot.slane %v487_v31, %v10753_v15  ;;  %v535_v39 = vrot.slane %v525_v26, %v10753_v15 }
 0x15c   : > { %1791 = vmatprep.mubr.f32.mxu0 %v16187_v6 }
 0x15d   : > { %v477_v38 = vrot.slane %v469_v14, %v10753_v15  ;;  %v16626_v14 = vld [vmem:[#allocation40_spill] sm:$0xff] }
 0x15e   : > { %2144 = vmatmul.mubr.f32.gmra.mxu1 %v16614_v43  ;;  %v16625_v43 = vand.u32 4294901760, %v16624_v47  ;;  %v16627_v31 = vand.u32 4294901760, %v16626_v14 }
 0x15f   : > { %1794 = vmatmul.mubr.f32.gmra.mxu0 %v10283_v55  ;;  %2149 = vmatprep.mubr.f32.mxu1 %v16187_v6  ;;  %v515_v55 = vrot.slane %v507_v33, %v10753_v15  ;;  %vm479_vm7 = vcmp.eq.s32.totalorder %v10011_v18, %v477_v38 }
 0x160   : > { %1799 = vmatprep.mubr.f32.mxu0 %v16187_v6  ;;  %v499_v23 = vsel %vm479_vm7, %v497_v61, 0.0  ;;  %v16630_v61 = vand.u32 4294901760, %v10411_v44 }
 0x161   : > { %vm517_vm8 = vcmp.eq.s32.totalorder %v10011_v18, %v515_v55 }
 0x162   : > { %2153 = vmatmul.mubr.f32.gmra.mxu1 %v16620_v37  ;;  %v537_v63 = vsel %vm517_vm8, %v535_v39, 0.0 }
 0x163   : > { %1802 = vmatmul.mubr.f32.gmra.mxu0 %v10299_v45  ;;  %2158 = vmatprep.mubr.f32.mxu1 %v16187_v6  ;;  %v539_v20 = vadd.f32 %v537_v63, %v499_v23  ;;  %v16631_v23 = vand.u32 4294901760, %v10427_v57 }
 0x164   : > { %1807 = vmatprep.mubr.f32.mxu0 %v16187_v6 }
 0x165   : > { %v10779_v45 = vand.u32 4294901760, %v539_v20 }
 0x166   : > { %2162 = vmatmul.mubr.f32.gmra.mxu1 %v16622_v54  ;;  %v16632_v54 = vand.u32 4294901760, %v10443_v51 }
 0x167   : > { %1810 = vmatmul.mubr.f32.gmra.mxu0 %v10315_v56  ;;  %2167 = vmatprep.mubr.f32.mxu1 %v16187_v6  ;;  %16623 = vst [vmem:[#allocation34_spill] sm:$0xff] %v10779_v45  ;;  %v10785_v13 = vsub.f32 %v539_v20, %v10779_v45 }
 0x168   : > { %1815 = vmatprep.mubr.f32.mxu0 %v16187_v6  ;;  %3244 = vmatprep.subr.mxu0 %v10779_v45 }
 0x169   : > { %v16159_v56 = vand.u32 4294901760, %v10785_v13 }
 0x16a   : > { %2171 = vmatmul.mubr.f32.gmra.mxu1 %v16625_v43 }
 0x16b   : > { %1818 = vmatmul.mubr.f32.gmra.mxu0 %v16619_v36  ;;  %2176 = vmatprep.mubr.f32.mxu1 %v16187_v6  ;;  %v3665_v33 = vsub.f32 %v10785_v13, %v16159_v56  ;;  %v16628_v36 = vld [vmem:[#allocation42_spill] sm:$0xff] }
 0x16c   : > { %1823 = vmatprep.mubr.f32.mxu0 %v16187_v6  ;;  %v16629_v37 = vand.u32 4294901760, %v16628_v36 }
 0x16d   : > { %v3666_v26 = vand.u32 4294901760, %v3665_v33 }
 0x16e   : > { %2180 = vmatmul.mubr.f32.gmra.mxu1 %v16627_v31 }
 0x16f   : > { %1826 = vmatmul.mubr.f32.gmra.mxu0 %v16621_v49  ;;  %2185 = vmatprep.mubr.f32.mxu1 %v16187_v6 }
 0x170   : > { %1831 = vmatprep.mubr.f32.mxu0 %v16187_v6  ;;  %3667 = vmatprep.subr.mxu1 %v3666_v26  ;;  %v16633_v26 = vand.u32 4294901760, %v10461_v48 }
 0x172   : > { %2189 = vmatmul.mubr.f32.gmra.mxu1 %v16629_v37 }
 0x173   : > { %1834 = vmatmul.mubr.f32.gmra.mxu0 %v16624_v47  ;;  %2194 = vmatprep.mubr.f32.mxu1 %v16187_v6 }
 0x174   : > { %1839 = vmatprep.mubr.f32.mxu0 %v16187_v6 }
 0x176   : > { %v1437_v38 = vpop.f32.mrf.mxu1  ;;  %2198 = vmatmul.mubr.f32.gmra.mxu1 %v16630_v61 }
 0x177   : > { %1842 = vmatmul.mubr.f32.gmra.mxu0 %v16626_v14  ;;  %2203 = vmatprep.mubr.f32.mxu1 %v16187_v6 }
 0x178   : > { %v1439_v55 = vpop.f32.mrf.mxu1  ;;  %1847 = vmatprep.mubr.f32.mxu0 %v16187_v6 }
 0x17a   : > { %v1444_v39 = vpop.f32.mrf.mxu1  ;;  %2207 = vmatmul.mubr.f32.gmra.mxu1 %v16631_v23 }
 0x17b   : > { %1850 = vmatmul.mubr.f32.gmra.mxu0 %v16628_v36  ;;  %2212 = vmatprep.mubr.f32.mxu1 %v16187_v6 }
 0x17c   : > { %v1446_v63 = vpop.f32.mrf.mxu1  ;;  %1855 = vmatprep.mubr.f32.mxu0 %v16187_v6 }
 0x17e   : > { %v1451_v49 = vpop.f32.mrf.mxu1  ;;  %2216 = vmatmul.mubr.f32.gmra.mxu1 %v16632_v54 }
 0x17f   : > { %v1014_v20 = vpop.f32.mrf.mxu0  ;;  %1858 = vmatmul.mubr.f32.gmra.mxu0 %v10411_v44  ;;  %2221 = vmatprep.mubr.f32.mxu1 %v16187_v6 }
 0x180   : > { %v10818_v47 = vadd.f32 %v1437_v38, %v1014_v20  ;;  %v1453_v43 = vpop.f32.mrf.mxu1  ;;  %1863 = vmatprep.mubr.f32.mxu0 %v16187_v6 }
 0x181   : > { %v1016_v14 = vpop.f32.mrf.mxu0 }
 0x182   : > { %v10821_v31 = vadd.f32 %v1439_v55, %v1016_v14  ;;  %v1458_v33 = vpop.f32.mrf.mxu1  ;;  %2225 = vmatmul.mubr.f32.gmra.mxu1 %v16633_v26  ;;  %v16634_v55 = vand.u32 4294901760, %v10479_v58 }
 0x183   : > { %v1025_v36 = vpop.f32.mrf.mxu0  ;;  %1866 = vmatmul.mubr.f32.gmra.mxu0 %v10427_v57  ;;  %2230 = vmatprep.mubr.f32.mxu1 %v16187_v6 }
 0x184   : > { %v10827_v44 = vadd.f32 %v1444_v39, %v1025_v36  ;;  %v1460_v37 = vpop.f32.mrf.mxu1  ;;  %1871 = vmatprep.mubr.f32.mxu0 %v16187_v6 }
 0x185   : > { %v1027_v38 = vpop.f32.mrf.mxu0 }
 0x186   : > { %v10830_v61 = vadd.f32 %v1446_v63, %v1027_v38  ;;  %v1465_v23 = vpop.f32.mrf.mxu1  ;;  %2234 = vmatmul.mubr.f32.gmra.mxu1 %v16634_v55  ;;  %v16635_v63 = vand.u32 4294901760, %v10497_v27 }
 0x187   : > { %v1036_v54 = vpop.f32.mrf.mxu0  ;;  %1874 = vmatmul.mubr.f32.gmra.mxu0 %v10443_v51  ;;  %2239 = vmatprep.mubr.f32.mxu1 %v16187_v6 }
 0x188   : > { %v10836_v57 = vadd.f32 %v1451_v49, %v1036_v54  ;;  %v1467_v20 = vpop.f32.mrf.mxu1  ;;  %1879 = vmatprep.mubr.f32.mxu0 %v16187_v6 }
 0x189   : > { %v1038_v39 = vpop.f32.mrf.mxu0 }
 0x18a   : > { %v10839_v14 = vadd.f32 %v1453_v43, %v1038_v39  ;;  %v1472_v26 = vpop.f32.mrf.mxu1  ;;  %2243 = vmatmul.mubr.f32.gmra.mxu1 %v16635_v63  ;;  %v16636_v43 = vand.u32 4294901760, %v10515_v34 }
 0x18b   : > { %v1047_v36 = vpop.f32.mrf.mxu0  ;;  %1882 = vmatmul.mubr.f32.gmra.mxu0 %v10461_v48  ;;  %2248 = vmatprep.mubr.f32.mxu1 %v16187_v6 }
 0x18c   : > { %v10845_v51 = vadd.f32 %v1458_v33, %v1047_v36  ;;  %v1474_v38 = vpop.f32.mrf.mxu1  ;;  %1887 = vmatprep.mubr.f32.mxu0 %v16187_v6 }
 0x18d   : > { %v1049_v49 = vpop.f32.mrf.mxu0 }
 0x18e   : > { %v10848_v55 = vadd.f32 %v1460_v37, %v1049_v49  ;;  %v1479_v54 = vpop.f32.mrf.mxu1  ;;  %2252 = vmatmul.mubr.f32.gmra.mxu1 %v16636_v43  ;;  %v16637_v37 = vand.u32 4294901760, %v10533_v2  ;;  %v465_v49 = vrot.slane %v16615_v52, %v10753_v15 }
 0x18f   : > { %v1058_v39 = vpop.f32.mrf.mxu0  ;;  %1890 = vmatmul.mubr.f32.gmra.mxu0 %v10479_v58  ;;  %2257 = vmatprep.mubr.f32.mxu1 %v16187_v6  ;;  %v503_v58 = vrot.slane %v16617_v32, %v10753_v15  ;;  %v16644_v32 = vand.u32 4294901760, %v10641_v29 }
 0x190   : > { %v10854_v48 = vadd.f32 %v1465_v23, %v1058_v39  ;;  %v1481_v63 = vpop.f32.mrf.mxu1  ;;  %1895 = vmatprep.mubr.f32.mxu0 %v16187_v6 }
 0x191   : > { %v1060_v33 = vpop.f32.mrf.mxu0 }
 0x192   : > { %v10857_v36 = vadd.f32 %v1467_v20, %v1060_v33  ;;  %v1486_v56 = vpop.f32.mrf.mxu1  ;;  %2261 = vmatmul.mubr.f32.gmra.mxu1 %v16637_v37  ;;  %v483_v33 = vrot.slane %v16616_v0, %v10753_v15  ;;  %v521_v37 = vrot.slane %v16618_v35, %v10753_v15 }
 0x193   : > { %v1069_v43 = vpop.f32.mrf.mxu0  ;;  %1898 = vmatmul.mubr.f32.gmra.mxu0 %v10497_v27  ;;  %2266 = vmatprep.mubr.f32.mxu1 %v16187_v6  ;;  %v473_v27 = vrot.slane %v465_v49, %v10753_v15 }
 0x194   : > { %v10867_v23 = vadd.f32 %v1472_v26, %v1069_v43  ;;  %v1488_v39 = vpop.f32.mrf.mxu1  ;;  %1903 = vmatprep.mubr.f32.mxu0 %v16187_v6  ;;  %v511_v26 = vrot.slane %v503_v58, %v10753_v15  ;;  %v531_v35 = vrot.slane %v521_v37, %v10753_v15  ;;  %v16639_v58 = vand.u32 4294901760, %v10569_v7 }
 0x195   : > { %v1071_v20 = vpop.f32.mrf.mxu0  ;;  %vm478_vm9 = vcmp.eq.s32.totalorder %v10011_v18, %v473_v27  ;;  %v16640_v27 = vand.u32 4294901760, %v10587_v10 }
 0x196   : > { %v10874_v59 = vadd.f32 %v1474_v38, %v1071_v20  ;;  %v1493_v24 = vpop.f32.mrf.mxu1  ;;  %2270 = vmatmul.mubr.f32.gmra.mxu1 %v16638_v12  ;;  %v493_v20 = vrot.slane %v483_v33, %v10753_v15  ;;  %vm516_vm10 = vcmp.eq.s32.totalorder %v10011_v18, %v511_v26 }
 0x197   : > { %v1080_v43 = vpop.f32.mrf.mxu0  ;;  %1906 = vmatmul.mubr.f32.gmra.mxu0 %v10515_v34  ;;  %2275 = vmatprep.mubr.f32.mxu1 %v16187_v6  ;;  %v536_v37 = vsel %vm516_vm10, %v531_v35, 0.0 }
 0x198   : > { %v10882_v3 = vadd.f32 %v1479_v54, %v1080_v43  ;;  %v1495_v19 = vpop.f32.mrf.mxu1  ;;  %1911 = vmatprep.mubr.f32.mxu0 %v16187_v6 }
 0x199   : > { %v1082_v38 = vpop.f32.mrf.mxu0 }
 0x19a   : > { %v10887_v12 = vadd.f32 %v1481_v63, %v1082_v38  ;;  %v1500_v49 = vpop.f32.mrf.mxu1  ;;  %2279 = vmatmul.mubr.f32.gmra.mxu1 %v16639_v58  ;;  %v498_v63 = vsel %vm478_vm9, %v493_v20, 0.0 }
 0x19b   : > { %v1091_v34 = vpop.f32.mrf.mxu0  ;;  %1914 = vmatmul.mubr.f32.gmra.mxu0 %v10533_v2  ;;  %2284 = vmatprep.mubr.f32.mxu1 %v16187_v6  ;;  %v538_v58 = vadd.f32 %v536_v37, %v498_v63 }
 0x19c   : > { %v10895_v54 = vadd.f32 %v1486_v56, %v1091_v34  ;;  %v1502_v33 = vpop.f32.mrf.mxu1  ;;  %1919 = vmatprep.mubr.f32.mxu0 %v16187_v6 }
 0x19d   : > { %v1093_v15 = vpop.f32.mrf.mxu0 }
 0x19e   : > { %v10898_v43 = vadd.f32 %v1488_v39, %v1093_v15  ;;  %v1507_v38 = vpop.f32.mrf.mxu1  ;;  %2288 = vmatmul.mubr.f32.gmra.mxu1 %v16640_v27  ;;  %v16641_v39 = vand.u32 4294901760, %v10605_v16  ;;  %v10916_v27 = vand.u32 4294901760, %v538_v58 }
 0x19f   : > { %v1102_v26 = vpop.f32.mrf.mxu0  ;;  %1922 = vmatmul.mubr.f32.gmra.mxu0 %v10551_v4  ;;  %2293 = vmatprep.mubr.f32.mxu1 %v16187_v6 }
 0x1a0   : > { %v10904_v2 = vadd.f32 %v1493_v24, %v1102_v26  ;;  %v1509_v56 = vpop.f32.mrf.mxu1  ;;  %1927 = vmatprep.mubr.f32.mxu0 %v16187_v6  ;;  %v16642_v26 = vand.u32 4294901760, %v10623_v21 }
 0x1a1   : > { %v1104_v34 = vpop.f32.mrf.mxu0 }
 0x1a2   : > { %v10907_v20 = vadd.f32 %v1495_v19, %v1104_v34  ;;  %v1514_v35 = vpop.f32.mrf.mxu1  ;;  %2297 = vmatmul.mubr.f32.gmra.mxu1 %v16641_v39  ;;  %v10928_v39 = vsub.f32 %v538_v58, %v10916_v27 }
 0x1a3   : > { %v1113_v15 = vpop.f32.mrf.mxu0  ;;  %1930 = vmatmul.mubr.f32.gmra.mxu0 %v10569_v7  ;;  %2302 = vmatprep.mubr.f32.mxu1 %v16187_v6 }
 0x1a4   : > { %v10913_v4 = vadd.f32 %v1500_v49, %v1113_v15  ;;  %v1516_v24 = vpop.f32.mrf.mxu1  ;;  %1935 = vmatprep.mubr.f32.mxu0 %v16187_v6  ;;  %16643 = vst [vmem:[#allocation36_spill] sm:$0xff] %v10928_v39  ;;  %v16173_v58 = vand.u32 4294901760, %v10928_v39 }
 0x1a5   : > { %v1115_v63 = vpop.f32.mrf.mxu0 }
 0x1a6   : > { %v10918_v37 = vadd.f32 %v1502_v33, %v1115_v63  ;;  %v1521_v19 = vpop.f32.mrf.mxu1  ;;  %2306 = vmatmul.mubr.f32.gmra.mxu1 %v16642_v26 }
 0x1a7   : > { %v1124_v34 = vpop.f32.mrf.mxu0  ;;  %1938 = vmatmul.mubr.f32.gmra.mxu0 %v10587_v10  ;;  %2311 = vmatprep.mubr.f32.mxu1 %v16187_v6 }
 0x1a8   : > { %v10924_v7 = vadd.f32 %v1507_v38, %v1124_v34  ;;  %v1523_v49 = vpop.f32.mrf.mxu1  ;;  %1943 = vmatprep.mubr.f32.mxu0 %v16187_v6 }
 0x1a9   : > { %v1126_v15 = vpop.f32.mrf.mxu0 }
 0x1aa   : > { %v10930_v33 = vadd.f32 %v1509_v56, %v1126_v15  ;;  %v1528_v63 = vpop.f32.mrf.mxu1  ;;  %2315 = vmatmul.mubr.f32.gmra.mxu1 %v16644_v32  ;;  %v16645_v15 = vand.u32 4294901760, %v10658_v9 }
 0x1ab   : > { %v1135_v26 = vpop.f32.mrf.mxu0  ;;  %1946 = vmatmul.mubr.f32.gmra.mxu0 %v10605_v16  ;;  %2320 = vmatprep.mubr.f32.mxu1 %v16187_v6 }
 0x1ac   : > { %v10936_v10 = vadd.f32 %v1514_v35, %v1135_v26  ;;  %v1530_v38 = vpop.f32.mrf.mxu1  ;;  %1951 = vmatprep.mubr.f32.mxu0 %v16187_v6  ;;  %v3671_v26 = vsub.f32 %v10928_v39, %v16173_v58 }
 0x1ad   : > { %v1137_v34 = vpop.f32.mrf.mxu0 }
 0x1ae   : > { %v10940_v0 = vadd.f32 %v1516_v24, %v1137_v34  ;;  %v1535_v56 = vpop.f32.mrf.mxu1  ;;  %2324 = vmatmul.mubr.f32.gmra.mxu1 %v16645_v15  ;;  %v16646_v15 = vand.u32 4294901760, %v10672_v25 }
 0x1af   : > { %v1146_v32 = vpop.f32.mrf.mxu0  ;;  %1954 = vmatmul.mubr.f32.gmra.mxu0 %v10623_v21  ;;  %2329 = vmatprep.mubr.f32.mxu1 %v16187_v6 }
 0x1b0   : > { %v10946_v16 = vadd.f32 %v1521_v19, %v1146_v32  ;;  %v1537_v35 = vpop.f32.mrf.mxu1  ;;  %1959 = vmatprep.mubr.f32.mxu0 %v16187_v6  ;;  %v3672_v32 = vand.u32 4294901760, %v3671_v26  ;;  %v16648_v26 = vld [vmem:[#allocation24_spill] sm:$0xff] }
 0x1b1   : > { %v1148_v24 = vpop.f32.mrf.mxu0 }
 0x1b2   : > { %v10952_v34 = vadd.f32 %v1523_v49, %v1148_v24  ;;  %v1542_v52 = vpop.f32.mrf.mxu1  ;;  %2333 = vmatmul.mubr.f32.gmra.mxu1 %v16646_v15  ;;  %v16647_v24 = vld [vmem:[#allocation22_spill] sm:$0xff] }
 0x1b3   : > { %v1157_v18 = vpop.f32.mrf.mxu0  ;;  %1962 = vmatmul.mubr.f32.gmra.mxu0 %v10641_v29  ;;  %2700 = vmatprep.mubr.f32.mxu1 %v16187_v6 }
 0x1b4   : > { %v10958_v21 = vadd.f32 %v1528_v63, %v1157_v18  ;;  %v1544_v19 = vpop.f32.mrf.mxu1  ;;  %1967 = vmatprep.mubr.f32.mxu0 %v16187_v6 }
 0x1b5   : > { %v1159_v41 = vpop.f32.mrf.mxu0 }
 0x1b6   : > { %v10961_v58 = vadd.f32 %v1530_v38, %v1159_v41  ;;  %v1549_v49 = vpop.f32.mrf.mxu1  ;;  %9259 = vmatmul.mubr.msk.f32.vlgmr.msra.gmra.mxu1 %vm844_vm4, %v16647_v24 }
 0x1b7   : > { %v1168_v39 = vpop.f32.mrf.mxu0  ;;  %1970 = vmatmul.mubr.f32.gmra.mxu0 %v10658_v9  ;;  %2707 = vmatprep.mubr.f32.mxu1 %v16187_v6 }
 0x1b8   : > { %v10967_v29 = vadd.f32 %v1535_v56, %v1168_v39  ;;  %v1551_v18 = vpop.f32.mrf.mxu1  ;;  %1975 = vmatprep.mubr.f32.mxu0 %v16187_v6  ;;  %3673 = vmatpush1.msra.mxu1 %v3672_v32 }
 0x1b9   : > { %v1170_v63 = vpop.f32.mrf.mxu0  ;;  %4287 = vmatprep.subr.mxu1 %v10779_v45 }
 0x1ba   : > { %v10971_v41 = vadd.f32 %v1537_v35, %v1170_v63  ;;  %v1556_v38 = vpop.f32.mrf.mxu1  ;;  %9260 = vmatmul.mubr.msk.f32.gmra.mxu1 %vm844_vm4, %v16648_v26  ;;  %v16651_v35 = vld [vmem:[#allocation21_spill] sm:$0xff] }
 0x1bb   : > { %v1179_v15 = vpop.f32.mrf.mxu0  ;;  %1978 = vmatmul.mubr.f32.gmra.mxu0 %v10672_v25  ;;  %2714 = vmatprep.mubr.f32.mxu1 %v16187_v6 }
 0x1bc   : > { %v10977_v9 = vadd.f32 %v1542_v52, %v1179_v15  ;;  %v1558_v39 = vpop.f32.mrf.mxu1  ;;  %2409 = vmatprep.mubr.f32.mxu0 %v16187_v6 }
 0x1bd   : > { %v1181_v56 = vpop.f32.mrf.mxu0 }
 0x1be   : > { %16649 = vst [vmem:[#allocation38_spill] sm:$0xff] %v10977_v9  ;;  %v10980_v32 = vadd.f32 %v1544_v19, %v1181_v56  ;;  %v1563_v45 = vpop.f32.mrf.mxu1  ;;  %9261 = vmatmul.mubr.msk.f32.gmra.mxu1 %vm844_vm4, %v16651_v35 }
 0x1bf   : > { %v1190_v63 = vpop.f32.mrf.mxu0  ;;  %9227 = vmatmul.mubr.msk.f32.vlgmr.msra.gmra.mxu0 %vm844_vm4, %v16647_v24  ;;  %2721 = vmatprep.mubr.f32.mxu1 %v16187_v6 }
 0x1c0   : > { %16650 = vst [vmem:[#allocation40_spill] sm:$0xff] %v10980_v32  ;;  %v10987_v25 = vadd.f32 %v1549_v49, %v1190_v63  ;;  %v1565_v52 = vpop.f32.mrf.mxu1  ;;  %2416 = vmatprep.mubr.f32.mxu0 %v16187_v6  ;;  %3246 = vmatpush1.msra.mxu0 %v10916_v27  ;;  %v16654_v32 = vld [vmem:[#allocation23_spill] sm:$0xff] }
 0x1c1   : > { %v1192_v15 = vpop.f32.mrf.mxu0  ;;  %3963 = vmatprep.subr.mxu0 %v10785_v13 }
 0x1c2   : > { %16652 = vst [vmem:[#allocation42_spill] sm:$0xff] %v10987_v25  ;;  %v10992_v19 = vadd.f32 %v1551_v18, %v1192_v15  ;;  %v1570_v56 = vpop.f32.mrf.mxu1  ;;  %9262 = vmatmul.mubr.msk.f32.gmra.mxu1 %vm844_vm4, %v16654_v32  ;;  %v16657_v15 = vld [vmem:[#allocation25_spill] sm:$0xff] }
 0x1c3   : > { %v1201_v9 = vpop.f32.mrf.mxu0  ;;  %9228 = vmatmul.mubr.msk.f32.gmra.mxu0 %vm844_vm4, %v16648_v26  ;;  %2728 = vmatprep.mubr.f32.mxu1 %v16187_v6 }
 0x1c4   : > { %16653 = vst [vmem:[#allocation22_spill] sm:$0xff] %v10992_v19  ;;  %v10999_v49 = vadd.f32 %v1556_v38, %v1201_v9  ;;  %v1572_v24 = vpop.f32.mrf.mxu1  ;;  %2423 = vmatprep.mubr.f32.mxu0 %v16187_v6 }
 0x1c5   : > { %v1203_v63 = vpop.f32.mrf.mxu0 }
 0x1c6   : > { %16655 = vst [vmem:[#allocation24_spill] sm:$0xff] %v10999_v49  ;;  %v11002_v25 = vadd.f32 %v1558_v39, %v1203_v63  ;;  %v1577_v18 = vpop.f32.mrf.mxu1  ;;  %9263 = vmatmul.mubr.msk.f32.gmra.mxu1 %vm844_vm4, %v16657_v15  ;;  %v16660_v63 = vld [vmem:[#allocation26_spill] sm:$0xff] }
 0x1c7   : > { %v1212_v19 = vpop.f32.mrf.mxu0  ;;  %9229 = vmatmul.mubr.msk.f32.gmra.mxu0 %vm844_vm4, %v16651_v35  ;;  %2735 = vmatprep.mubr.f32.mxu1 %v16187_v6 }
 0x1c8   : > { %16656 = vst [vmem:[#allocation21_spill] sm:$0xff] %v11002_v25  ;;  %v11009_v26 = vadd.f32 %v1563_v45, %v1212_v19  ;;  %v1579_v38 = vpop.f32.mrf.mxu1  ;;  %2430 = vmatprep.mubr.f32.mxu0 %v16187_v6 }
 0x1c9   : > { %v1214_v9 = vpop.f32.mrf.mxu0 }
 0x1ca   : > { %16658 = vst [vmem:[#allocation23_spill] sm:$0xff] %v11009_v26  ;;  %v11012_v49 = vadd.f32 %v1565_v52, %v1214_v9  ;;  %v1584_v39 = vpop.f32.mrf.mxu1  ;;  %9264 = vmatmul.mubr.msk.f32.gmra.mxu1 %vm844_vm4, %v16660_v63  ;;  %v16663_v9 = vld [vmem:[#allocation27_spill] sm:$0xff] }
 0x1cb   : > { %v1223_v25 = vpop.f32.mrf.mxu0  ;;  %9230 = vmatmul.mubr.msk.f32.gmra.mxu0 %vm844_vm4, %v16654_v32  ;;  %2742 = vmatprep.mubr.f32.mxu1 %v16187_v6 }
 0x1cc   : > { %16659 = vst [vmem:[#allocation25_spill] sm:$0xff] %v11012_v49  ;;  %v11019_v35 = vadd.f32 %v1570_v56, %v1223_v25  ;;  %v1586_v45 = vpop.f32.mrf.mxu1  ;;  %2437 = vmatprep.mubr.f32.mxu0 %v16187_v6 }
 0x1cd   : > { %v1225_v19 = vpop.f32.mrf.mxu0 }
 0x1ce   : > { %16661 = vst [vmem:[#allocation26_spill] sm:$0xff] %v11019_v35  ;;  %v11022_v26 = vadd.f32 %v1572_v24, %v1225_v19  ;;  %v1591_v52 = vpop.f32.mrf.mxu1  ;;  %9265 = vmatmul.mubr.msk.f32.gmra.mxu1 %vm844_vm4, %v16663_v9  ;;  %v16666_v19 = vld [vmem:[#allocation28_spill] sm:$0xff] }
 0x1cf   : > { %v1234_v49 = vpop.f32.mrf.mxu0  ;;  %9231 = vmatmul.mubr.msk.f32.gmra.mxu0 %vm844_vm4, %v16657_v15  ;;  %2749 = vmatprep.mubr.f32.mxu1 %v16187_v6 }
 0x1d0   : > { %16662 = vst [vmem:[#allocation44_spill] sm:$0xff] %v11022_v26  ;;  %v11029_v32 = vadd.f32 %v1577_v18, %v1234_v49  ;;  %v1593_v25 = vpop.f32.mrf.mxu1  ;;  %2444 = vmatprep.mubr.f32.mxu0 %v16187_v6 }
 0x1d1   : > { %v1236_v56 = vpop.f32.mrf.mxu0 }
 0x1d2   : > { %16664 = vst [vmem:[#allocation27_spill] sm:$0xff] %v11029_v32  ;;  %v11032_v35 = vadd.f32 %v1579_v38, %v1236_v56  ;;  %v1598_v24 = vpop.f32.mrf.mxu1  ;;  %9266 = vmatmul.mubr.msk.f32.gmra.mxu1 %vm844_vm4, %v16666_v19  ;;  %v16669_v56 = vld [vmem:[#allocation29_spill] sm:$0xff] }
 0x1d3   : > { %v1245_v26 = vpop.f32.mrf.mxu0  ;;  %9232 = vmatmul.mubr.msk.f32.gmra.mxu0 %vm844_vm4, %v16660_v63  ;;  %2756 = vmatprep.mubr.f32.mxu1 %v16187_v6 }
 0x1d4   : > { %16665 = vst [vmem:[#allocation45_spill] sm:$0xff] %v11032_v35  ;;  %v11039_v15 = vadd.f32 %v1584_v39, %v1245_v26  ;;  %v1600_v49 = vpop.f32.mrf.mxu1  ;;  %2451 = vmatprep.mubr.f32.mxu0 %v16187_v6 }
 0x1d5   : > { %v1247_v18 = vpop.f32.mrf.mxu0 }
 0x1d6   : > { %16667 = vst [vmem:[#allocation28_spill] sm:$0xff] %v11039_v15  ;;  %v11042_v32 = vadd.f32 %v1586_v45, %v1247_v18  ;;  %v1605_v38 = vpop.f32.mrf.mxu1  ;;  %9267 = vmatmul.mubr.msk.f32.gmra.mxu1 %vm844_vm4, %v16669_v56  ;;  %v16672_v18 = vld [vmem:[#allocation30_spill] sm:$0xff] }
 0x1d7   : > { %v1256_v35 = vpop.f32.mrf.mxu0  ;;  %9233 = vmatmul.mubr.msk.f32.gmra.mxu0 %vm844_vm4, %v16663_v9  ;;  %2763 = vmatprep.mubr.f32.mxu1 %v16187_v6 }
 0x1d8   : > { %16668 = vst [vmem:[#allocation46_spill] sm:$0xff] %v11042_v32  ;;  %v11049_v63 = vadd.f32 %v1591_v52, %v1256_v35  ;;  %v1607_v26 = vpop.f32.mrf.mxu1  ;;  %2458 = vmatprep.mubr.f32.mxu0 %v16187_v6 }
 0x1d9   : > { %v1258_v39 = vpop.f32.mrf.mxu0 }
 0x1da   : > { %16670 = vst [vmem:[#allocation29_spill] sm:$0xff] %v11049_v63  ;;  %v11052_v15 = vadd.f32 %v1593_v25, %v1258_v39  ;;  %v1612_v45 = vpop.f32.mrf.mxu1  ;;  %9268 = vmatmul.mubr.msk.f32.gmra.mxu1 %vm844_vm4, %v16672_v18  ;;  %v16675_v39 = vld [vmem:[#allocation31_spill] sm:$0xff] }
 0x1db   : > { %v1267_v32 = vpop.f32.mrf.mxu0  ;;  %9234 = vmatmul.mubr.msk.f32.gmra.mxu0 %vm844_vm4, %v16666_v19  ;;  %2770 = vmatprep.mubr.f32.mxu1 %v16187_v6 }
 0x1dc   : > { %16671 = vst [vmem:[#allocation47_spill] sm:$0xff] %v11052_v15  ;;  %v11059_v9 = vadd.f32 %v1598_v24, %v1267_v32  ;;  %v1614_v35 = vpop.f32.mrf.mxu1  ;;  %2465 = vmatprep.mubr.f32.mxu0 %v16187_v6 }
 0x1dd   : > { %v1269_v52 = vpop.f32.mrf.mxu0 }
 0x1de   : > { %16673 = vst [vmem:[#allocation30_spill] sm:$0xff] %v11059_v9  ;;  %v11062_v63 = vadd.f32 %v1600_v49, %v1269_v52  ;;  %v1619_v25 = vpop.f32.mrf.mxu1  ;;  %9269 = vmatmul.mubr.msk.f32.gmra.mxu1 %vm844_vm4, %v16675_v39  ;;  %v16678_v52 = vld [vmem:[#allocation32_spill] sm:$0xff] }
 0x1df   : > { %v1278_v15 = vpop.f32.mrf.mxu0  ;;  %9235 = vmatmul.mubr.msk.f32.gmra.mxu0 %vm844_vm4, %v16669_v56  ;;  %2777 = vmatprep.mubr.f32.mxu1 %v16187_v6 }
 0x1e0   : > { %16674 = vst [vmem:[#allocation48_spill] sm:$0xff] %v11062_v63  ;;  %v11069_v19 = vadd.f32 %v1605_v38, %v1278_v15  ;;  %v1621_v32 = vpop.f32.mrf.mxu1  ;;  %2472 = vmatprep.mubr.f32.mxu0 %v16187_v6 }
 0x1e1   : > { %v1280_v24 = vpop.f32.mrf.mxu0 }
 0x1e2   : > { %16676 = vst [vmem:[#allocation31_spill] sm:$0xff] %v11069_v19  ;;  %v11072_v9 = vadd.f32 %v1607_v26, %v1280_v24  ;;  %v1626_v49 = vpop.f32.mrf.mxu1  ;;  %9270 = vmatmul.mubr.msk.f32.gmra.mxu1 %vm844_vm4, %v16678_v52  ;;  %v16681_v24 = vld [vmem:[#allocation33_spill] sm:$0xff] }
 0x1e3   : > { %v1289_v63 = vpop.f32.mrf.mxu0  ;;  %9236 = vmatmul.mubr.msk.f32.gmra.mxu0 %vm844_vm4, %v16672_v18  ;;  %2784 = vmatprep.mubr.f32.mxu1 %v16187_v6 }
 0x1e4   : > { %16677 = vst [vmem:[#allocation49_spill] sm:$0xff] %v11072_v9  ;;  %v11079_v56 = vadd.f32 %v1612_v45, %v1289_v63  ;;  %v1628_v15 = vpop.f32.mrf.mxu1  ;;  %2479 = vmatprep.mubr.f32.mxu0 %v16187_v6 }
 0x1e5   : > { %v1291_v38 = vpop.f32.mrf.mxu0 }
 0x1e6   : > { %16679 = vst [vmem:[#allocation32_spill] sm:$0xff] %v11079_v56  ;;  %v11082_v19 = vadd.f32 %v1614_v35, %v1291_v38  ;;  %v1633_v26 = vpop.f32.mrf.mxu1  ;;  %9271 = vmatmul.mubr.msk.f32.gmra.mxu1 %vm844_vm4, %v16681_v24  ;;  %v16684_v38 = vld [vmem:[#allocation35_spill] sm:$0xff] }
 0x1e7   : > { %v1300_v9 = vpop.f32.mrf.mxu0  ;;  %9237 = vmatmul.mubr.msk.f32.gmra.mxu0 %vm844_vm4, %v16675_v39  ;;  %2791 = vmatprep.mubr.f32.mxu1 %v16187_v6 }
 0x1e8   : > { %16680 = vst [vmem:[#allocation50_spill] sm:$0xff] %v11082_v19  ;;  %v11089_v18 = vadd.f32 %v1619_v25, %v1300_v9  ;;  %v1635_v63 = vpop.f32.mrf.mxu1  ;;  %2486 = vmatprep.mubr.f32.mxu0 %v16187_v6 }
 0x1e9   : > { %v1302_v45 = vpop.f32.mrf.mxu0 }
 0x1ea   : > { %16682 = vst [vmem:[#allocation33_spill] sm:$0xff] %v11089_v18  ;;  %v11092_v56 = vadd.f32 %v1621_v32, %v1302_v45  ;;  %v1640_v35 = vpop.f32.mrf.mxu1  ;;  %9272 = vmatmul.mubr.msk.f32.gmra.mxu1 %vm844_vm4, %v16684_v38  ;;  %v16687_v45 = vld [vmem:[#allocation37_spill] sm:$0xff] }
 0x1eb   : > { %v1311_v19 = vpop.f32.mrf.mxu0  ;;  %9238 = vmatmul.mubr.msk.f32.gmra.mxu0 %vm844_vm4, %v16678_v52  ;;  %2798 = vmatprep.mubr.f32.mxu1 %v16187_v6 }
 0x1ec   : > { %16683 = vst [vmem:[#allocation51_spill] sm:$0xff] %v11092_v56  ;;  %v11099_v39 = vadd.f32 %v1626_v49, %v1311_v19  ;;  %v1642_v9 = vpop.f32.mrf.mxu1  ;;  %2493 = vmatprep.mubr.f32.mxu0 %v16187_v6 }
 0x1ed   : > { %v1313_v25 = vpop.f32.mrf.mxu0 }
 0x1ee   : > { %16685 = vst [vmem:[#allocation35_spill] sm:$0xff] %v11099_v39  ;;  %v11102_v18 = vadd.f32 %v1628_v15, %v1313_v25  ;;  %v1647_v32 = vpop.f32.mrf.mxu1  ;;  %9273 = vmatmul.mubr.msk.f32.gmra.mxu1 %vm844_vm4, %v16687_v45  ;;  %v16690_v25 = vld [vmem:[#allocation39_spill] sm:$0xff] }
 0x1ef   : > { %v1322_v56 = vpop.f32.mrf.mxu0  ;;  %9239 = vmatmul.mubr.msk.f32.gmra.mxu0 %vm844_vm4, %v16681_v24  ;;  %2805 = vmatprep.mubr.f32.mxu1 %v16187_v6 }
 0x1f0   : > { %16686 = vst [vmem:[#allocation52_spill] sm:$0xff] %v11102_v18  ;;  %v11109_v52 = vadd.f32 %v1633_v26, %v1322_v56  ;;  %v1649_v19 = vpop.f32.mrf.mxu1  ;;  %2500 = vmatprep.mubr.f32.mxu0 %v16187_v6 }
 0x1f1   : > { %v1324_v49 = vpop.f32.mrf.mxu0 }
 0x1f2   : > { %16688 = vst [vmem:[#allocation37_spill] sm:$0xff] %v11109_v52  ;;  %v11112_v39 = vadd.f32 %v1635_v63, %v1324_v49  ;;  %v1654_v15 = vpop.f32.mrf.mxu1  ;;  %9274 = vmatmul.mubr.msk.f32.gmra.mxu1 %vm844_vm4, %v16690_v25  ;;  %v16692_v49 = vld [vmem:[#allocation41_spill] sm:$0xff] }
 0x1f3   : > { %v1333_v18 = vpop.f32.mrf.mxu0  ;;  %9240 = vmatmul.mubr.msk.f32.gmra.mxu0 %vm844_vm4, %v16684_v38  ;;  %2812 = vmatprep.mubr.f32.mxu1 %v16187_v6 }
 0x1f4   : > { %16689 = vst [vmem:[#allocation53_spill] sm:$0xff] %v11112_v39  ;;  %v11119_v24 = vadd.f32 %v1640_v35, %v1333_v18  ;;  %v1656_v56 = vpop.f32.mrf.mxu1  ;;  %2507 = vmatprep.mubr.f32.mxu0 %v16187_v6 }
 0x1f5   : > { %v1335_v26 = vpop.f32.mrf.mxu0 }
 0x1f6   : > { %16691 = vst [vmem:[#allocation39_spill] sm:$0xff] %v11119_v24  ;;  %v11122_v52 = vadd.f32 %v1642_v9, %v1335_v26  ;;  %v2055_v63 = vpop.f32.mrf.mxu1  ;;  %9275 = vmatmul.mubr.msk.f32.gmra.mxu1 %vm844_vm4, %v16692_v49 }
 0x1f7   : > { %v1344_v39 = vpop.f32.mrf.mxu0  ;;  %9241 = vmatmul.mubr.msk.f32.gmra.mxu0 %vm844_vm4, %v16687_v45  ;;  %2819 = vmatprep.mubr.f32.mxu1 %v16187_v6 }
 0x1f8   : > { %v11129_v38 = vadd.f32 %v1647_v32, %v1344_v39  ;;  %v2057_v18 = vpop.f32.mrf.mxu1  ;;  %2514 = vmatprep.mubr.f32.mxu0 %v16187_v6 }
 0x1f9   : > { %v1346_v35 = vpop.f32.mrf.mxu0 }
 0x1fa   : > { %16693 = vst [vmem:[#allocation41_spill] sm:$0xff] %v11129_v38  ;;  %v11132_v24 = vadd.f32 %v1649_v19, %v1346_v35  ;;  %v2064_v9 = vpop.f32.mrf.mxu1  ;;  %9276 = vmatmul.mubr.msk.f32.gmra.mxu1 %vm844_vm4, %v10406_v62 }
 0x1fb   : > { %v1355_v26 = vpop.f32.mrf.mxu0  ;;  %9242 = vmatmul.mubr.msk.f32.gmra.mxu0 %vm844_vm4, %v16690_v25  ;;  %2826 = vmatprep.mubr.f32.mxu1 %v16187_v6 }
 0x1fc   : > { %16694 = vst [vmem:[#allocation54_spill] sm:$0xff] %v11132_v24  ;;  %v11139_v45 = vadd.f32 %v1654_v15, %v1355_v26  ;;  %v2066_v39 = vpop.f32.mrf.mxu1  ;;  %2521 = vmatprep.mubr.f32.mxu0 %v16187_v6 }
 0x1fd   : > { %v1357_v32 = vpop.f32.mrf.mxu0 }
 0x1fe   : > { %16695 = vst [vmem:[#allocation55_spill] sm:$0xff] %v11139_v45  ;;  %v11142_v38 = vadd.f32 %v1656_v56, %v1357_v32  ;;  %v2073_v19 = vpop.f32.mrf.mxu1  ;;  %9277 = vmatmul.mubr.msk.f32.gmra.mxu1 %vm844_vm4, %v10422_v50 }
 0x1ff   : > { %v1731_v35 = vpop.f32.mrf.mxu0  ;;  %9243 = vmatmul.mubr.msk.f32.gmra.mxu0 %vm844_vm4, %v16692_v49  ;;  %2833 = vmatprep.mubr.f32.mxu1 %v16187_v6 }
 0x200   : > { %16696 = vst [vmem:[#allocation56_spill] sm:$0xff] %v11142_v38  ;;  %v1732_v25 = vadd.f32 %v1731_v35, %v10818_v47  ;;  %v2075_v15 = vpop.f32.mrf.mxu1  ;;  %2528 = vmatprep.mubr.f32.mxu0 %v16187_v6 }
 0x201   : > { %v1733_v26 = vpop.f32.mrf.mxu0 }
 0x202   : > { %v1734_v45 = vadd.f32 %v1733_v26, %v10821_v31  ;;  %v2082_v56 = vpop.f32.mrf.mxu1  ;;  %9278 = vmatmul.mubr.msk.f32.gmra.mxu1 %vm844_vm4, %v10438_v46  ;;  %v11154_v32 = vadd.f32 %v2055_v63, %v1732_v25 }
 0x203   : > { %v1739_v38 = vpop.f32.mrf.mxu0  ;;  %9244 = vmatmul.mubr.msk.f32.gmra.mxu0 %vm844_vm4, %v10406_v62  ;;  %2840 = vmatprep.mubr.f32.mxu1 %v16187_v6 }
 0x204   : > { %v1740_v47 = vadd.f32 %v1739_v38, %v10827_v44  ;;  %v2084_v49 = vpop.f32.mrf.mxu1  ;;  %2535 = vmatprep.mubr.f32.mxu0 %v16187_v6  ;;  %v11161_v35 = vadd.f32 %v2057_v18, %v1734_v45 }
 0x205   : > { %v1741_v31 = vpop.f32.mrf.mxu0 }
 0x206   : > { %v1742_v26 = vadd.f32 %v1741_v31, %v10830_v61  ;;  %v2091_v24 = vpop.f32.mrf.mxu1  ;;  %9279 = vmatmul.mubr.msk.f32.gmra.mxu1 %vm844_vm4, %v10455_v28  ;;  %v11166_v63 = vadd.f32 %v2064_v9, %v1740_v47 }
 0x207   : > { %v1747_v25 = vpop.f32.mrf.mxu0  ;;  %9245 = vmatmul.mubr.msk.f32.gmra.mxu0 %vm844_vm4, %v10422_v50  ;;  %2847 = vmatprep.mubr.f32.mxu1 %v16187_v6 }
 0x208   : > { %v1748_v62 = vadd.f32 %v1747_v25, %v10836_v57  ;;  %v2093_v44 = vpop.f32.mrf.mxu1  ;;  %2542 = vmatprep.mubr.f32.mxu0 %v16187_v6  ;;  %v11173_v38 = vadd.f32 %v2066_v39, %v1742_v26 }
 0x209   : > { %v1749_v61 = vpop.f32.mrf.mxu0 }
 0x20a   : > { %v1750_v18 = vadd.f32 %v1749_v61, %v10839_v14  ;;  %v2100_v45 = vpop.f32.mrf.mxu1  ;;  %9280 = vmatmul.mubr.msk.f32.gmra.mxu1 %vm844_vm4, %v10473_v5  ;;  %v11178_v9 = vadd.f32 %v2073_v19, %v1748_v62 }
 0x20b   : > { %v1755_v47 = vpop.f32.mrf.mxu0  ;;  %9246 = vmatmul.mubr.msk.f32.gmra.mxu0 %vm844_vm4, %v10438_v46  ;;  %2854 = vmatprep.mubr.f32.mxu1 %v16187_v6 }
 0x20c   : > { %v1756_v50 = vadd.f32 %v1755_v47, %v10845_v51  ;;  %v2102_v57 = vpop.f32.mrf.mxu1  ;;  %2549 = vmatprep.mubr.f32.mxu0 %v16187_v6  ;;  %v11185_v39 = vadd.f32 %v2075_v15, %v1750_v18 }
 0x20d   : > { %v1757_v14 = vpop.f32.mrf.mxu0 }
 0x20e   : > { %v1758_v31 = vadd.f32 %v1757_v14, %v10848_v55  ;;  %v2109_v26 = vpop.f32.mrf.mxu1  ;;  %9281 = vmatmul.mubr.msk.f32.gmra.mxu1 %vm844_vm4, %v10491_v1  ;;  %v11190_v19 = vadd.f32 %v2082_v56, %v1756_v50 }
 0x20f   : > { %v1763_v25 = vpop.f32.mrf.mxu0  ;;  %9247 = vmatmul.mubr.msk.f32.gmra.mxu0 %vm844_vm4, %v10455_v28  ;;  %2861 = vmatprep.mubr.f32.mxu1 %v16187_v6 }
 0x210   : > { %v1764_v46 = vadd.f32 %v1763_v25, %v10854_v48  ;;  %v2111_v51 = vpop.f32.mrf.mxu1  ;;  %2556 = vmatprep.mubr.f32.mxu0 %v16187_v6  ;;  %v11197_v15 = vadd.f32 %v2084_v49, %v1758_v31 }
 0x211   : > { %v1765_v55 = vpop.f32.mrf.mxu0 }
 0x212   : > { %v1766_v62 = vadd.f32 %v1765_v55, %v10857_v36  ;;  %v2118_v61 = vpop.f32.mrf.mxu1  ;;  %9282 = vmatmul.mubr.msk.f32.gmra.mxu1 %vm844_vm4, %v10509_v8  ;;  %v11202_v56 = vadd.f32 %v2091_v24, %v1764_v46 }
 0x213   : > { %v1771_v18 = vpop.f32.mrf.mxu0  ;;  %9248 = vmatmul.mubr.msk.f32.gmra.mxu0 %vm844_vm4, %v10473_v5  ;;  %2868 = vmatprep.mubr.f32.mxu1 %v16187_v6 }
 0x214   : > { %v1772_v28 = vadd.f32 %v1771_v18, %v10867_v23  ;;  %v2120_v48 = vpop.f32.mrf.mxu1  ;;  %2563 = vmatprep.mubr.f32.mxu0 %v16187_v6  ;;  %v11209_v49 = vadd.f32 %v2093_v44, %v1766_v62 }
 0x215   : > { %v1773_v36 = vpop.f32.mrf.mxu0 }
 0x216   : > { %v1774_v47 = vadd.f32 %v1773_v36, %v10874_v59  ;;  %v2127_v50 = vpop.f32.mrf.mxu1  ;;  %9283 = vmatmul.mubr.msk.f32.gmra.mxu1 %vm844_vm4, %v10527_v11  ;;  %v11214_v24 = vadd.f32 %v2100_v45, %v1772_v28 }
 0x217   : > { %v1779_v14 = vpop.f32.mrf.mxu0  ;;  %9249 = vmatmul.mubr.msk.f32.gmra.mxu0 %vm844_vm4, %v10491_v1  ;;  %2875 = vmatprep.mubr.f32.mxu1 %v16187_v6 }
 0x218   : > { %v1780_v5 = vadd.f32 %v1779_v14, %v10882_v3  ;;  %v2129_v23 = vpop.f32.mrf.mxu1  ;;  %2570 = vmatprep.mubr.f32.mxu0 %v16187_v6  ;;  %v11221_v44 = vadd.f32 %v2102_v57, %v1774_v47 }
 0x219   : > { %v1781_v59 = vpop.f32.mrf.mxu0 }
 0x21a   : > { %v1782_v31 = vadd.f32 %v1781_v59, %v10887_v12  ;;  %v2136_v25 = vpop.f32.mrf.mxu1  ;;  %9284 = vmatmul.mubr.msk.f32.gmra.mxu1 %vm844_vm4, %v10545_v17  ;;  %v11226_v45 = vadd.f32 %v2109_v26, %v1780_v5  ;;  %v2927_v59 = vpop.permute.xlu0 %2926 }
 0x21b   : > { %v1787_v46 = vpop.f32.mrf.mxu0  ;;  %9250 = vmatmul.mubr.msk.f32.gmra.mxu0 %vm844_vm4, %v10509_v8  ;;  %2882 = vmatprep.mubr.f32.mxu1 %v16187_v6  ;;  %vm3021_vm11 = vcmp.eq.s32.totalorder %v2927_v59, %v10150_v40 }
 0x21c   : > { %v1788_v1 = vadd.f32 %v1787_v46, %v10895_v54  ;;  %v2138_v3 = vpop.f32.mrf.mxu1  ;;  %2577 = vmatprep.mubr.f32.mxu0 %v16187_v6  ;;  %v11233_v57 = vadd.f32 %v2111_v51, %v1782_v31  ;;  %v2930_v31 = vpop.permute.xlu1 %2929 }
 0x21d   : > { %v1789_v12 = vpop.f32.mrf.mxu0  ;;  %vm3022_vm12 = vcmp.eq.s32.totalorder %v2930_v31, %v10150_v40 }
 0x21e   : > { %v1790_v55 = vadd.f32 %v1789_v12, %v10898_v43  ;;  %v2145_v62 = vpop.f32.mrf.mxu1  ;;  %9285 = vmatmul.mubr.msk.f32.gmra.mxu1 %vm844_vm4, %v10563_v22  ;;  %v11238_v26 = vadd.f32 %v2118_v61, %v1788_v1  ;;  %v11278_v12 = vsel %vm3021_vm11, 1.0, %v16187_v6  ;;  %v2936_v59 = vpop.permute.xlu0 %2935 }
 0x21f   : > { %v1795_v18 = vpop.f32.mrf.mxu0  ;;  %9251 = vmatmul.mubr.msk.f32.gmra.mxu0 %vm844_vm4, %v10527_v11  ;;  %2889 = vmatprep.mubr.f32.mxu1 %v16187_v6  ;;  %16697 = vst [vmem:[#allocation57_spill] sm:$0xff] %v11278_v12  ;;  %vm3024_vm14 = vcmp.eq.s32.totalorder %v2936_v59, %v10150_v40 }
 0x220   : > { %v1796_v8 = vadd.f32 %v1795_v18, %v10904_v2  ;;  %v2147_v54 = vpop.f32.mrf.mxu1  ;;  %2584 = vmatprep.mubr.f32.mxu0 %v16187_v6  ;;  %v11245_v51 = vadd.f32 %v2120_v48, %v1790_v55  ;;  %v3118_v18 = vsel %vm844_vm4, %v11278_v12, 0 }
 0x221   : > { %v1797_v43 = vpop.f32.mrf.mxu0 }
 0x222   : > { %v1798_v28 = vadd.f32 %v1797_v43, %v10907_v20  ;;  %v2154_v36 = vpop.f32.mrf.mxu1  ;;  %9286 = vmatmul.mubr.msk.f32.gmra.mxu1 %vm844_vm4, %v10581_v30  ;;  %v11250_v61 = vadd.f32 %v2127_v50, %v1796_v8 }
 0x223   : > { %v1803_v47 = vpop.f32.mrf.mxu0  ;;  %9252 = vmatmul.mubr.msk.f32.gmra.mxu0 %vm844_vm4, %v10545_v17  ;;  %2896 = vmatprep.mubr.f32.mxu1 %v16187_v6 }
 0x224   : > { %v1804_v11 = vadd.f32 %v1803_v47, %v10913_v4  ;;  %v2156_v2 = vpop.f32.mrf.mxu1  ;;  %2591 = vmatprep.mubr.f32.mxu0 %v16187_v6  ;;  %v11257_v48 = vadd.f32 %v2129_v23, %v1798_v28  ;;  %v11296_v28 = vsel %vm3022_vm12, 1.0, %v16187_v6 }
 0x225   : > { %v1805_v20 = vpop.f32.mrf.mxu0  ;;  %16698 = vst [vmem:[#allocation58_spill] sm:$0xff] %v11296_v28 }
 0x226   : > { %v1806_v14 = vadd.f32 %v1805_v20, %v10918_v37  ;;  %v2163_v5 = vpop.f32.mrf.mxu1  ;;  %9287 = vmatmul.mubr.msk.f32.gmra.mxu1 %vm844_vm4, %v10599_v42  ;;  %v11262_v50 = vadd.f32 %v2136_v25, %v1804_v11 }
 0x227   : > { %v1811_v17 = vpop.f32.mrf.mxu0  ;;  %9253 = vmatmul.mubr.msk.f32.gmra.mxu0 %vm844_vm4, %v10563_v22  ;;  %2903 = vmatprep.mubr.f32.mxu1 %v16187_v6 }
 0x228   : > { %v1812_v4 = vadd.f32 %v1811_v17, %v10924_v7  ;;  %v2165_v23 = vpop.f32.mrf.mxu1  ;;  %2598 = vmatprep.mubr.f32.mxu0 %v16187_v6  ;;  %v11270_v37 = vadd.f32 %v2138_v3, %v1806_v14  ;;  %v3121_v14 = vsel %vm844_vm4, %v11296_v28, 0 }
 0x229   : > { %v1813_v46 = vpop.f32.mrf.mxu0 }
 0x22a   : > { %v1814_v25 = vadd.f32 %v1813_v46, %v10930_v33  ;;  %v2172_v1 = vpop.f32.mrf.mxu1  ;;  %9288 = vmatmul.mubr.msk.f32.gmra.mxu1 %vm844_vm4, %v10617_v53  ;;  %v11275_v22 = vadd.f32 %v2145_v62, %v1812_v4  ;;  %v16699_v4 = vld [vmem:[#allocation43_spill] sm:$0xff] }
 0x22b   : > { %v1819_v55 = vpop.f32.mrf.mxu0  ;;  %9254 = vmatmul.mubr.msk.f32.gmra.mxu0 %vm844_vm4, %v10581_v30  ;;  %2910 = vmatprep.mubr.f32.mxu1 %v16187_v6 }
 0x22c   : > { %v1820_v7 = vadd.f32 %v1819_v55, %v10936_v10  ;;  %v2174_v33 = vpop.f32.mrf.mxu1  ;;  %2605 = vmatprep.mubr.f32.mxu0 %v16187_v6  ;;  %v11286_v3 = vadd.f32 %v2147_v54, %v1814_v25  ;;  %v2933_v10 = vpop.permute.xlu1 %2932  ;;  %v11329_v55 = vsub.f32 %v3121_v14, %v3121_v14 }
 0x22d   : > { %v1821_v62 = vpop.f32.mrf.mxu0  ;;  %vm3023_vm13 = vcmp.eq.s32.totalorder %v2933_v10, %v10150_v40  ;;  %v2942_v14 = vpop.permute.xlu0 %2941 }
 0x22e   : > { %v1822_v8 = vadd.f32 %v1821_v62, %v10940_v0  ;;  %v2181_v43 = vpop.f32.mrf.mxu1  ;;  %9289 = vmatmul.mubr.msk.f32.gmra.mxu1 %vm844_vm4, %v10635_v60  ;;  %v11293_v30 = vadd.f32 %v2154_v36, %v1820_v7  ;;  %v11306_v36 = vsub.f32 %v3118_v18, %v3118_v18  ;;  %16701 = vst [vmem:[#allocation59_spill] sm:$0xff] %v11329_v55  ;;  %v11332_v62 = vsel %vm3024_vm14, 1.0, %v16187_v6 }
 0x22f   : > { %v1827_v47 = vpop.f32.mrf.mxu0  ;;  %9255 = vmatmul.mubr.msk.f32.gmra.mxu0 %vm844_vm4, %v10599_v42  ;;  %2917 = vmatprep.mubr.f32.mxu1 %v16187_v6  ;;  %16702 = vst [vmem:[#allocation60_spill] sm:$0xff] %v11332_v62  ;;  %vm3026_vm0 = vcmp.eq.s32.totalorder %v2942_v14, %v10150_v40 }
 0x230   : > { %v1828_v0 = vadd.f32 %v1827_v47, %v10946_v16  ;;  %v2183_v54 = vpop.f32.mrf.mxu1  ;;  %2612 = vmatprep.mubr.f32.mxu0 %v16187_v6  ;;  %v11304_v11 = vadd.f32 %v2156_v2, %v1822_v8  ;;  %v11317_v16 = vsel %vm3023_vm13, 1.0, %v16187_v6  ;;  %v2939_v8 = vpop.permute.xlu1 %2938 }
 0x231   : > { %v1829_v20 = vpop.f32.mrf.mxu0  ;;  %16700 = vst [vmem:[#allocation43_spill] sm:$0xff] %v11317_v16  ;;  %vm3025_vm15 = vcmp.eq.s32.totalorder %v2939_v8, %v10150_v40  ;;  %v11388_v8 = vsel %vm3026_vm0, 1.0, %v16187_v6 }
 0x232   : > { %v1830_v42 = vadd.f32 %v1829_v20, %v10952_v34  ;;  %v2190_v17 = vpop.f32.mrf.mxu1  ;;  %9290 = vmatmul.mubr.msk.f32.gmra.mxu1 %vm844_vm4, %v16699_v4  ;;  %v11313_v31 = vadd.f32 %v2163_v5, %v1828_v0  ;;  %v16177_v5 = vand.u32 4294901760, %v11306_v36 }
 0x233   : > { %v1835_v2 = vpop.f32.mrf.mxu0  ;;  %9256 = vmatmul.mubr.msk.f32.gmra.mxu0 %vm844_vm4, %v10617_v53  ;;  %3706 = vmatprep.mubr.f32.mxu1 %v16187_v6  ;;  %v3124_v53 = vsel %vm844_vm4, %v11317_v16, 0 }
 0x234   : > { %v1836_v46 = vadd.f32 %v1835_v2, %v10958_v21  ;;  %v11323_v34 = vpop.f32.mrf.mxu1  ;;  %2619 = vmatprep.mubr.f32.mxu0 %v16187_v6  ;;  %v11326_v25 = vadd.f32 %v2165_v23, %v1830_v42  ;;  %v11359_v20 = vsub.f32 %v3124_v53, %v3124_v53  ;;  %v16704_v42 = vld [vmem:[#allocation34_spill] sm:$0xff] }
 0x235   : > { %v1837_v7 = vpop.f32.mrf.mxu0 }
 0x236   : > { %v1838_v18 = vadd.f32 %v1837_v7, %v10961_v58  ;;  %v11337_v21 = vpop.f32.mrf.mxu1  ;;  %9323 = vmatmul.mubr.msk.f32.vlgmr.msra.gmra.mxu1 %vm844_vm4, %v11278_v12  ;;  %v11341_v23 = vadd.f32 %v2172_v1, %v1836_v46  ;;  %v3283_v1 = vsub.f32 %v11306_v36, %v16177_v5  ;;  %16703 = vst [vmem:[#allocation61_spill] sm:$0xff] %v11359_v20  ;;  %v11374_v7 = vsel %vm3025_vm15, 1.0, %v16187_v6 }
 0x237   : > { %v1843_v10 = vpop.f32.mrf.mxu0  ;;  %9257 = vmatmul.mubr.msk.f32.gmra.mxu0 %vm844_vm4, %v10635_v60  ;;  %3713 = vmatprep.mubr.f32.mxu1 %v16187_v6  ;;  %v3127_v60 = vsel %vm844_vm4, %v11332_v62, 0  ;;  %16705 = vst [vmem:[#allocation34_spill] sm:$0xff] %v11374_v7 }
 0x238   : > { %v1844_v47 = vadd.f32 %v1843_v10, %v10967_v29  ;;  %v11348_v0 = vpop.f32.mrf.mxu1  ;;  %2626 = vmatprep.mubr.f32.mxu0 %v16187_v6  ;;  %4289 = vmatpush1.msra.mxu1 %v10916_v27  ;;  %v11352_v58 = vadd.f32 %v2174_v33, %v1838_v18  ;;  %v16178_v29 = vand.u32 4294901760, %v11329_v55  ;;  %v11379_v18 = vsub.f32 %v3127_v60, %v3127_v60  ;;  %v16711_v60 = vld [vmem:[#allocation42_spill] sm:$0xff] }
 0x239   : > { %v1845_v59 = vpop.f32.mrf.mxu0  ;;  %4937 = vmatprep.subr.mxu1 %v16704_v42  ;;  %v3130_v42 = vsel %vm844_vm4, %v11374_v7, 0 }
 0x23a   : > { %v1846_v33 = vadd.f32 %v1845_v59, %v10971_v41  ;;  %v11365_v2 = vpop.f32.mrf.mxu1  ;;  %9324 = vmatmul.mubr.msk.f32.gmra.mxu1 %vm844_vm4, %v11296_v28  ;;  %v11369_v46 = vadd.f32 %v2181_v43, %v1844_v47  ;;  %16706 = vst [vmem:[#allocation62_spill] sm:$0xff] %v11379_v18  ;;  %v16707_v41 = vld [vmem:[#allocation38_spill] sm:$0xff]  ;;  %v3284_v47 = vand.u32 4294901760, %v3283_v1  ;;  %v2945_v1 = vpop.permute.xlu1 %2944 }
 0x23b   : > { %v1851_v53 = vpop.f32.mrf.mxu0  ;;  %9258 = vmatmul.mubr.msk.f32.gmra.mxu0 %vm844_vm4, %v16699_v4  ;;  %3720 = vmatprep.mubr.f32.mxu1 %v16187_v6  ;;  %16708 = vst [vmem:[#allocation38_spill] sm:$0xff] %v11388_v8  ;;  %v3294_v4 = vsub.f32 %v11329_v55, %v16178_v29  ;;  %v3133_v29 = vsel %vm844_vm4, %v11388_v8, 0  ;;  %vm3027_vm1 = vcmp.eq.s32.totalorder %v2945_v1, %v10150_v40 }
 0x23c   : > { %v1852_v10 = vadd.f32 %v1851_v53, %v16707_v41  ;;  %v11382_v14 = vpop.f32.mrf.mxu1  ;;  %3279 = vmatprep.mubr.f32.mxu0 %v16187_v6  ;;  %v11385_v43 = vadd.f32 %v2183_v54, %v1846_v33  ;;  %v16709_v53 = vld [vmem:[#allocation40_spill] sm:$0xff] }
 0x23d   : > { %v1853_v59 = vpop.f32.mrf.mxu0  ;;  %v3295_v12 = vand.u32 4294901760, %v3294_v4  ;;  %v16719_v4 = vmov 0.0  }
 0x23e   : > { %v1854_v41 = vadd.f32 %v1853_v59, %v16709_v53  ;;  %v11397_v5 = vpop.f32.mrf.mxu1  ;;  %9325 = vmatmul.mubr.msk.f32.gmra.mxu1 %vm844_vm4, %v11317_v16  ;;  %v11401_v54 = vadd.f32 %v2190_v17, %v1852_v10  ;;  %v16712_v53 = vld [vmem:[#allocation36_spill] sm:$0xff]  ;;  %v11415_v10 = vsub.f32 %v3130_v42, %v3130_v42 }
 0x23f   : > { %v1859_v33 = vpop.f32.mrf.mxu0  ;;  %3285 = vmatmul.mubr.f32.vlgmr.msra.gmra.mxu0 %v3284_v47  ;;  %3727 = vmatprep.mubr.f32.mxu1 %v16187_v6  ;;  %v2948_v47 = vpop.permute.xlu0 %2947 }
 0x240   : > { %16710 = vst [vmem:[#allocation40_spill] sm:$0xff] %v11401_v54  ;;  %v1860_v28 = vadd.f32 %v1859_v33, %v16711_v60  ;;  %v11408_v59 = vpop.f32.mrf.mxu1  ;;  %3290 = vmatprep.mubr.f32.mxu0 %v16187_v6  ;;  %3966 = vmatpush1.msra.mxu0 %v16712_v53  ;;  %v11413_v17 = vadd.f32 %v11323_v34, %v1854_v41  ;;  %16714 = vst [vmem:[#allocation63_spill] sm:$0xff] %v11415_v10  ;;  %v16715_v54 = vand.u32 4294901760, %v11359_v20  ;;  %v16717_v6 = vld [vmem:[#allocation22_spill] sm:$0xff] }
 0x241   : > { %v1861_v16 = vpop.f32.mrf.mxu0  ;;  %v16191_v60 = vand.u32 4294901760, %v11379_v18  ;;  %v16716_v33 = vand.u32 4294901760, %v10785_v13  ;;  %vm3028_vm2 = vcmp.eq.s32.totalorder %v2948_v47, %v10150_v40  ;;  %v11433_v41 = vsel %vm3027_vm1, 1.0, %v16719_v4  ;;  %v16722_v47 = vld [vmem:[#allocation24_spill] sm:$0xff] }
 0x242   : > { %16713 = vst [vmem:[#allocation42_spill] sm:$0xff] %v11413_v17  ;;  %v3305_v55 = vsub.f32 %v11359_v20, %v16715_v54  ;;  %v1862_v53 = vadd.f32 %v1861_v16, %v16717_v6  ;;  %v2226_v34 = vpop.f32.mrf.mxu1  ;;  %9326 = vmatmul.mubr.msk.f32.gmra.mxu1 %vm844_vm4, %v11332_v62  ;;  %v11428_v42 = vadd.f32 %v11337_v21, %v1860_v28  ;;  %16720 = vst [vmem:[#allocation64_spill] sm:$0xff] %v11433_v41 }
 0x243   : > { %4644 = vmatprep.subr.mxu0 %v16716_v33  ;;  %v1867_v54 = vpop.f32.mrf.mxu0  ;;  %3296 = vmatmul.mubr.f32.gmra.mxu0 %v3295_v12  ;;  %v11436_v13 = vsub.f32 %v3133_v29, %v3133_v29  ;;  %v11444_v28 = vsel %vm3028_vm2, 1.0, %v16719_v4  ;;  %v3316_v12 = vsub.f32 %v11379_v18, %v16191_v60  ;;  %v16727_v29 = vld [vmem:[#allocation23_spill] sm:$0xff]  ;;  %v16730_v18 = vand.u32 4294901760, %v11415_v10 }
 0x244   : > { %16718 = vst [vmem:[#allocation22_spill] sm:$0xff] %v11428_v42  ;;  %3734 = vmatprep.mubr.f32.mxu1 %v16719_v4  ;;  %v1868_v6 = vadd.f32 %v1867_v54, %v16722_v47  ;;  %v2228_v16 = vpop.f32.mrf.mxu1  ;;  %3301 = vmatprep.mubr.f32.mxu0 %v16719_v4  ;;  %v11441_v33 = vadd.f32 %v11348_v0, %v1862_v53  ;;  %16724 = vst [vmem:[#allocation66_spill] sm:$0xff] %v11444_v28  ;;  %v3306_v1 = vand.u32 4294901760, %v3305_v55  ;;  %v16725_v47 = vld [vmem:[#allocation21_spill] sm:$0xff]  ;;  %v2951_v55 = vpop.permute.xlu1 %2950 }
 0x245   : > { %16721 = vst [vmem:[#allocation65_spill] sm:$0xff] %v11436_v13  ;;  %v1869_v21 = vpop.f32.mrf.mxu0  ;;  %v3136_v54 = vsel %vm844_vm4, %v11433_v41, 0  ;;  %v3139_v60 = vsel %vm844_vm4, %v11444_v28, 0  ;;  %vm3029_vm3 = vcmp.eq.s32.totalorder %v2951_v55, %v10150_v40  ;;  %v16200_v20 = vand.u32 4294901760, %v11436_v13 }
 0x246   : > { %16723 = vst [vmem:[#allocation24_spill] sm:$0xff] %v11441_v33  ;;  %v1870_v62 = vadd.f32 %v1869_v21, %v16725_v47  ;;  %v11453_v42 = vpop.f32.mrf.mxu1  ;;  %9327 = vmatmul.mubr.msk.f32.gmra.mxu1 %vm844_vm4, %v11374_v7  ;;  %v11458_v0 = vadd.f32 %v11365_v2, %v1868_v6  ;;  %v11469_v2 = vsub.f32 %v3136_v54, %v3136_v54  ;;  %v2954_v6 = vpop.permute.xlu0 %2953  ;;  %v16735_v54 = vld [vmem:[#allocation26_spill] sm:$0xff] }
 0x247   : > { %v1875_v53 = vpop.f32.mrf.mxu0  ;;  %3307 = vmatmul.mubr.f32.gmra.mxu0 %v3306_v1  ;;  %3741 = vmatprep.mubr.f32.mxu1 %v16719_v4  ;;  %v3317_v1 = vand.u32 4294901760, %v3316_v12  ;;  %v3327_v33 = vsub.f32 %v11415_v10, %v16730_v18  ;;  %vm3030_vm5 = vcmp.eq.s32.totalorder %v2954_v6, %v10150_v40  ;;  %v11488_v18 = vsub.f32 %v3139_v60, %v3139_v60  ;;  %v16740_v60 = vld [vmem:[#allocation27_spill] sm:$0xff] }
 0x248   : > { %16726 = vst [vmem:[#allocation21_spill] sm:$0xff] %v11458_v0  ;;  %v1876_v21 = vadd.f32 %v1875_v53, %v16727_v29  ;;  %v2237_v47 = vpop.f32.mrf.mxu1  ;;  %3312 = vmatprep.mubr.f32.mxu0 %v16719_v4  ;;  %v11467_v7 = vadd.f32 %v11382_v14, %v1870_v62  ;;  %16729 = vst [vmem:[#allocation67_spill] sm:$0xff] %v11469_v2  ;;  %v16731_v29 = vld [vmem:[#allocation25_spill] sm:$0xff]  ;;  %v11485_v14 = vsel %vm3029_vm3, 1.0, %v16719_v4 }
 0x249   : > { %v1877_v0 = vpop.f32.mrf.mxu0  ;;  %16733 = vst [vmem:[#allocation68_spill] sm:$0xff] %v11485_v14  ;;  %16734 = vst [vmem:[#allocation69_spill] sm:$0xff] %v11488_v18  ;;  %v16209_v10 = vand.u32 4294901760, %v11488_v18 }
 0x24a   : > { %16728 = vst [vmem:[#allocation23_spill] sm:$0xff] %v11467_v7  ;;  %v1878_v53 = vadd.f32 %v1877_v0, %v16731_v29  ;;  %v2244_v17 = vpop.f32.mrf.mxu1  ;;  %9328 = vmatmul.mubr.msk.f32.gmra.mxu1 %vm844_vm4, %v11388_v8  ;;  %v11480_v62 = vadd.f32 %v11397_v5, %v1876_v21  ;;  %v11496_v5 = vsel %vm3030_vm5, 1.0, %v16719_v4  ;;  %v3328_v21 = vand.u32 4294901760, %v3327_v33  ;;  %v16744_v7 = vld [vmem:[#allocation45_spill] sm:$0xff] }
 0x24b   : > { %v1883_v12 = vpop.f32.mrf.mxu0  ;;  %3318 = vmatmul.mubr.f32.gmra.mxu0 %v3317_v1  ;;  %3748 = vmatprep.mubr.f32.mxu1 %v16719_v4  ;;  %16737 = vst [vmem:[#allocation70_spill] sm:$0xff] %v11496_v5  ;;  %v3338_v1 = vsub.f32 %v11436_v13, %v16200_v20  ;;  %v3145_v20 = vsel %vm844_vm4, %v11496_v5, 0 }
 0x24c   : > { %16732 = vst [vmem:[#allocation25_spill] sm:$0xff] %v11480_v62  ;;  %v1884_v0 = vadd.f32 %v1883_v12, %v16735_v54  ;;  %v2246_v6 = vpop.f32.mrf.mxu1  ;;  %3323 = vmatprep.mubr.f32.mxu0 %v16719_v4  ;;  %v11493_v29 = vadd.f32 %v11408_v59, %v1878_v53  ;;  %v3142_v12 = vsel %vm844_vm4, %v11485_v14, 0  ;;  %v16738_v54 = vld [vmem:[#allocation44_spill] sm:$0xff]  ;;  %v2957_v53 = vpop.permute.xlu1 %2956 }
 0x24d   : > { %v1885_v55 = vpop.f32.mrf.mxu0  ;;  %vm3031_vm6 = vcmp.eq.s32.totalorder %v2957_v53, %v10150_v40 }
 0x24e   : > { %16736 = vst [vmem:[#allocation26_spill] sm:$0xff] %v11493_v29  ;;  %v1886_v8 = vadd.f32 %v1885_v55, %v16738_v54  ;;  %v11505_v62 = vpop.f32.mrf.mxu1  ;;  %9329 = vmatmul.mubr.msk.f32.gmra.mxu1 %vm844_vm4, %v11433_v41  ;;  %v11509_v59 = vadd.f32 %v2226_v34, %v1884_v0  ;;  %v11519_v41 = vsub.f32 %v3142_v12, %v3142_v12  ;;  %v2960_v34 = vpop.permute.xlu0 %2959 }
 0x24f   : > { %v1891_v33 = vpop.f32.mrf.mxu0  ;;  %3329 = vmatmul.mubr.f32.gmra.mxu0 %v3328_v21  ;;  %3755 = vmatprep.mubr.f32.mxu1 %v16719_v4  ;;  %v16743_v21 = vand.u32 4294901760, %v11469_v2  ;;  %vm3032_vm7 = vcmp.eq.s32.totalorder %v2960_v34, %v10150_v40  ;;  %v11538_v12 = vsub.f32 %v3145_v20, %v3145_v20  ;;  %v16748_v34 = vld [vmem:[#allocation28_spill] sm:$0xff] }
 0x250   : > { %16739 = vst [vmem:[#allocation44_spill] sm:$0xff] %v11509_v59  ;;  %v1892_v13 = vadd.f32 %v1891_v33, %v16740_v60  ;;  %v2255_v55 = vpop.f32.mrf.mxu1  ;;  %3334 = vmatprep.mubr.f32.mxu0 %v16719_v4  ;;  %v11517_v54 = vadd.f32 %v2228_v16, %v1886_v8  ;;  %16742 = vst [vmem:[#allocation71_spill] sm:$0xff] %v11519_v41  ;;  %v3339_v59 = vand.u32 4294901760, %v3338_v1  ;;  %v11535_v16 = vsel %vm3031_vm6, 1.0, %v16719_v4 }
 0x251   : > { %v1893_v0 = vpop.f32.mrf.mxu0  ;;  %v3349_v29 = vsub.f32 %v11469_v2, %v16743_v21  ;;  %16746 = vst [vmem:[#allocation72_spill] sm:$0xff] %v11535_v16  ;;  %16747 = vst [vmem:[#allocation73_spill] sm:$0xff] %v11538_v12  ;;  %v3148_v20 = vsel %vm844_vm4, %v11535_v16, 0  ;;  %v16218_v2 = vand.u32 4294901760, %v11538_v12 }
 0x252   : > { %16741 = vst [vmem:[#allocation27_spill] sm:$0xff] %v11517_v54  ;;  %v1894_v60 = vadd.f32 %v1893_v0, %v16744_v7  ;;  %v2262_v33 = vpop.f32.mrf.mxu1  ;;  %9330 = vmatmul.mubr.msk.f32.gmra.mxu1 %vm844_vm4, %v11444_v28  ;;  %v11530_v8 = vadd.f32 %v11453_v42, %v1892_v13  ;;  %v11545_v42 = vsel %vm3032_vm7, 1.0, %v16719_v4  ;;  %v16753_v28 = vld [vmem:[#allocation29_spill] sm:$0xff]  ;;  %v16757_v54 = vld [vmem:[#allocation47_spill] sm:$0xff] }
 0x253   : > { %v1899_v1 = vpop.f32.mrf.mxu0  ;;  %3340 = vmatmul.mubr.f32.gmra.mxu0 %v3339_v59  ;;  %3762 = vmatprep.mubr.f32.mxu1 %v16719_v4  ;;  %16750 = vst [vmem:[#allocation74_spill] sm:$0xff] %v11545_v42  ;;  %v3350_v53 = vand.u32 4294901760, %v3349_v29  ;;  %v3360_v59 = vsub.f32 %v11488_v18, %v16209_v10  ;;  %v3151_v10 = vsel %vm844_vm4, %v11545_v42, 0 }
 0x254   : > { %16745 = vst [vmem:[#allocation45_spill] sm:$0xff] %v11530_v8  ;;  %v1900_v7 = vadd.f32 %v1899_v1, %v16748_v34  ;;  %v2264_v0 = vpop.f32.mrf.mxu1  ;;  %3345 = vmatprep.mubr.f32.mxu0 %v16719_v4  ;;  %v11542_v21 = vadd.f32 %v2237_v47, %v1894_v60  ;;  %v16751_v1 = vld [vmem:[#allocation46_spill] sm:$0xff]  ;;  %v2963_v60 = vpop.permute.xlu1 %2962 }
 0x255   : > { %v1901_v13 = vpop.f32.mrf.mxu0  ;;  %vm3033_vm8 = vcmp.eq.s32.totalorder %v2963_v60, %v10150_v40 }
 0x256   : > { %16749 = vst [vmem:[#allocation28_spill] sm:$0xff] %v11542_v21  ;;  %v1902_v34 = vadd.f32 %v1901_v13, %v16751_v1  ;;  %v11554_v8 = vpop.f32.mrf.mxu1  ;;  %9331 = vmatmul.mubr.msk.f32.gmra.mxu1 %vm844_vm4, %v11485_v14  ;;  %v11558_v47 = vadd.f32 %v2244_v17, %v1900_v7  ;;  %v11568_v14 = vsub.f32 %v3148_v20, %v3148_v20  ;;  %v2966_v17 = vpop.permute.xlu0 %2965 }
 0x257   : > { %v1907_v29 = vpop.f32.mrf.mxu0  ;;  %3351 = vmatmul.mubr.f32.gmra.mxu0 %v3350_v53  ;;  %3769 = vmatprep.mubr.f32.mxu1 %v16719_v4  ;;  %v16756_v53 = vand.u32 4294901760, %v11519_v41  ;;  %vm3034_vm9 = vcmp.eq.s32.totalorder %v2966_v17, %v10150_v40  ;;  %v16761_v17 = vld [vmem:[#allocation30_spill] sm:$0xff] }
 0x258   : > { %16752 = vst [vmem:[#allocation46_spill] sm:$0xff] %v11558_v47  ;;  %v1908_v18 = vadd.f32 %v1907_v29, %v16753_v28  ;;  %v2273_v13 = vpop.f32.mrf.mxu1  ;;  %3356 = vmatprep.mubr.f32.mxu0 %v16719_v4  ;;  %v11566_v1 = vadd.f32 %v2246_v6, %v1902_v34  ;;  %16755 = vst [vmem:[#allocation75_spill] sm:$0xff] %v11568_v14  ;;  %v3361_v47 = vand.u32 4294901760, %v3360_v59  ;;  %v11584_v59 = vsel %vm3033_vm8, 1.0, %v16719_v4 }
 0x259   : > { %v1909_v7 = vpop.f32.mrf.mxu0  ;;  %v3371_v21 = vsub.f32 %v11519_v41, %v16756_v53  ;;  %16759 = vst [vmem:[#allocation76_spill] sm:$0xff] %v11584_v59  ;;  %v11587_v34 = vsub.f32 %v3151_v10, %v3151_v10  ;;  %v3154_v10 = vsel %vm844_vm4, %v11584_v59, 0 }
 0x25a   : > { %16754 = vst [vmem:[#allocation29_spill] sm:$0xff] %v11566_v1  ;;  %v1910_v28 = vadd.f32 %v1909_v7, %v16757_v54  ;;  %v2280_v29 = vpop.f32.mrf.mxu1  ;;  %9332 = vmatmul.mubr.msk.f32.gmra.mxu1 %vm844_vm4, %v11496_v5  ;;  %v11579_v6 = vadd.f32 %v11505_v62, %v1908_v18  ;;  %v11594_v62 = vsel %vm3034_vm9, 1.0, %v16719_v4  ;;  %v16766_v5 = vld [vmem:[#allocation31_spill] sm:$0xff]  ;;  %v16770_v1 = vld [vmem:[#allocation49_spill] sm:$0xff] }
 0x25b   : > { %v1915_v20 = vpop.f32.mrf.mxu0  ;;  %3362 = vmatmul.mubr.f32.gmra.mxu0 %v3361_v47  ;;  %3776 = vmatprep.mubr.f32.mxu1 %v16719_v4  ;;  %16760 = vst [vmem:[#allocation77_spill] sm:$0xff] %v11587_v34  ;;  %16763 = vst [vmem:[#allocation78_spill] sm:$0xff] %v11594_v62  ;;  %v3372_v60 = vand.u32 4294901760, %v3371_v21  ;;  %v3382_v47 = vsub.f32 %v11538_v12, %v16218_v2  ;;  %v3157_v2 = vsel %vm844_vm4, %v11594_v62, 0  ;;  %v16227_v41 = vand.u32 4294901760, %v11587_v34 }
 0x25c   : > { %16758 = vst [vmem:[#allocation47_spill] sm:$0xff] %v11579_v6  ;;  %v1916_v54 = vadd.f32 %v1915_v20, %v16761_v17  ;;  %v2282_v7 = vpop.f32.mrf.mxu1  ;;  %3367 = vmatprep.mubr.f32.mxu0 %v16719_v4  ;;  %v11591_v53 = vadd.f32 %v2255_v55, %v1910_v28  ;;  %v16764_v20 = vld [vmem:[#allocation48_spill] sm:$0xff]  ;;  %v2969_v28 = vpop.permute.xlu1 %2968 }
 0x25d   : > { %v1917_v18 = vpop.f32.mrf.mxu0  ;;  %vm3035_vm10 = vcmp.eq.s32.totalorder %v2969_v28, %v10150_v40 }
 0x25e   : > { %16762 = vst [vmem:[#allocation30_spill] sm:$0xff] %v11591_v53  ;;  %v1918_v17 = vadd.f32 %v1917_v18, %v16764_v20  ;;  %v11603_v6 = vpop.f32.mrf.mxu1  ;;  %9333 = vmatmul.mubr.msk.f32.gmra.mxu1 %vm844_vm4, %v11535_v16  ;;  %v11607_v55 = vadd.f32 %v2262_v33, %v1916_v54  ;;  %v11617_v16 = vsub.f32 %v3154_v10, %v3154_v10  ;;  %v2972_v33 = vpop.permute.xlu0 %2971 }
 0x25f   : > { %v1923_v21 = vpop.f32.mrf.mxu0  ;;  %3373 = vmatmul.mubr.f32.gmra.mxu0 %v3372_v60  ;;  %3783 = vmatprep.mubr.f32.mxu1 %v16719_v4  ;;  %v16769_v60 = vand.u32 4294901760, %v11568_v14  ;;  %vm3036_vm11 = vcmp.eq.s32.totalorder %v2972_v33, %v10150_v40  ;;  %v16774_v33 = vld [vmem:[#allocation32_spill] sm:$0xff] }
 0x260   : > { %16765 = vst [vmem:[#allocation48_spill] sm:$0xff] %v11607_v55  ;;  %v1924_v12 = vadd.f32 %v1923_v21, %v16766_v5  ;;  %v2291_v18 = vpop.f32.mrf.mxu1  ;;  %3378 = vmatprep.mubr.f32.mxu0 %v16719_v4  ;;  %v11615_v20 = vadd.f32 %v2264_v0, %v1918_v17  ;;  %16768 = vst [vmem:[#allocation79_spill] sm:$0xff] %v11617_v16  ;;  %v3383_v55 = vand.u32 4294901760, %v3382_v47  ;;  %v11633_v47 = vsel %vm3035_vm10, 1.0, %v16719_v4 }
 0x261   : > { %v1925_v54 = vpop.f32.mrf.mxu0  ;;  %v3393_v53 = vsub.f32 %v11568_v14, %v16769_v60  ;;  %16772 = vst [vmem:[#allocation80_spill] sm:$0xff] %v11633_v47  ;;  %v11636_v17 = vsub.f32 %v3157_v2, %v3157_v2  ;;  %v3160_v2 = vsel %vm844_vm4, %v11633_v47, 0 }
 0x262   : > { %16767 = vst [vmem:[#allocation31_spill] sm:$0xff] %v11615_v20  ;;  %v1926_v5 = vadd.f32 %v1925_v54, %v16770_v1  ;;  %v2298_v21 = vpop.f32.mrf.mxu1  ;;  %9334 = vmatmul.mubr.msk.f32.gmra.mxu1 %vm844_vm4, %v11545_v42  ;;  %v11628_v0 = vadd.f32 %v11554_v8, %v1924_v12  ;;  %v11643_v8 = vsel %vm3036_vm11, 1.0, %v16719_v4  ;;  %v16783_v20 = vld [vmem:[#allocation51_spill] sm:$0xff] }
 0x263   : > { %v1931_v10 = vpop.f32.mrf.mxu0  ;;  %3384 = vmatmul.mubr.f32.gmra.mxu0 %v3383_v55  ;;  %3790 = vmatprep.mubr.f32.mxu1 %v16719_v4  ;;  %16773 = vst [vmem:[#allocation81_spill] sm:$0xff] %v11636_v17  ;;  %16776 = vst [vmem:[#allocation82_spill] sm:$0xff] %v11643_v8  ;;  %v3394_v28 = vand.u32 4294901760, %v3393_v53  ;;  %v3404_v55 = vsub.f32 %v11587_v34, %v16227_v41  ;;  %v3163_v53 = vsel %vm844_vm4, %v11643_v8, 0  ;;  %v16779_v41 = vld [vmem:[#allocation33_spill] sm:$0xff]  ;;  %v16236_v14 = vand.u32 4294901760, %v11636_v17 }
 0x264   : > { %16771 = vst [vmem:[#allocation49_spill] sm:$0xff] %v11628_v0  ;;  %v1932_v1 = vadd.f32 %v1931_v10, %v16774_v33  ;;  %v2300_v54 = vpop.f32.mrf.mxu1  ;;  %3389 = vmatprep.mubr.f32.mxu0 %v16719_v4  ;;  %v11640_v60 = vadd.f32 %v2273_v13, %v1926_v5  ;;  %v16777_v10 = vld [vmem:[#allocation50_spill] sm:$0xff]  ;;  %v2975_v5 = vpop.permute.xlu1 %2974 }
 0x265   : > { %v1933_v12 = vpop.f32.mrf.mxu0  ;;  %vm3037_vm12 = vcmp.eq.s32.totalorder %v2975_v5, %v10150_v40 }
 0x266   : > { %16775 = vst [vmem:[#allocation32_spill] sm:$0xff] %v11640_v60  ;;  %v1934_v33 = vadd.f32 %v1933_v12, %v16777_v10  ;;  %v2307_v0 = vpop.f32.mrf.mxu1  ;;  %9335 = vmatmul.mubr.msk.f32.gmra.mxu1 %vm844_vm4, %v11584_v59  ;;  %v11654_v13 = vadd.f32 %v2280_v29, %v1932_v1  ;;  %v11664_v10 = vsub.f32 %v3160_v2, %v3160_v2  ;;  %v2978_v29 = vpop.permute.xlu0 %2977  ;;  %v3405_v59 = vand.u32 4294901760, %v3404_v55 }
 0x267   : > { %v1939_v60 = vpop.f32.mrf.mxu0  ;;  %3395 = vmatmul.mubr.f32.gmra.mxu0 %v3394_v28  ;;  %3797 = vmatprep.mubr.f32.mxu1 %v16719_v4  ;;  %v16782_v28 = vand.u32 4294901760, %v11617_v16  ;;  %vm3038_vm13 = vcmp.eq.s32.totalorder %v2978_v29, %v10150_v40  ;;  %v11680_v55 = vsel %vm3037_vm12, 1.0, %v16719_v4  ;;  %v16787_v29 = vld [vmem:[#allocation35_spill] sm:$0xff] }
 0x268   : > { %16778 = vst [vmem:[#allocation50_spill] sm:$0xff] %v11654_v13  ;;  %v1940_v42 = vadd.f32 %v1939_v60, %v16779_v41  ;;  %v2309_v34 = vpop.f32.mrf.mxu1  ;;  %3400 = vmatprep.mubr.f32.mxu0 %v16719_v4  ;;  %v11662_v12 = vadd.f32 %v2282_v7, %v1934_v33  ;;  %16781 = vst [vmem:[#allocation83_spill] sm:$0xff] %v11664_v10  ;;  %v11683_v33 = vsub.f32 %v3163_v53, %v3163_v53  ;;  %v16792_v53 = vld [vmem:[#allocation37_spill] sm:$0xff] }
 0x269   : > { %v1941_v1 = vpop.f32.mrf.mxu0  ;;  %v3415_v13 = vsub.f32 %v11617_v16, %v16782_v28  ;;  %16785 = vst [vmem:[#allocation84_spill] sm:$0xff] %v11680_v55  ;;  %v16795_v16 = vld [vmem:[#allocation53_spill] sm:$0xff] }
 0x26a   : > { %16780 = vst [vmem:[#allocation33_spill] sm:$0xff] %v11662_v12  ;;  %v1942_v41 = vadd.f32 %v1941_v1, %v16783_v20  ;;  %v2316_v60 = vpop.f32.mrf.mxu1  ;;  %9336 = vmatmul.mubr.msk.f32.gmra.mxu1 %vm844_vm4, %v11594_v62  ;;  %v11675_v7 = vadd.f32 %v11603_v6, %v1940_v42  ;;  %16786 = vst [vmem:[#allocation85_spill] sm:$0xff] %v11683_v33  ;;  %v11692_v42 = vsel %vm3038_vm13, 1.0, %v16719_v4 }
 0x26b   : > { %v1947_v2 = vpop.f32.mrf.mxu0  ;;  %3406 = vmatmul.mubr.f32.gmra.mxu0 %v3405_v59  ;;  %3804 = vmatprep.mubr.f32.mxu1 %v16719_v4  ;;  %16789 = vst [vmem:[#allocation86_spill] sm:$0xff] %v11692_v42  ;;  %v3416_v5 = vand.u32 4294901760, %v3415_v13  ;;  %v3426_v59 = vsub.f32 %v11636_v17, %v16236_v14  ;;  %v3169_v14 = vsel %vm844_vm4, %v11692_v42, 0 }
 0x26c   : > { %16784 = vst [vmem:[#allocation51_spill] sm:$0xff] %v11675_v7  ;;  %v1948_v20 = vadd.f32 %v1947_v2, %v16787_v29  ;;  %v11686_v1 = vpop.f32.mrf.mxu1  ;;  %3411 = vmatprep.mubr.f32.mxu0 %v16719_v4  ;;  %v11689_v28 = vadd.f32 %v2291_v18, %v1942_v41  ;;  %v3166_v2 = vsel %vm844_vm4, %v11680_v55, 0  ;;  %v16790_v29 = vld [vmem:[#allocation52_spill] sm:$0xff]  ;;  %v2981_v41 = vpop.permute.xlu1 %2980 }
 0x26d   : > { %v1949_v6 = vpop.f32.mrf.mxu0  ;;  %vm3039_vm14 = vcmp.eq.s32.totalorder %v2981_v41, %v10150_v40 }
 0x26e   : > { %16788 = vst [vmem:[#allocation35_spill] sm:$0xff] %v11689_v28  ;;  %v1950_v62 = vadd.f32 %v1949_v6, %v16790_v29  ;;  %v11701_v7 = vpop.f32.mrf.mxu1  ;;  %9337 = vmatmul.mubr.msk.f32.gmra.mxu1 %vm844_vm4, %v11633_v47  ;;  %v11705_v18 = vadd.f32 %v2298_v21, %v1948_v20  ;;  %v11717_v21 = vsub.f32 %v3166_v2, %v3166_v2  ;;  %v3427_v47 = vand.u32 4294901760, %v3426_v59 }
 0x26f   : > { %v1955_v13 = vpop.f32.mrf.mxu0  ;;  %3417 = vmatmul.mubr.f32.gmra.mxu0 %v3416_v5  ;;  %3811 = vmatprep.mubr.f32.mxu1 %v16719_v4  ;;  %v16794_v5 = vand.u32 4294901760, %v11664_v10  ;;  %v16245_v28 = vand.u32 4294901760, %v11683_v33  ;;  %v11734_v2 = vsub.f32 %v3169_v14, %v3169_v14 }
 0x270   : > { %16791 = vst [vmem:[#allocation52_spill] sm:$0xff] %v11705_v18  ;;  %v1956_v17 = vadd.f32 %v1955_v13, %v16792_v53  ;;  %v11712_v6 = vpop.f32.mrf.mxu1  ;;  %3422 = vmatprep.mubr.f32.mxu0 %v16719_v4  ;;  %v11715_v29 = vadd.f32 %v2300_v54, %v1950_v62  ;;  %16793 = vst [vmem:[#allocation37_spill] sm:$0xff] %v11717_v21  ;;  %v2984_v62 = vpop.permute.xlu0 %2983  ;;  %v11731_v54 = vsel %vm3039_vm14, 1.0, %v16719_v4 }
 0x271   : > { %v1957_v20 = vpop.f32.mrf.mxu0  ;;  %v3437_v18 = vsub.f32 %v11664_v10, %v16794_v5  ;;  %16797 = vst [vmem:[#allocation87_spill] sm:$0xff] %v11731_v54  ;;  %vm3040_vm15 = vcmp.eq.s32.totalorder %v2984_v62, %v10150_v40  ;;  %v3172_v14 = vsel %vm844_vm4, %v11731_v54, 0  ;;  %v9659_v62 = vld [vmem:[%s9956_s30] sm:$0xff] }
 0x272   : > { %v1958_v41 = vadd.f32 %v1957_v20, %v16795_v16  ;;  %v11724_v12 = vpop.f32.mrf.mxu1  ;;  %9338 = vmatmul.mubr.msk.f32.gmra.mxu1 %vm844_vm4, %v11643_v8  ;;  %v11728_v53 = vadd.f32 %v2307_v0, %v1956_v17  ;;  %v16798_v16 = vld [vmem:[#allocation39_spill] sm:$0xff] }
 0x273   : > { %v1963_v59 = vpop.f32.mrf.mxu0  ;;  %3428 = vmatmul.mubr.f32.gmra.mxu0 %v3427_v47  ;;  %3818 = vmatprep.mubr.f32.mxu1 %v16719_v4  ;;  %v3438_v5 = vand.u32 4294901760, %v3437_v18  ;;  %v3448_v47 = vsub.f32 %v11683_v33, %v16245_v28  ;;  %v9805_v18 = vmov 2  }
 0x274   : > { %16796 = vst [vmem:[#allocation53_spill] sm:$0xff] %v11728_v53  ;;  %v1964_v13 = vadd.f32 %v1963_v59, %v16798_v16  ;;  %v11738_v20 = vpop.f32.mrf.mxu1  ;;  %3433 = vmatprep.mubr.f32.mxu0 %v16719_v4  ;;  %v11741_v0 = vadd.f32 %v2309_v34, %v1958_v41  ;;  %9657 = vset.pattern.permute.xlu1 %v9805_v18  ;;  %v11759_v41 = vsel %vm3040_vm15, 1.0, %v16719_v4  ;;  %v2987_v16 = vpop.permute.xlu1 %2986 }
 0x275   : > { %v1965_v17 = vpop.f32.mrf.mxu0  ;;  %vm3041_vm0 = vcmp.eq.s32.totalorder %v2987_v16, %v10150_v40  ;;  %5198 = vperm.xlu1 %9657, %v9659_v62   ;;  %9658 = vset.pattern.permute.xlu0 %v9805_v18 }
 0x276   : > { %16799 = vst [vmem:[#allocation39_spill] sm:$0xff] %v11741_v0  ;;  %v1966_v53 = vadd.f32 %v1965_v17, %v11122_v52  ;;  %v11750_v59 = vpop.f32.mrf.mxu1  ;;  %9339 = vmatmul.mubr.msk.f32.gmra.mxu1 %vm844_vm4, %v11680_v55  ;;  %v11754_v34 = vadd.f32 %v2316_v60, %v1964_v13  ;;  %v16801_v52 = vld [vmem:[#allocation41_spill] sm:$0xff]  ;;  %v11771_v13 = vsub.f32 %v3172_v14, %v3172_v14  ;;  %v16803_v0 = vld [vmem:[#allocation54_spill] sm:$0xff]  ;;  %v2990_v14 = vpop.permute.xlu0 %2989 }
 0x277   : > { %v1971_v28 = vpop.f32.mrf.mxu0  ;;  %3439 = vmatmul.mubr.f32.gmra.mxu0 %v3438_v5  ;;  %3825 = vmatprep.mubr.f32.mxu1 %v16719_v4  ;;  %v3449_v5 = vand.u32 4294901760, %v3448_v47  ;;  %v9660_v47 = vld [vmem:[%s9956_s30 + $0x8] sm:$0xff]  ;;  %vm3042_vm1 = vcmp.eq.s32.totalorder %v2990_v14, %v10150_v40  ;;  %v9663_v14 = vld [vmem:[%s9956_s30 + $0x18] sm:$0xff] }
 0x278   : > { %16800 = vst [vmem:[#allocation88_spill] sm:$0xff] %v11754_v34  ;;  %v1972_v17 = vadd.f32 %v1971_v28, %v16801_v52  ;;  %v11764_v8 = vpop.f32.mrf.mxu1  ;;  %3444 = vmatprep.mubr.f32.mxu0 %v16719_v4  ;;  %v11768_v60 = vadd.f32 %v11686_v1, %v1966_v53  ;;  %v16802_v34 = vand.u32 4294901760, %v11717_v21  ;;  %v16256_v28 = vand.u32 4294901760, %v11734_v2  ;;  %5201 = vperm.xlu0 %9658, %v9660_v47  }
 0x279   : > { %v1973_v55 = vpop.f32.mrf.mxu0  ;;  %v3175_v52 = vsel %vm844_vm4, %v11759_v41, 0 }
 0x27a   : > { %v3459_v33 = vsub.f32 %v11717_v21, %v16802_v34  ;;  %v1974_v10 = vadd.f32 %v1973_v55, %v16803_v0  ;;  %v11780_v1 = vpop.f32.mrf.mxu1  ;;  %9340 = vmatmul.mubr.msk.f32.gmra.mxu1 %vm844_vm4, %v11692_v42  ;;  %v11785_v53 = vadd.f32 %v11701_v7, %v1972_v17  ;;  %v11791_v34 = vsel %vm3041_vm0, 1.0, %v16719_v4  ;;  %v16805_v55 = vld [vmem:[#allocation55_spill] sm:$0xff] }
 0x27b   : > { %v1979_v18 = vpop.f32.mrf.mxu0  ;;  %3450 = vmatmul.mubr.f32.gmra.mxu0 %v3449_v5  ;;  %3832 = vmatprep.mubr.f32.mxu1 %v16719_v4  ;;  %v9661_v17 = vld [vmem:[%s9956_s30 + $0x10] sm:$0xff]  ;;  %v11803_v16 = vsub.f32 %v3175_v52, %v3175_v52  ;;  %v3470_v42 = vsub.f32 %v11734_v2, %v16256_v28  ;;  %v11823_v52 = vsel %vm3042_vm1, 1.0, %v16719_v4 }
 0x27c   : > { %16804 = vst [vmem:[#allocation41_spill] sm:$0xff] %v11785_v53  ;;  %v1980_v0 = vadd.f32 %v1979_v18, %v16805_v55  ;;  %v11796_v62 = vpop.f32.mrf.mxu1  ;;  %3455 = vmatprep.mubr.f32.mxu0 %v16719_v4  ;;  %v11800_v7 = vadd.f32 %v11712_v6, %v1974_v10  ;;  %5204 = vperm.xlu1 %9657, %v9661_v17   ;;  %v3460_v5 = vand.u32 4294901760, %v3459_v33  ;;  %v16259_v18 = vand.u32 4294901760, %v11771_v13  ;;  %v16806_v53 = vld [vmem:[#allocation56_spill] sm:$0xff]  ;;  %v9662_v33 = vld [vmem:[%s9956_s30 + $0x20] sm:$0xff]  ;;  %v2993_v17 = vpop.permute.xlu1 %2992 }
 0x27d   : > { %v1981_v47 = vpop.f32.mrf.mxu0  ;;  %v3178_v55 = vsel %vm844_vm4, %v11791_v34, 0  ;;  %5210 = vperm.xlu0 %9658, %v9662_v33   ;;  %vm3043_vm2 = vcmp.eq.s32.totalorder %v2993_v17, %v10150_v40 }
 0x27e   : > { %v1982_v21 = vadd.f32 %v1981_v47, %v16806_v53  ;;  %v11812_v10 = vpop.f32.mrf.mxu1  ;;  %9341 = vmatmul.mubr.msk.f32.gmra.mxu1 %vm844_vm4, %v11731_v54  ;;  %v11817_v6 = vadd.f32 %v11724_v12, %v1980_v0  ;;  %v11835_v0 = vsub.f32 %v3178_v55, %v3178_v55  ;;  %v3481_v54 = vsub.f32 %v11771_v13, %v16259_v18  ;;  %v2996_v55 = vpop.permute.xlu0 %2995 }
 0x27f   : > { %v2412_v28 = vpop.f32.mrf.mxu0  ;;  %3461 = vmatmul.mubr.f32.gmra.mxu0 %v3460_v5  ;;  %3839 = vmatprep.mubr.f32.mxu1 %v16719_v4  ;;  %v3471_v5 = vand.u32 4294901760, %v3470_v42  ;;  %v9664_v42 = vld [vmem:[%s9956_s30 + $0x30] sm:$0xff]  ;;  %vm3044_vm3 = vcmp.eq.s32.totalorder %v2996_v55, %v10150_v40  ;;  %v9667_v55 = vld [vmem:[%s9956_s30 + $0x38] sm:$0xff] }
 0x280   : > { %16807 = vst [vmem:[#allocation54_spill] sm:$0xff] %v11817_v6  ;;  %v2413_v53 = vadd.f32 %v2412_v28, %v11154_v32  ;;  %v11828_v47 = vpop.f32.mrf.mxu1  ;;  %3466 = vmatprep.mubr.f32.mxu0 %v16719_v4  ;;  %v11832_v12 = vadd.f32 %v11738_v20, %v1982_v21  ;;  %5207 = vperm.xlu1 %9657, %v9663_v14   ;;  %v16260_v32 = vand.u32 4294901760, %v11803_v16  ;;  %v3181_v28 = vsel %vm844_vm4, %v11823_v52, 0 }
 0x281   : > { %v2414_v33 = vpop.f32.mrf.mxu0  ;;  %5216 = vperm.xlu0 %9658, %v9664_v42   ;;  %v11855_v14 = vsel %vm3043_vm2, 1.0, %v16719_v4  ;;  %v11867_v17 = vsub.f32 %v3181_v28, %v3181_v28  ;;  %v11887_v28 = vsel %vm3044_vm3, 1.0, %v16719_v4 }
 0x282   : > { %v11844_v6 = vadd.f32 %v11750_v59, %v2413_v53  ;;  %v2415_v21 = vadd.f32 %v2414_v33, %v11161_v35  ;;  %v11847_v20 = vpop.f32.mrf.mxu1  ;;  %9342 = vmatmul.mubr.msk.f32.gmra.mxu1 %vm844_vm4, %v11759_v41  ;;  %v9665_v33 = vld [vmem:[%s9956_s30 + $0x28] sm:$0xff] }
 0x283   : > { %v2419_v18 = vpop.f32.mrf.mxu0  ;;  %3472 = vmatmul.mubr.f32.gmra.mxu0 %v3471_v5  ;;  %3846 = vmatprep.mubr.f32.mxu1 %v16719_v4  ;;  %v3482_v5 = vand.u32 4294901760, %v3481_v54  ;;  %v9666_v54 = vld [vmem:[%s9956_s30 + $0x40] sm:$0xff] }
 0x284   : > { %16808 = vst [vmem:[#allocation55_spill] sm:$0xff] %v11844_v6  ;;  %v11860_v35 = vadd.f32 %v11764_v8, %v2415_v21  ;;  %v2420_v59 = vadd.f32 %v2419_v18, %v11166_v63  ;;  %v11863_v53 = vpop.f32.mrf.mxu1  ;;  %3477 = vmatprep.mubr.f32.mxu0 %v16719_v4  ;;  %5213 = vperm.xlu1 %9657, %v9665_v33   ;;  %v3184_v21 = vsel %vm844_vm4, %v11855_v14, 0 }
 0x285   : > { %v2421_v42 = vpop.f32.mrf.mxu0  ;;  %v3492_v6 = vsub.f32 %v11803_v16, %v16260_v32  ;;  %5222 = vperm.xlu0 %9658, %v9666_v54   ;;  %v2999_v32 = vpop.permute.xlu1 %2998 }
 0x286   : > { %16809 = vst [vmem:[#allocation56_spill] sm:$0xff] %v11860_v35  ;;  %v11876_v63 = vadd.f32 %v11780_v1, %v2420_v59  ;;  %v2422_v18 = vadd.f32 %v2421_v42, %v11173_v38  ;;  %v11879_v33 = vpop.f32.mrf.mxu1  ;;  %9343 = vmatmul.mubr.msk.f32.gmra.mxu1 %vm844_vm4, %v11791_v34  ;;  %vm3045_vm5 = vcmp.eq.s32.totalorder %v2999_v32, %v10150_v40 }
 0x287   : > { %v2426_v8 = vpop.f32.mrf.mxu0  ;;  %3483 = vmatmul.mubr.f32.gmra.mxu0 %v3482_v5  ;;  %3853 = vmatprep.mubr.f32.mxu1 %v16719_v4  ;;  %v11899_v42 = vsub.f32 %v3184_v21, %v3184_v21  ;;  %v3493_v5 = vand.u32 4294901760, %v3492_v6  ;;  %v9668_v6 = vld [vmem:[%s9956_s30 + $0x50] sm:$0xff]  ;;  %v3002_v21 = vpop.permute.xlu0 %3001 }
 0x288   : > { %16810 = vst [vmem:[#allocation89_spill] sm:$0xff] %v11876_v63  ;;  %v11892_v38 = vadd.f32 %v11796_v62, %v2422_v18  ;;  %v2427_v1 = vadd.f32 %v2426_v8, %v11178_v9  ;;  %v11895_v59 = vpop.f32.mrf.mxu1  ;;  %3488 = vmatprep.mubr.f32.mxu0 %v16719_v4  ;;  %5219 = vperm.xlu1 %9657, %v9667_v55   ;;  %v16812_v63 = vand.u32 4294901760, %v11835_v0  ;;  %v3187_v18 = vsel %vm844_vm4, %v11887_v28, 0 }
 0x289   : > { %v2428_v54 = vpop.f32.mrf.mxu0  ;;  %5228 = vperm.xlu0 %9658, %v9668_v6   ;;  %vm3046_vm6 = vcmp.eq.s32.totalorder %v3002_v21, %v10150_v40  ;;  %v11931_v32 = vsub.f32 %v3187_v18, %v3187_v18  ;;  %v9671_v21 = vld [vmem:[%s9956_s30 + $0x58] sm:$0xff] }
 0x28a   : > { %16811 = vst [vmem:[#allocation90_spill] sm:$0xff] %v11892_v38  ;;  %v3503_v35 = vsub.f32 %v11835_v0, %v16812_v63  ;;  %v11908_v9 = vadd.f32 %v11812_v10, %v2427_v1  ;;  %v2429_v8 = vadd.f32 %v2428_v54, %v11185_v39  ;;  %v11911_v55 = vpop.f32.mrf.mxu1  ;;  %9344 = vmatmul.mubr.msk.f32.gmra.mxu1 %vm844_vm4, %v11823_v52  ;;  %v11919_v63 = vsel %vm3045_vm5, 1.0, %v16719_v4  ;;  %v9669_v54 = vld [vmem:[%s9956_s30 + $0x48] sm:$0xff] }
 0x28b   : > { %v2433_v62 = vpop.f32.mrf.mxu0  ;;  %3494 = vmatmul.mubr.f32.gmra.mxu0 %v3493_v5  ;;  %3860 = vmatprep.mubr.f32.mxu1 %v16719_v4  ;;  %v11951_v18 = vsel %vm3046_vm6, 1.0, %v16719_v4 }
 0x28c   : > { %16813 = vst [vmem:[#allocation91_spill] sm:$0xff] %v11908_v9  ;;  %v11924_v39 = vadd.f32 %v11828_v47, %v2429_v8  ;;  %v2434_v10 = vadd.f32 %v2433_v62, %v11190_v19  ;;  %v11927_v1 = vpop.f32.mrf.mxu1  ;;  %3499 = vmatprep.mubr.f32.mxu0 %v16719_v4  ;;  %5225 = vperm.xlu1 %9657, %v9669_v54   ;;  %v3504_v5 = vand.u32 4294901760, %v3503_v35  ;;  %v16815_v9 = vand.u32 4294901760, %v11867_v17  ;;  %v9670_v35 = vld [vmem:[%s9956_s30 + $0x60] sm:$0xff] }
 0x28d   : > { %v2435_v6 = vpop.f32.mrf.mxu0  ;;  %v3190_v8 = vsel %vm844_vm4, %v11919_v63, 0  ;;  %5234 = vperm.xlu0 %9658, %v9670_v35   ;;  %16817 = vst [vmem:[#allocation94_spill] sm:$0xff] %v11951_v18 }
 0x28e   : > { %16814 = vst [vmem:[#allocation92_spill] sm:$0xff] %v11924_v39  ;;  %v3514_v38 = vsub.f32 %v11867_v17, %v16815_v9  ;;  %v11940_v19 = vadd.f32 %v11847_v20, %v2434_v10  ;;  %v2436_v62 = vadd.f32 %v2435_v6, %v11197_v15  ;;  %v11943_v54 = vpop.f32.mrf.mxu1  ;;  %9345 = vmatmul.mubr.msk.f32.gmra.mxu1 %vm844_vm4, %v11855_v14  ;;  %v3005_v9 = vpop.permute.xlu1 %3004 }
 0x28f   : > { %v2440_v47 = vpop.f32.mrf.mxu0  ;;  %3505 = vmatmul.mubr.f32.gmra.mxu0 %v3504_v5  ;;  %3867 = vmatprep.mubr.f32.mxu1 %v16719_v4  ;;  %vm3047_vm7 = vcmp.eq.s32.totalorder %v3005_v9, %v10150_v40  ;;  %v11963_v6 = vsub.f32 %v3190_v8, %v3190_v8  ;;  %v3008_v8 = vpop.permute.xlu0 %3007 }
 0x290   : > { %16816 = vst [vmem:[#allocation93_spill] sm:$0xff] %v11940_v19  ;;  %v11956_v15 = vadd.f32 %v11863_v53, %v2436_v62  ;;  %v2441_v20 = vadd.f32 %v2440_v47, %v11202_v56  ;;  %v11959_v10 = vpop.f32.mrf.mxu1  ;;  %3510 = vmatprep.mubr.f32.mxu0 %v16719_v4  ;;  %5231 = vperm.xlu1 %9657, %v9671_v21   ;;  %v3515_v5 = vand.u32 4294901760, %v3514_v38  ;;  %v16819_v19 = vand.u32 4294901760, %v11899_v42  ;;  %v9672_v38 = vld [vmem:[%s9956_s30 + $0x70] sm:$0xff] }
 0x291   : > { %v2442_v35 = vpop.f32.mrf.mxu0  ;;  %v3193_v62 = vsel %vm844_vm4, %v11951_v18, 0  ;;  %5240 = vperm.xlu0 %9658, %v9672_v38   ;;  %vm3048_vm8 = vcmp.eq.s32.totalorder %v3008_v8, %v10150_v40  ;;  %v9675_v8 = vld [vmem:[%s9956_s30 + $0x78] sm:$0xff] }
 0x292   : > { %16818 = vst [vmem:[#allocation95_spill] sm:$0xff] %v11956_v15  ;;  %v3525_v39 = vsub.f32 %v11899_v42, %v16819_v19  ;;  %v11972_v56 = vadd.f32 %v11879_v33, %v2441_v20  ;;  %v2443_v47 = vadd.f32 %v2442_v35, %v11209_v49  ;;  %v11975_v21 = vpop.f32.mrf.mxu1  ;;  %9346 = vmatmul.mubr.msk.f32.gmra.mxu1 %vm844_vm4, %v11887_v28  ;;  %v11983_v19 = vsel %vm3047_vm7, 1.0, %v16719_v4  ;;  %v9673_v35 = vld [vmem:[%s9956_s30 + $0x68] sm:$0xff] }
 0x293   : > { %v2447_v53 = vpop.f32.mrf.mxu0  ;;  %3516 = vmatmul.mubr.f32.gmra.mxu0 %v3515_v5  ;;  %3874 = vmatprep.mubr.f32.mxu1 %v16719_v4  ;;  %v11995_v9 = vsub.f32 %v3193_v62, %v3193_v62  ;;  %v12015_v62 = vsel %vm3048_vm8, 1.0, %v16719_v4 }
 0x294   : > { %16820 = vst [vmem:[#allocation96_spill] sm:$0xff] %v11972_v56  ;;  %v11988_v49 = vadd.f32 %v11895_v59, %v2443_v47  ;;  %v2448_v33 = vadd.f32 %v2447_v53, %v11214_v24  ;;  %v11991_v20 = vpop.f32.mrf.mxu1  ;;  %3521 = vmatprep.mubr.f32.mxu0 %v16719_v4  ;;  %5237 = vperm.xlu1 %9657, %v9673_v35   ;;  %v3526_v5 = vand.u32 4294901760, %v3525_v39  ;;  %v16822_v56 = vand.u32 4294901760, %v11931_v32  ;;  %v9674_v39 = vld [vmem:[%s9956_s30 + $0x80] sm:$0xff] }
 0x295   : > { %v2449_v38 = vpop.f32.mrf.mxu0  ;;  %v3196_v47 = vsel %vm844_vm4, %v11983_v19, 0  ;;  %5246 = vperm.xlu0 %9658, %v9674_v39  }
 0x296   : > { %16821 = vst [vmem:[#allocation97_spill] sm:$0xff] %v11988_v49  ;;  %v3536_v15 = vsub.f32 %v11931_v32, %v16822_v56  ;;  %v12004_v24 = vadd.f32 %v11911_v55, %v2448_v33  ;;  %v2450_v53 = vadd.f32 %v2449_v38, %v11221_v44  ;;  %v12007_v35 = vpop.f32.mrf.mxu1  ;;  %9347 = vmatmul.mubr.msk.f32.gmra.mxu1 %vm844_vm4, %v11919_v63  ;;  %v3011_v56 = vpop.permute.xlu1 %3010 }
 0x297   : > { %v2454_v59 = vpop.f32.mrf.mxu0  ;;  %3527 = vmatmul.mubr.f32.gmra.mxu0 %v3526_v5  ;;  %3881 = vmatprep.mubr.f32.mxu1 %v16719_v4  ;;  %vm3049_vm9 = vcmp.eq.s32.totalorder %v3011_v56, %v10150_v40  ;;  %v12027_v38 = vsub.f32 %v3196_v47, %v3196_v47  ;;  %v3014_v47 = vpop.permute.xlu0 %3013 }
 0x298   : > { %16823 = vst [vmem:[#allocation98_spill] sm:$0xff] %v12004_v24  ;;  %v12020_v44 = vadd.f32 %v11927_v1, %v2450_v53  ;;  %v2455_v55 = vadd.f32 %v2454_v59, %v11226_v45  ;;  %v12023_v33 = vpop.f32.mrf.mxu1  ;;  %3532 = vmatprep.mubr.f32.mxu0 %v16719_v4  ;;  %5243 = vperm.xlu1 %9657, %v9675_v8   ;;  %v3537_v5 = vand.u32 4294901760, %v3536_v15  ;;  %v16825_v24 = vand.u32 4294901760, %v11963_v6  ;;  %v9676_v15 = vld [vmem:[%s9956_s30 + $0x90] sm:$0xff] }
 0x299   : > { %v2456_v39 = vpop.f32.mrf.mxu0  ;;  %v3199_v53 = vsel %vm844_vm4, %v12015_v62, 0  ;;  %5252 = vperm.xlu0 %9658, %v9676_v15   ;;  %vm3050_vm10 = vcmp.eq.s32.totalorder %v3014_v47, %v10150_v40 }
 0x29a   : > { %16824 = vst [vmem:[#allocation99_spill] sm:$0xff] %v12020_v44  ;;  %v3547_v49 = vsub.f32 %v11963_v6, %v16825_v24  ;;  %v12036_v45 = vadd.f32 %v11943_v54, %v2455_v55  ;;  %v2457_v59 = vadd.f32 %v2456_v39, %v11233_v57  ;;  %v12039_v8 = vpop.f32.mrf.mxu1  ;;  %9348 = vmatmul.mubr.msk.f32.gmra.mxu1 %vm844_vm4, %v11951_v18  ;;  %v12047_v24 = vsel %vm3049_vm9, 1.0, %v16719_v4  ;;  %v9677_v39 = vld [vmem:[%s9956_s30 + $0x88] sm:$0xff]  ;;  %v3017_v15 = vpop.permute.xlu1 %3016 }
 0x29b   : > { %v2461_v1 = vpop.f32.mrf.mxu0  ;;  %3538 = vmatmul.mubr.f32.gmra.mxu0 %v3537_v5  ;;  %3888 = vmatprep.mubr.f32.mxu1 %v16719_v4  ;;  %v12059_v56 = vsub.f32 %v3199_v53, %v3199_v53  ;;  %v16828_v44 = vand.u32 4294901760, %v11995_v9  ;;  %vm3051_vm11 = vcmp.eq.s32.totalorder %v3017_v15, %v10150_v40 }
 0x29c   : > { %16826 = vst [vmem:[#allocation100_spill] sm:$0xff] %v12036_v45  ;;  %v12052_v57 = vadd.f32 %v11959_v10, %v2457_v59  ;;  %v2462_v54 = vadd.f32 %v2461_v1, %v11238_v26  ;;  %v12055_v55 = vpop.f32.mrf.mxu1  ;;  %3543 = vmatprep.mubr.f32.mxu0 %v16719_v4  ;;  %5249 = vperm.xlu1 %9657, %v9677_v39   ;;  %v3548_v45 = vand.u32 4294901760, %v3547_v49  ;;  %v3202_v26 = vsel %vm844_vm4, %v12047_v24, 0  ;;  %v9678_v49 = vld [vmem:[%s9956_s30 + $0xa0] sm:$0xff] }
 0x29d   : > { %v2463_v5 = vpop.f32.mrf.mxu0  ;;  %v3558_v18 = vsub.f32 %v11995_v9, %v16828_v44  ;;  %5258 = vperm.xlu0 %9658, %v9678_v49   ;;  %v12079_v44 = vsel %vm3050_vm10, 1.0, %v16719_v4  ;;  %v12091_v47 = vsub.f32 %v3202_v26, %v3202_v26  ;;  %v3020_v49 = vpop.permute.xlu0 %3019 }
 0x29e   : > { %16827 = vst [vmem:[#allocation101_spill] sm:$0xff] %v12052_v57  ;;  %v12068_v1 = vadd.f32 %v11975_v21, %v2462_v54  ;;  %v2464_v59 = vadd.f32 %v2463_v5, %v11245_v51  ;;  %v12071_v53 = vpop.f32.mrf.mxu1  ;;  %9349 = vmatmul.mubr.msk.f32.gmra.mxu1 %vm844_vm4, %v11983_v19  ;;  %v9679_v5 = vld [vmem:[%s9956_s30 + $0x98] sm:$0xff]  ;;  %vm3052_vm12 = vcmp.eq.s32.totalorder %v3020_v49, %v10150_v40 }
 0x29f   : > { %v2468_v39 = vpop.f32.mrf.mxu0  ;;  %3549 = vmatmul.mubr.f32.gmra.mxu0 %v3548_v45  ;;  %3895 = vmatprep.mubr.f32.mxu1 %v16719_v4  ;;  %v3559_v10 = vand.u32 4294901760, %v3558_v18  ;;  %v9680_v18 = vld [vmem:[%s9956_s30 + $0xb0] sm:$0xff] }
 0x2a0   : > { %16829 = vst [vmem:[#allocation102_spill] sm:$0xff] %v12068_v1  ;;  %v12084_v51 = vadd.f32 %v11991_v20, %v2464_v59  ;;  %v2469_v21 = vadd.f32 %v2468_v39, %v11250_v61  ;;  %v12087_v54 = vpop.f32.mrf.mxu1  ;;  %3554 = vmatprep.mubr.f32.mxu0 %v16719_v4  ;;  %5255 = vperm.xlu1 %9657, %v9679_v5   ;;  %v16831_v1 = vand.u32 4294901760, %v12027_v38  ;;  %v3205_v61 = vsel %vm844_vm4, %v12079_v44, 0 }
 0x2a1   : > { %v2470_v45 = vpop.f32.mrf.mxu0  ;;  %5264 = vperm.xlu0 %9658, %v9680_v18   ;;  %v12121_v15 = vsub.f32 %v3205_v61, %v3205_v61  ;;  %v12139_v61 = vsel %vm3052_vm12, 1.0, %v16719_v4 }
 0x2a2   : > { %16830 = vst [vmem:[#allocation103_spill] sm:$0xff] %v12084_v51  ;;  %v3569_v57 = vsub.f32 %v12027_v38, %v16831_v1  ;;  %v12100_v59 = vadd.f32 %v12007_v35, %v2469_v21  ;;  %v2471_v39 = vadd.f32 %v2470_v45, %v11257_v48  ;;  %v12103_v26 = vpop.f32.mrf.mxu1  ;;  %9350 = vmatmul.mubr.msk.f32.gmra.mxu1 %vm844_vm4, %v12015_v62  ;;  %v12111_v1 = vsel %vm3051_vm11, 1.0, %v16719_v4  ;;  %v9681_v45 = vld [vmem:[%s9956_s30 + $0xa8] sm:$0xff] }
 0x2a3   : > { %v2475_v5 = vpop.f32.mrf.mxu0  ;;  %3560 = vmatmul.mubr.f32.gmra.mxu0 %v3559_v10  ;;  %3902 = vmatprep.mubr.f32.mxu1 %v16719_v4  ;;  %v16834_v10 = vand.u32 4294901760, %v12059_v56  ;;  %v16263_v51 = vand.u32 4294901760, %v12091_v47  ;;  %16836 = vst [vmem:[#allocation107_spill] sm:$0xff] %v12139_v61 }
 0x2a4   : > { %16832 = vst [vmem:[#allocation104_spill] sm:$0xff] %v12100_v59  ;;  %v12116_v48 = vadd.f32 %v12023_v33, %v2471_v39  ;;  %v2476_v35 = vadd.f32 %v2475_v5, %v11262_v50  ;;  %v2782_v21 = vpop.f32.mrf.mxu1  ;;  %3565 = vmatprep.mubr.f32.mxu0 %v16719_v4  ;;  %5261 = vperm.xlu1 %9657, %v9681_v45   ;;  %v3570_v20 = vand.u32 4294901760, %v3569_v57  ;;  %v3208_v33 = vsel %vm844_vm4, %v12111_v1, 0  ;;  %v9682_v57 = vld [vmem:[%s9956_s30 + $0xc0] sm:$0xff] }
 0x2a5   : > { %v2477_v18 = vpop.f32.mrf.mxu0  ;;  %v3580_v59 = vsub.f32 %v12059_v56, %v16834_v10  ;;  %5270 = vperm.xlu0 %9658, %v9682_v57   ;;  %v12148_v10 = vsub.f32 %v3208_v33, %v3208_v33 }
 0x2a6   : > { %16833 = vst [vmem:[#allocation105_spill] sm:$0xff] %v12116_v48  ;;  %v12130_v50 = vadd.f32 %v12039_v8, %v2476_v35  ;;  %v2478_v39 = vadd.f32 %v2477_v18, %v11270_v37  ;;  %v2787_v5 = vpop.f32.mrf.mxu1  ;;  %9351 = vmatmul.mubr.msk.f32.gmra.mxu1 %vm844_vm4, %v12047_v24  ;;  %v9683_v18 = vld [vmem:[%s9956_s30 + $0xb8] sm:$0xff] }
 0x2a7   : > { %v2482_v45 = vpop.f32.mrf.mxu0  ;;  %3571 = vmatmul.mubr.f32.gmra.mxu0 %v3570_v20  ;;  %3909 = vmatprep.mubr.f32.mxu1 %v16719_v4  ;;  %v3581_v57 = vand.u32 4294901760, %v3580_v59  ;;  %v3591_v20 = vsub.f32 %v12091_v47, %v16263_v51  ;;  %v9684_v59 = vld [vmem:[%s9956_s30 + $0xd0] sm:$0xff] }
 0x2a8   : > { %16835 = vst [vmem:[#allocation106_spill] sm:$0xff] %v12130_v50  ;;  %v12143_v8 = vadd.f32 %v12055_v55, %v2478_v39  ;;  %v2483_v37 = vadd.f32 %v2482_v45, %v11275_v22  ;;  %v2789_v35 = vpop.f32.mrf.mxu1  ;;  %3576 = vmatprep.mubr.f32.mxu0 %v16719_v4  ;;  %5267 = vperm.xlu1 %9657, %v9683_v18   ;;  %v3211_v39 = vsel %vm844_vm4, %v12139_v61, 0 }
 0x2a9   : > { %v2484_v49 = vpop.f32.mrf.mxu0  ;;  %5276 = vperm.xlu0 %9658, %v9684_v59   ;;  %v16840_v59 = vand.u32 4294901760, %v12121_v15 }
 0x2aa   : > { %16837 = vst [vmem:[#allocation108_spill] sm:$0xff] %v12143_v8  ;;  %v12157_v22 = vadd.f32 %v12071_v53, %v2483_v37  ;;  %v2485_v45 = vadd.f32 %v2484_v49, %v11286_v3  ;;  %v2794_v18 = vpop.f32.mrf.mxu1  ;;  %9352 = vmatmul.mubr.msk.f32.gmra.mxu1 %vm844_vm4, %v12079_v44  ;;  %v9685_v3 = vld [vmem:[%s9956_s30 + $0xc8] sm:$0xff]  ;;  %v12170_v37 = vsub.f32 %v3211_v39, %v3211_v39  ;;  %v16264_v8 = vand.u32 4294901760, %v12148_v10  ;;  %v9686_v39 = vld [vmem:[%s9956_s30 + $0xe0] sm:$0xff] }
 0x2ab   : > { %v2489_v33 = vpop.f32.mrf.mxu0  ;;  %3582 = vmatmul.mubr.f32.gmra.mxu0 %v3581_v57  ;;  %3916 = vmatprep.mubr.f32.mxu1 %v16719_v4  ;;  %v3602_v57 = vsub.f32 %v12121_v15, %v16840_v59 }
 0x2ac   : > { %16838 = vst [vmem:[#allocation109_spill] sm:$0xff] %v12157_v22  ;;  %v12165_v51 = vadd.f32 %v12087_v54, %v2485_v45  ;;  %v2490_v55 = vadd.f32 %v2489_v33, %v11293_v30  ;;  %v2796_v53 = vpop.f32.mrf.mxu1  ;;  %3587 = vmatprep.mubr.f32.mxu0 %v16719_v4  ;;  %5273 = vperm.xlu1 %9657, %v9685_v3   ;;  %v3592_v22 = vand.u32 4294901760, %v3591_v20 }
 0x2ad   : > { %v2491_v49 = vpop.f32.mrf.mxu0  ;;  %5282 = vperm.xlu0 %9658, %v9686_v39  }
 0x2ae   : > { %16839 = vst [vmem:[#allocation110_spill] sm:$0xff] %v12165_v51  ;;  %v12177_v54 = vadd.f32 %v12103_v26, %v2490_v55  ;;  %v2492_v30 = vadd.f32 %v2491_v49, %v11304_v11  ;;  %v2801_v45 = vpop.f32.mrf.mxu1  ;;  %9353 = vmatmul.mubr.msk.f32.gmra.mxu1 %vm844_vm4, %v12111_v1  ;;  %v9687_v26 = vld [vmem:[%s9956_s30 + $0xd8] sm:$0xff]  ;;  %v3603_v55 = vand.u32 4294901760, %v3602_v57  ;;  %v3613_v49 = vsub.f32 %v12148_v10, %v16264_v8 }
 0x2af   : > { %v2496_v33 = vpop.f32.mrf.mxu0  ;;  %3593 = vmatmul.mubr.f32.gmra.mxu0 %v3592_v22  ;;  %3923 = vmatprep.mubr.f32.mxu1 %v16719_v4  ;;  %v16265_v22 = vand.u32 4294901760, %v12170_v37 }
 0x2b0   : > { %16841 = vst [vmem:[#allocation111_spill] sm:$0xff] %v12177_v54  ;;  %v12184_v20 = vadd.f32 %v2782_v21, %v2492_v30  ;;  %v2497_v3 = vadd.f32 %v2496_v33, %v11313_v31  ;;  %v2803_v59 = vpop.f32.mrf.mxu1  ;;  %3598 = vmatprep.mubr.f32.mxu0 %v16719_v4  ;;  %5279 = vperm.xlu1 %9657, %v9687_v26   ;;  %v9688_v31 = vld [vmem:[%s9956_s30 + $0xf0] sm:$0xff] }
 0x2b1   : > { %v2498_v11 = vpop.f32.mrf.mxu0  ;;  %5288 = vperm.xlu0 %9658, %v9688_v31  }
 0x2b2   : > { %16842 = vst [vmem:[#allocation112_spill] sm:$0xff] %v12184_v20  ;;  %v12193_v39 = vadd.f32 %v2787_v5, %v2497_v3  ;;  %v2499_v21 = vadd.f32 %v2498_v11, %v11326_v25  ;;  %v2808_v30 = vpop.f32.mrf.mxu1  ;;  %9354 = vmatmul.mubr.msk.f32.gmra.mxu1 %vm844_vm4, %v12139_v61  ;;  %v9689_v5 = vld [vmem:[%s9956_s30 + $0xe8] sm:$0xff]  ;;  %v3614_v3 = vand.u32 4294901760, %v3613_v49  ;;  %v3624_v11 = vsub.f32 %v12170_v37, %v16265_v22 }
 0x2b3   : > { %v2503_v33 = vpop.f32.mrf.mxu0  ;;  %3604 = vmatmul.mubr.f32.gmra.mxu0 %v3603_v55  ;;  %4322 = vmatprep.mubr.f32.mxu1 %v16719_v4  ;;  %v16849_v22 = vld [vmem:[#allocation59_spill] sm:$0xff] }
 0x2b4   : > { %16843 = vst [vmem:[#allocation113_spill] sm:$0xff] %v12193_v39  ;;  %v12200_v57 = vadd.f32 %v2789_v35, %v2499_v21  ;;  %v2504_v26 = vadd.f32 %v2503_v33, %v11341_v23  ;;  %v2810_v8 = vpop.f32.mrf.mxu1  ;;  %3609 = vmatprep.mubr.f32.mxu0 %v16719_v4  ;;  %5285 = vperm.xlu1 %9657, %v9689_v5   ;;  %v16846_v21 = vand.u32 4294901760, %v11306_v36  ;;  %v16913_v39 = vld [vmem:[#allocation17_spill] sm:$0xff]  ;;  %v16922_v61 = vld [vmem:[#allocation79_spill] sm:$0xff] }
 0x2b5   : > { %v2505_v25 = vpop.f32.mrf.mxu0 }
 0x2b6   : > { %16844 = vst [vmem:[#allocation114_spill] sm:$0xff] %v12200_v57  ;;  %v12208_v31 = vadd.f32 %v2794_v18, %v2504_v26  ;;  %v2506_v55 = vadd.f32 %v2505_v25, %v11352_v58  ;;  %v2815_v35 = vpop.f32.mrf.mxu1  ;;  %4326 = vmatmul.mubr.f32.vlgmr.msra.gmra.mxu1 %v16846_v21  ;;  %v3625_v26 = vand.u32 4294901760, %v3624_v11  ;;  %v9690_v58 = vld [vmem:[%s9956_s30 + $0xf8] sm:$0xff] }
 0x2b7   : > { %v2510_v23 = vpop.f32.mrf.mxu0  ;;  %3615 = vmatmul.mubr.f32.gmra.mxu0 %v3614_v3  ;;  %4331 = vmatprep.mubr.f32.mxu1 %v16719_v4 }
 0x2b8   : > { %16845 = vst [vmem:[#allocation115_spill] sm:$0xff] %v12208_v31  ;;  %v12214_v33 = vadd.f32 %v2796_v53, %v2506_v55  ;;  %v2511_v49 = vadd.f32 %v2510_v23, %v11369_v46  ;;  %v2817_v5 = vpop.f32.mrf.mxu1  ;;  %3620 = vmatprep.mubr.f32.mxu0 %v16719_v4  ;;  %4939 = vmatpush1.msra.mxu1 %v10916_v27  ;;  %v16850_v31 = vand.u32 4294901760, %v16849_v22  ;;  %v16852_v55 = vld [vmem:[#allocation40_spill] sm:$0xff] }
 0x2b9   : > { %v2512_v18 = vpop.f32.mrf.mxu0  ;;  %5291 = vperm.xlu1 %9657, %v9690_v58   ;;  %v16855_v58 = vld [vmem:[#allocation61_spill] sm:$0xff] }
 0x2ba   : > { %16847 = vst [vmem:[#allocation116_spill] sm:$0xff] %v12214_v33  ;;  %v12220_v25 = vadd.f32 %v2801_v45, %v2511_v49  ;;  %v2513_v21 = vadd.f32 %v2512_v18, %v11385_v43  ;;  %v2822_v3 = vpop.f32.mrf.mxu1  ;;  %4335 = vmatmul.mubr.f32.gmra.mxu1 %v16850_v31  ;;  %v16854_v49 = vld [vmem:[#allocation42_spill] sm:$0xff] }
 0x2bb   : > { %v2517_v53 = vpop.f32.mrf.mxu0  ;;  %3626 = vmatmul.mubr.f32.gmra.mxu0 %v3625_v26  ;;  %4340 = vmatprep.mubr.f32.mxu1 %v16719_v4  ;;  %v16858_v26 = vld [vmem:[#allocation22_spill] sm:$0xff] }
 0x2bc   : > { %16848 = vst [vmem:[#allocation117_spill] sm:$0xff] %v12220_v25  ;;  %v12226_v46 = vadd.f32 %v2803_v59, %v2513_v21  ;;  %v2518_v27 = vadd.f32 %v2517_v53, %v16852_v55  ;;  %v2824_v23 = vpop.f32.mrf.mxu1  ;;  %3999 = vmatprep.mubr.f32.mxu0 %v16719_v4  ;;  %v16856_v25 = vand.u32 4294901760, %v16855_v58 }
 0x2bd   : > { %v2519_v11 = vpop.f32.mrf.mxu0 }
 0x2be   : > { %16851 = vst [vmem:[#allocation59_spill] sm:$0xff] %v12226_v46  ;;  %v12230_v45 = vadd.f32 %v2808_v30, %v2518_v27  ;;  %v2520_v43 = vadd.f32 %v2519_v11, %v16854_v49  ;;  %v2829_v18 = vpop.f32.mrf.mxu1  ;;  %4344 = vmatmul.mubr.f32.gmra.mxu1 %v16856_v25  ;;  %v16859_v30 = vld [vmem:[#allocation36_spill] sm:$0xff]  ;;  %v16863_v46 = vld [vmem:[#allocation62_spill] sm:$0xff] }
 0x2bf   : > { %v2524_v31 = vpop.f32.mrf.mxu0  ;;  %4002 = vmatmul.mubr.f32.vlgmr.msra.gmra.mxu0 %v11306_v36  ;;  %4349 = vmatprep.mubr.f32.mxu1 %v16719_v4  ;;  %v16860_v55 = vand.u32 4294901760, %v16859_v30  ;;  %v16862_v49 = vld [vmem:[#allocation24_spill] sm:$0xff]  ;;  %v16864_v36 = vand.u32 4294901760, %v16863_v46  ;;  %v16868_v30 = vld [vmem:[#allocation23_spill] sm:$0xff] }
 0x2c0   : > { %16853 = vst [vmem:[#allocation40_spill] sm:$0xff] %v12230_v45  ;;  %v12237_v59 = vadd.f32 %v2810_v8, %v2520_v43  ;;  %v2525_v21 = vadd.f32 %v2524_v31, %v16858_v26  ;;  %v2831_v53 = vpop.f32.mrf.mxu1  ;;  %4007 = vmatprep.mubr.f32.mxu0 %v16719_v4  ;;  %v16866_v43 = vld [vmem:[#allocation21_spill] sm:$0xff] }
 0x2c1   : > { %4648 = vmatpush1.msra.mxu0 %v16860_v55  ;;  %v2526_v27 = vpop.f32.mrf.mxu0 }
 0x2c2   : > { %16857 = vst [vmem:[#allocation42_spill] sm:$0xff] %v12237_v59  ;;  %v12243_v11 = vadd.f32 %v2815_v35, %v2525_v21  ;;  %v2527_v25 = vadd.f32 %v2526_v27, %v16862_v49  ;;  %v2836_v45 = vpop.f32.mrf.mxu1  ;;  %4353 = vmatmul.mubr.f32.gmra.mxu1 %v16864_v36  ;;  %v16869_v49 = vld [vmem:[#allocation63_spill] sm:$0xff]  ;;  %v16912_v59 = vld [vmem:[#allocation20_spill] sm:$0xff] }
 0x2c3   : > { %v2531_v33 = vpop.f32.mrf.mxu0  ;;  %4010 = vmatmul.mubr.f32.gmra.mxu0 %v16849_v22  ;;  %4358 = vmatprep.mubr.f32.mxu1 %v16719_v4  ;;  %v16870_v36 = vand.u32 4294901760, %v16869_v49 }
 0x2c4   : > { %16861 = vst [vmem:[#allocation61_spill] sm:$0xff] %v12243_v11  ;;  %v12250_v8 = vadd.f32 %v2817_v5, %v2527_v25  ;;  %v2532_v31 = vadd.f32 %v2531_v33, %v16866_v43  ;;  %v2838_v26 = vpop.f32.mrf.mxu1  ;;  %4015 = vmatprep.mubr.f32.mxu0 %v16719_v4  ;;  %v16872_v33 = vld [vmem:[#allocation25_spill] sm:$0xff] }
 0x2c5   : > { %v2533_v35 = vpop.f32.mrf.mxu0 }
 0x2c6   : > { %16865 = vst [vmem:[#allocation22_spill] sm:$0xff] %v12250_v8  ;;  %v12254_v21 = vadd.f32 %v2822_v3, %v2532_v31  ;;  %v2534_v55 = vadd.f32 %v2533_v35, %v16868_v30  ;;  %v2843_v27 = vpop.f32.mrf.mxu1  ;;  %4362 = vmatmul.mubr.f32.gmra.mxu1 %v16870_v36  ;;  %v16874_v31 = vld [vmem:[#allocation26_spill] sm:$0xff] }
 0x2c7   : > { %v2538_v11 = vpop.f32.mrf.mxu0  ;;  %4018 = vmatmul.mubr.f32.gmra.mxu0 %v16855_v58  ;;  %4367 = vmatprep.mubr.f32.mxu1 %v16719_v4  ;;  %v16878_v58 = vld [vmem:[#allocation44_spill] sm:$0xff] }
 0x2c8   : > { %16867 = vst [vmem:[#allocation36_spill] sm:$0xff] %v12254_v21  ;;  %v12261_v22 = vadd.f32 %v2824_v23, %v2534_v55  ;;  %v2539_v5 = vadd.f32 %v2538_v11, %v16872_v33  ;;  %v2845_v25 = vpop.f32.mrf.mxu1  ;;  %4023 = vmatprep.mubr.f32.mxu0 %v16719_v4  ;;  %v16875_v21 = vld [vmem:[#allocation65_spill] sm:$0xff] }
 0x2c9   : > { %v2540_v3 = vpop.f32.mrf.mxu0  ;;  %v16876_v36 = vand.u32 4294901760, %v16875_v21 }
 0x2ca   : > { %16871 = vst [vmem:[#allocation24_spill] sm:$0xff] %v12261_v22  ;;  %v12265_v43 = vadd.f32 %v2829_v18, %v2539_v5  ;;  %v2541_v35 = vadd.f32 %v2540_v3, %v16874_v31  ;;  %v2850_v30 = vpop.f32.mrf.mxu1  ;;  %v16880_v5 = vld [vmem:[#allocation27_spill] sm:$0xff] }
 0x2cb   : > { %4371 = vmatmul.mubr.f32.gmra.mxu1 %v16876_v36  ;;  %v2545_v8 = vpop.f32.mrf.mxu0  ;;  %4026 = vmatmul.mubr.f32.gmra.mxu0 %v16863_v46 }
 0x2cc   : > { %16873 = vst [vmem:[#allocation62_spill] sm:$0xff] %v12265_v43  ;;  %4376 = vmatprep.mubr.f32.mxu1 %v16719_v4  ;;  %v12272_v23 = vadd.f32 %v2831_v53, %v2541_v35  ;;  %v2546_v11 = vadd.f32 %v2545_v8, %v16878_v58  ;;  %v2852_v55 = vpop.f32.mrf.mxu1  ;;  %4031 = vmatprep.mubr.f32.mxu0 %v16719_v4  ;;  %v16881_v43 = vld [vmem:[#allocation67_spill] sm:$0xff]  ;;  %v16884_v53 = vld [vmem:[#allocation45_spill] sm:$0xff] }
 0x2cd   : > { %v2547_v18 = vpop.f32.mrf.mxu0  ;;  %v16882_v36 = vand.u32 4294901760, %v16881_v43 }
 0x2ce   : > { %16877 = vst [vmem:[#allocation21_spill] sm:$0xff] %v12272_v23  ;;  %v12276_v33 = vadd.f32 %v2836_v45, %v2546_v11  ;;  %v2548_v3 = vadd.f32 %v2547_v18, %v16880_v5  ;;  %v2857_v31 = vpop.f32.mrf.mxu1  ;;  %v16886_v11 = vld [vmem:[#allocation28_spill] sm:$0xff] }
 0x2cf   : > { %4380 = vmatmul.mubr.f32.gmra.mxu1 %v16882_v36  ;;  %v2552_v22 = vpop.f32.mrf.mxu0  ;;  %4034 = vmatmul.mubr.f32.gmra.mxu0 %v16869_v49  ;;  %v16890_v49 = vld [vmem:[#allocation46_spill] sm:$0xff] }
 0x2d0   : > { %16879 = vst [vmem:[#allocation23_spill] sm:$0xff] %v12276_v33  ;;  %4385 = vmatprep.mubr.f32.mxu1 %v16719_v4  ;;  %v12283_v46 = vadd.f32 %v2838_v26, %v2548_v3  ;;  %v2553_v8 = vadd.f32 %v2552_v22, %v16884_v53  ;;  %v2859_v35 = vpop.f32.mrf.mxu1  ;;  %4039 = vmatprep.mubr.f32.mxu0 %v16719_v4  ;;  %v16887_v33 = vld [vmem:[#allocation69_spill] sm:$0xff] }
 0x2d1   : > { %v2554_v45 = vpop.f32.mrf.mxu0  ;;  %v16888_v36 = vand.u32 4294901760, %v16887_v33 }
 0x2d2   : > { %16883 = vst [vmem:[#allocation63_spill] sm:$0xff] %v12283_v46  ;;  %v12287_v58 = vadd.f32 %v2843_v27, %v2553_v8  ;;  %v2555_v18 = vadd.f32 %v2554_v45, %v16886_v11  ;;  %v2864_v5 = vpop.f32.mrf.mxu1  ;;  %v16892_v8 = vld [vmem:[#allocation29_spill] sm:$0xff] }
 0x2d3   : > { %4389 = vmatmul.mubr.f32.gmra.mxu1 %v16888_v36  ;;  %v2559_v23 = vpop.f32.mrf.mxu0  ;;  %4042 = vmatmul.mubr.f32.gmra.mxu0 %v16875_v21 }
 0x2d4   : > { %16885 = vst [vmem:[#allocation25_spill] sm:$0xff] %v12287_v58  ;;  %4394 = vmatprep.mubr.f32.mxu1 %v16719_v4  ;;  %v12294_v26 = vadd.f32 %v2845_v25, %v2555_v18  ;;  %v2560_v22 = vadd.f32 %v2559_v23, %v16890_v49  ;;  %v2866_v3 = vpop.f32.mrf.mxu1  ;;  %4047 = vmatprep.mubr.f32.mxu0 %v16719_v4  ;;  %v16893_v58 = vld [vmem:[#allocation71_spill] sm:$0xff] }
 0x2d5   : > { %v2561_v27 = vpop.f32.mrf.mxu0  ;;  %v16894_v36 = vand.u32 4294901760, %v16893_v58  ;;  %v16896_v25 = vld [vmem:[#allocation47_spill] sm:$0xff] }
 0x2d6   : > { %16889 = vst [vmem:[#allocation26_spill] sm:$0xff] %v12294_v26  ;;  %v12298_v53 = vadd.f32 %v2850_v30, %v2560_v22  ;;  %v2562_v45 = vadd.f32 %v2561_v27, %v16892_v8  ;;  %v2871_v11 = vpop.f32.mrf.mxu1  ;;  %v16898_v22 = vld [vmem:[#allocation30_spill] sm:$0xff] }
 0x2d7   : > { %4398 = vmatmul.mubr.f32.gmra.mxu1 %v16894_v36  ;;  %v2566_v46 = vpop.f32.mrf.mxu0  ;;  %4050 = vmatmul.mubr.f32.gmra.mxu0 %v16881_v43 }
 0x2d8   : > { %16891 = vst [vmem:[#allocation65_spill] sm:$0xff] %v12298_v53  ;;  %4403 = vmatprep.mubr.f32.mxu1 %v16719_v4  ;;  %v12305_v21 = vadd.f32 %v2852_v55, %v2562_v45  ;;  %v2567_v23 = vadd.f32 %v2566_v46, %v16896_v25  ;;  %v2873_v18 = vpop.f32.mrf.mxu1  ;;  %4055 = vmatprep.mubr.f32.mxu0 %v16719_v4  ;;  %v16899_v53 = vld [vmem:[#allocation73_spill] sm:$0xff]  ;;  %v16902_v55 = vld [vmem:[#allocation48_spill] sm:$0xff] }
 0x2d9   : > { %v2568_v30 = vpop.f32.mrf.mxu0  ;;  %v16900_v36 = vand.u32 4294901760, %v16899_v53 }
 0x2da   : > { %16895 = vst [vmem:[#allocation44_spill] sm:$0xff] %v12305_v21  ;;  %v12309_v49 = vadd.f32 %v2857_v31, %v2567_v23  ;;  %v2569_v27 = vadd.f32 %v2568_v30, %v16898_v22  ;;  %v2878_v8 = vpop.f32.mrf.mxu1  ;;  %v16904_v23 = vld [vmem:[#allocation31_spill] sm:$0xff]  ;;  %v16907_v21 = vld [vmem:[#allocation16_spill] sm:$0xff] }
 0x2db   : > { %4407 = vmatmul.mubr.f32.gmra.mxu1 %v16900_v36  ;;  %v2573_v26 = vpop.f32.mrf.mxu0  ;;  %4058 = vmatmul.mubr.f32.gmra.mxu0 %v16887_v33  ;;  %v12326_v33 = vsub.s32 2, %v16907_v21 }
 0x2dc   : > { %16897 = vst [vmem:[#allocation27_spill] sm:$0xff] %v12309_v49  ;;  %4412 = vmatprep.mubr.f32.mxu1 %v16719_v4  ;;  %v12316_v43 = vadd.f32 %v2859_v35, %v2569_v27  ;;  %v2574_v46 = vadd.f32 %v2573_v26, %v16902_v55  ;;  %v2880_v45 = vpop.f32.mrf.mxu1  ;;  %4063 = vmatprep.mubr.f32.mxu0 %v16719_v4  ;;  %v16905_v49 = vld [vmem:[#allocation75_spill] sm:$0xff]  ;;  %v546_v35 = vsub.s32 6, %v16907_v21 }
 0x2dd   : > { %v2575_v31 = vpop.f32.mrf.mxu0  ;;  %v16906_v36 = vand.u32 4294901760, %v16905_v49 }
 0x2de   : > { %16901 = vst [vmem:[#allocation67_spill] sm:$0xff] %v12316_v43  ;;  %v12320_v25 = vadd.f32 %v2864_v5, %v2574_v46  ;;  %v2576_v30 = vadd.f32 %v2575_v31, %v16904_v23  ;;  %v2885_v22 = vpop.f32.mrf.mxu1  ;;  %v16909_v5 = vld [vmem:[#allocation49_spill] sm:$0xff]  ;;  %v16910_v31 = vld [vmem:[#allocation18_spill] sm:$0xff]  ;;  %v585_v57 = vrot.slane %v16912_v59, %v546_v35  ;;  %v603_v20 = vrot.slane %v16913_v39, %v546_v35 }
 0x2df   : > { %4416 = vmatmul.mubr.f32.gmra.mxu1 %v16906_v36  ;;  %v2580_v27 = vpop.f32.mrf.mxu0  ;;  %4066 = vmatmul.mubr.f32.gmra.mxu0 %v16893_v58  ;;  %v547_v23 = vrot.slane %v16910_v31, %v546_v35  ;;  %v16911_v36 = vld [vmem:[#allocation19_spill] sm:$0xff]  ;;  %v16915_v58 = vld [vmem:[#allocation32_spill] sm:$0xff] }
 0x2e0   : > { %16903 = vst [vmem:[#allocation45_spill] sm:$0xff] %v12320_v25  ;;  %4421 = vmatprep.mubr.f32.mxu1 %v16719_v4  ;;  %v12331_v26 = vadd.f32 %v2866_v3, %v2576_v30  ;;  %v2581_v55 = vadd.f32 %v2580_v27, %v16909_v5  ;;  %v2887_v46 = vpop.f32.mrf.mxu1  ;;  %4071 = vmatprep.mubr.f32.mxu0 %v16719_v4  ;;  %v16916_v30 = vld [vmem:[#allocation77_spill] sm:$0xff] }
 0x2e1   : > { %v565_v25 = vrot.slane %v16911_v36, %v546_v35  ;;  %v2582_v43 = vpop.f32.mrf.mxu0  ;;  %v555_v27 = vrot.slane %v547_v23, %v12326_v33  ;;  %v593_v48 = vrot.slane %v585_v57, %v12326_v33  ;;  %v16921_v23 = vld [vmem:[#allocation33_spill] sm:$0xff] }
 0x2e2   : > { %16908 = vst [vmem:[#allocation28_spill] sm:$0xff] %v12331_v26  ;;  %v12339_v54 = vadd.f32 %v2871_v11, %v2581_v55  ;;  %v2583_v51 = vadd.f32 %v2582_v43, %v16915_v58  ;;  %v2892_v3 = vpop.f32.mrf.mxu1  ;;  %v16917_v26 = vand.u32 4294901760, %v16916_v30  ;;  %v613_v11 = vrot.slane %v603_v20, %v12326_v33  ;;  %v16919_v43 = vld [vmem:[#allocation50_spill] sm:$0xff] }
 0x2e3   : > { %v575_v5 = vrot.slane %v565_v25, %v12326_v33  ;;  %v2587_v50 = vpop.f32.mrf.mxu0  ;;  %4074 = vmatmul.mubr.f32.gmra.mxu0 %v16899_v53  ;;  %vm557_vm13 = vcmp.eq.s32.totalorder %v16907_v21, %v555_v27  ;;  %vm595_vm14 = vcmp.eq.s32.totalorder %v16907_v21, %v593_v48  ;;  %v16923_v20 = vand.u32 4294901760, %v16922_v61 }
 0x2e4   : > { %16914 = vst [vmem:[#allocation69_spill] sm:$0xff] %v12339_v54  ;;  %4425 = vmatmul.mubr.f32.gmra.mxu1 %v16917_v26  ;;  %v12350_v35 = vadd.f32 %v2873_v18, %v2583_v51  ;;  %v2588_v55 = vadd.f32 %v2587_v50, %v16919_v43  ;;  %v2894_v58 = vpop.f32.mrf.mxu1  ;;  %4079 = vmatprep.mubr.f32.mxu0 %v16719_v4  ;;  %v615_v51 = vsel %vm595_vm14, %v613_v11, 0.0 }
 0x2e5   : > { %4430 = vmatprep.mubr.f32.mxu1 %v16719_v4  ;;  %v2589_v26 = vpop.f32.mrf.mxu0  ;;  %v577_v25 = vsel %vm557_vm13, %v575_v5, 0.0  ;;  %v16925_v5 = vld [vmem:[#allocation51_spill] sm:$0xff] }
 0x2e6   : > { %16918 = vst [vmem:[#allocation46_spill] sm:$0xff] %v12350_v35  ;;  %v12356_v53 = vadd.f32 %v2878_v8, %v2588_v55  ;;  %v2590_v54 = vadd.f32 %v2589_v26, %v16921_v23  ;;  %v2899_v57 = vpop.f32.mrf.mxu1  ;;  %v617_v50 = vadd.f32 %v615_v51, %v577_v25  ;;  %v16927_v23 = vld [vmem:[#allocation35_spill] sm:$0xff]  ;;  %v16932_v25 = vld [vmem:[#allocation52_spill] sm:$0xff] }
 0x2e7   : > { %v2594_v18 = vpop.f32.mrf.mxu0  ;;  %4082 = vmatmul.mubr.f32.gmra.mxu0 %v16905_v49 }
 0x2e8   : > { %16920 = vst [vmem:[#allocation29_spill] sm:$0xff] %v12356_v53  ;;  %4434 = vmatmul.mubr.f32.gmra.mxu1 %v16923_v20  ;;  %v12363_v27 = vadd.f32 %v2880_v45, %v2590_v54  ;;  %v2595_v43 = vadd.f32 %v2594_v18, %v16925_v5  ;;  %v2901_v48 = vpop.f32.mrf.mxu1  ;;  %4087 = vmatprep.mubr.f32.mxu0 %v16719_v4  ;;  %v12367_v55 = vand.u32 4294901760, %v617_v50  ;;  %v16928_v53 = vld [vmem:[#allocation81_spill] sm:$0xff] }
 0x2e9   : > { %4439 = vmatprep.mubr.f32.mxu1 %v16719_v4  ;;  %v2596_v8 = vpop.f32.mrf.mxu0  ;;  %v16929_v49 = vand.u32 4294901760, %v16928_v53 }
 0x2ea   : > { %16924 = vst [vmem:[#allocation71_spill] sm:$0xff] %v12363_v27  ;;  %v12369_v26 = vadd.f32 %v2885_v22, %v2595_v43  ;;  %v2597_v11 = vadd.f32 %v2596_v8, %v16927_v23  ;;  %v2906_v20 = vpop.f32.mrf.mxu1  ;;  %v12377_v54 = vsub.f32 %v617_v50, %v12367_v55  ;;  %5516 = vmatprep.subr.mxu0 %v12367_v55  ;;  %v16934_v23 = vld [vmem:[#allocation83_spill] sm:$0xff] }
 0x2eb   : > { %v2601_v35 = vpop.f32.mrf.mxu0  ;;  %4090 = vmatmul.mubr.f32.gmra.mxu0 %v16916_v30  ;;  %v16935_v50 = vand.u32 4294901760, %v16934_v23 }
 0x2ec   : > { %16926 = vst [vmem:[#allocation47_spill] sm:$0xff] %v12369_v26  ;;  %4443 = vmatmul.mubr.f32.gmra.mxu1 %v16929_v49  ;;  %16930 = vst [vmem:[#allocation30_spill] sm:$0xff] %v12377_v54  ;;  %v12379_v45 = vadd.f32 %v2887_v46, %v2597_v11  ;;  %v2602_v51 = vadd.f32 %v2601_v35, %v16932_v25  ;;  %v2908_v22 = vpop.f32.mrf.mxu1  ;;  %4095 = vmatprep.mubr.f32.mxu0 %v16719_v4  ;;  %v16268_v5 = vand.u32 4294901760, %v12377_v54  ;;  %v16937_v49 = vld [vmem:[#allocation53_spill] sm:$0xff] }
 0x2ed   : > { %4448 = vmatprep.mubr.f32.mxu1 %v16719_v4  ;;  %v2603_v18 = vpop.f32.mrf.mxu0 }
 0x2ee   : > { %16931 = vst [vmem:[#allocation73_spill] sm:$0xff] %v12379_v45  ;;  %v12385_v43 = vadd.f32 %v2892_v3, %v2602_v51  ;;  %v2604_v30 = vadd.f32 %v2603_v18, %v11715_v29  ;;  %v2913_v8 = vpop.f32.mrf.mxu1  ;;  %v5937_v35 = vsub.f32 %v12377_v54, %v16268_v5  ;;  %v16940_v45 = vld [vmem:[#allocation85_spill] sm:$0xff] }
 0x2ef   : > { %v2608_v46 = vpop.f32.mrf.mxu0  ;;  %4098 = vmatmul.mubr.f32.gmra.mxu0 %v16922_v61  ;;  %v16941_v26 = vand.u32 4294901760, %v16940_v45 }
 0x2f0   : > { %16933 = vst [vmem:[#allocation48_spill] sm:$0xff] %v12385_v43  ;;  %4452 = vmatmul.mubr.f32.gmra.mxu1 %v16935_v50  ;;  %v12395_v11 = vadd.f32 %v2894_v58, %v2604_v30  ;;  %v2609_v3 = vadd.f32 %v2608_v46, %v16937_v49  ;;  %v2915_v25 = vpop.f32.mrf.mxu1  ;;  %4103 = vmatprep.mubr.f32.mxu0 %v16719_v4  ;;  %v5938_v51 = vand.u32 4294901760, %v5937_v35  ;;  %v16939_v50 = vld [vmem:[#allocation39_spill] sm:$0xff]  ;;  %v16943_v30 = vld [vmem:[#allocation88_spill] sm:$0xff] }
 0x2f1   : > { %4457 = vmatprep.mubr.f32.mxu1 %v16719_v4  ;;  %v2610_v29 = vpop.f32.mrf.mxu0 }
 0x2f2   : > { %16936 = vst [vmem:[#allocation31_spill] sm:$0xff] %v12395_v11  ;;  %v12399_v18 = vadd.f32 %v2899_v57, %v2609_v3  ;;  %v2611_v43 = vadd.f32 %v2610_v29, %v16939_v50  ;;  %v2920_v61 = vpop.f32.mrf.mxu1  ;;  %5939 = vmatprep.subr.mxu1 %v5938_v51  ;;  %v16975_v11 = vld [vmem:[#allocation60_spill] sm:$0xff] }
 0x2f3   : > { %v2615_v27 = vpop.f32.mrf.mxu0  ;;  %4106 = vmatmul.mubr.f32.gmra.mxu0 %v16928_v53 }
 0x2f4   : > { %16938 = vst [vmem:[#allocation75_spill] sm:$0xff] %v12399_v18  ;;  %4461 = vmatmul.mubr.f32.gmra.mxu1 %v16941_v26  ;;  %v12406_v58 = vadd.f32 %v2901_v48, %v2611_v43  ;;  %v2616_v46 = vadd.f32 %v2615_v27, %v16943_v30  ;;  %v2922_v49 = vpop.f32.mrf.mxu1  ;;  %4111 = vmatprep.mubr.f32.mxu0 %v16719_v4  ;;  %v16945_v26 = vld [vmem:[#allocation37_spill] sm:$0xff] }
 0x2f5   : > { %4466 = vmatprep.mubr.f32.mxu1 %v16719_v4  ;;  %v2617_v57 = vpop.f32.mrf.mxu0  ;;  %v16946_v50 = vand.u32 4294901760, %v16945_v26  ;;  %v16948_v27 = vld [vmem:[#allocation41_spill] sm:$0xff] }
 0x2f6   : > { %16942 = vst [vmem:[#allocation49_spill] sm:$0xff] %v12406_v58  ;;  %v12410_v35 = vadd.f32 %v2906_v20, %v2616_v46  ;;  %v2618_v3 = vadd.f32 %v2617_v57, %v11768_v60  ;;  %v3709_v29 = vpop.f32.mrf.mxu1  ;;  %v16950_v57 = vand.u32 4294901760, %v11734_v2 }
 0x2f7   : > { %v2622_v53 = vpop.f32.mrf.mxu0  ;;  %4114 = vmatmul.mubr.f32.gmra.mxu0 %v16934_v23  ;;  %v16952_v23 = vld [vmem:[#allocation54_spill] sm:$0xff] }
 0x2f8   : > { %16944 = vst [vmem:[#allocation18_spill] sm:$0xff] %v12410_v35  ;;  %4470 = vmatmul.mubr.f32.gmra.mxu1 %v16946_v50  ;;  %v12417_v48 = vadd.f32 %v2908_v22, %v2618_v3  ;;  %v2623_v43 = vadd.f32 %v2622_v53, %v16948_v27  ;;  %v3711_v30 = vpop.f32.mrf.mxu1  ;;  %4119 = vmatprep.mubr.f32.mxu0 %v16719_v4 }
 0x2f9   : > { %4475 = vmatprep.mubr.f32.mxu1 %v16719_v4  ;;  %v2624_v20 = vpop.f32.mrf.mxu0 }
 0x2fa   : > { %16947 = vst [vmem:[#allocation19_spill] sm:$0xff] %v12417_v48  ;;  %v12421_v51 = vadd.f32 %v2913_v8, %v2623_v43  ;;  %v2625_v60 = vadd.f32 %v2624_v20, %v11800_v7  ;;  %v3716_v46 = vpop.f32.mrf.mxu1  ;;  %v16954_v20 = vand.u32 4294901760, %v11771_v13 }
 0x2fb   : > { %v2629_v50 = vpop.f32.mrf.mxu0  ;;  %4122 = vmatmul.mubr.f32.gmra.mxu0 %v16940_v45 }
 0x2fc   : > { %16949 = vst [vmem:[#allocation20_spill] sm:$0xff] %v12421_v51  ;;  %4479 = vmatmul.mubr.f32.gmra.mxu1 %v16950_v57  ;;  %v12428_v22 = vadd.f32 %v2915_v25, %v2625_v60  ;;  %v2630_v3 = vadd.f32 %v2629_v50, %v16952_v23  ;;  %v3718_v53 = vpop.f32.mrf.mxu1  ;;  %4127 = vmatprep.mubr.f32.mxu0 %v16719_v4  ;;  %v16956_v23 = vand.u32 4294901760, %v11803_v16 }
 0x2fd   : > { %4484 = vmatprep.mubr.f32.mxu1 %v16719_v4  ;;  %v2631_v8 = vpop.f32.mrf.mxu0 }
 0x2fe   : > { %16951 = vst [vmem:[#allocation17_spill] sm:$0xff] %v12428_v22  ;;  %v12432_v27 = vadd.f32 %v2920_v61, %v2630_v3  ;;  %v2632_v7 = vadd.f32 %v2631_v8, %v11832_v12  ;;  %v3723_v43 = vpop.f32.mrf.mxu1 }
 0x2ff   : > { %v3286_v57 = vpop.f32.mrf.mxu0  ;;  %4130 = vmatmul.mubr.f32.gmra.mxu0 %v16945_v26 }
 0x300   : > { %16953 = vst [vmem:[#allocation32_spill] sm:$0xff] %v12432_v27  ;;  %4488 = vmatmul.mubr.f32.gmra.mxu1 %v16954_v20  ;;  %v12439_v45 = vadd.f32 %v2922_v49, %v2632_v7  ;;  %v12441_v25 = vadd.f32 %v3709_v29, %v3286_v57  ;;  %v3725_v60 = vpop.f32.mrf.mxu1  ;;  %4135 = vmatprep.mubr.f32.mxu0 %v16719_v4 }
 0x301   : > { %4493 = vmatprep.mubr.f32.mxu1 %v16719_v4  ;;  %v3288_v61 = vpop.f32.mrf.mxu0 }
 0x302   : > { %16955 = vst [vmem:[#allocation77_spill] sm:$0xff] %v12439_v45  ;;  %v12444_v50 = vadd.f32 %v3711_v30, %v3288_v61  ;;  %v3730_v12 = vpop.f32.mrf.mxu1  ;;  %v16957_v30 = vand.u32 4294901760, %v11835_v0  ;;  %v16961_v45 = vand.u32 4294901760, %v11963_v6 }
 0x303   : > { %v3297_v3 = vpop.f32.mrf.mxu0  ;;  %4138 = vmatmul.mubr.f32.gmra.mxu0 %v11734_v2 }
 0x304   : > { %4497 = vmatmul.mubr.f32.gmra.mxu1 %v16956_v23  ;;  %v12450_v26 = vadd.f32 %v3716_v46, %v3297_v3  ;;  %v3732_v49 = vpop.f32.mrf.mxu1  ;;  %4143 = vmatprep.mubr.f32.mxu0 %v16719_v4 }
 0x305   : > { %4502 = vmatprep.mubr.f32.mxu1 %v16719_v4  ;;  %v3299_v29 = vpop.f32.mrf.mxu0 }
 0x306   : > { %v12453_v8 = vadd.f32 %v3718_v53, %v3299_v29  ;;  %v3737_v7 = vpop.f32.mrf.mxu1  ;;  %v16958_v53 = vand.u32 4294901760, %v11867_v17 }
 0x307   : > { %v3308_v20 = vpop.f32.mrf.mxu0  ;;  %4146 = vmatmul.mubr.f32.gmra.mxu0 %v11771_v13 }
 0x308   : > { %4506 = vmatmul.mubr.f32.gmra.mxu1 %v16957_v30  ;;  %v12459_v2 = vadd.f32 %v3723_v43, %v3308_v20  ;;  %v3739_v57 = vpop.f32.mrf.mxu1  ;;  %4151 = vmatprep.mubr.f32.mxu0 %v16719_v4 }
 0x309   : > { %4511 = vmatprep.mubr.f32.mxu1 %v16719_v4  ;;  %v3310_v46 = vpop.f32.mrf.mxu0 }
 0x30a   : > { %v12462_v61 = vadd.f32 %v3725_v60, %v3310_v46  ;;  %v3744_v23 = vpop.f32.mrf.mxu1  ;;  %v16959_v60 = vand.u32 4294901760, %v11899_v42 }
 0x30b   : > { %v3319_v3 = vpop.f32.mrf.mxu0  ;;  %4154 = vmatmul.mubr.f32.gmra.mxu0 %v11803_v16 }
 0x30c   : > { %4515 = vmatmul.mubr.f32.gmra.mxu1 %v16958_v53  ;;  %v12468_v13 = vadd.f32 %v3730_v12, %v3319_v3  ;;  %v3746_v29 = vpop.f32.mrf.mxu1  ;;  %4159 = vmatprep.mubr.f32.mxu0 %v16719_v4 }
 0x30d   : > { %4520 = vmatprep.mubr.f32.mxu1 %v16719_v4  ;;  %v3321_v43 = vpop.f32.mrf.mxu0 }
 0x30e   : > { %v12471_v30 = vadd.f32 %v3732_v49, %v3321_v43  ;;  %v3751_v20 = vpop.f32.mrf.mxu1  ;;  %v16960_v49 = vand.u32 4294901760, %v11931_v32  ;;  %v543_v43 = vrot.slane %v16910_v31, %v12326_v33  ;;  %v599_v31 = vrot.slane %v16913_v39, %v12326_v33 }
 0x30f   : > { %v3330_v46 = vpop.f32.mrf.mxu0  ;;  %4162 = vmatmul.mubr.f32.gmra.mxu0 %v11835_v0  ;;  %v581_v0 = vrot.slane %v16912_v59, %v12326_v33 }
 0x310   : > { %4524 = vmatmul.mubr.f32.gmra.mxu1 %v16959_v60  ;;  %v12477_v16 = vadd.f32 %v3737_v7, %v3330_v46  ;;  %v3753_v53 = vpop.f32.mrf.mxu1  ;;  %4167 = vmatprep.mubr.f32.mxu0 %v16719_v4 }
 0x311   : > { %4529 = vmatprep.mubr.f32.mxu1 %v16719_v4  ;;  %v3332_v12 = vpop.f32.mrf.mxu0 }
 0x312   : > { %v12480_v3 = vadd.f32 %v3739_v57, %v3332_v12  ;;  %v3758_v5 = vpop.f32.mrf.mxu1  ;;  %v561_v12 = vrot.slane %v16911_v36, %v12326_v33 }
 0x313   : > { %v3341_v60 = vpop.f32.mrf.mxu0  ;;  %4170 = vmatmul.mubr.f32.gmra.mxu0 %v11867_v17  ;;  %v551_v17 = vrot.slane %v543_v43, %v12326_v33 }
 0x314   : > { %4533 = vmatmul.mubr.f32.gmra.mxu1 %v16960_v49  ;;  %v12490_v7 = vadd.f32 %v3744_v23, %v3341_v60  ;;  %v3760_v46 = vpop.f32.mrf.mxu1  ;;  %4175 = vmatprep.mubr.f32.mxu0 %v16719_v4  ;;  %v589_v23 = vrot.slane %v581_v0, %v12326_v33  ;;  %v16962_v0 = vand.u32 4294901760, %v11995_v9 }
 0x315   : > { %4538 = vmatprep.mubr.f32.mxu1 %v16719_v4  ;;  %v3343_v57 = vpop.f32.mrf.mxu0  ;;  %vm556_vm15 = vcmp.eq.s32.totalorder %v16907_v21, %v551_v17  ;;  %v16963_v17 = vand.u32 4294901760, %v12027_v38 }
 0x316   : > { %v12497_v49 = vadd.f32 %v3746_v29, %v3343_v57  ;;  %v3765_v59 = vpop.f32.mrf.mxu1  ;;  %v571_v29 = vrot.slane %v561_v12, %v12326_v33  ;;  %v609_v57 = vrot.slane %v599_v31, %v12326_v33  ;;  %vm594_vm0 = vcmp.eq.s32.totalorder %v16907_v21, %v589_v23 }
 0x317   : > { %v3352_v60 = vpop.f32.mrf.mxu0  ;;  %4178 = vmatmul.mubr.f32.gmra.mxu0 %v11899_v42  ;;  %v16967_v21 = vand.u32 4294901760, %v12121_v15 }
 0x318   : > { %4542 = vmatmul.mubr.f32.gmra.mxu1 %v16961_v45  ;;  %v12505_v27 = vadd.f32 %v3751_v20, %v3352_v60  ;;  %v3767_v36 = vpop.f32.mrf.mxu1  ;;  %4183 = vmatprep.mubr.f32.mxu0 %v16719_v4  ;;  %v614_v31 = vsel %vm594_vm0, %v609_v57, 0.0  ;;  %v16964_v57 = vand.u32 4294901760, %v12059_v56 }
 0x319   : > { %4547 = vmatprep.mubr.f32.mxu1 %v16719_v4  ;;  %v3354_v39 = vpop.f32.mrf.mxu0 }
 0x31a   : > { %v12510_v45 = vadd.f32 %v3753_v53, %v3354_v39  ;;  %v3772_v43 = vpop.f32.mrf.mxu1  ;;  %v576_v53 = vsel %vm556_vm15, %v571_v29, 0.0 }
 0x31b   : > { %v3363_v42 = vpop.f32.mrf.mxu0  ;;  %4186 = vmatmul.mubr.f32.gmra.mxu0 %v11931_v32 }
 0x31c   : > { %4551 = vmatmul.mubr.f32.gmra.mxu1 %v16962_v0  ;;  %v12518_v20 = vadd.f32 %v3758_v5, %v3363_v42  ;;  %v3774_v12 = vpop.f32.mrf.mxu1  ;;  %4191 = vmatprep.mubr.f32.mxu0 %v16719_v4  ;;  %v616_v0 = vadd.f32 %v614_v31, %v576_v53 }
 0x31d   : > { %4556 = vmatprep.mubr.f32.mxu1 %v16719_v4  ;;  %v3365_v33 = vpop.f32.mrf.mxu0 }
 0x31e   : > { %v12521_v60 = vadd.f32 %v3760_v46, %v3365_v33  ;;  %v3779_v39 = vpop.f32.mrf.mxu1 }
 0x31f   : > { %v3374_v23 = vpop.f32.mrf.mxu0  ;;  %4194 = vmatmul.mubr.f32.gmra.mxu0 %v11963_v6 }
 0x320   : > { %4560 = vmatmul.mubr.f32.gmra.mxu1 %v16963_v17  ;;  %v12527_v32 = vadd.f32 %v3765_v59, %v3374_v23  ;;  %v3781_v5 = vpop.f32.mrf.mxu1  ;;  %4199 = vmatprep.mubr.f32.mxu0 %v16719_v4  ;;  %v12539_v17 = vand.u32 4294901760, %v616_v0  ;;  %v16965_v23 = vand.u32 4294901760, %v12091_v47 }
 0x321   : > { %4565 = vmatprep.mubr.f32.mxu1 %v16719_v4  ;;  %v3376_v42 = vpop.f32.mrf.mxu0 }
 0x322   : > { %v12530_v29 = vadd.f32 %v3767_v36, %v3376_v42  ;;  %v3786_v46 = vpop.f32.mrf.mxu1 }
 0x323   : > { %v3385_v33 = vpop.f32.mrf.mxu0  ;;  %4202 = vmatmul.mubr.f32.gmra.mxu0 %v11995_v9 }
 0x324   : > { %4569 = vmatmul.mubr.f32.gmra.mxu1 %v16964_v57  ;;  %v12536_v6 = vadd.f32 %v3772_v43, %v3385_v33  ;;  %v3788_v59 = vpop.f32.mrf.mxu1  ;;  %4207 = vmatprep.mubr.f32.mxu0 %v16719_v4  ;;  %v12551_v57 = vsub.f32 %v616_v0, %v12539_v17 }
 0x325   : > { %4574 = vmatprep.mubr.f32.mxu1 %v16719_v4  ;;  %v3387_v53 = vpop.f32.mrf.mxu0 }
 0x326   : > { %v12541_v31 = vadd.f32 %v3774_v12, %v3387_v53  ;;  %v3793_v36 = vpop.f32.mrf.mxu1  ;;  %16966 = vst [vmem:[#allocation50_spill] sm:$0xff] %v12551_v57  ;;  %v16270_v0 = vand.u32 4294901760, %v12551_v57 }
 0x327   : > { %v3396_v42 = vpop.f32.mrf.mxu0  ;;  %4210 = vmatmul.mubr.f32.gmra.mxu0 %v12027_v38 }
 0x328   : > { %4578 = vmatmul.mubr.f32.gmra.mxu1 %v16965_v23  ;;  %v12547_v9 = vadd.f32 %v3779_v39, %v3396_v42  ;;  %v3795_v43 = vpop.f32.mrf.mxu1  ;;  %4215 = vmatprep.mubr.f32.mxu0 %v16719_v4 }
 0x329   : > { %4583 = vmatprep.mubr.f32.mxu1 %v16719_v4  ;;  %v3398_v33 = vpop.f32.mrf.mxu0 }
 0x32a   : > { %v12553_v12 = vadd.f32 %v3781_v5, %v3398_v33  ;;  %v3800_v53 = vpop.f32.mrf.mxu1  ;;  %v16968_v33 = vand.u32 4294901760, %v12148_v10 }
 0x32b   : > { %v3407_v23 = vpop.f32.mrf.mxu0  ;;  %4218 = vmatmul.mubr.f32.gmra.mxu0 %v12059_v56 }
 0x32c   : > { %4587 = vmatmul.mubr.f32.gmra.mxu1 %v16967_v21  ;;  %v12559_v38 = vadd.f32 %v3786_v46, %v3407_v23  ;;  %v3802_v39 = vpop.f32.mrf.mxu1  ;;  %4223 = vmatprep.mubr.f32.mxu0 %v16719_v4  ;;  %v5943_v23 = vsub.f32 %v12551_v57, %v16270_v0 }
 0x32d   : > { %4592 = vmatprep.mubr.f32.mxu1 %v16719_v4  ;;  %v3409_v42 = vpop.f32.mrf.mxu0 }
 0x32e   : > { %v12563_v22 = vadd.f32 %v3788_v59, %v3409_v42  ;;  %v3807_v5 = vpop.f32.mrf.mxu1 }
 0x32f   : > { %v3418_v21 = vpop.f32.mrf.mxu0  ;;  %4226 = vmatmul.mubr.f32.gmra.mxu0 %v12091_v47 }
 0x330   : > { %4596 = vmatmul.mubr.f32.gmra.mxu1 %v16968_v33  ;;  %v12569_v56 = vadd.f32 %v3793_v36, %v3418_v21  ;;  %v3809_v46 = vpop.f32.mrf.mxu1  ;;  %4231 = vmatprep.mubr.f32.mxu0 %v16719_v4  ;;  %v16969_v33 = vand.u32 4294901760, %v12170_v37  ;;  %v5944_v21 = vand.u32 4294901760, %v5943_v23  ;;  %v16971_v23 = vld [vmem:[#allocation58_spill] sm:$0xff] }
 0x331   : > { %4601 = vmatprep.mubr.f32.mxu1 %v16719_v4  ;;  %v3420_v59 = vpop.f32.mrf.mxu0 }
 0x332   : > { %v12575_v42 = vadd.f32 %v3795_v43, %v3420_v59  ;;  %v3814_v51 = vpop.f32.mrf.mxu1  ;;  %v16970_v59 = vld [vmem:[#allocation57_spill] sm:$0xff] }
 0x333   : > { %v3429_v48 = vpop.f32.mrf.mxu0  ;;  %4234 = vmatmul.mubr.f32.gmra.mxu0 %v12121_v15 }
 0x334   : > { %4605 = vmatmul.mubr.f32.gmra.mxu1 %v16969_v33  ;;  %v12581_v47 = vadd.f32 %v3800_v53, %v3429_v48  ;;  %v3816_v36 = vpop.f32.mrf.mxu1  ;;  %4239 = vmatprep.mubr.f32.mxu0 %v16719_v4 }
 0x335   : > { %4972 = vmatprep.mubr.f32.mxu1 %v16719_v4  ;;  %v3431_v35 = vpop.f32.mrf.mxu0 }
 0x336   : > { %v12584_v0 = vadd.f32 %v3802_v39, %v3431_v35  ;;  %v3821_v43 = vpop.f32.mrf.mxu1 }
 0x337   : > { %v3440_v58 = vpop.f32.mrf.mxu0  ;;  %4242 = vmatmul.mubr.f32.gmra.mxu0 %v12148_v10 }
 0x338   : > { %9387 = vmatmul.mubr.msk.f32.vlgmr.msra.gmra.mxu1 %vm844_vm4, %v16970_v59  ;;  %v12590_v15 = vadd.f32 %v3807_v5, %v3440_v58  ;;  %v3823_v48 = vpop.f32.mrf.mxu1  ;;  %4247 = vmatprep.mubr.f32.mxu0 %v16719_v4 }
 0x339   : > { %4979 = vmatprep.mubr.f32.mxu1 %v16719_v4  ;;  %5945 = vmatpush1.msra.mxu1 %v5944_v21  ;;  %v3442_v53 = vpop.f32.mrf.mxu0 }
 0x33a   : > { %6559 = vmatprep.subr.mxu1 %v12367_v55  ;;  %v12594_v35 = vadd.f32 %v3809_v46, %v3442_v53  ;;  %v3828_v39 = vpop.f32.mrf.mxu1  ;;  %v16972_v46 = vld [vmem:[#allocation43_spill] sm:$0xff] }
 0x33b   : > { %v3451_v33 = vpop.f32.mrf.mxu0  ;;  %4250 = vmatmul.mubr.f32.gmra.mxu0 %v12170_v37 }
 0x33c   : > { %9388 = vmatmul.mubr.msk.f32.gmra.mxu1 %vm844_vm4, %v16971_v23  ;;  %v12600_v10 = vadd.f32 %v3814_v51, %v3451_v33  ;;  %v3830_v58 = vpop.f32.mrf.mxu1  ;;  %4681 = vmatprep.mubr.f32.mxu0 %v16719_v4 }
 0x33d   : > { %4986 = vmatprep.mubr.f32.mxu1 %v16719_v4  ;;  %v3453_v5 = vpop.f32.mrf.mxu0 }
 0x33e   : > { %v12603_v21 = vadd.f32 %v3816_v36, %v3453_v5  ;;  %v3835_v18 = vpop.f32.mrf.mxu1 }
 0x33f   : > { %v3462_v53 = vpop.f32.mrf.mxu0  ;;  %9355 = vmatmul.mubr.msk.f32.vlgmr.msra.gmra.mxu0 %vm844_vm4, %v16970_v59 }
 0x340   : > { %9389 = vmatmul.mubr.msk.f32.gmra.mxu1 %vm844_vm4, %v16972_v46  ;;  %v12610_v37 = vadd.f32 %v3821_v43, %v3462_v53  ;;  %v3837_v51 = vpop.f32.mrf.mxu1  ;;  %4688 = vmatprep.mubr.f32.mxu0 %v16719_v4 }
 0x341   : > { %4993 = vmatprep.mubr.f32.mxu1 %v16719_v4  ;;  %5518 = vmatpush1.msra.mxu0 %v12539_v17  ;;  %v3464_v33 = vpop.f32.mrf.mxu0 }
 0x342   : > { %16973 = vst [vmem:[#allocation33_spill] sm:$0xff] %v12610_v37  ;;  %6235 = vmatprep.subr.mxu0 %v12377_v54  ;;  %v12615_v36 = vadd.f32 %v3823_v48, %v3464_v33  ;;  %v3842_v5 = vpop.f32.mrf.mxu1  ;;  %v16978_v33 = vld [vmem:[#allocation34_spill] sm:$0xff] }
 0x343   : > { %v3473_v57 = vpop.f32.mrf.mxu0  ;;  %9356 = vmatmul.mubr.msk.f32.gmra.mxu0 %vm844_vm4, %v16971_v23 }
 0x344   : > { %16974 = vst [vmem:[#allocation79_spill] sm:$0xff] %v12615_v36  ;;  %9390 = vmatmul.mubr.msk.f32.gmra.mxu1 %vm844_vm4, %v16975_v11  ;;  %v12622_v43 = vadd.f32 %v3828_v39, %v3473_v57  ;;  %v3844_v59 = vpop.f32.mrf.mxu1  ;;  %4695 = vmatprep.mubr.f32.mxu0 %v16719_v4 }
 0x345   : > { %5000 = vmatprep.mubr.f32.mxu1 %v16719_v4  ;;  %v3475_v53 = vpop.f32.mrf.mxu0 }
 0x346   : > { %16976 = vst [vmem:[#allocation51_spill] sm:$0xff] %v12622_v43  ;;  %v12625_v37 = vadd.f32 %v3830_v58, %v3475_v53  ;;  %v3849_v48 = vpop.f32.mrf.mxu1  ;;  %v16981_v53 = vld [vmem:[#allocation38_spill] sm:$0xff] }
 0x347   : > { %v3484_v36 = vpop.f32.mrf.mxu0  ;;  %9357 = vmatmul.mubr.msk.f32.gmra.mxu0 %vm844_vm4, %v16972_v46 }
 0x348   : > { %16977 = vst [vmem:[#allocation35_spill] sm:$0xff] %v12625_v37  ;;  %9391 = vmatmul.mubr.msk.f32.gmra.mxu1 %vm844_vm4, %v16978_v33  ;;  %v12632_v23 = vadd.f32 %v3835_v18, %v3484_v36  ;;  %v3851_v57 = vpop.f32.mrf.mxu1  ;;  %4702 = vmatprep.mubr.f32.mxu0 %v16719_v4 }
 0x349   : > { %5007 = vmatprep.mubr.f32.mxu1 %v16719_v4  ;;  %v3486_v39 = vpop.f32.mrf.mxu0 }
 0x34a   : > { %16979 = vst [vmem:[#allocation81_spill] sm:$0xff] %v12632_v23  ;;  %v12635_v43 = vadd.f32 %v3837_v51, %v3486_v39  ;;  %v3856_v58 = vpop.f32.mrf.mxu1  ;;  %v16984_v39 = vld [vmem:[#allocation64_spill] sm:$0xff] }
 0x34b   : > { %v3495_v37 = vpop.f32.mrf.mxu0  ;;  %9358 = vmatmul.mubr.msk.f32.gmra.mxu0 %vm844_vm4, %v16975_v11 }
 0x34c   : > { %16980 = vst [vmem:[#allocation52_spill] sm:$0xff] %v12635_v43  ;;  %9392 = vmatmul.mubr.msk.f32.gmra.mxu1 %vm844_vm4, %v16981_v53  ;;  %v12642_v46 = vadd.f32 %v3842_v5, %v3495_v37  ;;  %v3858_v18 = vpop.f32.mrf.mxu1  ;;  %4709 = vmatprep.mubr.f32.mxu0 %v16719_v4 }
 0x34d   : > { %5014 = vmatprep.mubr.f32.mxu1 %v16719_v4  ;;  %v3497_v36 = vpop.f32.mrf.mxu0 }
 0x34e   : > { %16982 = vst [vmem:[#allocation83_spill] sm:$0xff] %v12642_v46  ;;  %v12645_v23 = vadd.f32 %v3844_v59, %v3497_v36  ;;  %v3863_v51 = vpop.f32.mrf.mxu1  ;;  %v16987_v36 = vld [vmem:[#allocation66_spill] sm:$0xff] }
 0x34f   : > { %v3506_v43 = vpop.f32.mrf.mxu0  ;;  %9359 = vmatmul.mubr.msk.f32.gmra.mxu0 %vm844_vm4, %v16978_v33 }
 0x350   : > { %16983 = vst [vmem:[#allocation53_spill] sm:$0xff] %v12645_v23  ;;  %9393 = vmatmul.mubr.msk.f32.gmra.mxu1 %vm844_vm4, %v16984_v39  ;;  %v12652_v11 = vadd.f32 %v3849_v48, %v3506_v43  ;;  %v3865_v37 = vpop.f32.mrf.mxu1  ;;  %4716 = vmatprep.mubr.f32.mxu0 %v16719_v4 }
 0x351   : > { %5021 = vmatprep.mubr.f32.mxu1 %v16719_v4  ;;  %v3508_v5 = vpop.f32.mrf.mxu0 }
 0x352   : > { %16985 = vst [vmem:[#allocation39_spill] sm:$0xff] %v12652_v11  ;;  %v12655_v46 = vadd.f32 %v3851_v57, %v3508_v5  ;;  %v3870_v59 = vpop.f32.mrf.mxu1  ;;  %v16990_v5 = vld [vmem:[#allocation68_spill] sm:$0xff] }
 0x353   : > { %v3517_v23 = vpop.f32.mrf.mxu0  ;;  %9360 = vmatmul.mubr.msk.f32.gmra.mxu0 %vm844_vm4, %v16981_v53 }
 0x354   : > { %16986 = vst [vmem:[#allocation85_spill] sm:$0xff] %v12655_v46  ;;  %9394 = vmatmul.mubr.msk.f32.gmra.mxu1 %vm844_vm4, %v16987_v36  ;;  %v12662_v33 = vadd.f32 %v3856_v58, %v3517_v23  ;;  %v3872_v43 = vpop.f32.mrf.mxu1  ;;  %4723 = vmatprep.mubr.f32.mxu0 %v16719_v4 }
 0x355   : > { %5028 = vmatprep.mubr.f32.mxu1 %v16719_v4  ;;  %v3519_v48 = vpop.f32.mrf.mxu0 }
 0x356   : > { %16988 = vst [vmem:[#allocation88_spill] sm:$0xff] %v12662_v33  ;;  %v12665_v11 = vadd.f32 %v3858_v18, %v3519_v48  ;;  %v3877_v57 = vpop.f32.mrf.mxu1  ;;  %v16993_v48 = vld [vmem:[#allocation70_spill] sm:$0xff] }
 0x357   : > { %v3528_v46 = vpop.f32.mrf.mxu0  ;;  %9361 = vmatmul.mubr.msk.f32.gmra.mxu0 %vm844_vm4, %v16984_v39 }
 0x358   : > { %16989 = vst [vmem:[#allocation37_spill] sm:$0xff] %v12665_v11  ;;  %9395 = vmatmul.mubr.msk.f32.gmra.mxu1 %vm844_vm4, %v16990_v5  ;;  %v12672_v53 = vadd.f32 %v3863_v51, %v3528_v46  ;;  %v3879_v23 = vpop.f32.mrf.mxu1  ;;  %4730 = vmatprep.mubr.f32.mxu0 %v16719_v4 }
 0x359   : > { %5035 = vmatprep.mubr.f32.mxu1 %v16719_v4  ;;  %v3530_v58 = vpop.f32.mrf.mxu0 }
 0x35a   : > { %16991 = vst [vmem:[#allocation41_spill] sm:$0xff] %v12672_v53  ;;  %v12675_v33 = vadd.f32 %v3865_v37, %v3530_v58  ;;  %v3884_v18 = vpop.f32.mrf.mxu1  ;;  %v16996_v58 = vld [vmem:[#allocation72_spill] sm:$0xff] }
 0x35b   : > { %v3539_v11 = vpop.f32.mrf.mxu0  ;;  %9362 = vmatmul.mubr.msk.f32.gmra.mxu0 %vm844_vm4, %v16987_v36 }
 0x35c   : > { %16992 = vst [vmem:[#allocation54_spill] sm:$0xff] %v12675_v33  ;;  %9396 = vmatmul.mubr.msk.f32.gmra.mxu1 %vm844_vm4, %v16993_v48  ;;  %v12682_v39 = vadd.f32 %v3870_v59, %v3539_v11  ;;  %v3886_v46 = vpop.f32.mrf.mxu1  ;;  %4737 = vmatprep.mubr.f32.mxu0 %v16719_v4 }
 0x35d   : > { %5042 = vmatprep.mubr.f32.mxu1 %v16719_v4  ;;  %v3541_v51 = vpop.f32.mrf.mxu0 }
 0x35e   : > { %16994 = vst [vmem:[#allocation57_spill] sm:$0xff] %v12682_v39  ;;  %v12685_v53 = vadd.f32 %v3872_v43, %v3541_v51  ;;  %v3891_v37 = vpop.f32.mrf.mxu1  ;;  %v16999_v51 = vld [vmem:[#allocation74_spill] sm:$0xff] }
 0x35f   : > { %v3550_v33 = vpop.f32.mrf.mxu0  ;;  %9363 = vmatmul.mubr.msk.f32.gmra.mxu0 %vm844_vm4, %v16990_v5 }
 0x360   : > { %16995 = vst [vmem:[#allocation58_spill] sm:$0xff] %v12685_v53  ;;  %9397 = vmatmul.mubr.msk.f32.gmra.mxu1 %vm844_vm4, %v16996_v58  ;;  %v12692_v36 = vadd.f32 %v3877_v57, %v3550_v33  ;;  %v3893_v11 = vpop.f32.mrf.mxu1  ;;  %4744 = vmatprep.mubr.f32.mxu0 %v16719_v4 }
 0x361   : > { %5049 = vmatprep.mubr.f32.mxu1 %v16719_v4  ;;  %v3552_v59 = vpop.f32.mrf.mxu0 }
 0x362   : > { %16997 = vst [vmem:[#allocation43_spill] sm:$0xff] %v12692_v36  ;;  %v12695_v39 = vadd.f32 %v3879_v23, %v3552_v59  ;;  %v3898_v43 = vpop.f32.mrf.mxu1  ;;  %v17002_v59 = vld [vmem:[#allocation76_spill] sm:$0xff] }
 0x363   : > { %v3561_v53 = vpop.f32.mrf.mxu0  ;;  %9364 = vmatmul.mubr.msk.f32.gmra.mxu0 %vm844_vm4, %v16993_v48 }
 0x364   : > { %16998 = vst [vmem:[#allocation60_spill] sm:$0xff] %v12695_v39  ;;  %9398 = vmatmul.mubr.msk.f32.gmra.mxu1 %vm844_vm4, %v16999_v51  ;;  %v12702_v5 = vadd.f32 %v3884_v18, %v3561_v53  ;;  %v3900_v33 = vpop.f32.mrf.mxu1  ;;  %4751 = vmatprep.mubr.f32.mxu0 %v16719_v4 }
 0x365   : > { %5056 = vmatprep.mubr.f32.mxu1 %v16719_v4  ;;  %v3563_v57 = vpop.f32.mrf.mxu0 }
 0x366   : > { %17000 = vst [vmem:[#allocation34_spill] sm:$0xff] %v12702_v5  ;;  %v12705_v36 = vadd.f32 %v3886_v46, %v3563_v57  ;;  %v3905_v23 = vpop.f32.mrf.mxu1  ;;  %v17005_v57 = vld [vmem:[#allocation78_spill] sm:$0xff] }
 0x367   : > { %v3572_v39 = vpop.f32.mrf.mxu0  ;;  %9365 = vmatmul.mubr.msk.f32.gmra.mxu0 %vm844_vm4, %v16996_v58 }
 0x368   : > { %17001 = vst [vmem:[#allocation38_spill] sm:$0xff] %v12705_v36  ;;  %9399 = vmatmul.mubr.msk.f32.gmra.mxu1 %vm844_vm4, %v17002_v59  ;;  %v12712_v48 = vadd.f32 %v3891_v37, %v3572_v39  ;;  %v3907_v53 = vpop.f32.mrf.mxu1  ;;  %4758 = vmatprep.mubr.f32.mxu0 %v16719_v4 }
 0x369   : > { %5063 = vmatprep.mubr.f32.mxu1 %v16719_v4  ;;  %v3574_v18 = vpop.f32.mrf.mxu0 }
 0x36a   : > { %17003 = vst [vmem:[#allocation64_spill] sm:$0xff] %v12712_v48  ;;  %v12715_v5 = vadd.f32 %v3893_v11, %v3574_v18  ;;  %v3912_v46 = vpop.f32.mrf.mxu1  ;;  %v17008_v18 = vld [vmem:[#allocation80_spill] sm:$0xff] }
 0x36b   : > { %v3583_v36 = vpop.f32.mrf.mxu0  ;;  %9366 = vmatmul.mubr.msk.f32.gmra.mxu0 %vm844_vm4, %v16999_v51 }
 0x36c   : > { %17004 = vst [vmem:[#allocation66_spill] sm:$0xff] %v12715_v5  ;;  %9400 = vmatmul.mubr.msk.f32.gmra.mxu1 %vm844_vm4, %v17005_v57  ;;  %v12722_v58 = vadd.f32 %v3898_v43, %v3583_v36  ;;  %v3914_v39 = vpop.f32.mrf.mxu1  ;;  %4765 = vmatprep.mubr.f32.mxu0 %v16719_v4 }
 0x36d   : > { %5070 = vmatprep.mubr.f32.mxu1 %v16719_v4  ;;  %v3585_v37 = vpop.f32.mrf.mxu0 }
 0x36e   : > { %17006 = vst [vmem:[#allocation68_spill] sm:$0xff] %v12722_v58  ;;  %v12725_v48 = vadd.f32 %v3900_v33, %v3585_v37  ;;  %v3919_v11 = vpop.f32.mrf.mxu1  ;;  %v17011_v37 = vld [vmem:[#allocation82_spill] sm:$0xff] }
 0x36f   : > { %v3594_v5 = vpop.f32.mrf.mxu0  ;;  %9367 = vmatmul.mubr.msk.f32.gmra.mxu0 %vm844_vm4, %v17002_v59 }
 0x370   : > { %17007 = vst [vmem:[#allocation70_spill] sm:$0xff] %v12725_v48  ;;  %9401 = vmatmul.mubr.msk.f32.gmra.mxu1 %vm844_vm4, %v17008_v18  ;;  %v12732_v51 = vadd.f32 %v3905_v23, %v3594_v5  ;;  %v3921_v36 = vpop.f32.mrf.mxu1  ;;  %4772 = vmatprep.mubr.f32.mxu0 %v16719_v4 }
 0x371   : > { %5077 = vmatprep.mubr.f32.mxu1 %v16719_v4  ;;  %v3596_v43 = vpop.f32.mrf.mxu0 }
 0x372   : > { %17009 = vst [vmem:[#allocation72_spill] sm:$0xff] %v12732_v51  ;;  %v12735_v58 = vadd.f32 %v3907_v53, %v3596_v43  ;;  %v3926_v33 = vpop.f32.mrf.mxu1  ;;  %v17014_v43 = vld [vmem:[#allocation84_spill] sm:$0xff] }
 0x373   : > { %v3605_v48 = vpop.f32.mrf.mxu0  ;;  %9368 = vmatmul.mubr.msk.f32.gmra.mxu0 %vm844_vm4, %v17005_v57 }
 0x374   : > { %17010 = vst [vmem:[#allocation74_spill] sm:$0xff] %v12735_v58  ;;  %9402 = vmatmul.mubr.msk.f32.gmra.mxu1 %vm844_vm4, %v17011_v37  ;;  %v12742_v59 = vadd.f32 %v3912_v46, %v3605_v48  ;;  %v3928_v5 = vpop.f32.mrf.mxu1  ;;  %4779 = vmatprep.mubr.f32.mxu0 %v16719_v4 }
 0x375   : > { %5084 = vmatprep.mubr.f32.mxu1 %v16719_v4  ;;  %v3607_v23 = vpop.f32.mrf.mxu0 }
 0x376   : > { %17012 = vst [vmem:[#allocation76_spill] sm:$0xff] %v12742_v59  ;;  %v12745_v51 = vadd.f32 %v3914_v39, %v3607_v23  ;;  %v4327_v53 = vpop.f32.mrf.mxu1  ;;  %v17017_v23 = vld [vmem:[#allocation86_spill] sm:$0xff] }
 0x377   : > { %v3616_v58 = vpop.f32.mrf.mxu0  ;;  %9369 = vmatmul.mubr.msk.f32.gmra.mxu0 %vm844_vm4, %v17008_v18 }
 0x378   : > { %17013 = vst [vmem:[#allocation78_spill] sm:$0xff] %v12745_v51  ;;  %9403 = vmatmul.mubr.msk.f32.gmra.mxu1 %vm844_vm4, %v17014_v43  ;;  %v12752_v57 = vadd.f32 %v3919_v11, %v3616_v58  ;;  %v4329_v48 = vpop.f32.mrf.mxu1  ;;  %4786 = vmatprep.mubr.f32.mxu0 %v16719_v4 }
 0x379   : > { %5091 = vmatprep.mubr.f32.mxu1 %v16719_v4  ;;  %v3618_v46 = vpop.f32.mrf.mxu0 }
 0x37a   : > { %17015 = vst [vmem:[#allocation80_spill] sm:$0xff] %v12752_v57  ;;  %v12755_v59 = vadd.f32 %v3921_v36, %v3618_v46  ;;  %v4336_v39 = vpop.f32.mrf.mxu1  ;;  %v17020_v46 = vld [vmem:[#allocation87_spill] sm:$0xff] }
 0x37b   : > { %v3627_v51 = vpop.f32.mrf.mxu0  ;;  %9370 = vmatmul.mubr.msk.f32.gmra.mxu0 %vm844_vm4, %v17011_v37 }
 0x37c   : > { %17016 = vst [vmem:[#allocation82_spill] sm:$0xff] %v12755_v59  ;;  %9404 = vmatmul.mubr.msk.f32.gmra.mxu1 %vm844_vm4, %v17017_v23  ;;  %v12762_v18 = vadd.f32 %v3926_v33, %v3627_v51  ;;  %v4338_v58 = vpop.f32.mrf.mxu1  ;;  %4793 = vmatprep.mubr.f32.mxu0 %v16719_v4 }
 0x37d   : > { %5098 = vmatprep.mubr.f32.mxu1 %v16719_v4  ;;  %v3629_v11 = vpop.f32.mrf.mxu0 }
 0x37e   : > { %17018 = vst [vmem:[#allocation84_spill] sm:$0xff] %v12762_v18  ;;  %v12765_v57 = vadd.f32 %v3928_v5, %v3629_v11  ;;  %v4345_v36 = vpop.f32.mrf.mxu1 }
 0x37f   : > { %v4003_v59 = vpop.f32.mrf.mxu0  ;;  %9371 = vmatmul.mubr.msk.f32.gmra.mxu0 %vm844_vm4, %v17014_v43 }
 0x380   : > { %17019 = vst [vmem:[#allocation86_spill] sm:$0xff] %v12765_v57  ;;  %9405 = vmatmul.mubr.msk.f32.gmra.mxu1 %vm844_vm4, %v17020_v46  ;;  %v4004_v37 = vadd.f32 %v4003_v59, %v12441_v25  ;;  %v4347_v51 = vpop.f32.mrf.mxu1  ;;  %4800 = vmatprep.mubr.f32.mxu0 %v16719_v4 }
 0x381   : > { %5105 = vmatprep.mubr.f32.mxu1 %v16719_v4  ;;  %v4005_v33 = vpop.f32.mrf.mxu0 }
 0x382   : > { %v4006_v18 = vadd.f32 %v4005_v33, %v12444_v50  ;;  %v4354_v5 = vpop.f32.mrf.mxu1  ;;  %v12777_v11 = vadd.f32 %v4327_v53, %v4004_v37 }
 0x383   : > { %v4011_v57 = vpop.f32.mrf.mxu0  ;;  %9372 = vmatmul.mubr.msk.f32.gmra.mxu0 %vm844_vm4, %v17017_v23 }
 0x384   : > { %9406 = vmatmul.mubr.msk.f32.gmra.mxu1 %vm844_vm4, %v11759_v41  ;;  %v4012_v25 = vadd.f32 %v4011_v57, %v12450_v26  ;;  %v4356_v59 = vpop.f32.mrf.mxu1  ;;  %4807 = vmatprep.mubr.f32.mxu0 %v16719_v4  ;;  %v12784_v43 = vadd.f32 %v4329_v48, %v4006_v18 }
 0x385   : > { %5112 = vmatprep.mubr.f32.mxu1 %v16719_v4  ;;  %v4013_v50 = vpop.f32.mrf.mxu0 }
 0x386   : > { %v4014_v33 = vadd.f32 %v4013_v50, %v12453_v8  ;;  %v4363_v54 = vpop.f32.mrf.mxu1  ;;  %v12789_v53 = vadd.f32 %v4336_v39, %v4012_v25 }
 0x387   : > { %v4019_v37 = vpop.f32.mrf.mxu0  ;;  %9373 = vmatmul.mubr.msk.f32.gmra.mxu0 %vm844_vm4, %v17020_v46 }
 0x388   : > { %9407 = vmatmul.mubr.msk.f32.gmra.mxu1 %vm844_vm4, %v11791_v34  ;;  %v4020_v26 = vadd.f32 %v4019_v37, %v12459_v2  ;;  %v4365_v57 = vpop.f32.mrf.mxu1  ;;  %4814 = vmatprep.mubr.f32.mxu0 %v16719_v4  ;;  %v12796_v48 = vadd.f32 %v4338_v58, %v4014_v33 }
 0x389   : > { %5119 = vmatprep.mubr.f32.mxu1 %v16719_v4  ;;  %v4021_v8 = vpop.f32.mrf.mxu0 }
 0x38a   : > { %v4022_v23 = vadd.f32 %v4021_v8, %v12462_v61  ;;  %v12801_v39 = vadd.f32 %v4345_v36, %v4020_v26 }
 0x38b   : > { %v4372_v18 = vpop.f32.mrf.mxu1  ;;  %v4027_v25 = vpop.f32.mrf.mxu0  ;;  %9374 = vmatmul.mubr.msk.f32.gmra.mxu0 %vm844_vm4, %v11759_v41 }
 0x38c   : > { %9408 = vmatmul.mubr.msk.f32.gmra.mxu1 %vm844_vm4, %v11823_v52  ;;  %v4028_v2 = vadd.f32 %v4027_v25, %v12468_v13  ;;  %4821 = vmatprep.mubr.f32.mxu0 %v16719_v4  ;;  %v12808_v58 = vadd.f32 %v4347_v51, %v4022_v23 }
 0x38d   : > { %5126 = vmatprep.mubr.f32.mxu1 %v16719_v4  ;;  %v4374_v46 = vpop.f32.mrf.mxu1  ;;  %v4029_v61 = vpop.f32.mrf.mxu0 }
 0x38e   : > { %v4030_v50 = vadd.f32 %v4029_v61, %v12471_v30  ;;  %v12813_v36 = vadd.f32 %v4354_v5, %v4028_v2 }
 0x38f   : > { %v4381_v33 = vpop.f32.mrf.mxu1  ;;  %v4035_v37 = vpop.f32.mrf.mxu0  ;;  %9375 = vmatmul.mubr.msk.f32.gmra.mxu0 %vm844_vm4, %v11791_v34 }
 0x390   : > { %9409 = vmatmul.mubr.msk.f32.gmra.mxu1 %vm844_vm4, %v11855_v14  ;;  %v4036_v41 = vadd.f32 %v4035_v37, %v12477_v16  ;;  %4828 = vmatprep.mubr.f32.mxu0 %v16719_v4  ;;  %v12820_v51 = vadd.f32 %v4356_v59, %v4030_v50 }
 0x391   : > { %5133 = vmatprep.mubr.f32.mxu1 %v16719_v4  ;;  %v4383_v13 = vpop.f32.mrf.mxu1  ;;  %v4037_v30 = vpop.f32.mrf.mxu0 }
 0x392   : > { %v4038_v26 = vadd.f32 %v4037_v30, %v12480_v3  ;;  %v12825_v5 = vadd.f32 %v4363_v54, %v4036_v41  ;;  %v17021_v41 = vld [vmem:[#allocation94_spill] sm:$0xff] }
 0x393   : > { %v4390_v8 = vpop.f32.mrf.mxu1  ;;  %v4043_v23 = vpop.f32.mrf.mxu0  ;;  %9376 = vmatmul.mubr.msk.f32.gmra.mxu0 %vm844_vm4, %v11823_v52 }
 0x394   : > { %9410 = vmatmul.mubr.msk.f32.gmra.mxu1 %vm844_vm4, %v11887_v28  ;;  %v4044_v34 = vadd.f32 %v4043_v23, %v12490_v7  ;;  %4835 = vmatprep.mubr.f32.mxu0 %v16719_v4  ;;  %v12832_v59 = vadd.f32 %v4365_v57, %v4038_v26 }
 0x395   : > { %5140 = vmatprep.mubr.f32.mxu1 %v16719_v4  ;;  %v4392_v16 = vpop.f32.mrf.mxu1  ;;  %v4045_v3 = vpop.f32.mrf.mxu0 }
 0x396   : > { %v4046_v25 = vadd.f32 %v4045_v3, %v12497_v49  ;;  %v12837_v54 = vadd.f32 %v4372_v18, %v4044_v34 }
 0x397   : > { %v4399_v2 = vpop.f32.mrf.mxu1  ;;  %v4051_v61 = vpop.f32.mrf.mxu0  ;;  %9377 = vmatmul.mubr.msk.f32.gmra.mxu0 %vm844_vm4, %v11855_v14 }
 0x398   : > { %9411 = vmatmul.mubr.msk.f32.gmra.mxu1 %vm844_vm4, %v11919_v63  ;;  %v4052_v52 = vadd.f32 %v4051_v61, %v12505_v27  ;;  %4842 = vmatprep.mubr.f32.mxu0 %v16719_v4  ;;  %v12844_v57 = vadd.f32 %v4374_v46, %v4046_v25 }
 0x399   : > { %5147 = vmatprep.mubr.f32.mxu1 %v16719_v4  ;;  %v4401_v7 = vpop.f32.mrf.mxu1  ;;  %v4053_v49 = vpop.f32.mrf.mxu0 }
 0x39a   : > { %v4054_v50 = vadd.f32 %v4053_v49, %v12510_v45  ;;  %v12849_v18 = vadd.f32 %v4381_v33, %v4052_v52 }
 0x39b   : > { %v4408_v37 = vpop.f32.mrf.mxu1  ;;  %v4059_v30 = vpop.f32.mrf.mxu0  ;;  %9378 = vmatmul.mubr.msk.f32.gmra.mxu0 %vm844_vm4, %v11887_v28 }
 0x39c   : > { %9412 = vmatmul.mubr.msk.f32.gmra.mxu1 %vm844_vm4, %v17021_v41  ;;  %v4060_v14 = vadd.f32 %v4059_v30, %v12518_v20  ;;  %4849 = vmatprep.mubr.f32.mxu0 %v16719_v4  ;;  %v12856_v46 = vadd.f32 %v4383_v13, %v4054_v50  ;;  %v5199_v50 = vpop.permute.xlu1 %5198 }
 0x39d   : > { %5154 = vmatprep.mubr.f32.mxu1 %v16719_v4  ;;  %v4410_v27 = vpop.f32.mrf.mxu1  ;;  %v4061_v45 = vpop.f32.mrf.mxu0  ;;  %vm5293_vm1 = vcmp.eq.s32.totalorder %v5199_v50, %v10150_v40 }
 0x39e   : > { %v4062_v26 = vadd.f32 %v4061_v45, %v12521_v60  ;;  %v12861_v33 = vadd.f32 %v4390_v8, %v4060_v14 }
 0x39f   : > { %v4417_v23 = vpop.f32.mrf.mxu1  ;;  %v4067_v34 = vpop.f32.mrf.mxu0  ;;  %9379 = vmatmul.mubr.msk.f32.gmra.mxu0 %vm844_vm4, %v11919_v63 }
 0x3a0   : > { %9413 = vmatmul.mubr.msk.f32.gmra.mxu1 %vm844_vm4, %v11983_v19  ;;  %v4068_v28 = vadd.f32 %v4067_v34, %v12527_v32  ;;  %4856 = vmatprep.mubr.f32.mxu0 %v16719_v4  ;;  %v12868_v13 = vadd.f32 %v4392_v16, %v4062_v26  ;;  %v5202_v26 = vpop.permute.xlu0 %5201 }
 0x3a1   : > { %5161 = vmatprep.mubr.f32.mxu1 %v16719_v4  ;;  %v4419_v20 = vpop.f32.mrf.mxu1  ;;  %v4069_v60 = vpop.f32.mrf.mxu0  ;;  %vm5294_vm2 = vcmp.eq.s32.totalorder %v5202_v26, %v10150_v40 }
 0x3a2   : > { %v4070_v3 = vadd.f32 %v4069_v60, %v12530_v29  ;;  %v12873_v8 = vadd.f32 %v4399_v2, %v4068_v28 }
 0x3a3   : > { %v4075_v61 = vpop.f32.mrf.mxu0  ;;  %9380 = vmatmul.mubr.msk.f32.gmra.mxu0 %vm844_vm4, %v17021_v41 }
 0x3a4   : > { %v4426_v25 = vpop.f32.mrf.mxu1  ;;  %9414 = vmatmul.mubr.msk.f32.gmra.mxu1 %vm844_vm4, %v12015_v62  ;;  %v4076_v63 = vadd.f32 %v4075_v61, %v12536_v6  ;;  %4863 = vmatprep.mubr.f32.mxu0 %v16719_v4  ;;  %v12880_v16 = vadd.f32 %v4401_v7, %v4070_v3 }
 0x3a5   : > { %5168 = vmatprep.mubr.f32.mxu1 %v16719_v4  ;;  %v4077_v29 = vpop.f32.mrf.mxu0 }
 0x3a6   : > { %v4428_v32 = vpop.f32.mrf.mxu1  ;;  %v4078_v52 = vadd.f32 %v4077_v29, %v12541_v31  ;;  %v12885_v2 = vadd.f32 %v4408_v37, %v4076_v63 }
 0x3a7   : > { %v4083_v41 = vpop.f32.mrf.mxu0  ;;  %9381 = vmatmul.mubr.msk.f32.gmra.mxu0 %vm844_vm4, %v11983_v19  ;;  %v12901_v19 = vsel %vm5293_vm1, 1.0, %v16719_v4 }
 0x3a8   : > { %v4435_v49 = vpop.f32.mrf.mxu1  ;;  %9415 = vmatmul.mubr.msk.f32.gmra.mxu1 %vm844_vm4, %v12047_v24  ;;  %v4084_v6 = vadd.f32 %v4083_v41, %v12547_v9  ;;  %4870 = vmatprep.mubr.f32.mxu0 %v16719_v4  ;;  %v12893_v31 = vadd.f32 %v4410_v27, %v4078_v52  ;;  %17022 = vst [vmem:[#allocation87_spill] sm:$0xff] %v12901_v19  ;;  %v5390_v60 = vsel %vm844_vm4, %v12901_v19, 0 }
 0x3a9   : > { %5175 = vmatprep.mubr.f32.mxu1 %v16719_v4  ;;  %v4085_v30 = vpop.f32.mrf.mxu0 }
 0x3aa   : > { %v4437_v7 = vpop.f32.mrf.mxu1  ;;  %v4086_v37 = vadd.f32 %v4085_v30, %v12553_v12  ;;  %v12898_v45 = vadd.f32 %v4417_v23, %v4084_v6  ;;  %v5205_v23 = vpop.permute.xlu1 %5204  ;;  %v17024_v6 = vld [vmem:[#allocation107_spill] sm:$0xff] }
 0x3ab   : > { %v4091_v34 = vpop.f32.mrf.mxu0  ;;  %9382 = vmatmul.mubr.msk.f32.gmra.mxu0 %vm844_vm4, %v12015_v62  ;;  %vm5295_vm3 = vcmp.eq.s32.totalorder %v5205_v23, %v10150_v40 }
 0x3ac   : > { %v4444_v14 = vpop.f32.mrf.mxu1  ;;  %9416 = vmatmul.mubr.msk.f32.gmra.mxu1 %vm844_vm4, %v12079_v44  ;;  %v4092_v9 = vadd.f32 %v4091_v34, %v12559_v38  ;;  %4877 = vmatprep.mubr.f32.mxu0 %v16719_v4  ;;  %v12909_v27 = vadd.f32 %v4419_v20, %v4086_v37  ;;  %v12919_v38 = vsel %vm5294_vm2, 1.0, %v16719_v4 }
 0x3ad   : > { %5182 = vmatprep.mubr.f32.mxu1 %v16719_v4  ;;  %v4093_v28 = vpop.f32.mrf.mxu0  ;;  %17023 = vst [vmem:[#allocation94_spill] sm:$0xff] %v12919_v38  ;;  %v5393_v50 = vsel %vm844_vm4, %v12919_v38, 0 }
 0x3ae   : > { %v4446_v12 = vpop.f32.mrf.mxu1  ;;  %v4094_v3 = vadd.f32 %v4093_v28, %v12563_v22  ;;  %v12916_v62 = vadd.f32 %v4426_v25, %v4092_v9  ;;  %v12929_v25 = vsub.f32 %v5390_v60, %v5390_v60  ;;  %v5208_v37 = vpop.permute.xlu1 %5207  ;;  %v12950_v9 = vsub.f32 %v5393_v50, %v5393_v50 }
 0x3af   : > { %v4099_v63 = vpop.f32.mrf.mxu0  ;;  %9383 = vmatmul.mubr.msk.f32.gmra.mxu0 %vm844_vm4, %v12047_v24  ;;  %vm5296_vm5 = vcmp.eq.s32.totalorder %v5208_v37, %v10150_v40 }
 0x3b0   : > { %v4453_v61 = vpop.f32.mrf.mxu1  ;;  %9417 = vmatmul.mubr.msk.f32.gmra.mxu1 %vm844_vm4, %v12111_v1  ;;  %v4100_v20 = vadd.f32 %v4099_v63, %v12569_v56  ;;  %4884 = vmatprep.mubr.f32.mxu0 %v16719_v4  ;;  %v12927_v29 = vadd.f32 %v4428_v32, %v4094_v3  ;;  %v12939_v56 = vsel %vm5295_vm3, 1.0, %v16719_v4  ;;  %v5211_v3 = vpop.permute.xlu0 %5210 }
 0x3b1   : > { %5189 = vmatprep.mubr.f32.mxu1 %v16719_v4  ;;  %v4101_v52 = vpop.f32.mrf.mxu0  ;;  %17025 = vst [vmem:[#allocation107_spill] sm:$0xff] %v12939_v56  ;;  %v5396_v28 = vsel %vm844_vm4, %v12939_v56, 0  ;;  %vm5297_vm6 = vcmp.eq.s32.totalorder %v5211_v3, %v10150_v40 }
 0x3b2   : > { %v4455_v22 = vpop.f32.mrf.mxu1  ;;  %v4102_v41 = vadd.f32 %v4101_v52, %v12575_v42  ;;  %v12936_v30 = vadd.f32 %v4435_v49, %v4100_v20  ;;  %v16275_v49 = vand.u32 4294901760, %v12929_v25  ;;  %v12978_v50 = vsub.f32 %v5396_v28, %v5396_v28 }
 0x3b3   : > { %v4107_v32 = vpop.f32.mrf.mxu0  ;;  %9384 = vmatmul.mubr.msk.f32.gmra.mxu0 %vm844_vm4, %v12079_v44 }
 0x3b4   : > { %v4462_v24 = vpop.f32.mrf.mxu1  ;;  %9418 = vmatmul.mubr.msk.f32.gmra.mxu1 %vm844_vm4, %v17024_v6  ;;  %v4108_v42 = vadd.f32 %v4107_v32, %v12581_v47  ;;  %4891 = vmatprep.mubr.f32.mxu0 %v16719_v4  ;;  %v12947_v34 = vadd.f32 %v4437_v7, %v4102_v41  ;;  %v12962_v7 = vsel %vm5296_vm5, 1.0, %v16719_v4  ;;  %v5555_v52 = vsub.f32 %v12929_v25, %v16275_v49 }
 0x3b5   : > { %5978 = vmatprep.mubr.f32.mxu1 %v16719_v4  ;;  %v4109_v23 = vpop.f32.mrf.mxu0  ;;  %17026 = vst [vmem:[#allocation118_spill] sm:$0xff] %v12962_v7  ;;  %17027 = vst [vmem:[#allocation119_spill] sm:$0xff] %v12978_v50  ;;  %v16274_v41 = vand.u32 4294901760, %v12950_v9 }
 0x3b6   : > { %v4464_v26 = vpop.f32.mrf.mxu1  ;;  %v4110_v44 = vadd.f32 %v4109_v23, %v12584_v0  ;;  %v12959_v47 = vadd.f32 %v4444_v14, %v4108_v42  ;;  %v5214_v42 = vpop.permute.xlu1 %5213  ;;  %v12994_v23 = vsel %vm5297_vm6, 1.0, %v16719_v4 }
 0x3b7   : > { %v4115_v63 = vpop.f32.mrf.mxu0  ;;  %9385 = vmatmul.mubr.msk.f32.gmra.mxu0 %vm844_vm4, %v12111_v1  ;;  %17028 = vst [vmem:[#allocation120_spill] sm:$0xff] %v12994_v23  ;;  %vm5298_vm7 = vcmp.eq.s32.totalorder %v5214_v42, %v10150_v40 }
 0x3b8   : > { %v12955_v60 = vpop.f32.mrf.mxu1  ;;  %9451 = vmatmul.mubr.msk.f32.vlgmr.msra.gmra.mxu1 %vm844_vm4, %v12901_v19  ;;  %v4116_v0 = vadd.f32 %v4115_v63, %v12590_v15  ;;  %4898 = vmatprep.mubr.f32.mxu0 %v16719_v4  ;;  %v12973_v14 = vadd.f32 %v4446_v12, %v4110_v44  ;;  %v5399_v15 = vsel %vm844_vm4, %v12962_v7, 0  ;;  %v5556_v44 = vand.u32 4294901760, %v5555_v52  ;;  %v17036_v19 = vld [vmem:[#allocation30_spill] sm:$0xff] }
 0x3b9   : > { %5985 = vmatprep.mubr.f32.mxu1 %v16719_v4  ;;  %6561 = vmatpush1.msra.mxu1 %v12539_v17  ;;  %v4117_v1 = vpop.f32.mrf.mxu0  ;;  %v13006_v3 = vsub.f32 %v5399_v15, %v5399_v15  ;;  %v13022_v52 = vsel %vm5298_vm7, 1.0, %v16719_v4  ;;  %v5217_v15 = vpop.permute.xlu0 %5216 }
 0x3ba   : > { %v12969_v20 = vpop.f32.mrf.mxu1  ;;  %7209 = vmatprep.subr.mxu1 %v12367_v55  ;;  %v4118_v37 = vadd.f32 %v4117_v1, %v12594_v35  ;;  %v12989_v12 = vadd.f32 %v4453_v61, %v4116_v0  ;;  %v5402_v1 = vsel %vm844_vm4, %v12994_v23, 0  ;;  %17031 = vst [vmem:[#allocation123_spill] sm:$0xff] %v13022_v52  ;;  %vm5299_vm8 = vcmp.eq.s32.totalorder %v5217_v15, %v10150_v40 }
 0x3bb   : > { %v4123_v28 = vpop.f32.mrf.mxu0  ;;  %9386 = vmatmul.mubr.msk.f32.gmra.mxu0 %vm844_vm4, %v17024_v6  ;;  %17029 = vst [vmem:[#allocation121_spill] sm:$0xff] %v13006_v3  ;;  %v5566_v6 = vsub.f32 %v12950_v9, %v16274_v41 }
 0x3bc   : > { %v12985_v32 = vpop.f32.mrf.mxu1  ;;  %9452 = vmatmul.mubr.msk.f32.gmra.mxu1 %vm844_vm4, %v12919_v38  ;;  %v4124_v55 = vadd.f32 %v4123_v28, %v12600_v10  ;;  %5551 = vmatprep.mubr.f32.mxu0 %v16719_v4  ;;  %v13004_v61 = vadd.f32 %v4455_v22, %v4118_v37  ;;  %v17032_v28 = vld [vmem:[#allocation33_spill] sm:$0xff]  ;;  %v16284_v38 = vand.u32 4294901760, %v13006_v3 }
 0x3bd   : > { %5992 = vmatprep.mubr.f32.mxu1 %v16719_v4  ;;  %v4125_v63 = vpop.f32.mrf.mxu0  ;;  %v5567_v0 = vand.u32 4294901760, %v5566_v6 }
 0x3be   : > { %v13001_v35 = vpop.f32.mrf.mxu1  ;;  %v4126_v10 = vadd.f32 %v4125_v63, %v12603_v21  ;;  %v13019_v22 = vadd.f32 %v4462_v24, %v4124_v55  ;;  %v17033_v63 = vld [vmem:[#allocation50_spill] sm:$0xff]  ;;  %v13033_v55 = vsub.f32 %v5402_v1, %v5402_v1  ;;  %v5220_v1 = vpop.permute.xlu1 %5219 }
 0x3bf   : > { %v4131_v37 = vpop.f32.mrf.mxu0  ;;  %5557 = vmatmul.mubr.f32.vlgmr.msra.gmra.mxu0 %v5556_v44  ;;  %v17035_v44 = vand.u32 4294901760, %v12978_v50  ;;  %vm5300_vm9 = vcmp.eq.s32.totalorder %v5220_v1, %v10150_v40 }
 0x3c0   : > { %v13015_v42 = vpop.f32.mrf.mxu1  ;;  %9453 = vmatmul.mubr.msk.f32.gmra.mxu1 %vm844_vm4, %v12939_v56  ;;  %17030 = vst [vmem:[#allocation122_spill] sm:$0xff] %v13019_v22  ;;  %v4132_v41 = vadd.f32 %v4131_v37, %v17032_v28  ;;  %5562 = vmatprep.mubr.f32.mxu0 %v16719_v4  ;;  %v13031_v24 = vadd.f32 %v4464_v26, %v4126_v10  ;;  %17034 = vst [vmem:[#allocation33_spill] sm:$0xff] %v13033_v55  ;;  %v17037_v37 = vand.u32 4294901760, %v17036_v19  ;;  %v17038_v22 = vld [vmem:[#allocation79_spill] sm:$0xff] }
 0x3c1   : > { %5999 = vmatprep.mubr.f32.mxu1 %v16719_v4  ;;  %6238 = vmatpush1.msra.mxu0 %v17033_v63  ;;  %v4133_v49 = vpop.f32.mrf.mxu0  ;;  %v5577_v56 = vsub.f32 %v12978_v50, %v17035_v44  ;;  %v5405_v28 = vsel %vm844_vm4, %v13022_v52, 0  ;;  %v13052_v10 = vsel %vm5299_vm8, 1.0, %v16719_v4 }
 0x3c2   : > { %v13027_v21 = vpop.f32.mrf.mxu1  ;;  %6916 = vmatprep.subr.mxu0 %v17037_v37  ;;  %v4134_v63 = vadd.f32 %v4133_v49, %v17038_v22  ;;  %v13047_v6 = vadd.f32 %v12955_v60, %v4132_v41  ;;  %17040 = vst [vmem:[#allocation79_spill] sm:$0xff] %v13052_v10  ;;  %v17041_v49 = vld [vmem:[#allocation51_spill] sm:$0xff]  ;;  %v13061_v41 = vsub.f32 %v5405_v28, %v5405_v28  ;;  %v5408_v1 = vsel %vm844_vm4, %v13052_v10, 0 }
 0x3c3   : > { %v4139_v19 = vpop.f32.mrf.mxu0  ;;  %5568 = vmatmul.mubr.f32.gmra.mxu0 %v5567_v0  ;;  %v5578_v15 = vand.u32 4294901760, %v5577_v56  ;;  %v5588_v0 = vsub.f32 %v13006_v3, %v16284_v38  ;;  %v13076_v56 = vsel %vm5300_vm9, 1.0, %v16719_v4  ;;  %v17047_v38 = vld [vmem:[#allocation81_spill] sm:$0xff] }
 0x3c4   : > { %v4498_v26 = vpop.f32.mrf.mxu1  ;;  %9454 = vmatmul.mubr.msk.f32.gmra.mxu1 %vm844_vm4, %v12962_v7  ;;  %17039 = vst [vmem:[#allocation30_spill] sm:$0xff] %v13047_v6  ;;  %v4140_v22 = vadd.f32 %v4139_v19, %v17041_v49  ;;  %5573 = vmatprep.mubr.f32.mxu0 %v16719_v4  ;;  %v13059_v60 = vadd.f32 %v12969_v20, %v4134_v63  ;;  %17043 = vst [vmem:[#allocation124_spill] sm:$0xff] %v13061_v41  ;;  %v17044_v19 = vld [vmem:[#allocation35_spill] sm:$0xff]  ;;  %v5223_v63 = vpop.permute.xlu0 %5222 }
 0x3c5   : > { %6006 = vmatprep.mubr.f32.mxu1 %v16719_v4  ;;  %v4141_v37 = vpop.f32.mrf.mxu0  ;;  %17046 = vst [vmem:[#allocation125_spill] sm:$0xff] %v13076_v56  ;;  %vm5301_vm10 = vcmp.eq.s32.totalorder %v5223_v63, %v10150_v40 }
 0x3c6   : > { %v4500_v44 = vpop.f32.mrf.mxu1  ;;  %17042 = vst [vmem:[#allocation51_spill] sm:$0xff] %v13059_v60  ;;  %v4142_v49 = vadd.f32 %v4141_v37, %v17044_v19  ;;  %v13073_v20 = vadd.f32 %v12985_v32, %v4140_v22  ;;  %v13085_v32 = vsub.f32 %v5408_v1, %v5408_v1  ;;  %v5411_v60 = vsel %vm844_vm4, %v13076_v56, 0  ;;  %v5226_v1 = vpop.permute.xlu1 %5225 }
 0x3c7   : > { %v4147_v28 = vpop.f32.mrf.mxu0  ;;  %5579 = vmatmul.mubr.f32.gmra.mxu0 %v5578_v15  ;;  %vm5302_vm11 = vcmp.eq.s32.totalorder %v5226_v1, %v10150_v40 }
 0x3c8   : > { %v4507_v6 = vpop.f32.mrf.mxu1  ;;  %9455 = vmatmul.mubr.msk.f32.gmra.mxu1 %vm844_vm4, %v12994_v23  ;;  %17045 = vst [vmem:[#allocation35_spill] sm:$0xff] %v13073_v20  ;;  %v4148_v7 = vadd.f32 %v4147_v28, %v17047_v38  ;;  %5584 = vmatprep.mubr.f32.mxu0 %v16719_v4  ;;  %v13083_v19 = vadd.f32 %v13001_v35, %v4142_v49  ;;  %17049 = vst [vmem:[#allocation126_spill] sm:$0xff] %v13085_v32  ;;  %v5589_v23 = vand.u32 4294901760, %v5588_v0  ;;  %v17051_v38 = vld [vmem:[#allocation52_spill] sm:$0xff] }
 0x3c9   : > { %6013 = vmatprep.mubr.f32.mxu1 %v16719_v4  ;;  %v4149_v22 = vpop.f32.mrf.mxu0  ;;  %v17050_v20 = vand.u32 4294901760, %v13033_v55  ;;  %v13102_v0 = vsel %vm5301_vm10, 1.0, %v16719_v4 }
 0x3ca   : > { %v4509_v37 = vpop.f32.mrf.mxu1  ;;  %17048 = vst [vmem:[#allocation81_spill] sm:$0xff] %v13083_v19  ;;  %v4150_v28 = vadd.f32 %v4149_v22, %v17051_v38  ;;  %v13097_v35 = vadd.f32 %v13015_v42, %v4148_v7  ;;  %17053 = vst [vmem:[#allocation127_spill] sm:$0xff] %v13102_v0  ;;  %v13111_v42 = vsub.f32 %v5411_v60, %v5411_v60  ;;  %v5414_v1 = vsel %vm844_vm4, %v13102_v0, 0  ;;  %v17065_v19 = vld [vmem:[#allocation85_spill] sm:$0xff] }
 0x3cb   : > { %v5599_v15 = vsub.f32 %v13033_v55, %v17050_v20  ;;  %v4155_v49 = vpop.f32.mrf.mxu0  ;;  %5590 = vmatmul.mubr.f32.gmra.mxu0 %v5589_v23  ;;  %v17054_v20 = vld [vmem:[#allocation83_spill] sm:$0xff]  ;;  %v13125_v60 = vsel %vm5302_vm11, 1.0, %v16719_v4 }
 0x3cc   : > { %v4516_v50 = vpop.f32.mrf.mxu1  ;;  %9456 = vmatmul.mubr.msk.f32.gmra.mxu1 %vm844_vm4, %v13022_v52  ;;  %17052 = vst [vmem:[#allocation52_spill] sm:$0xff] %v13097_v35  ;;  %v4156_v22 = vadd.f32 %v4155_v49, %v17054_v20  ;;  %5595 = vmatprep.mubr.f32.mxu0 %v16719_v4  ;;  %v13109_v7 = vadd.f32 %v13027_v21, %v4150_v28  ;;  %17056 = vst [vmem:[#allocation128_spill] sm:$0xff] %v13111_v42  ;;  %v17057_v52 = vand.u32 4294901760, %v13061_v41  ;;  %v17058_v49 = vld [vmem:[#allocation53_spill] sm:$0xff] }
 0x3cd   : > { %6020 = vmatprep.mubr.f32.mxu1 %v16719_v4  ;;  %v4157_v3 = vpop.f32.mrf.mxu0  ;;  %v5600_v63 = vand.u32 4294901760, %v5599_v15  ;;  %17060 = vst [vmem:[#allocation129_spill] sm:$0xff] %v13125_v60  ;;  %v5229_v15 = vpop.permute.xlu0 %5228 }
 0x3ce   : > { %v4518_v38 = vpop.f32.mrf.mxu1  ;;  %17055 = vst [vmem:[#allocation83_spill] sm:$0xff] %v13109_v7  ;;  %v5610_v23 = vsub.f32 %v13061_v41, %v17057_v52  ;;  %v4158_v20 = vadd.f32 %v4157_v3, %v17058_v49  ;;  %v13122_v21 = vadd.f32 %v4498_v26, %v4156_v22  ;;  %vm5303_vm12 = vcmp.eq.s32.totalorder %v5229_v15, %v10150_v40  ;;  %v17061_v52 = vld [vmem:[#allocation39_spill] sm:$0xff] }
 0x3cf   : > { %v4163_v28 = vpop.f32.mrf.mxu0  ;;  %5601 = vmatmul.mubr.f32.gmra.mxu0 %v5600_v63  ;;  %v13133_v49 = vsub.f32 %v5414_v1, %v5414_v1  ;;  %v5417_v7 = vsel %vm844_vm4, %v13125_v60, 0  ;;  %v5232_v1 = vpop.permute.xlu1 %5231  ;;  %v17071_v15 = vand.u32 4294901760, %v13111_v42 }
 0x3d0   : > { %v4525_v55 = vpop.f32.mrf.mxu1  ;;  %9457 = vmatmul.mubr.msk.f32.gmra.mxu1 %vm844_vm4, %v13052_v10  ;;  %17059 = vst [vmem:[#allocation53_spill] sm:$0xff] %v13122_v21  ;;  %v4164_v35 = vadd.f32 %v4163_v28, %v17061_v52  ;;  %5606 = vmatprep.mubr.f32.mxu0 %v16719_v4  ;;  %v13131_v3 = vadd.f32 %v4500_v44, %v4158_v20  ;;  %v5611_v22 = vand.u32 4294901760, %v5610_v23  ;;  %v17064_v10 = vand.u32 4294901760, %v13085_v32  ;;  %v17068_v20 = vld [vmem:[#allocation88_spill] sm:$0xff] }
 0x3d1   : > { %6027 = vmatprep.mubr.f32.mxu1 %v16719_v4  ;;  %17063 = vst [vmem:[#allocation130_spill] sm:$0xff] %v13133_v49  ;;  %v4165_v26 = vpop.f32.mrf.mxu0  ;;  %v13149_v23 = vsel %vm5303_vm12, 1.0, %v16719_v4  ;;  %vm5304_vm13 = vcmp.eq.s32.totalorder %v5232_v1, %v10150_v40 }
 0x3d2   : > { %v4527_v41 = vpop.f32.mrf.mxu1  ;;  %17062 = vst [vmem:[#allocation39_spill] sm:$0xff] %v13131_v3  ;;  %v5621_v21 = vsub.f32 %v13085_v32, %v17064_v10  ;;  %v4166_v28 = vadd.f32 %v4165_v26, %v17065_v19  ;;  %v13144_v44 = vadd.f32 %v4507_v6, %v4164_v35  ;;  %17067 = vst [vmem:[#allocation131_spill] sm:$0xff] %v13149_v23  ;;  %v5420_v1 = vsel %vm844_vm4, %v13149_v23, 0  ;;  %v17072_v32 = vld [vmem:[#allocation37_spill] sm:$0xff]  ;;  %v17079_v3 = vld [vmem:[#allocation54_spill] sm:$0xff] }
 0x3d3   : > { %v4171_v10 = vpop.f32.mrf.mxu0  ;;  %5612 = vmatmul.mubr.f32.gmra.mxu0 %v5611_v22  ;;  %v13157_v6 = vsub.f32 %v5417_v7, %v5417_v7  ;;  %v13171_v7 = vsel %vm5304_vm13, 1.0, %v16719_v4 }
 0x3d4   : > { %v4534_v52 = vpop.f32.mrf.mxu1  ;;  %9458 = vmatmul.mubr.msk.f32.gmra.mxu1 %vm844_vm4, %v13076_v56  ;;  %17066 = vst [vmem:[#allocation85_spill] sm:$0xff] %v13144_v44  ;;  %v4172_v19 = vadd.f32 %v4171_v10, %v17068_v20  ;;  %5617 = vmatprep.mubr.f32.mxu0 %v16719_v4  ;;  %v13155_v63 = vadd.f32 %v4509_v37, %v4166_v28  ;;  %v5622_v56 = vand.u32 4294901760, %v5621_v21  ;;  %17074 = vst [vmem:[#allocation133_spill] sm:$0xff] %v13171_v7  ;;  %v5235_v21 = vpop.permute.xlu0 %5234 }
 0x3d5   : > { %6034 = vmatprep.mubr.f32.mxu1 %v16719_v4  ;;  %17070 = vst [vmem:[#allocation132_spill] sm:$0xff] %v13157_v6  ;;  %v4173_v35 = vpop.f32.mrf.mxu0  ;;  %v5632_v44 = vsub.f32 %v13111_v42, %v17071_v15  ;;  %vm5305_vm14 = vcmp.eq.s32.totalorder %v5235_v21, %v10150_v40  ;;  %v17075_v15 = vld [vmem:[#allocation41_spill] sm:$0xff]  ;;  %v17085_v21 = vand.u32 4294901760, %v13157_v6 }
 0x3d6   : > { %v4536_v26 = vpop.f32.mrf.mxu1  ;;  %17069 = vst [vmem:[#allocation88_spill] sm:$0xff] %v13155_v63  ;;  %v4174_v10 = vadd.f32 %v4173_v35, %v17072_v32  ;;  %v13168_v37 = vadd.f32 %v4516_v50, %v4172_v19  ;;  %v13179_v35 = vsub.f32 %v5420_v1, %v5420_v1  ;;  %v5423_v63 = vsel %vm844_vm4, %v13171_v7, 0  ;;  %v5238_v1 = vpop.permute.xlu1 %5237 }
 0x3d7   : > { %v4179_v28 = vpop.f32.mrf.mxu0  ;;  %5623 = vmatmul.mubr.f32.gmra.mxu0 %v5622_v56  ;;  %v5633_v19 = vand.u32 4294901760, %v5632_v44  ;;  %v13195_v44 = vsel %vm5305_vm14, 1.0, %v16719_v4  ;;  %vm5306_vm15 = vcmp.eq.s32.totalorder %v5238_v1, %v10150_v40 }
 0x3d8   : > { %v4543_v20 = vpop.f32.mrf.mxu1  ;;  %9459 = vmatmul.mubr.msk.f32.gmra.mxu1 %vm844_vm4, %v13102_v0  ;;  %17073 = vst [vmem:[#allocation37_spill] sm:$0xff] %v13168_v37  ;;  %v4180_v22 = vadd.f32 %v4179_v28, %v17075_v15  ;;  %5628 = vmatprep.mubr.f32.mxu0 %v16719_v4  ;;  %v13177_v32 = vadd.f32 %v4518_v38, %v4174_v10  ;;  %17077 = vst [vmem:[#allocation134_spill] sm:$0xff] %v13179_v35  ;;  %v17078_v0 = vand.u32 4294901760, %v13133_v49  ;;  %v17082_v10 = vld [vmem:[#allocation57_spill] sm:$0xff] }
 0x3d9   : > { %6041 = vmatprep.mubr.f32.mxu1 %v16719_v4  ;;  %v4181_v50 = vpop.f32.mrf.mxu0  ;;  %17081 = vst [vmem:[#allocation135_spill] sm:$0xff] %v13195_v44  ;;  %v5426_v1 = vsel %vm844_vm4, %v13195_v44, 0 }
 0x3da   : > { %v4545_v42 = vpop.f32.mrf.mxu1  ;;  %17076 = vst [vmem:[#allocation41_spill] sm:$0xff] %v13177_v32  ;;  %v5643_v37 = vsub.f32 %v13133_v49, %v17078_v0  ;;  %v4182_v28 = vadd.f32 %v4181_v50, %v17079_v3  ;;  %v13190_v38 = vadd.f32 %v4525_v55, %v4180_v22  ;;  %v13203_v55 = vsub.f32 %v5423_v63, %v5423_v63  ;;  %v17086_v49 = vld [vmem:[#allocation58_spill] sm:$0xff]  ;;  %v17093_v32 = vld [vmem:[#allocation60_spill] sm:$0xff] }
 0x3db   : > { %v4187_v0 = vpop.f32.mrf.mxu0  ;;  %5634 = vmatmul.mubr.f32.gmra.mxu0 %v5633_v19  ;;  %v13217_v63 = vsel %vm5306_vm15, 1.0, %v16719_v4 }
 0x3dc   : > { %v4552_v15 = vpop.f32.mrf.mxu1  ;;  %9460 = vmatmul.mubr.msk.f32.gmra.mxu1 %vm844_vm4, %v13125_v60  ;;  %17080 = vst [vmem:[#allocation54_spill] sm:$0xff] %v13190_v38  ;;  %v4188_v3 = vadd.f32 %v4187_v0, %v17082_v10  ;;  %5639 = vmatprep.mubr.f32.mxu0 %v16719_v4  ;;  %v13201_v56 = vadd.f32 %v4527_v41, %v4182_v28  ;;  %17084 = vst [vmem:[#allocation136_spill] sm:$0xff] %v13203_v55  ;;  %v5644_v60 = vand.u32 4294901760, %v5643_v37  ;;  %v5241_v37 = vpop.permute.xlu0 %5240 }
 0x3dd   : > { %6048 = vmatprep.mubr.f32.mxu1 %v16719_v4  ;;  %v4189_v22 = vpop.f32.mrf.mxu0  ;;  %v5654_v38 = vsub.f32 %v13157_v6, %v17085_v21  ;;  %17088 = vst [vmem:[#allocation137_spill] sm:$0xff] %v13217_v63  ;;  %vm5307_vm0 = vcmp.eq.s32.totalorder %v5241_v37, %v10150_v40  ;;  %v17089_v21 = vld [vmem:[#allocation43_spill] sm:$0xff]  ;;  %v17099_v37 = vand.u32 4294901760, %v13203_v55 }
 0x3de   : > { %v4554_v50 = vpop.f32.mrf.mxu1  ;;  %17083 = vst [vmem:[#allocation57_spill] sm:$0xff] %v13201_v56  ;;  %v4190_v0 = vadd.f32 %v4189_v22, %v17086_v49  ;;  %v13214_v41 = vadd.f32 %v4534_v52, %v4188_v3  ;;  %v13225_v22 = vsub.f32 %v5426_v1, %v5426_v1  ;;  %v5429_v56 = vsel %vm844_vm4, %v13217_v63, 0  ;;  %v5244_v1 = vpop.permute.xlu1 %5243 }
 0x3df   : > { %v4195_v28 = vpop.f32.mrf.mxu0  ;;  %5645 = vmatmul.mubr.f32.gmra.mxu0 %v5644_v60  ;;  %v5655_v3 = vand.u32 4294901760, %v5654_v38  ;;  %v13241_v38 = vsel %vm5307_vm0, 1.0, %v16719_v4  ;;  %vm5308_vm1 = vcmp.eq.s32.totalorder %v5244_v1, %v10150_v40 }
 0x3e0   : > { %v4561_v10 = vpop.f32.mrf.mxu1  ;;  %9461 = vmatmul.mubr.msk.f32.gmra.mxu1 %vm844_vm4, %v13149_v23  ;;  %17087 = vst [vmem:[#allocation58_spill] sm:$0xff] %v13214_v41  ;;  %v4196_v19 = vadd.f32 %v4195_v28, %v17089_v21  ;;  %5650 = vmatprep.mubr.f32.mxu0 %v16719_v4  ;;  %v13223_v49 = vadd.f32 %v4536_v26, %v4190_v0  ;;  %17091 = vst [vmem:[#allocation138_spill] sm:$0xff] %v13225_v22  ;;  %v17092_v23 = vand.u32 4294901760, %v13179_v35  ;;  %v17096_v0 = vld [vmem:[#allocation34_spill] sm:$0xff] }
 0x3e1   : > { %6055 = vmatprep.mubr.f32.mxu1 %v16719_v4  ;;  %v4197_v52 = vpop.f32.mrf.mxu0  ;;  %17095 = vst [vmem:[#allocation139_spill] sm:$0xff] %v13241_v38  ;;  %v5432_v1 = vsel %vm844_vm4, %v13241_v38, 0 }
 0x3e2   : > { %v4563_v6 = vpop.f32.mrf.mxu1  ;;  %17090 = vst [vmem:[#allocation43_spill] sm:$0xff] %v13223_v49  ;;  %v5665_v41 = vsub.f32 %v13179_v35, %v17092_v23  ;;  %v4198_v28 = vadd.f32 %v4197_v52, %v17093_v32  ;;  %v13236_v26 = vadd.f32 %v4543_v20, %v4196_v19  ;;  %v13249_v20 = vsub.f32 %v5429_v56, %v5429_v56  ;;  %v17100_v35 = vld [vmem:[#allocation38_spill] sm:$0xff] }
 0x3e3   : > { %v4203_v23 = vpop.f32.mrf.mxu0  ;;  %5656 = vmatmul.mubr.f32.gmra.mxu0 %v5655_v3  ;;  %v13263_v56 = vsel %vm5308_vm1, 1.0, %v16719_v4  ;;  %v17107_v49 = vld [vmem:[#allocation66_spill] sm:$0xff] }
 0x3e4   : > { %v4570_v21 = vpop.f32.mrf.mxu1  ;;  %9462 = vmatmul.mubr.msk.f32.gmra.mxu1 %vm844_vm4, %v13171_v7  ;;  %17094 = vst [vmem:[#allocation60_spill] sm:$0xff] %v13236_v26  ;;  %v4204_v32 = vadd.f32 %v4203_v23, %v17096_v0  ;;  %5661 = vmatprep.mubr.f32.mxu0 %v16719_v4  ;;  %v13247_v60 = vadd.f32 %v4545_v42, %v4198_v28  ;;  %17098 = vst [vmem:[#allocation140_spill] sm:$0xff] %v13249_v20  ;;  %v5666_v7 = vand.u32 4294901760, %v5665_v41  ;;  %v5247_v41 = vpop.permute.xlu0 %5246 }
 0x3e5   : > { %6062 = vmatprep.mubr.f32.mxu1 %v16719_v4  ;;  %v4205_v19 = vpop.f32.mrf.mxu0  ;;  %v5676_v26 = vsub.f32 %v13203_v55, %v17099_v37  ;;  %17102 = vst [vmem:[#allocation141_spill] sm:$0xff] %v13263_v56  ;;  %vm5309_vm2 = vcmp.eq.s32.totalorder %v5247_v41, %v10150_v40  ;;  %v17103_v37 = vld [vmem:[#allocation64_spill] sm:$0xff]  ;;  %v17113_v41 = vand.u32 4294901760, %v13249_v20 }
 0x3e6   : > { %v4572_v52 = vpop.f32.mrf.mxu1  ;;  %17097 = vst [vmem:[#allocation34_spill] sm:$0xff] %v13247_v60  ;;  %v4206_v23 = vadd.f32 %v4205_v19, %v17100_v35  ;;  %v13260_v42 = vadd.f32 %v4552_v15, %v4204_v32  ;;  %v13271_v19 = vsub.f32 %v5432_v1, %v5432_v1  ;;  %v5435_v60 = vsel %vm844_vm4, %v13263_v56, 0  ;;  %v5250_v1 = vpop.permute.xlu1 %5249 }
 0x3e7   : > { %v4211_v28 = vpop.f32.mrf.mxu0  ;;  %5667 = vmatmul.mubr.f32.gmra.mxu0 %v5666_v7  ;;  %v5677_v32 = vand.u32 4294901760, %v5676_v26  ;;  %v13287_v26 = vsel %vm5309_vm2, 1.0, %v16719_v4  ;;  %vm5310_vm3 = vcmp.eq.s32.totalorder %v5250_v1, %v10150_v40 }
 0x3e8   : > { %v4579_v0 = vpop.f32.mrf.mxu1  ;;  %9463 = vmatmul.mubr.msk.f32.gmra.mxu1 %vm844_vm4, %v13195_v44  ;;  %17101 = vst [vmem:[#allocation38_spill] sm:$0xff] %v13260_v42  ;;  %v4212_v3 = vadd.f32 %v4211_v28, %v17103_v37  ;;  %5672 = vmatprep.mubr.f32.mxu0 %v16719_v4  ;;  %v13269_v35 = vadd.f32 %v4554_v50, %v4206_v23  ;;  %17105 = vst [vmem:[#allocation142_spill] sm:$0xff] %v13271_v19  ;;  %v17106_v44 = vand.u32 4294901760, %v13225_v22  ;;  %v17110_v23 = vld [vmem:[#allocation68_spill] sm:$0xff] }
 0x3e9   : > { %6069 = vmatprep.mubr.f32.mxu1 %v16719_v4  ;;  %v4213_v15 = vpop.f32.mrf.mxu0  ;;  %17109 = vst [vmem:[#allocation143_spill] sm:$0xff] %v13287_v26  ;;  %v5438_v1 = vsel %vm844_vm4, %v13287_v26, 0 }
 0x3ea   : > { %v4581_v55 = vpop.f32.mrf.mxu1  ;;  %17104 = vst [vmem:[#allocation64_spill] sm:$0xff] %v13269_v35  ;;  %v5687_v42 = vsub.f32 %v13225_v22, %v17106_v44  ;;  %v4214_v28 = vadd.f32 %v4213_v15, %v17107_v49  ;;  %v13282_v50 = vadd.f32 %v4561_v10, %v4212_v3  ;;  %v13295_v10 = vsub.f32 %v5435_v60, %v5435_v60  ;;  %v17114_v22 = vld [vmem:[#allocation70_spill] sm:$0xff] }
 0x3eb   : > { %v4219_v44 = vpop.f32.mrf.mxu0  ;;  %5678 = vmatmul.mubr.f32.gmra.mxu0 %v5677_v32  ;;  %v13309_v60 = vsel %vm5310_vm3, 1.0, %v16719_v4  ;;  %v17121_v35 = vld [vmem:[#allocation74_spill] sm:$0xff] }
 0x3ec   : > { %v4588_v37 = vpop.f32.mrf.mxu1  ;;  %9464 = vmatmul.mubr.msk.f32.gmra.mxu1 %vm844_vm4, %v13217_v63  ;;  %17108 = vst [vmem:[#allocation66_spill] sm:$0xff] %v13282_v50  ;;  %v4220_v49 = vadd.f32 %v4219_v44, %v17110_v23  ;;  %5683 = vmatprep.mubr.f32.mxu0 %v16719_v4  ;;  %v13293_v7 = vadd.f32 %v4563_v6, %v4214_v28  ;;  %17112 = vst [vmem:[#allocation144_spill] sm:$0xff] %v13295_v10  ;;  %v5688_v63 = vand.u32 4294901760, %v5687_v42  ;;  %v5253_v42 = vpop.permute.xlu0 %5252 }
 0x3ed   : > { %6076 = vmatprep.mubr.f32.mxu1 %v16719_v4  ;;  %v4221_v3 = vpop.f32.mrf.mxu0  ;;  %v5698_v50 = vsub.f32 %v13249_v20, %v17113_v41  ;;  %17116 = vst [vmem:[#allocation145_spill] sm:$0xff] %v13309_v60  ;;  %vm5311_vm5 = vcmp.eq.s32.totalorder %v5253_v42, %v10150_v40  ;;  %v17117_v41 = vld [vmem:[#allocation72_spill] sm:$0xff]  ;;  %v17127_v42 = vand.u32 4294901760, %v13295_v10 }
 0x3ee   : > { %v4590_v15 = vpop.f32.mrf.mxu1  ;;  %17111 = vst [vmem:[#allocation68_spill] sm:$0xff] %v13293_v7  ;;  %v4222_v44 = vadd.f32 %v4221_v3, %v17114_v22  ;;  %v13306_v6 = vadd.f32 %v4570_v21, %v4220_v49  ;;  %v13317_v3 = vsub.f32 %v5438_v1, %v5438_v1  ;;  %v5441_v7 = vsel %vm844_vm4, %v13309_v60, 0  ;;  %v5256_v1 = vpop.permute.xlu1 %5255 }
 0x3ef   : > { %v4227_v28 = vpop.f32.mrf.mxu0  ;;  %5689 = vmatmul.mubr.f32.gmra.mxu0 %v5688_v63  ;;  %v5699_v49 = vand.u32 4294901760, %v5698_v50  ;;  %v13333_v50 = vsel %vm5311_vm5, 1.0, %v16719_v4  ;;  %vm5312_vm6 = vcmp.eq.s32.totalorder %v5256_v1, %v10150_v40 }
 0x3f0   : > { %v4597_v23 = vpop.f32.mrf.mxu1  ;;  %9465 = vmatmul.mubr.msk.f32.gmra.mxu1 %vm844_vm4, %v13241_v38  ;;  %17115 = vst [vmem:[#allocation70_spill] sm:$0xff] %v13306_v6  ;;  %v4228_v32 = vadd.f32 %v4227_v28, %v17117_v41  ;;  %5694 = vmatprep.mubr.f32.mxu0 %v16719_v4  ;;  %v13315_v22 = vadd.f32 %v4572_v52, %v4222_v44  ;;  %17119 = vst [vmem:[#allocation146_spill] sm:$0xff] %v13317_v3  ;;  %v17120_v38 = vand.u32 4294901760, %v13271_v19  ;;  %v17124_v44 = vld [vmem:[#allocation76_spill] sm:$0xff] }
 0x3f1   : > { %6083 = vmatprep.mubr.f32.mxu1 %v16719_v4  ;;  %v4229_v21 = vpop.f32.mrf.mxu0  ;;  %17123 = vst [vmem:[#allocation147_spill] sm:$0xff] %v13333_v50  ;;  %v5444_v1 = vsel %vm844_vm4, %v13333_v50, 0 }
 0x3f2   : > { %v4599_v20 = vpop.f32.mrf.mxu1  ;;  %17118 = vst [vmem:[#allocation72_spill] sm:$0xff] %v13315_v22  ;;  %v5709_v6 = vsub.f32 %v13271_v19, %v17120_v38  ;;  %v4230_v28 = vadd.f32 %v4229_v21, %v17121_v35  ;;  %v13328_v52 = vadd.f32 %v4579_v0, %v4228_v32  ;;  %v13341_v0 = vsub.f32 %v5441_v7, %v5441_v7  ;;  %v17128_v19 = vld [vmem:[#allocation78_spill] sm:$0xff] }
 0x3f3   : > { %v4235_v38 = vpop.f32.mrf.mxu0  ;;  %5700 = vmatmul.mubr.f32.gmra.mxu0 %v5699_v49  ;;  %v13355_v7 = vsel %vm5312_vm6, 1.0, %v16719_v4  ;;  %v17134_v22 = vld [vmem:[#allocation82_spill] sm:$0xff] }
 0x3f4   : > { %v4606_v41 = vpop.f32.mrf.mxu1  ;;  %9466 = vmatmul.mubr.msk.f32.gmra.mxu1 %vm844_vm4, %v13263_v56  ;;  %17122 = vst [vmem:[#allocation74_spill] sm:$0xff] %v13328_v52  ;;  %v4236_v35 = vadd.f32 %v4235_v38, %v17124_v44  ;;  %5705 = vmatprep.mubr.f32.mxu0 %v16719_v4  ;;  %v13339_v63 = vadd.f32 %v4581_v55, %v4230_v28  ;;  %17126 = vst [vmem:[#allocation148_spill] sm:$0xff] %v13341_v0  ;;  %v5710_v56 = vand.u32 4294901760, %v5709_v6  ;;  %v5259_v6 = vpop.permute.xlu0 %5258 }
 0x3f5   : > { %6090 = vmatprep.mubr.f32.mxu1 %v16719_v4  ;;  %v4237_v32 = vpop.f32.mrf.mxu0  ;;  %v5720_v52 = vsub.f32 %v13295_v10, %v17127_v42  ;;  %17130 = vst [vmem:[#allocation149_spill] sm:$0xff] %v13355_v7  ;;  %vm5313_vm7 = vcmp.eq.s32.totalorder %v5259_v6, %v10150_v40  ;;  %v17131_v42 = vld [vmem:[#allocation80_spill] sm:$0xff]  ;;  %v17138_v6 = vand.u32 4294901760, %v13341_v0 }
 0x3f6   : > { %v4608_v21 = vpop.f32.mrf.mxu1  ;;  %17125 = vst [vmem:[#allocation76_spill] sm:$0xff] %v13339_v63  ;;  %v4238_v38 = vadd.f32 %v4237_v32, %v17128_v19  ;;  %v13352_v55 = vadd.f32 %v4588_v37, %v4236_v35  ;;  %v13363_v32 = vsub.f32 %v5444_v1, %v5444_v1  ;;  %v5447_v63 = vsel %vm844_vm4, %v13355_v7, 0  ;;  %v5262_v1 = vpop.permute.xlu1 %5261 }
 0x3f7   : > { %v4243_v28 = vpop.f32.mrf.mxu0  ;;  %5711 = vmatmul.mubr.f32.gmra.mxu0 %v5710_v56  ;;  %v5721_v35 = vand.u32 4294901760, %v5720_v52  ;;  %v13379_v52 = vsel %vm5313_vm7, 1.0, %v16719_v4  ;;  %vm5314_vm8 = vcmp.eq.s32.totalorder %v5262_v1, %v10150_v40 }
 0x3f8   : > { %v4975_v44 = vpop.f32.mrf.mxu1  ;;  %9467 = vmatmul.mubr.msk.f32.gmra.mxu1 %vm844_vm4, %v13287_v26  ;;  %17129 = vst [vmem:[#allocation78_spill] sm:$0xff] %v13352_v55  ;;  %v4244_v49 = vadd.f32 %v4243_v28, %v17131_v42  ;;  %5716 = vmatprep.mubr.f32.mxu0 %v16719_v4  ;;  %v13361_v19 = vadd.f32 %v4590_v15, %v4238_v38  ;;  %17132 = vst [vmem:[#allocation80_spill] sm:$0xff] %v13363_v32  ;;  %v17133_v26 = vand.u32 4294901760, %v13317_v3  ;;  %v17136_v38 = vld [vmem:[#allocation84_spill] sm:$0xff] }
 0x3f9   : > { %6097 = vmatprep.mubr.f32.mxu1 %v16719_v4  ;;  %v4245_v37 = vpop.f32.mrf.mxu0  ;;  %v5450_v1 = vsel %vm844_vm4, %v13379_v52, 0 }
 0x3fa   : > { %v4977_v10 = vpop.f32.mrf.mxu1  ;;  %v5731_v55 = vsub.f32 %v13317_v3, %v17133_v26  ;;  %v4246_v28 = vadd.f32 %v4245_v37, %v17134_v22  ;;  %v13374_v15 = vadd.f32 %v4597_v23, %v4244_v49  ;;  %v13387_v23 = vsub.f32 %v5447_v63, %v5447_v63  ;;  %v17139_v3 = vld [vmem:[#allocation86_spill] sm:$0xff] }
 0x3fb   : > { %v4251_v26 = vpop.f32.mrf.mxu0  ;;  %5722 = vmatmul.mubr.f32.gmra.mxu0 %v5721_v35  ;;  %v13403_v63 = vsel %vm5314_vm8, 1.0, %v16719_v4 }
 0x3fc   : > { %v4982_v42 = vpop.f32.mrf.mxu1  ;;  %9468 = vmatmul.mubr.msk.f32.gmra.mxu1 %vm844_vm4, %v13309_v60  ;;  %17135 = vst [vmem:[#allocation82_spill] sm:$0xff] %v13374_v15  ;;  %v4252_v22 = vadd.f32 %v4251_v26, %v17136_v38  ;;  %5727 = vmatprep.mubr.f32.mxu0 %v16719_v4  ;;  %v13385_v56 = vadd.f32 %v4599_v20, %v4246_v28  ;;  %v5732_v60 = vand.u32 4294901760, %v5731_v55  ;;  %v5265_v55 = vpop.permute.xlu0 %5264 }
 0x3fd   : > { %6104 = vmatprep.mubr.f32.mxu1 %v16719_v4  ;;  %v4253_v49 = vpop.f32.mrf.mxu0  ;;  %v5742_v15 = vsub.f32 %v13341_v0, %v17138_v6  ;;  %vm5315_vm9 = vcmp.eq.s32.totalorder %v5265_v55, %v10150_v40  ;;  %v5453_v0 = vsel %vm844_vm4, %v13403_v63, 0 }
 0x3fe   : > { %v4984_v37 = vpop.f32.mrf.mxu1  ;;  %17137 = vst [vmem:[#allocation84_spill] sm:$0xff] %v13385_v56  ;;  %v4254_v26 = vadd.f32 %v4253_v49, %v17139_v3  ;;  %v13400_v20 = vadd.f32 %v4606_v41, %v4252_v22  ;;  %v13413_v41 = vsub.f32 %v5450_v1, %v5450_v1 }
 0x3ff   : > { %v4684_v28 = vpop.f32.mrf.mxu0  ;;  %5733 = vmatmul.mubr.f32.gmra.mxu0 %v5732_v60  ;;  %v5743_v35 = vand.u32 4294901760, %v5742_v15  ;;  %v13429_v15 = vsel %vm5315_vm9, 1.0, %v16719_v4 }
 0x400   : > { %v13396_v38 = vpop.f32.mrf.mxu1  ;;  %9469 = vmatmul.mubr.msk.f32.gmra.mxu1 %vm844_vm4, %v13333_v50  ;;  %17140 = vst [vmem:[#allocation86_spill] sm:$0xff] %v13400_v20  ;;  %v4685_v6 = vadd.f32 %v4684_v28, %v12777_v11  ;;  %5738 = vmatprep.mubr.f32.mxu0 %v16719_v4  ;;  %v13411_v49 = vadd.f32 %v4608_v21, %v4254_v26  ;;  %v17141_v50 = vand.u32 4294901760, %v13363_v32  ;;  %v5268_v21 = vpop.permute.xlu1 %5267 }
 0x401   : > { %6111 = vmatprep.mubr.f32.mxu1 %v16719_v4  ;;  %v4686_v22 = vpop.f32.mrf.mxu0  ;;  %vm5316_vm10 = vcmp.eq.s32.totalorder %v5268_v21, %v10150_v40 }
 0x402   : > { %v13408_v3 = vpop.f32.mrf.mxu1  ;;  %v5753_v60 = vsub.f32 %v13363_v32, %v17141_v50  ;;  %v4976_v11 = vadd.f32 %v4975_v44, %v4685_v6  ;;  %v4687_v28 = vadd.f32 %v4686_v22, %v12784_v43  ;;  %v17142_v44 = vld [vmem:[#allocation55_spill] sm:$0xff]  ;;  %v13440_v22 = vsub.f32 %v5453_v0, %v5453_v0 }
 0x403   : > { %v4691_v50 = vpop.f32.mrf.mxu0  ;;  %5744 = vmatmul.mubr.f32.gmra.mxu0 %v5743_v35  ;;  %v17144_v35 = vand.u32 4294901760, %v13387_v23  ;;  %v13459_v0 = vsel %vm5316_vm10, 1.0, %v16719_v4 }
 0x404   : > { %v13422_v56 = vpop.f32.mrf.mxu1  ;;  %9470 = vmatmul.mubr.msk.f32.gmra.mxu1 %vm844_vm4, %v13355_v7  ;;  %v13434_v1 = vmul.f32 %v4976_v11, %v17142_v44  ;;  %v4978_v43 = vadd.f32 %v4977_v10, %v4687_v28  ;;  %v4692_v26 = vadd.f32 %v4691_v50, %v12789_v53  ;;  %5749 = vmatprep.mubr.f32.mxu0 %v16719_v4  ;;  %v5754_v20 = vand.u32 4294901760, %v5753_v60  ;;  %v17145_v10 = vld [vmem:[#allocation56_spill] sm:$0xff]  ;;  %v5271_v60 = vpop.permute.xlu0 %5270 }
 0x405   : > { %6118 = vmatprep.mubr.f32.mxu1 %v16719_v4  ;;  %v4693_v55 = vpop.f32.mrf.mxu0  ;;  %v5764_v7 = vsub.f32 %v13387_v23, %v17144_v35  ;;  %v5456_v11 = vsel %vm844_vm4, %v13429_v15, 0  ;;  %vm5317_vm11 = vcmp.eq.s32.totalorder %v5271_v60, %v10150_v40 }
 0x406   : > { %17143 = vst [vmem:[#allocation55_spill] sm:$0xff] %v13434_v1  ;;  %v13437_v6 = vpop.f32.mrf.mxu1  ;;  %v13449_v28 = vmul.f32 %v4978_v43, %v17145_v10  ;;  %v4983_v53 = vadd.f32 %v4982_v42, %v4692_v26  ;;  %v4694_v50 = vadd.f32 %v4693_v55, %v12796_v48  ;;  %v17147_v42 = vld [vmem:[#allocation89_spill] sm:$0xff]  ;;  %v13470_v21 = vsub.f32 %v5456_v11, %v5456_v11 }
 0x407   : > { %v4698_v35 = vpop.f32.mrf.mxu0  ;;  %5755 = vmatmul.mubr.f32.gmra.mxu0 %v5754_v20  ;;  %v5765_v32 = vand.u32 4294901760, %v5764_v7  ;;  %v17149_v20 = vand.u32 4294901760, %v13413_v41  ;;  %v5274_v7 = vpop.permute.xlu1 %5273 }
 0x408   : > { %17146 = vst [vmem:[#allocation56_spill] sm:$0xff] %v13449_v28  ;;  %v13452_v44 = vpop.f32.mrf.mxu1  ;;  %9471 = vmatmul.mubr.msk.f32.gmra.mxu1 %vm844_vm4, %v13379_v52  ;;  %v13464_v43 = vmul.f32 %v4983_v53, %v17147_v42  ;;  %v4985_v48 = vadd.f32 %v4984_v37, %v4694_v50  ;;  %v4699_v26 = vadd.f32 %v4698_v35, %v12801_v39  ;;  %v5459_v53 = vsel %vm844_vm4, %v13459_v0, 0  ;;  %v17150_v37 = vld [vmem:[#allocation90_spill] sm:$0xff] }
 0x409   : > { %6125 = vmatprep.mubr.f32.mxu1 %v16719_v4  ;;  %5760 = vmatprep.mubr.f32.mxu0 %v16719_v4  ;;  %v4700_v10 = vpop.f32.mrf.mxu0  ;;  %v5775_v28 = vsub.f32 %v13413_v41, %v17149_v20  ;;  %v13490_v42 = vsel %vm5317_vm11, 1.0, %v16719_v4  ;;  %vm5318_vm12 = vcmp.eq.s32.totalorder %v5274_v7, %v10150_v40  ;;  %v13502_v60 = vsub.f32 %v5459_v53, %v5459_v53 }
 0x40a   : > { %17148 = vst [vmem:[#allocation89_spill] sm:$0xff] %v13464_v43  ;;  %v13467_v55 = vpop.f32.mrf.mxu1  ;;  %v13479_v50 = vmul.f32 %v4985_v48, %v17150_v37  ;;  %v4990_v39 = vadd.f32 %v13396_v38, %v4699_v26  ;;  %v4701_v35 = vadd.f32 %v4700_v10, %v12808_v58  ;;  %v17152_v38 = vld [vmem:[#allocation91_spill] sm:$0xff] }
 0x40b   : > { %v4705_v20 = vpop.f32.mrf.mxu0  ;;  %5766 = vmatmul.mubr.f32.gmra.mxu0 %v5765_v32  ;;  %v5776_v1 = vand.u32 4294901760, %v5775_v28  ;;  %v17154_v32 = vand.u32 4294901760, %v13440_v22  ;;  %v13522_v28 = vsel %vm5318_vm12, 1.0, %v16719_v4 }
 0x40c   : > { %17151 = vst [vmem:[#allocation90_spill] sm:$0xff] %v13479_v50  ;;  %v13483_v11 = vpop.f32.mrf.mxu1  ;;  %9472 = vmatmul.mubr.msk.f32.gmra.mxu1 %vm844_vm4, %v13403_v63  ;;  %v13495_v48 = vmul.f32 %v4990_v39, %v17152_v38  ;;  %v4992_v58 = vadd.f32 %v13408_v3, %v4701_v35  ;;  %v4706_v26 = vadd.f32 %v4705_v20, %v12813_v36  ;;  %v5462_v39 = vsel %vm844_vm4, %v13490_v42, 0  ;;  %v17155_v3 = vld [vmem:[#allocation92_spill] sm:$0xff]  ;;  %v5277_v38 = vpop.permute.xlu0 %5276 }
 0x40d   : > { %6132 = vmatprep.mubr.f32.mxu1 %v16719_v4  ;;  %5771 = vmatprep.mubr.f32.mxu0 %v16719_v4  ;;  %v4707_v37 = vpop.f32.mrf.mxu0  ;;  %v5786_v50 = vsub.f32 %v13440_v22, %v17154_v32  ;;  %17157 = vst [vmem:[#allocation150_spill] sm:$0xff] %v13522_v28  ;;  %vm5319_vm13 = vcmp.eq.s32.totalorder %v5277_v38, %v10150_v40 }
 0x40e   : > { %17153 = vst [vmem:[#allocation91_spill] sm:$0xff] %v13495_v48  ;;  %v13499_v10 = vpop.f32.mrf.mxu1  ;;  %v13511_v35 = vmul.f32 %v4992_v58, %v17155_v3  ;;  %v4997_v36 = vadd.f32 %v13422_v56, %v4706_v26  ;;  %v4708_v20 = vadd.f32 %v4707_v37, %v12820_v51  ;;  %v17158_v56 = vld [vmem:[#allocation93_spill] sm:$0xff]  ;;  %v13534_v7 = vsub.f32 %v5462_v39, %v5462_v39 }
 0x40f   : > { %v4712_v32 = vpop.f32.mrf.mxu0  ;;  %5777 = vmatmul.mubr.f32.gmra.mxu0 %v5776_v1  ;;  %v5787_v43 = vand.u32 4294901760, %v5786_v50  ;;  %v17160_v1 = vand.u32 4294901760, %v13470_v21  ;;  %v5280_v50 = vpop.permute.xlu1 %5279 }
 0x410   : > { %17156 = vst [vmem:[#allocation92_spill] sm:$0xff] %v13511_v35  ;;  %v13515_v53 = vpop.f32.mrf.mxu1  ;;  %9473 = vmatmul.mubr.msk.f32.gmra.mxu1 %vm844_vm4, %v13429_v15  ;;  %v13527_v58 = vmul.f32 %v4997_v36, %v17158_v56  ;;  %v4999_v51 = vadd.f32 %v13437_v6, %v4708_v20  ;;  %v4713_v26 = vadd.f32 %v4712_v32, %v12825_v5  ;;  %v5465_v36 = vsel %vm844_vm4, %v13522_v28, 0  ;;  %v17161_v6 = vld [vmem:[#allocation95_spill] sm:$0xff] }
 0x411   : > { %6139 = vmatprep.mubr.f32.mxu1 %v16719_v4  ;;  %5782 = vmatprep.mubr.f32.mxu0 %v16719_v4  ;;  %v4714_v3 = vpop.f32.mrf.mxu0  ;;  %v5797_v35 = vsub.f32 %v13470_v21, %v17160_v1  ;;  %v13554_v56 = vsel %vm5319_vm13, 1.0, %v16719_v4  ;;  %vm5320_vm14 = vcmp.eq.s32.totalorder %v5280_v50, %v10150_v40  ;;  %v13566_v38 = vsub.f32 %v5465_v36, %v5465_v36 }
 0x412   : > { %17159 = vst [vmem:[#allocation93_spill] sm:$0xff] %v13527_v58  ;;  %v13531_v37 = vpop.f32.mrf.mxu1  ;;  %v13543_v20 = vmul.f32 %v4999_v51, %v17161_v6  ;;  %v5004_v5 = vadd.f32 %v13452_v44, %v4713_v26  ;;  %v4715_v32 = vadd.f32 %v4714_v3, %v12832_v59  ;;  %v17163_v44 = vld [vmem:[#allocation96_spill] sm:$0xff] }
 0x413   : > { %v4719_v1 = vpop.f32.mrf.mxu0  ;;  %5788 = vmatmul.mubr.f32.gmra.mxu0 %v5787_v43  ;;  %v5798_v48 = vand.u32 4294901760, %v5797_v35  ;;  %v17165_v43 = vand.u32 4294901760, %v13502_v60  ;;  %v13586_v35 = vsel %vm5320_vm14, 1.0, %v16719_v4 }
 0x414   : > { %17162 = vst [vmem:[#allocation95_spill] sm:$0xff] %v13543_v20  ;;  %v13547_v39 = vpop.f32.mrf.mxu1  ;;  %9474 = vmatmul.mubr.msk.f32.gmra.mxu1 %vm844_vm4, %v13459_v0  ;;  %v13559_v51 = vmul.f32 %v5004_v5, %v17163_v44  ;;  %v5006_v59 = vadd.f32 %v13467_v55, %v4715_v32  ;;  %v4720_v26 = vadd.f32 %v4719_v1, %v12837_v54  ;;  %v5468_v5 = vsel %vm844_vm4, %v13554_v56, 0  ;;  %v17166_v55 = vld [vmem:[#allocation97_spill] sm:$0xff]  ;;  %v5283_v44 = vpop.permute.xlu0 %5282 }
 0x415   : > { %6146 = vmatprep.mubr.f32.mxu1 %v16719_v4  ;;  %5793 = vmatprep.mubr.f32.mxu0 %v16719_v4  ;;  %v4721_v6 = vpop.f32.mrf.mxu0  ;;  %v5808_v20 = vsub.f32 %v13502_v60, %v17165_v43  ;;  %vm5321_vm15 = vcmp.eq.s32.totalorder %v5283_v44, %v10150_v40  ;;  %v13598_v50 = vsub.f32 %v5468_v5, %v5468_v5 }
 0x416   : > { %17164 = vst [vmem:[#allocation96_spill] sm:$0xff] %v13559_v51  ;;  %v13563_v3 = vpop.f32.mrf.mxu1  ;;  %v13575_v32 = vmul.f32 %v5006_v59, %v17166_v55  ;;  %v5011_v54 = vadd.f32 %v13483_v11, %v4720_v26  ;;  %v4722_v1 = vadd.f32 %v4721_v6, %v12844_v57  ;;  %v17168_v11 = vld [vmem:[#allocation98_spill] sm:$0xff] }
 0x417   : > { %v4726_v43 = vpop.f32.mrf.mxu0  ;;  %5799 = vmatmul.mubr.f32.gmra.mxu0 %v5798_v48  ;;  %v5809_v58 = vand.u32 4294901760, %v5808_v20  ;;  %v17170_v48 = vand.u32 4294901760, %v13534_v7  ;;  %v5286_v20 = vpop.permute.xlu1 %5285 }
 0x418   : > { %17167 = vst [vmem:[#allocation97_spill] sm:$0xff] %v13575_v32  ;;  %v13579_v36 = vpop.f32.mrf.mxu1  ;;  %9475 = vmatmul.mubr.msk.f32.gmra.mxu1 %vm844_vm4, %v13490_v42  ;;  %v13591_v59 = vmul.f32 %v5011_v54, %v17168_v11  ;;  %v5013_v57 = vadd.f32 %v13499_v10, %v4722_v1  ;;  %v4727_v26 = vadd.f32 %v4726_v43, %v12849_v18  ;;  %v5471_v54 = vsel %vm844_vm4, %v13586_v35, 0  ;;  %v17171_v10 = vld [vmem:[#allocation99_spill] sm:$0xff]  ;;  %v5289_v44 = vpop.permute.xlu0 %5288 }
 0x419   : > { %6153 = vmatprep.mubr.f32.mxu1 %v16719_v4  ;;  %5804 = vmatprep.mubr.f32.mxu0 %v16719_v4  ;;  %v4728_v55 = vpop.f32.mrf.mxu0  ;;  %v5819_v32 = vsub.f32 %v13534_v7, %v17170_v48  ;;  %v13618_v11 = vsel %vm5321_vm15, 1.0, %v16719_v4  ;;  %vm5322_vm0 = vcmp.eq.s32.totalorder %v5286_v20, %v10150_v40  ;;  %vm5323_vm1 = vcmp.eq.s32.totalorder %v5289_v44, %v10150_v40 }
 0x41a   : > { %17169 = vst [vmem:[#allocation98_spill] sm:$0xff] %v13591_v59  ;;  %v13595_v6 = vpop.f32.mrf.mxu1  ;;  %v13607_v1 = vmul.f32 %v5013_v57, %v17171_v10  ;;  %v5018_v18 = vadd.f32 %v13515_v53, %v4727_v26  ;;  %v4729_v43 = vadd.f32 %v4728_v55, %v12856_v46  ;;  %v17173_v53 = vld [vmem:[#allocation100_spill] sm:$0xff]  ;;  %v13628_v10 = vsub.f32 %v5471_v54, %v5471_v54 }
 0x41b   : > { %v4733_v48 = vpop.f32.mrf.mxu0  ;;  %5810 = vmatmul.mubr.f32.gmra.mxu0 %v5809_v58  ;;  %v17175_v58 = vand.u32 4294901760, %v13566_v38 }
 0x41c   : > { %17172 = vst [vmem:[#allocation99_spill] sm:$0xff] %v13607_v1  ;;  %v13611_v5 = vpop.f32.mrf.mxu1  ;;  %9476 = vmatmul.mubr.msk.f32.gmra.mxu1 %vm844_vm4, %v13522_v28  ;;  %v13623_v57 = vmul.f32 %v5018_v18, %v17173_v53  ;;  %v5020_v46 = vadd.f32 %v13531_v37, %v4729_v43  ;;  %v4734_v26 = vadd.f32 %v4733_v48, %v12861_v33  ;;  %v5820_v1 = vand.u32 4294901760, %v5819_v32  ;;  %v17176_v37 = vld [vmem:[#allocation101_spill] sm:$0xff] }
 0x41d   : > { %6160 = vmatprep.mubr.f32.mxu1 %v16719_v4  ;;  %5815 = vmatprep.mubr.f32.mxu0 %v16719_v4  ;;  %v4735_v51 = vpop.f32.mrf.mxu0  ;;  %v5830_v59 = vsub.f32 %v13566_v38, %v17175_v58  ;;  %v5474_v18 = vsel %vm844_vm4, %v13618_v11, 0  ;;  %v13646_v32 = vsel %vm5322_vm0, 1.0, %v16719_v4 }
 0x41e   : > { %17174 = vst [vmem:[#allocation100_spill] sm:$0xff] %v13623_v57  ;;  %v5040_v55 = vpop.f32.mrf.mxu1  ;;  %v13637_v43 = vmul.f32 %v5020_v46, %v17176_v37  ;;  %v5025_v33 = vadd.f32 %v13547_v39, %v4734_v26  ;;  %v4736_v54 = vadd.f32 %v4735_v51, %v12868_v13  ;;  %v17178_v46 = vld [vmem:[#allocation102_spill] sm:$0xff]  ;;  %v5292_v26 = vpop.permute.xlu1 %5291  ;;  %v13656_v20 = vsub.f32 %v5474_v18, %v5474_v18 }
 0x41f   : > { %v4740_v53 = vpop.f32.mrf.mxu0  ;;  %5821 = vmatmul.mubr.f32.gmra.mxu0 %v5820_v1  ;;  %v5831_v28 = vand.u32 4294901760, %v5830_v59  ;;  %v17180_v1 = vand.u32 4294901760, %v13598_v50  ;;  %v16353_v57 = vand.u32 4294901760, %v13628_v10  ;;  %v13674_v59 = vsel %vm5323_vm1, 1.0, %v16719_v4 }
 0x420   : > { %17177 = vst [vmem:[#allocation101_spill] sm:$0xff] %v13637_v43  ;;  %v5045_v48 = vpop.f32.mrf.mxu1  ;;  %9477 = vmatmul.mubr.msk.f32.gmra.mxu1 %vm844_vm4, %v13554_v56  ;;  %v13651_v58 = vmul.f32 %v5025_v33, %v17178_v46  ;;  %v5027_v13 = vadd.f32 %v13563_v3, %v4736_v54  ;;  %v4741_v39 = vadd.f32 %v4740_v53, %v12873_v8  ;;  %v5477_v33 = vsel %vm844_vm4, %v13646_v32, 0  ;;  %v17181_v3 = vld [vmem:[#allocation103_spill] sm:$0xff] }
 0x421   : > { %6167 = vmatprep.mubr.f32.mxu1 %v16719_v4  ;;  %5826 = vmatprep.mubr.f32.mxu0 %v16719_v4  ;;  %v4742_v37 = vpop.f32.mrf.mxu0  ;;  %v5841_v43 = vsub.f32 %v13598_v50, %v17180_v1  ;;  %vm5324_vm2 = vcmp.eq.s32.totalorder %v5292_v26, %v10150_v40  ;;  %v17189_v40 = vand.u32 4294901760, %v13656_v20 }
 0x422   : > { %17179 = vst [vmem:[#allocation102_spill] sm:$0xff] %v13651_v58  ;;  %v5047_v51 = vpop.f32.mrf.mxu1  ;;  %v13665_v54 = vmul.f32 %v5027_v13, %v17181_v3  ;;  %v5032_v8 = vadd.f32 %v13579_v36, %v4741_v39  ;;  %v4743_v53 = vadd.f32 %v4742_v37, %v12880_v16  ;;  %v17183_v13 = vld [vmem:[#allocation104_spill] sm:$0xff]  ;;  %v13684_v37 = vsub.f32 %v5477_v33, %v5477_v33 }
 0x423   : > { %v4747_v46 = vpop.f32.mrf.mxu0  ;;  %5832 = vmatmul.mubr.f32.gmra.mxu0 %v5831_v28  ;;  %v5842_v3 = vand.u32 4294901760, %v5841_v43  ;;  %v5852_v28 = vsub.f32 %v13628_v10, %v16353_v57  ;;  %v13702_v43 = vsel %vm5324_vm2, 1.0, %v16719_v4  ;;  %v17187_v57 = vld [vmem:[#allocation106_spill] sm:$0xff]  ;;  %v5863_v26 = vsub.f32 %v13656_v20, %v17189_v40 }
 0x424   : > { %17182 = vst [vmem:[#allocation103_spill] sm:$0xff] %v13665_v54  ;;  %v5052_v18 = vpop.f32.mrf.mxu1  ;;  %9478 = vmatmul.mubr.msk.f32.gmra.mxu1 %vm844_vm4, %v13586_v35  ;;  %v13679_v1 = vmul.f32 %v5032_v8, %v17183_v13  ;;  %v5034_v16 = vadd.f32 %v13595_v6, %v4743_v53  ;;  %v4748_v36 = vadd.f32 %v4747_v46, %v12885_v2  ;;  %v5480_v8 = vsel %vm844_vm4, %v13674_v59, 0  ;;  %v17185_v13 = vld [vmem:[#allocation105_spill] sm:$0xff] }
 0x425   : > { %6174 = vmatprep.mubr.f32.mxu1 %v16719_v4  ;;  %5837 = vmatprep.mubr.f32.mxu0 %v16719_v4  ;;  %v4749_v44 = vpop.f32.mrf.mxu0  ;;  %v5853_v54 = vand.u32 4294901760, %v5852_v28 }
 0x426   : > { %17184 = vst [vmem:[#allocation104_spill] sm:$0xff] %v13679_v1  ;;  %v5054_v39 = vpop.f32.mrf.mxu1  ;;  %v13693_v6 = vmul.f32 %v5034_v16, %v17185_v13  ;;  %v5039_v2 = vadd.f32 %v13611_v5, %v4748_v36  ;;  %v4750_v53 = vadd.f32 %v4749_v44, %v12893_v31  ;;  %v13710_v36 = vsub.f32 %v5480_v8, %v5480_v8  ;;  %v17192_v8 = vld [vmem:[#allocation109_spill] sm:$0xff] }
 0x427   : > { %v4754_v46 = vpop.f32.mrf.mxu0  ;;  %5843 = vmatmul.mubr.f32.gmra.mxu0 %v5842_v3 }
 0x428   : > { %17186 = vst [vmem:[#allocation105_spill] sm:$0xff] %v13693_v6  ;;  %v5059_v33 = vpop.f32.mrf.mxu1  ;;  %9479 = vmatmul.mubr.msk.f32.gmra.mxu1 %vm844_vm4, %v13618_v11  ;;  %v13706_v16 = vmul.f32 %v5039_v2, %v17187_v57  ;;  %v5041_v13 = vadd.f32 %v5040_v55, %v4750_v53  ;;  %v4755_v5 = vadd.f32 %v4754_v46, %v12898_v45  ;;  %v5483_v57 = vsel %vm844_vm4, %v13702_v43, 0  ;;  %v17190_v2 = vld [vmem:[#allocation108_spill] sm:$0xff] }
 0x429   : > { %6181 = vmatprep.mubr.f32.mxu1 %v16719_v4  ;;  %5848 = vmatprep.mubr.f32.mxu0 %v16719_v4  ;;  %v4756_v44 = vpop.f32.mrf.mxu0 }
 0x42a   : > { %17188 = vst [vmem:[#allocation106_spill] sm:$0xff] %v13706_v16  ;;  %v5061_v31 = vpop.f32.mrf.mxu1  ;;  %v13719_v55 = vmul.f32 %v5041_v13, %v17190_v2  ;;  %v5046_v45 = vadd.f32 %v5045_v48, %v4755_v5  ;;  %v4757_v53 = vadd.f32 %v4756_v44, %v12909_v27  ;;  %v13730_v48 = vsub.f32 %v5483_v57, %v5483_v57  ;;  %v17195_v2 = vld [vmem:[#allocation110_spill] sm:$0xff] }
 0x42b   : > { %v4761_v28 = vpop.f32.mrf.mxu0  ;;  %5854 = vmatmul.mubr.f32.gmra.mxu0 %v5853_v54  ;;  %v5864_v13 = vand.u32 4294901760, %v5863_v26  ;;  %v17194_v5 = vand.u32 4294901760, %v13684_v37  ;;  %v16354_v54 = vand.u32 4294901760, %v13710_v36  ;;  %v17197_v26 = vld [vmem:[#allocation111_spill] sm:$0xff] }
 0x42c   : > { %17191 = vst [vmem:[#allocation108_spill] sm:$0xff] %v13719_v55  ;;  %v5066_v46 = vpop.f32.mrf.mxu1  ;;  %9480 = vmatmul.mubr.msk.f32.gmra.mxu1 %vm844_vm4, %v13646_v32  ;;  %v13726_v40 = vmul.f32 %v5046_v45, %v17192_v8  ;;  %v5048_v3 = vadd.f32 %v5047_v51, %v4757_v53  ;;  %v4762_v16 = vadd.f32 %v4761_v28, %v12916_v62 }
 0x42d   : > { %6188 = vmatprep.mubr.f32.mxu1 %v16719_v4  ;;  %5859 = vmatprep.mubr.f32.mxu0 %v16719_v4  ;;  %v4763_v27 = vpop.f32.mrf.mxu0  ;;  %v5874_v44 = vsub.f32 %v13684_v37, %v17194_v5 }
 0x42e   : > { %17193 = vst [vmem:[#allocation109_spill] sm:$0xff] %v13726_v40  ;;  %v5068_v6 = vpop.f32.mrf.mxu1  ;;  %v13737_v55 = vmul.f32 %v5048_v3, %v17195_v2  ;;  %v5053_v45 = vadd.f32 %v5052_v18, %v4762_v16  ;;  %v4764_v51 = vadd.f32 %v4763_v27, %v12927_v29  ;;  %v5885_v29 = vsub.f32 %v13710_v36, %v16354_v54  ;;  %v17199_v27 = vld [vmem:[#allocation112_spill] sm:$0xff] }
 0x42f   : > { %v4768_v57 = vpop.f32.mrf.mxu0  ;;  %5865 = vmatmul.mubr.f32.gmra.mxu0 %v5864_v13  ;;  %v5875_v16 = vand.u32 4294901760, %v5874_v44  ;;  %v16355_v3 = vand.u32 4294901760, %v13730_v48  ;;  %v17201_v44 = vld [vmem:[#allocation113_spill] sm:$0xff] }
 0x430   : > { %17196 = vst [vmem:[#allocation110_spill] sm:$0xff] %v13737_v55  ;;  %v5073_v62 = vpop.f32.mrf.mxu1  ;;  %9481 = vmatmul.mubr.msk.f32.gmra.mxu1 %vm844_vm4, %v13674_v59  ;;  %v13744_v53 = vmul.f32 %v5053_v45, %v17197_v26  ;;  %v5055_v28 = vadd.f32 %v5054_v39, %v4764_v51  ;;  %v4769_v8 = vadd.f32 %v4768_v57, %v12936_v30 }
 0x431   : > { %6195 = vmatprep.mubr.f32.mxu1 %v16719_v4  ;;  %5870 = vmatprep.mubr.f32.mxu0 %v16719_v4  ;;  %v4770_v18 = vpop.f32.mrf.mxu0 }
 0x432   : > { %17198 = vst [vmem:[#allocation111_spill] sm:$0xff] %v13744_v53  ;;  %v5075_v5 = vpop.f32.mrf.mxu1  ;;  %v13753_v13 = vmul.f32 %v5055_v28, %v17199_v27  ;;  %v5060_v2 = vadd.f32 %v5059_v33, %v4769_v8  ;;  %v4771_v45 = vadd.f32 %v4770_v18, %v12947_v34  ;;  %v5886_v28 = vand.u32 4294901760, %v5885_v29  ;;  %v17203_v8 = vld [vmem:[#allocation114_spill] sm:$0xff] }
 0x433   : > { %v4775_v30 = vpop.f32.mrf.mxu0  ;;  %5876 = vmatmul.mubr.f32.gmra.mxu0 %v5875_v16  ;;  %v5896_v34 = vsub.f32 %v13730_v48, %v16355_v3 }
 0x434   : > { %17200 = vst [vmem:[#allocation112_spill] sm:$0xff] %v13753_v13  ;;  %v5080_v39 = vpop.f32.mrf.mxu1  ;;  %9482 = vmatmul.mubr.msk.f32.gmra.mxu1 %vm844_vm4, %v13702_v43  ;;  %v13760_v51 = vmul.f32 %v5060_v2, %v17201_v44  ;;  %v5062_v57 = vadd.f32 %v5061_v31, %v4771_v45  ;;  %v4776_v26 = vadd.f32 %v4775_v30, %v12959_v47  ;;  %v17205_v31 = vand.u32 4294901760, %v12929_v25  ;;  %v17206_v45 = vld [vmem:[#allocation115_spill] sm:$0xff] }
 0x435   : > { %6594 = vmatprep.mubr.f32.mxu1 %v16719_v4  ;;  %5881 = vmatprep.mubr.f32.mxu0 %v16719_v4  ;;  %v4777_v33 = vpop.f32.mrf.mxu0 }
 0x436   : > { %17202 = vst [vmem:[#allocation113_spill] sm:$0xff] %v13760_v51  ;;  %v5082_v54 = vpop.f32.mrf.mxu1  ;;  %v13768_v18 = vmul.f32 %v5062_v57, %v17203_v8  ;;  %v5067_v16 = vadd.f32 %v5066_v46, %v4776_v26  ;;  %v4778_v27 = vadd.f32 %v4777_v33, %v12973_v14  ;;  %v5897_v46 = vand.u32 4294901760, %v5896_v34  ;;  %v17208_v57 = vld [vmem:[#allocation116_spill] sm:$0xff] }
 0x437   : > { %v4782_v47 = vpop.f32.mrf.mxu0  ;;  %5887 = vmatmul.mubr.f32.gmra.mxu0 %v5886_v28 }
 0x438   : > { %17204 = vst [vmem:[#allocation114_spill] sm:$0xff] %v13768_v18  ;;  %v5087_v2 = vpop.f32.mrf.mxu1  ;;  %6598 = vmatmul.mubr.f32.vlgmr.msra.gmra.mxu1 %v17205_v31  ;;  %v13775_v29 = vmul.f32 %v5067_v16, %v17206_v45  ;;  %v5069_v30 = vadd.f32 %v5068_v6, %v4778_v27  ;;  %v4783_v44 = vadd.f32 %v4782_v47, %v12989_v12  ;;  %v17210_v16 = vand.u32 4294901760, %v12950_v9  ;;  %v17211_v12 = vld [vmem:[#allocation117_spill] sm:$0xff]  ;;  %v17213_v31 = vld [vmem:[#allocation122_spill] sm:$0xff]  ;;  %v17214_v45 = vld [vmem:[#allocation59_spill] sm:$0xff] }
 0x439   : > { %6603 = vmatprep.mubr.f32.mxu1 %v16719_v4  ;;  %5892 = vmatprep.mubr.f32.mxu0 %v16719_v4  ;;  %v4784_v14 = vpop.f32.mrf.mxu0 }
 0x43a   : > { %17207 = vst [vmem:[#allocation115_spill] sm:$0xff] %v13775_v29  ;;  %v5089_v3 = vpop.f32.mrf.mxu1  ;;  %7211 = vmatpush1.msra.mxu1 %v12539_v17  ;;  %v13781_v26 = vmul.f32 %v5069_v30, %v17208_v57  ;;  %v5074_v33 = vadd.f32 %v5073_v62, %v4783_v44  ;;  %v4785_v28 = vadd.f32 %v4784_v14, %v13004_v61 }
 0x43b   : > { %v4789_v6 = vpop.f32.mrf.mxu0  ;;  %5898 = vmatmul.mubr.f32.gmra.mxu0 %v5897_v46  ;;  %v17216_v46 = vld [vmem:[#allocation119_spill] sm:$0xff] }
 0x43c   : > { %17209 = vst [vmem:[#allocation116_spill] sm:$0xff] %v13781_v26  ;;  %v5094_v8 = vpop.f32.mrf.mxu1  ;;  %6607 = vmatmul.mubr.f32.gmra.mxu1 %v17210_v16  ;;  %v13788_v27 = vmul.f32 %v5074_v33, %v17211_v12  ;;  %v5076_v17 = vadd.f32 %v5075_v5, %v4785_v28  ;;  %v4790_v34 = vadd.f32 %v4789_v6, %v17213_v31  ;;  %v17217_v57 = vand.u32 4294901760, %v17216_v46  ;;  %v17218_v5 = vld [vmem:[#allocation40_spill] sm:$0xff]  ;;  %v17220_v6 = vld [vmem:[#allocation30_spill] sm:$0xff] }
 0x43d   : > { %6612 = vmatprep.mubr.f32.mxu1 %v16719_v4  ;;  %6271 = vmatprep.mubr.f32.mxu0 %v16719_v4  ;;  %v4791_v62 = vpop.f32.mrf.mxu0 }
 0x43e   : > { %17212 = vst [vmem:[#allocation117_spill] sm:$0xff] %v13788_v27  ;;  %v5096_v47 = vpop.f32.mrf.mxu1  ;;  %v13793_v61 = vmul.f32 %v5076_v17, %v17214_v45  ;;  %v5081_v30 = vadd.f32 %v5080_v39, %v4790_v34  ;;  %v4792_v44 = vadd.f32 %v4791_v62, %v13031_v24  ;;  %v17221_v39 = vld [vmem:[#allocation50_spill] sm:$0xff]  ;;  %v17226_v27 = vld [vmem:[#allocation121_spill] sm:$0xff] }
 0x43f   : > { %v4796_v16 = vpop.f32.mrf.mxu0  ;;  %6274 = vmatmul.mubr.f32.vlgmr.msra.gmra.mxu0 %v12929_v25  ;;  %v17222_v24 = vand.u32 4294901760, %v17221_v39  ;;  %v17223_v34 = vld [vmem:[#allocation42_spill] sm:$0xff]  ;;  %v17225_v25 = vld [vmem:[#allocation51_spill] sm:$0xff] }
 0x440   : > { %17215 = vst [vmem:[#allocation122_spill] sm:$0xff] %v13793_v61  ;;  %v5101_v14 = vpop.f32.mrf.mxu1  ;;  %6616 = vmatmul.mubr.f32.gmra.mxu1 %v17217_v57  ;;  %v13801_v33 = vmul.f32 %v5081_v30, %v17218_v5  ;;  %v5083_v28 = vadd.f32 %v5082_v54, %v4792_v44  ;;  %v4797_v12 = vadd.f32 %v4796_v16, %v17220_v6  ;;  %v17227_v30 = vand.u32 4294901760, %v17226_v27  ;;  %v17228_v44 = vld [vmem:[#allocation61_spill] sm:$0xff]  ;;  %v17230_v6 = vld [vmem:[#allocation35_spill] sm:$0xff] }
 0x441   : > { %6621 = vmatprep.mubr.f32.mxu1 %v16719_v4  ;;  %6279 = vmatprep.mubr.f32.mxu0 %v16719_v4  ;;  %v4798_v31 = vpop.f32.mrf.mxu0 }
 0x442   : > { %17219 = vst [vmem:[#allocation59_spill] sm:$0xff] %v13801_v33  ;;  %v5103_v17 = vpop.f32.mrf.mxu1  ;;  %6920 = vmatpush1.msra.mxu0 %v17222_v24  ;;  %v13808_v62 = vmul.f32 %v5083_v28, %v17223_v34  ;;  %v5088_v45 = vadd.f32 %v5087_v2, %v4797_v12  ;;  %v4799_v57 = vadd.f32 %v4798_v31, %v17225_v25  ;;  %v17231_v12 = vld [vmem:[#allocation22_spill] sm:$0xff]  ;;  %v17233_v34 = vld [vmem:[#allocation81_spill] sm:$0xff] }
 0x443   : > { %v4803_v54 = vpop.f32.mrf.mxu0  ;;  %6282 = vmatmul.mubr.f32.gmra.mxu0 %v12950_v9  ;;  %v17234_v9 = vld [vmem:[#allocation33_spill] sm:$0xff] }
 0x444   : > { %17224 = vst [vmem:[#allocation119_spill] sm:$0xff] %v13808_v62  ;;  %v5108_v61 = vpop.f32.mrf.mxu1  ;;  %6625 = vmatmul.mubr.f32.gmra.mxu1 %v17227_v30  ;;  %v13816_v16 = vmul.f32 %v5088_v45, %v17228_v44  ;;  %v5090_v5 = vadd.f32 %v5089_v3, %v4799_v57  ;;  %v4804_v39 = vadd.f32 %v4803_v54, %v17230_v6  ;;  %v17235_v62 = vand.u32 4294901760, %v17234_v9  ;;  %v17236_v3 = vld [vmem:[#allocation36_spill] sm:$0xff] }
 0x445   : > { %6630 = vmatprep.mubr.f32.mxu1 %v16719_v4  ;;  %6287 = vmatprep.mubr.f32.mxu0 %v16719_v4  ;;  %v4805_v2 = vpop.f32.mrf.mxu0  ;;  %v17238_v54 = vld [vmem:[#allocation52_spill] sm:$0xff] }
 0x446   : > { %17229 = vst [vmem:[#allocation40_spill] sm:$0xff] %v13816_v16  ;;  %v5110_v28 = vpop.f32.mrf.mxu1  ;;  %v13821_v24 = vmul.f32 %v5090_v5, %v17231_v12  ;;  %v5095_v31 = vadd.f32 %v5094_v8, %v4804_v39  ;;  %v4806_v25 = vadd.f32 %v4805_v2, %v17233_v34  ;;  %v17239_v6 = vld [vmem:[#allocation24_spill] sm:$0xff] }
 0x447   : > { %v4810_v33 = vpop.f32.mrf.mxu0  ;;  %6290 = vmatmul.mubr.f32.gmra.mxu0 %v17216_v46  ;;  %v17242_v46 = vld [vmem:[#allocation124_spill] sm:$0xff] }
 0x448   : > { %17232 = vst [vmem:[#allocation30_spill] sm:$0xff] %v13821_v24  ;;  %v5115_v30 = vpop.f32.mrf.mxu1  ;;  %6634 = vmatmul.mubr.f32.gmra.mxu1 %v17235_v62  ;;  %v13829_v45 = vmul.f32 %v5095_v31, %v17236_v3  ;;  %v5097_v57 = vadd.f32 %v5096_v47, %v4806_v25  ;;  %v4811_v44 = vadd.f32 %v4810_v33, %v17238_v54  ;;  %v17241_v62 = vld [vmem:[#allocation83_spill] sm:$0xff]  ;;  %v17243_v24 = vand.u32 4294901760, %v17242_v46  ;;  %v17244_v47 = vld [vmem:[#allocation62_spill] sm:$0xff]  ;;  %v17246_v25 = vld [vmem:[#allocation53_spill] sm:$0xff] }
 0x449   : > { %6639 = vmatprep.mubr.f32.mxu1 %v16719_v4  ;;  %6295 = vmatprep.mubr.f32.mxu0 %v16719_v4  ;;  %v4812_v8 = vpop.f32.mrf.mxu0  ;;  %v17247_v54 = vld [vmem:[#allocation21_spill] sm:$0xff] }
 0x44a   : > { %17237 = vst [vmem:[#allocation50_spill] sm:$0xff] %v13829_v45  ;;  %v5117_v5 = vpop.f32.mrf.mxu1  ;;  %v13834_v39 = vmul.f32 %v5097_v57, %v17239_v6  ;;  %v5102_v2 = vadd.f32 %v5101_v14, %v4811_v44  ;;  %v4813_v12 = vadd.f32 %v4812_v8, %v17241_v62 }
 0x44b   : > { %v4817_v16 = vpop.f32.mrf.mxu0  ;;  %6298 = vmatmul.mubr.f32.gmra.mxu0 %v17226_v27  ;;  %v17250_v27 = vld [vmem:[#allocation126_spill] sm:$0xff] }
 0x44c   : > { %17240 = vst [vmem:[#allocation42_spill] sm:$0xff] %v13834_v39  ;;  %v5122_v34 = vpop.f32.mrf.mxu1  ;;  %6643 = vmatmul.mubr.f32.gmra.mxu1 %v17243_v24  ;;  %v13842_v33 = vmul.f32 %v5102_v2, %v17244_v47  ;;  %v5104_v31 = vadd.f32 %v5103_v17, %v4813_v12  ;;  %v4818_v3 = vadd.f32 %v4817_v16, %v17246_v25  ;;  %v17249_v24 = vld [vmem:[#allocation39_spill] sm:$0xff]  ;;  %v17251_v39 = vand.u32 4294901760, %v17250_v27  ;;  %v17254_v12 = vld [vmem:[#allocation85_spill] sm:$0xff] }
 0x44d   : > { %6648 = vmatprep.mubr.f32.mxu1 %v16719_v4  ;;  %6303 = vmatprep.mubr.f32.mxu0 %v16719_v4  ;;  %v4819_v14 = vpop.f32.mrf.mxu0  ;;  %v17252_v17 = vld [vmem:[#allocation23_spill] sm:$0xff] }
 0x44e   : > { %17245 = vst [vmem:[#allocation51_spill] sm:$0xff] %v13842_v33  ;;  %v5124_v57 = vpop.f32.mrf.mxu1  ;;  %v13847_v44 = vmul.f32 %v5104_v31, %v17247_v54  ;;  %v5109_v8 = vadd.f32 %v5108_v61, %v4818_v3  ;;  %v4820_v6 = vadd.f32 %v4819_v14, %v17249_v24  ;;  %v17255_v25 = vld [vmem:[#allocation63_spill] sm:$0xff] }
 0x44f   : > { %v4824_v45 = vpop.f32.mrf.mxu0  ;;  %6306 = vmatmul.mubr.f32.gmra.mxu0 %v17234_v9  ;;  %v17258_v9 = vld [vmem:[#allocation128_spill] sm:$0xff] }
 0x450   : > { %17248 = vst [vmem:[#allocation121_spill] sm:$0xff] %v13847_v44  ;;  %v5129_v62 = vpop.f32.mrf.mxu1  ;;  %6652 = vmatmul.mubr.f32.gmra.mxu1 %v17251_v39  ;;  %v13855_v16 = vmul.f32 %v5109_v8, %v17252_v17  ;;  %v5111_v2 = vadd.f32 %v5110_v28, %v4820_v6  ;;  %v4825_v47 = vadd.f32 %v4824_v45, %v17254_v12  ;;  %v17257_v39 = vld [vmem:[#allocation88_spill] sm:$0xff]  ;;  %v17259_v44 = vand.u32 4294901760, %v17258_v9  ;;  %v17260_v28 = vld [vmem:[#allocation25_spill] sm:$0xff]  ;;  %v17263_v12 = vld [vmem:[#allocation26_spill] sm:$0xff] }
 0x451   : > { %6657 = vmatprep.mubr.f32.mxu1 %v16719_v4  ;;  %6311 = vmatprep.mubr.f32.mxu0 %v16719_v4  ;;  %v4826_v61 = vpop.f32.mrf.mxu0  ;;  %v17262_v6 = vld [vmem:[#allocation37_spill] sm:$0xff] }
 0x452   : > { %17253 = vst [vmem:[#allocation61_spill] sm:$0xff] %v13855_v16  ;;  %v5131_v31 = vpop.f32.mrf.mxu1  ;;  %v13860_v3 = vmul.f32 %v5111_v2, %v17255_v25  ;;  %v5116_v14 = vadd.f32 %v5115_v30, %v4825_v47  ;;  %v4827_v54 = vadd.f32 %v4826_v61, %v17257_v39 }
 0x453   : > { %v4831_v33 = vpop.f32.mrf.mxu0  ;;  %6314 = vmatmul.mubr.f32.gmra.mxu0 %v17242_v46  ;;  %v17266_v46 = vld [vmem:[#allocation130_spill] sm:$0xff] }
 0x454   : > { %17256 = vst [vmem:[#allocation35_spill] sm:$0xff] %v13860_v3  ;;  %v5136_v24 = vpop.f32.mrf.mxu1  ;;  %6661 = vmatmul.mubr.f32.gmra.mxu1 %v17259_v44  ;;  %v13868_v45 = vmul.f32 %v5116_v14, %v17260_v28  ;;  %v5118_v8 = vadd.f32 %v5117_v5, %v4827_v54  ;;  %v4832_v17 = vadd.f32 %v4831_v33, %v17262_v6  ;;  %v17265_v44 = vld [vmem:[#allocation41_spill] sm:$0xff]  ;;  %v17267_v3 = vand.u32 4294901760, %v17266_v46  ;;  %v17270_v54 = vld [vmem:[#allocation54_spill] sm:$0xff]  ;;  %v17271_v6 = vld [vmem:[#allocation44_spill] sm:$0xff] }
 0x455   : > { %6666 = vmatprep.mubr.f32.mxu1 %v16719_v4  ;;  %6319 = vmatprep.mubr.f32.mxu0 %v16719_v4  ;;  %v4833_v30 = vpop.f32.mrf.mxu0  ;;  %v17268_v5 = vld [vmem:[#allocation65_spill] sm:$0xff] }
 0x456   : > { %17261 = vst [vmem:[#allocation22_spill] sm:$0xff] %v13868_v45  ;;  %v5138_v2 = vpop.f32.mrf.mxu1  ;;  %v13873_v47 = vmul.f32 %v5118_v8, %v17263_v12  ;;  %v5123_v61 = vadd.f32 %v5122_v34, %v4832_v17  ;;  %v4834_v25 = vadd.f32 %v4833_v30, %v17265_v44 }
 0x457   : > { %v4838_v16 = vpop.f32.mrf.mxu0  ;;  %6322 = vmatmul.mubr.f32.gmra.mxu0 %v17250_v27  ;;  %v17274_v27 = vld [vmem:[#allocation132_spill] sm:$0xff] }
 0x458   : > { %17264 = vst [vmem:[#allocation81_spill] sm:$0xff] %v13873_v47  ;;  %v5143_v39 = vpop.f32.mrf.mxu1  ;;  %6670 = vmatmul.mubr.f32.gmra.mxu1 %v17267_v3  ;;  %v13881_v33 = vmul.f32 %v5123_v61, %v17268_v5  ;;  %v5125_v14 = vadd.f32 %v5124_v57, %v4834_v25  ;;  %v4839_v28 = vadd.f32 %v4838_v16, %v17270_v54  ;;  %v17273_v3 = vld [vmem:[#allocation57_spill] sm:$0xff]  ;;  %v17275_v47 = vand.u32 4294901760, %v17274_v27  ;;  %v17276_v57 = vld [vmem:[#allocation27_spill] sm:$0xff]  ;;  %v17278_v25 = vld [vmem:[#allocation58_spill] sm:$0xff] }
 0x459   : > { %6675 = vmatprep.mubr.f32.mxu1 %v16719_v4  ;;  %6327 = vmatprep.mubr.f32.mxu0 %v16719_v4  ;;  %v4840_v34 = vpop.f32.mrf.mxu0  ;;  %v17279_v54 = vld [vmem:[#allocation67_spill] sm:$0xff] }
 0x45a   : > { %17269 = vst [vmem:[#allocation33_spill] sm:$0xff] %v13881_v33  ;;  %v5145_v8 = vpop.f32.mrf.mxu1  ;;  %v13886_v17 = vmul.f32 %v5125_v14, %v17271_v6  ;;  %v5130_v30 = vadd.f32 %v5129_v62, %v4839_v28  ;;  %v4841_v12 = vadd.f32 %v4840_v34, %v17273_v3 }
 0x45b   : > { %v4845_v45 = vpop.f32.mrf.mxu0  ;;  %6330 = vmatmul.mubr.f32.gmra.mxu0 %v17258_v9  ;;  %v17282_v9 = vld [vmem:[#allocation134_spill] sm:$0xff] }
 0x45c   : > { %17272 = vst [vmem:[#allocation36_spill] sm:$0xff] %v13886_v17  ;;  %v5150_v44 = vpop.f32.mrf.mxu1  ;;  %6679 = vmatmul.mubr.f32.gmra.mxu1 %v17275_v47  ;;  %v13894_v16 = vmul.f32 %v5130_v30, %v17276_v57  ;;  %v5132_v61 = vadd.f32 %v5131_v31, %v4841_v12  ;;  %v4846_v5 = vadd.f32 %v4845_v45, %v17278_v25  ;;  %v17281_v47 = vld [vmem:[#allocation43_spill] sm:$0xff]  ;;  %v17283_v17 = vand.u32 4294901760, %v17282_v9  ;;  %v17284_v31 = vld [vmem:[#allocation45_spill] sm:$0xff]  ;;  %v17286_v12 = vld [vmem:[#allocation60_spill] sm:$0xff] }
 0x45d   : > { %6684 = vmatprep.mubr.f32.mxu1 %v16719_v4  ;;  %6335 = vmatprep.mubr.f32.mxu0 %v16719_v4  ;;  %v4847_v62 = vpop.f32.mrf.mxu0  ;;  %v17287_v25 = vld [vmem:[#allocation28_spill] sm:$0xff] }
 0x45e   : > { %17277 = vst [vmem:[#allocation52_spill] sm:$0xff] %v13894_v16  ;;  %v5152_v14 = vpop.f32.mrf.mxu1  ;;  %v13899_v28 = vmul.f32 %v5132_v61, %v17279_v54  ;;  %v5137_v34 = vadd.f32 %v5136_v24, %v4846_v5  ;;  %v4848_v6 = vadd.f32 %v4847_v62, %v17281_v47 }
 0x45f   : > { %v4852_v33 = vpop.f32.mrf.mxu0  ;;  %6338 = vmatmul.mubr.f32.gmra.mxu0 %v17266_v46  ;;  %v17290_v46 = vld [vmem:[#allocation136_spill] sm:$0xff] }
 0x460   : > { %17280 = vst [vmem:[#allocation24_spill] sm:$0xff] %v13899_v28  ;;  %v5157_v3 = vpop.f32.mrf.mxu1  ;;  %6688 = vmatmul.mubr.f32.gmra.mxu1 %v17283_v17  ;;  %v13907_v45 = vmul.f32 %v5137_v34, %v17284_v31  ;;  %v5139_v30 = vadd.f32 %v5138_v2, %v4848_v6  ;;  %v4853_v57 = vadd.f32 %v4852_v33, %v17286_v12  ;;  %v17289_v17 = vld [vmem:[#allocation34_spill] sm:$0xff]  ;;  %v17291_v28 = vand.u32 4294901760, %v17290_v46  ;;  %v17292_v2 = vld [vmem:[#allocation69_spill] sm:$0xff] }
 0x461   : > { %6693 = vmatprep.mubr.f32.mxu1 %v16719_v4  ;;  %6343 = vmatprep.mubr.f32.mxu0 %v16719_v4  ;;  %v4854_v24 = vpop.f32.mrf.mxu0  ;;  %v17294_v6 = vld [vmem:[#allocation38_spill] sm:$0xff] }
 0x462   : > { %17285 = vst [vmem:[#allocation83_spill] sm:$0xff] %v13907_v45  ;;  %v5159_v61 = vpop.f32.mrf.mxu1  ;;  %v13912_v5 = vmul.f32 %v5139_v30, %v17287_v25  ;;  %v5144_v62 = vadd.f32 %v5143_v39, %v4853_v57  ;;  %v4855_v54 = vadd.f32 %v4854_v24, %v17289_v17  ;;  %v17295_v12 = vld [vmem:[#allocation46_spill] sm:$0xff] }
 0x463   : > { %v4859_v16 = vpop.f32.mrf.mxu0  ;;  %6346 = vmatmul.mubr.f32.gmra.mxu0 %v17274_v27  ;;  %v17298_v27 = vld [vmem:[#allocation138_spill] sm:$0xff] }
 0x464   : > { %17288 = vst [vmem:[#allocation124_spill] sm:$0xff] %v13912_v5  ;;  %v5164_v47 = vpop.f32.mrf.mxu1  ;;  %6697 = vmatmul.mubr.f32.gmra.mxu1 %v17291_v28  ;;  %v13920_v33 = vmul.f32 %v5144_v62, %v17292_v2  ;;  %v5146_v34 = vadd.f32 %v5145_v8, %v4855_v54  ;;  %v4860_v31 = vadd.f32 %v4859_v16, %v17294_v6  ;;  %v17297_v28 = vld [vmem:[#allocation64_spill] sm:$0xff]  ;;  %v17299_v5 = vand.u32 4294901760, %v17298_v27  ;;  %v17300_v8 = vld [vmem:[#allocation29_spill] sm:$0xff]  ;;  %v17302_v54 = vld [vmem:[#allocation66_spill] sm:$0xff] }
 0x465   : > { %6702 = vmatprep.mubr.f32.mxu1 %v16719_v4  ;;  %6351 = vmatprep.mubr.f32.mxu0 %v16719_v4  ;;  %v4861_v39 = vpop.f32.mrf.mxu0  ;;  %v17303_v6 = vld [vmem:[#allocation71_spill] sm:$0xff] }
 0x466   : > { %17293 = vst [vmem:[#allocation62_spill] sm:$0xff] %v13920_v33  ;;  %v5166_v30 = vpop.f32.mrf.mxu1  ;;  %v13925_v57 = vmul.f32 %v5146_v34, %v17295_v12  ;;  %v5151_v24 = vadd.f32 %v5150_v44, %v4860_v31  ;;  %v4862_v25 = vadd.f32 %v4861_v39, %v17297_v28 }
 0x467   : > { %v4866_v45 = vpop.f32.mrf.mxu0  ;;  %6354 = vmatmul.mubr.f32.gmra.mxu0 %v17282_v9  ;;  %v17306_v9 = vld [vmem:[#allocation140_spill] sm:$0xff] }
 0x468   : > { %17296 = vst [vmem:[#allocation53_spill] sm:$0xff] %v13925_v57  ;;  %v5171_v17 = vpop.f32.mrf.mxu1  ;;  %6706 = vmatmul.mubr.f32.gmra.mxu1 %v17299_v5  ;;  %v13933_v16 = vmul.f32 %v5151_v24, %v17300_v8  ;;  %v5153_v62 = vadd.f32 %v5152_v14, %v4862_v25  ;;  %v4867_v2 = vadd.f32 %v4866_v45, %v17302_v54  ;;  %v17305_v5 = vld [vmem:[#allocation68_spill] sm:$0xff]  ;;  %v17307_v57 = vand.u32 4294901760, %v17306_v9  ;;  %v17308_v14 = vld [vmem:[#allocation47_spill] sm:$0xff]  ;;  %v17310_v25 = vld [vmem:[#allocation70_spill] sm:$0xff] }
 0x469   : > { %6711 = vmatprep.mubr.f32.mxu1 %v16719_v4  ;;  %6359 = vmatprep.mubr.f32.mxu0 %v16719_v4  ;;  %v4868_v44 = vpop.f32.mrf.mxu0  ;;  %v17311_v54 = vld [vmem:[#allocation73_spill] sm:$0xff] }
 0x46a   : > { %17301 = vst [vmem:[#allocation21_spill] sm:$0xff] %v13933_v16  ;;  %v5173_v34 = vpop.f32.mrf.mxu1  ;;  %v13938_v31 = vmul.f32 %v5153_v62, %v17303_v6  ;;  %v5158_v39 = vadd.f32 %v5157_v3, %v4867_v2  ;;  %v4869_v12 = vadd.f32 %v4868_v44, %v17305_v5 }
 0x46b   : > { %v4873_v33 = vpop.f32.mrf.mxu0  ;;  %6362 = vmatmul.mubr.f32.gmra.mxu0 %v17290_v46  ;;  %v17314_v46 = vld [vmem:[#allocation142_spill] sm:$0xff] }
 0x46c   : > { %17304 = vst [vmem:[#allocation39_spill] sm:$0xff] %v13938_v31  ;;  %v5178_v28 = vpop.f32.mrf.mxu1  ;;  %6715 = vmatmul.mubr.f32.gmra.mxu1 %v17307_v57  ;;  %v13946_v45 = vmul.f32 %v5158_v39, %v17308_v14  ;;  %v5160_v24 = vadd.f32 %v5159_v61, %v4869_v12  ;;  %v4874_v8 = vadd.f32 %v4873_v33, %v17310_v25  ;;  %v17313_v57 = vld [vmem:[#allocation72_spill] sm:$0xff]  ;;  %v17315_v31 = vand.u32 4294901760, %v17314_v46  ;;  %v17318_v12 = vld [vmem:[#allocation74_spill] sm:$0xff]  ;;  %v17319_v25 = vld [vmem:[#allocation31_spill] sm:$0xff] }
 0x46d   : > { %6720 = vmatprep.mubr.f32.mxu1 %v16719_v4  ;;  %6367 = vmatprep.mubr.f32.mxu0 %v16719_v4  ;;  %v4875_v3 = vpop.f32.mrf.mxu0  ;;  %v17316_v61 = vld [vmem:[#allocation48_spill] sm:$0xff] }
 0x46e   : > { %17309 = vst [vmem:[#allocation126_spill] sm:$0xff] %v13946_v45  ;;  %v5180_v62 = vpop.f32.mrf.mxu1  ;;  %v13951_v2 = vmul.f32 %v5160_v24, %v17311_v54  ;;  %v5165_v44 = vadd.f32 %v5164_v47, %v4874_v8  ;;  %v4876_v6 = vadd.f32 %v4875_v3, %v17313_v57 }
 0x46f   : > { %v4880_v16 = vpop.f32.mrf.mxu0  ;;  %6370 = vmatmul.mubr.f32.gmra.mxu0 %v17298_v27  ;;  %v17322_v27 = vld [vmem:[#allocation144_spill] sm:$0xff] }
 0x470   : > { %17312 = vst [vmem:[#allocation23_spill] sm:$0xff] %v13951_v2  ;;  %v5185_v5 = vpop.f32.mrf.mxu1  ;;  %6724 = vmatmul.mubr.f32.gmra.mxu1 %v17315_v31  ;;  %v13959_v33 = vmul.f32 %v5165_v44, %v17316_v61  ;;  %v5167_v39 = vadd.f32 %v5166_v30, %v4876_v6  ;;  %v4881_v14 = vadd.f32 %v4880_v16, %v17318_v12  ;;  %v17321_v31 = vld [vmem:[#allocation76_spill] sm:$0xff]  ;;  %v17323_v2 = vand.u32 4294901760, %v17322_v27  ;;  %v17324_v30 = vld [vmem:[#allocation75_spill] sm:$0xff]  ;;  %v17326_v6 = vld [vmem:[#allocation78_spill] sm:$0xff] }
 0x471   : > { %6729 = vmatprep.mubr.f32.mxu1 %v16719_v4  ;;  %6375 = vmatprep.mubr.f32.mxu0 %v16719_v4  ;;  %v4882_v47 = vpop.f32.mrf.mxu0  ;;  %v17327_v12 = vld [vmem:[#allocation49_spill] sm:$0xff] }
 0x472   : > { %17317 = vst [vmem:[#allocation85_spill] sm:$0xff] %v13959_v33  ;;  %v5187_v24 = vpop.f32.mrf.mxu1  ;;  %v13964_v8 = vmul.f32 %v5167_v39, %v17319_v25  ;;  %v5172_v3 = vadd.f32 %v5171_v17, %v4881_v14  ;;  %v4883_v54 = vadd.f32 %v4882_v47, %v17321_v31 }
 0x473   : > { %v4887_v45 = vpop.f32.mrf.mxu0  ;;  %6378 = vmatmul.mubr.f32.gmra.mxu0 %v17306_v9  ;;  %v17329_v9 = vld [vmem:[#allocation146_spill] sm:$0xff] }
 0x474   : > { %17320 = vst [vmem:[#allocation63_spill] sm:$0xff] %v13964_v8  ;;  %v5192_v57 = vpop.f32.mrf.mxu1  ;;  %6733 = vmatmul.mubr.f32.gmra.mxu1 %v17323_v2  ;;  %v13972_v16 = vmul.f32 %v5172_v3, %v17324_v30  ;;  %v5174_v44 = vadd.f32 %v5173_v34, %v4883_v54  ;;  %v4888_v61 = vadd.f32 %v4887_v45, %v17326_v6  ;;  %v17330_v31 = vand.u32 4294901760, %v17329_v9  ;;  %v17331_v34 = vld [vmem:[#allocation18_spill] sm:$0xff] }
 0x475   : > { %6738 = vmatprep.mubr.f32.mxu1 %v16719_v4  ;;  %6383 = vmatprep.mubr.f32.mxu0 %v16719_v4  ;;  %v4889_v17 = vpop.f32.mrf.mxu0  ;;  %v17333_v54 = vld [vmem:[#allocation82_spill] sm:$0xff] }
 0x476   : > { %17325 = vst [vmem:[#allocation88_spill] sm:$0xff] %v13972_v16  ;;  %v5194_v39 = vpop.f32.mrf.mxu1  ;;  %v13977_v14 = vmul.f32 %v5174_v44, %v17327_v12  ;;  %v5179_v47 = vadd.f32 %v5178_v28, %v4888_v61  ;;  %v4890_v2 = vadd.f32 %v4889_v17, %v13361_v19  ;;  %v17334_v19 = vld [vmem:[#allocation19_spill] sm:$0xff]  ;;  %v17336_v17 = vld [vmem:[#allocation84_spill] sm:$0xff] }
 0x477   : > { %v4894_v8 = vpop.f32.mrf.mxu0  ;;  %6386 = vmatmul.mubr.f32.gmra.mxu0 %v17314_v46  ;;  %v17337_v46 = vld [vmem:[#allocation148_spill] sm:$0xff] }
 0x478   : > { %17328 = vst [vmem:[#allocation128_spill] sm:$0xff] %v13977_v14  ;;  %v5981_v25 = vpop.f32.mrf.mxu1  ;;  %6742 = vmatmul.mubr.f32.gmra.mxu1 %v17330_v31  ;;  %v13985_v45 = vmul.f32 %v5179_v47, %v17331_v34  ;;  %v5181_v3 = vadd.f32 %v5180_v62, %v4890_v2  ;;  %v4895_v30 = vadd.f32 %v4894_v8, %v17333_v54  ;;  %v17338_v14 = vand.u32 4294901760, %v17337_v46  ;;  %v17339_v62 = vld [vmem:[#allocation20_spill] sm:$0xff]  ;;  %v17341_v2 = vld [vmem:[#allocation86_spill] sm:$0xff]  ;;  %v17342_v54 = vld [vmem:[#allocation17_spill] sm:$0xff] }
 0x479   : > { %6747 = vmatprep.mubr.f32.mxu1 %v16719_v4  ;;  %6391 = vmatprep.mubr.f32.mxu0 %v16719_v4  ;;  %v4896_v28 = vpop.f32.mrf.mxu0 }
 0x47a   : > { %17332 = vst [vmem:[#allocation25_spill] sm:$0xff] %v13985_v45  ;;  %v5983_v44 = vpop.f32.mrf.mxu1  ;;  %v13990_v6 = vmul.f32 %v5181_v3, %v17334_v19  ;;  %v5186_v61 = vadd.f32 %v5185_v5, %v4895_v30  ;;  %v4897_v12 = vadd.f32 %v4896_v28, %v17336_v17 }
 0x47b   : > { %v4901_v16 = vpop.f32.mrf.mxu0  ;;  %6394 = vmatmul.mubr.f32.gmra.mxu0 %v17322_v27  ;;  %v17344_v27 = vld [vmem:[#allocation80_spill] sm:$0xff] }
 0x47c   : > { %17335 = vst [vmem:[#allocation37_spill] sm:$0xff] %v13990_v6  ;;  %v5988_v31 = vpop.f32.mrf.mxu1  ;;  %6751 = vmatmul.mubr.f32.gmra.mxu1 %v17338_v14  ;;  %v13998_v8 = vmul.f32 %v5186_v61, %v17339_v62  ;;  %v5188_v47 = vadd.f32 %v5187_v24, %v4897_v12  ;;  %v4902_v34 = vadd.f32 %v4901_v16, %v17341_v2  ;;  %v17345_v17 = vand.u32 4294901760, %v17344_v27  ;;  %v17346_v24 = vld [vmem:[#allocation32_spill] sm:$0xff] }
 0x47d   : > { %6756 = vmatprep.mubr.f32.mxu1 %v16719_v4  ;;  %6399 = vmatprep.mubr.f32.mxu0 %v16719_v4  ;;  %v4903_v5 = vpop.f32.mrf.mxu0 }
 0x47e   : > { %17340 = vst [vmem:[#allocation26_spill] sm:$0xff] %v13998_v8  ;;  %v5990_v3 = vpop.f32.mrf.mxu1  ;;  %v14003_v30 = vmul.f32 %v5188_v47, %v17342_v54  ;;  %v5193_v28 = vadd.f32 %v5192_v57, %v4902_v34  ;;  %v4904_v14 = vadd.f32 %v4903_v5, %v13411_v49  ;;  %v17348_v49 = vld [vmem:[#allocation77_spill] sm:$0xff] }
 0x47f   : > { %v5558_v6 = vpop.f32.mrf.mxu0  ;;  %6402 = vmatmul.mubr.f32.gmra.mxu0 %v17329_v9  ;;  %v17350_v9 = vand.u32 4294901760, %v13387_v23 }
 0x480   : > { %17343 = vst [vmem:[#allocation41_spill] sm:$0xff] %v14003_v30  ;;  %v5995_v19 = vpop.f32.mrf.mxu1  ;;  %6760 = vmatmul.mubr.f32.gmra.mxu1 %v17345_v17  ;;  %v14011_v16 = vmul.f32 %v5193_v28, %v17346_v24  ;;  %v5195_v61 = vadd.f32 %v5194_v39, %v4904_v14  ;;  %v14013_v12 = vadd.f32 %v5981_v25, %v5558_v6 }
 0x481   : > { %6765 = vmatprep.mubr.f32.mxu1 %v16719_v4  ;;  %6407 = vmatprep.mubr.f32.mxu0 %v16719_v4  ;;  %v5560_v57 = vpop.f32.mrf.mxu0 }
 0x482   : > { %17347 = vst [vmem:[#allocation130_spill] sm:$0xff] %v14011_v16  ;;  %v5997_v62 = vpop.f32.mrf.mxu1  ;;  %v14017_v47 = vmul.f32 %v5195_v61, %v17348_v49  ;;  %v14019_v2 = vadd.f32 %v5983_v44, %v5560_v57  ;;  %v17351_v44 = vand.u32 4294901760, %v13413_v41 }
 0x483   : > { %v5569_v5 = vpop.f32.mrf.mxu0  ;;  %6410 = vmatmul.mubr.f32.gmra.mxu0 %v17337_v46 }
 0x484   : > { %17349 = vst [vmem:[#allocation65_spill] sm:$0xff] %v14017_v47  ;;  %v6002_v34 = vpop.f32.mrf.mxu1  ;;  %6769 = vmatmul.mubr.f32.gmra.mxu1 %v17350_v9  ;;  %v14025_v39 = vadd.f32 %v5988_v31, %v5569_v5  ;;  %6415 = vmatprep.mubr.f32.mxu0 %v16719_v4 }
 0x485   : > { %6774 = vmatprep.mubr.f32.mxu1 %v16719_v4  ;;  %v5571_v6 = vpop.f32.mrf.mxu0 }
 0x486   : > { %v6004_v25 = vpop.f32.mrf.mxu1  ;;  %v14028_v54 = vadd.f32 %v5990_v3, %v5571_v6  ;;  %v17352_v3 = vand.u32 4294901760, %v13440_v22 }
 0x487   : > { %v5580_v14 = vpop.f32.mrf.mxu0  ;;  %6418 = vmatmul.mubr.f32.gmra.mxu0 %v17344_v27 }
 0x488   : > { %v6009_v28 = vpop.f32.mrf.mxu1  ;;  %6778 = vmatmul.mubr.f32.gmra.mxu1 %v17351_v44  ;;  %v14034_v46 = vadd.f32 %v5995_v19, %v5580_v14  ;;  %6423 = vmatprep.mubr.f32.mxu0 %v16719_v4 }
 0x489   : > { %6783 = vmatprep.mubr.f32.mxu1 %v16719_v4  ;;  %v5582_v31 = vpop.f32.mrf.mxu0 }
 0x48a   : > { %v6011_v17 = vpop.f32.mrf.mxu1  ;;  %v14037_v24 = vadd.f32 %v5997_v62, %v5582_v31  ;;  %v17353_v62 = vand.u32 4294901760, %v13470_v21 }
 0x48b   : > { %v5591_v57 = vpop.f32.mrf.mxu0  ;;  %6426 = vmatmul.mubr.f32.gmra.mxu0 %v13387_v23 }
 0x48c   : > { %v6016_v61 = vpop.f32.mrf.mxu1  ;;  %6787 = vmatmul.mubr.f32.gmra.mxu1 %v17352_v3  ;;  %v14043_v27 = vadd.f32 %v6002_v34, %v5591_v57  ;;  %6431 = vmatprep.mubr.f32.mxu0 %v16719_v4 }
 0x48d   : > { %6792 = vmatprep.mubr.f32.mxu1 %v16719_v4  ;;  %v5593_v19 = vpop.f32.mrf.mxu0 }
 0x48e   : > { %v6018_v49 = vpop.f32.mrf.mxu1  ;;  %v14046_v9 = vadd.f32 %v6004_v25, %v5593_v19  ;;  %v17354_v25 = vand.u32 4294901760, %v13502_v60 }
 0x48f   : > { %v5602_v6 = vpop.f32.mrf.mxu0  ;;  %6434 = vmatmul.mubr.f32.gmra.mxu0 %v13413_v41 }
 0x490   : > { %v6023_v5 = vpop.f32.mrf.mxu1  ;;  %6796 = vmatmul.mubr.f32.gmra.mxu1 %v17353_v62  ;;  %v14052_v23 = vadd.f32 %v6009_v28, %v5602_v6  ;;  %6439 = vmatprep.mubr.f32.mxu0 %v16719_v4 }
 0x491   : > { %6801 = vmatprep.mubr.f32.mxu1 %v16719_v4  ;;  %v5604_v34 = vpop.f32.mrf.mxu0 }
 0x492   : > { %v6025_v44 = vpop.f32.mrf.mxu1  ;;  %v14055_v14 = vadd.f32 %v6011_v17, %v5604_v34  ;;  %v17355_v17 = vand.u32 4294901760, %v13534_v7 }
 0x493   : > { %v5613_v3 = vpop.f32.mrf.mxu0  ;;  %6442 = vmatmul.mubr.f32.gmra.mxu0 %v13440_v22 }
 0x494   : > { %v6030_v31 = vpop.f32.mrf.mxu1  ;;  %6805 = vmatmul.mubr.f32.gmra.mxu1 %v17354_v25  ;;  %v14061_v41 = vadd.f32 %v6016_v61, %v5613_v3  ;;  %6447 = vmatprep.mubr.f32.mxu0 %v16719_v4 }
 0x495   : > { %6810 = vmatprep.mubr.f32.mxu1 %v16719_v4  ;;  %v5615_v28 = vpop.f32.mrf.mxu0 }
 0x496   : > { %v6032_v57 = vpop.f32.mrf.mxu1  ;;  %v14064_v19 = vadd.f32 %v6018_v49, %v5615_v28  ;;  %v17356_v49 = vand.u32 4294901760, %v13566_v38 }
 0x497   : > { %v5624_v6 = vpop.f32.mrf.mxu0  ;;  %6450 = vmatmul.mubr.f32.gmra.mxu0 %v13470_v21 }
 0x498   : > { %v6037_v62 = vpop.f32.mrf.mxu1  ;;  %6814 = vmatmul.mubr.f32.gmra.mxu1 %v17355_v17  ;;  %v14070_v22 = vadd.f32 %v6023_v5, %v5624_v6  ;;  %6455 = vmatprep.mubr.f32.mxu0 %v16719_v4 }
 0x499   : > { %6819 = vmatprep.mubr.f32.mxu1 %v16719_v4  ;;  %v5626_v61 = vpop.f32.mrf.mxu0 }
 0x49a   : > { %v6039_v34 = vpop.f32.mrf.mxu1  ;;  %v14073_v25 = vadd.f32 %v6025_v44, %v5626_v61  ;;  %v17357_v44 = vand.u32 4294901760, %v13598_v50 }
 0x49b   : > { %v5635_v28 = vpop.f32.mrf.mxu0  ;;  %6458 = vmatmul.mubr.f32.gmra.mxu0 %v13502_v60 }
 0x49c   : > { %v6044_v3 = vpop.f32.mrf.mxu1  ;;  %6823 = vmatmul.mubr.f32.gmra.mxu1 %v17356_v49  ;;  %v14079_v21 = vadd.f32 %v6030_v31, %v5635_v28  ;;  %6463 = vmatprep.mubr.f32.mxu0 %v16719_v4 }
 0x49d   : > { %6828 = vmatprep.mubr.f32.mxu1 %v16719_v4  ;;  %v5637_v5 = vpop.f32.mrf.mxu0 }
 0x49e   : > { %v6046_v17 = vpop.f32.mrf.mxu1  ;;  %v14082_v6 = vadd.f32 %v6032_v57, %v5637_v5  ;;  %v17359_v57 = vand.u32 4294901760, %v13628_v10 }
 0x49f   : > { %v5646_v61 = vpop.f32.mrf.mxu0  ;;  %6466 = vmatmul.mubr.f32.gmra.mxu0 %v13534_v7 }
 0x4a0   : > { %v6051_v47 = vpop.f32.mrf.mxu1  ;;  %6832 = vmatmul.mubr.f32.gmra.mxu1 %v17357_v44  ;;  %v14088_v60 = vadd.f32 %v6037_v62, %v5646_v61  ;;  %6471 = vmatprep.mubr.f32.mxu0 %v16719_v4 }
 0x4a1   : > { %6837 = vmatprep.mubr.f32.mxu1 %v16719_v4  ;;  %v5648_v31 = vpop.f32.mrf.mxu0 }
 0x4a2   : > { %v6053_v49 = vpop.f32.mrf.mxu1  ;;  %v14091_v28 = vadd.f32 %v6039_v34, %v5648_v31  ;;  %v17361_v34 = vand.u32 4294901760, %v13656_v20 }
 0x4a3   : > { %v5657_v5 = vpop.f32.mrf.mxu0  ;;  %6474 = vmatmul.mubr.f32.gmra.mxu0 %v13566_v38 }
 0x4a4   : > { %17358 = vst [vmem:[#allocation54_spill] sm:$0xff] %v14091_v28  ;;  %v6058_v16 = vpop.f32.mrf.mxu1  ;;  %6841 = vmatmul.mubr.f32.gmra.mxu1 %v17359_v57  ;;  %v14097_v7 = vadd.f32 %v6044_v3, %v5657_v5  ;;  %6479 = vmatprep.mubr.f32.mxu0 %v16719_v4 }
 0x4a5   : > { %6846 = vmatprep.mubr.f32.mxu1 %v16719_v4  ;;  %v5659_v62 = vpop.f32.mrf.mxu0 }
 0x4a6   : > { %v6060_v44 = vpop.f32.mrf.mxu1  ;;  %v14100_v61 = vadd.f32 %v6046_v17, %v5659_v62  ;;  %v17363_v17 = vand.u32 4294901760, %v13684_v37 }
 0x4a7   : > { %v5668_v31 = vpop.f32.mrf.mxu0  ;;  %6482 = vmatmul.mubr.f32.gmra.mxu0 %v13598_v50 }
 0x4a8   : > { %17360 = vst [vmem:[#allocation44_spill] sm:$0xff] %v14100_v61  ;;  %v6065_v30 = vpop.f32.mrf.mxu1  ;;  %6850 = vmatmul.mubr.f32.gmra.mxu1 %v17361_v34  ;;  %v14106_v38 = vadd.f32 %v6051_v47, %v5668_v31  ;;  %6487 = vmatprep.mubr.f32.mxu0 %v16719_v4 }
 0x4a9   : > { %6855 = vmatprep.mubr.f32.mxu1 %v16719_v4  ;;  %v5670_v3 = vpop.f32.mrf.mxu0 }
 0x4aa   : > { %v6067_v57 = vpop.f32.mrf.mxu1  ;;  %v14109_v5 = vadd.f32 %v6053_v49, %v5670_v3  ;;  %v17364_v49 = vand.u32 4294901760, %v13710_v36 }
 0x4ab   : > { %v5679_v62 = vpop.f32.mrf.mxu0  ;;  %6490 = vmatmul.mubr.f32.gmra.mxu0 %v13628_v10 }
 0x4ac   : > { %17362 = vst [vmem:[#allocation57_spill] sm:$0xff] %v14109_v5  ;;  %v6072_v8 = vpop.f32.mrf.mxu1  ;;  %6859 = vmatmul.mubr.f32.gmra.mxu1 %v17363_v17  ;;  %v14115_v50 = vadd.f32 %v6058_v16, %v5679_v62  ;;  %6495 = vmatprep.mubr.f32.mxu0 %v16719_v4 }
 0x4ad   : > { %6864 = vmatprep.mubr.f32.mxu1 %v16719_v4  ;;  %v5681_v47 = vpop.f32.mrf.mxu0 }
 0x4ae   : > { %v6074_v34 = vpop.f32.mrf.mxu1  ;;  %v14118_v31 = vadd.f32 %v6060_v44, %v5681_v47  ;;  %v17365_v44 = vand.u32 4294901760, %v13730_v48 }
 0x4af   : > { %v5690_v3 = vpop.f32.mrf.mxu0  ;;  %6498 = vmatmul.mubr.f32.gmra.mxu0 %v13656_v20 }
 0x4b0   : > { %v6079_v45 = vpop.f32.mrf.mxu1  ;;  %6868 = vmatmul.mubr.f32.gmra.mxu1 %v17364_v49  ;;  %v14124_v10 = vadd.f32 %v6065_v30, %v5690_v3  ;;  %6503 = vmatprep.mubr.f32.mxu0 %v16719_v4 }
 0x4b1   : > { %6873 = vmatprep.mubr.f32.mxu1 %v16719_v4  ;;  %v5692_v16 = vpop.f32.mrf.mxu0 }
 0x4b2   : > { %v6081_v17 = vpop.f32.mrf.mxu1  ;;  %v14127_v62 = vadd.f32 %v6067_v57, %v5692_v16  ;;  %v17366_v57 = vld [vmem:[#allocation87_spill] sm:$0xff] }
 0x4b3   : > { %v5701_v47 = vpop.f32.mrf.mxu0  ;;  %6506 = vmatmul.mubr.f32.gmra.mxu0 %v13684_v37 }
 0x4b4   : > { %v6086_v33 = vpop.f32.mrf.mxu1  ;;  %6877 = vmatmul.mubr.f32.gmra.mxu1 %v17365_v44  ;;  %v14133_v20 = vadd.f32 %v6072_v8, %v5701_v47  ;;  %6511 = vmatprep.mubr.f32.mxu0 %v16719_v4 }
 0x4b5   : > { %7244 = vmatprep.mubr.f32.mxu1 %v16719_v4  ;;  %v5703_v30 = vpop.f32.mrf.mxu0 }
 0x4b6   : > { %v6088_v49 = vpop.f32.mrf.mxu1  ;;  %v14136_v3 = vadd.f32 %v6074_v34, %v5703_v30  ;;  %v17367_v34 = vld [vmem:[#allocation94_spill] sm:$0xff] }
 0x4b7   : > { %v5712_v16 = vpop.f32.mrf.mxu0  ;;  %6514 = vmatmul.mubr.f32.gmra.mxu0 %v13710_v36 }
 0x4b8   : > { %v6093_v26 = vpop.f32.mrf.mxu1  ;;  %9515 = vmatmul.mubr.msk.f32.vlgmr.msra.gmra.mxu1 %vm844_vm4, %v17366_v57  ;;  %v14142_v37 = vadd.f32 %v6079_v45, %v5712_v16  ;;  %6519 = vmatprep.mubr.f32.mxu0 %v16719_v4 }
 0x4b9   : > { %7251 = vmatprep.mubr.f32.mxu1 %v16719_v4  ;;  %v5714_v8 = vpop.f32.mrf.mxu0 }
 0x4ba   : > { %v6095_v44 = vpop.f32.mrf.mxu1  ;;  %v14145_v47 = vadd.f32 %v6081_v17, %v5714_v8  ;;  %v17368_v17 = vld [vmem:[#allocation107_spill] sm:$0xff] }
 0x4bb   : > { %v5723_v30 = vpop.f32.mrf.mxu0  ;;  %6522 = vmatmul.mubr.f32.gmra.mxu0 %v13730_v48 }
 0x4bc   : > { %v6100_v29 = vpop.f32.mrf.mxu1  ;;  %9516 = vmatmul.mubr.msk.f32.gmra.mxu1 %vm844_vm4, %v17367_v34  ;;  %v14151_v36 = vadd.f32 %v6086_v33, %v5723_v30  ;;  %6953 = vmatprep.mubr.f32.mxu0 %v16719_v4 }
 0x4bd   : > { %7258 = vmatprep.mubr.f32.mxu1 %v16719_v4  ;;  %v5725_v45 = vpop.f32.mrf.mxu0 }
 0x4be   : > { %v6102_v18 = vpop.f32.mrf.mxu1  ;;  %v14154_v16 = vadd.f32 %v6088_v49, %v5725_v45  ;;  %v17369_v45 = vld [vmem:[#allocation118_spill] sm:$0xff] }
 0x4bf   : > { %v5734_v8 = vpop.f32.mrf.mxu0  ;;  %9483 = vmatmul.mubr.msk.f32.vlgmr.msra.gmra.mxu0 %vm844_vm4, %v17366_v57 }
 0x4c0   : > { %v6107_v51 = vpop.f32.mrf.mxu1  ;;  %9517 = vmatmul.mubr.msk.f32.gmra.mxu1 %vm844_vm4, %v17368_v17  ;;  %v14161_v48 = vadd.f32 %v6093_v26, %v5734_v8  ;;  %6960 = vmatprep.mubr.f32.mxu0 %v16719_v4 }
 0x4c1   : > { %7265 = vmatprep.mubr.f32.mxu1 %v16719_v4  ;;  %v5736_v30 = vpop.f32.mrf.mxu0 }
 0x4c2   : > { %v6109_v33 = vpop.f32.mrf.mxu1  ;;  %v14164_v13 = vadd.f32 %v6095_v44, %v5736_v30  ;;  %v17370_v30 = vld [vmem:[#allocation120_spill] sm:$0xff] }
 0x4c3   : > { %v5745_v53 = vpop.f32.mrf.mxu0  ;;  %9484 = vmatmul.mubr.msk.f32.gmra.mxu0 %vm844_vm4, %v17367_v34 }
 0x4c4   : > { %v6114_v49 = vpop.f32.mrf.mxu1  ;;  %9518 = vmatmul.mubr.msk.f32.gmra.mxu1 %vm844_vm4, %v17369_v45  ;;  %v14171_v57 = vadd.f32 %v6100_v29, %v5745_v53  ;;  %6967 = vmatprep.mubr.f32.mxu0 %v16719_v4 }
 0x4c5   : > { %7272 = vmatprep.mubr.f32.mxu1 %v16719_v4  ;;  %v5747_v8 = vpop.f32.mrf.mxu0 }
 0x4c6   : > { %v6116_v26 = vpop.f32.mrf.mxu1  ;;  %v14174_v55 = vadd.f32 %v6102_v18, %v5747_v8  ;;  %v17372_v8 = vld [vmem:[#allocation123_spill] sm:$0xff] }
 0x4c7   : > { %v5756_v40 = vpop.f32.mrf.mxu0  ;;  %9485 = vmatmul.mubr.msk.f32.gmra.mxu0 %vm844_vm4, %v17368_v17 }
 0x4c8   : > { %v6121_v44 = vpop.f32.mrf.mxu1  ;;  %9519 = vmatmul.mubr.msk.f32.gmra.mxu1 %vm844_vm4, %v17370_v30  ;;  %v14181_v34 = vadd.f32 %v6107_v51, %v5756_v40  ;;  %6974 = vmatprep.mubr.f32.mxu0 %v16719_v4 }
 0x4c9   : > { %7279 = vmatprep.mubr.f32.mxu1 %v16719_v4  ;;  %v5758_v29 = vpop.f32.mrf.mxu0 }
 0x4ca   : > { %v6123_v53 = vpop.f32.mrf.mxu1  ;;  %v14184_v1 = vadd.f32 %v6109_v33, %v5758_v29  ;;  %v17375_v29 = vld [vmem:[#allocation79_spill] sm:$0xff] }
 0x4cb   : > { %v5767_v5 = vpop.f32.mrf.mxu0  ;;  %9486 = vmatmul.mubr.msk.f32.gmra.mxu0 %vm844_vm4, %v17369_v45 }
 0x4cc   : > { %17371 = vst [vmem:[#allocation132_spill] sm:$0xff] %v14184_v1  ;;  %v6128_v18 = vpop.f32.mrf.mxu1  ;;  %9520 = vmatmul.mubr.msk.f32.gmra.mxu1 %vm844_vm4, %v17372_v8  ;;  %v14191_v17 = vadd.f32 %v6114_v49, %v5767_v5  ;;  %6981 = vmatprep.mubr.f32.mxu0 %v16719_v4 }
 0x4cd   : > { %7286 = vmatprep.mubr.f32.mxu1 %v16719_v4  ;;  %v5769_v51 = vpop.f32.mrf.mxu0 }
 0x4ce   : > { %17373 = vst [vmem:[#allocation27_spill] sm:$0xff] %v14191_v17  ;;  %v6130_v40 = vpop.f32.mrf.mxu1  ;;  %v14194_v58 = vadd.f32 %v6116_v26, %v5769_v51  ;;  %v17378_v51 = vld [vmem:[#allocation125_spill] sm:$0xff] }
 0x4cf   : > { %v5778_v61 = vpop.f32.mrf.mxu0  ;;  %9487 = vmatmul.mubr.msk.f32.gmra.mxu0 %vm844_vm4, %v17370_v30 }
 0x4d0   : > { %17374 = vst [vmem:[#allocation58_spill] sm:$0xff] %v14194_v58  ;;  %v6135_v33 = vpop.f32.mrf.mxu1  ;;  %9521 = vmatmul.mubr.msk.f32.gmra.mxu1 %vm844_vm4, %v17375_v29  ;;  %v14201_v45 = vadd.f32 %v6121_v44, %v5778_v61  ;;  %6988 = vmatprep.mubr.f32.mxu0 %v16719_v4 }
 0x4d1   : > { %7293 = vmatprep.mubr.f32.mxu1 %v16719_v4  ;;  %v5780_v49 = vpop.f32.mrf.mxu0 }
 0x4d2   : > { %17376 = vst [vmem:[#allocation67_spill] sm:$0xff] %v14201_v45  ;;  %v6137_v5 = vpop.f32.mrf.mxu1  ;;  %v14204_v28 = vadd.f32 %v6123_v53, %v5780_v49  ;;  %v17381_v49 = vld [vmem:[#allocation127_spill] sm:$0xff] }
 0x4d3   : > { %v5789_v58 = vpop.f32.mrf.mxu0  ;;  %9488 = vmatmul.mubr.msk.f32.gmra.mxu0 %vm844_vm4, %v17372_v8 }
 0x4d4   : > { %17377 = vst [vmem:[#allocation43_spill] sm:$0xff] %v14204_v28  ;;  %v6142_v26 = vpop.f32.mrf.mxu1  ;;  %9522 = vmatmul.mubr.msk.f32.gmra.mxu1 %vm844_vm4, %v17378_v51  ;;  %v14211_v30 = vadd.f32 %v6128_v18, %v5789_v58  ;;  %6995 = vmatprep.mubr.f32.mxu0 %v16719_v4 }
 0x4d5   : > { %7300 = vmatprep.mubr.f32.mxu1 %v16719_v4  ;;  %v5791_v44 = vpop.f32.mrf.mxu0 }
 0x4d6   : > { %17379 = vst [vmem:[#allocation134_spill] sm:$0xff] %v14211_v30  ;;  %v6144_v61 = vpop.f32.mrf.mxu1  ;;  %v14214_v45 = vadd.f32 %v6130_v40, %v5791_v44  ;;  %v17384_v44 = vld [vmem:[#allocation129_spill] sm:$0xff] }
 0x4d7   : > { %v5800_v28 = vpop.f32.mrf.mxu0  ;;  %9489 = vmatmul.mubr.msk.f32.gmra.mxu0 %vm844_vm4, %v17375_v29 }
 0x4d8   : > { %17380 = vst [vmem:[#allocation45_spill] sm:$0xff] %v14214_v45  ;;  %v6149_v53 = vpop.f32.mrf.mxu1  ;;  %9523 = vmatmul.mubr.msk.f32.gmra.mxu1 %vm844_vm4, %v17381_v49  ;;  %v14221_v8 = vadd.f32 %v6135_v33, %v5800_v28  ;;  %7002 = vmatprep.mubr.f32.mxu0 %v16719_v4 }
 0x4d9   : > { %7307 = vmatprep.mubr.f32.mxu1 %v16719_v4  ;;  %v5802_v18 = vpop.f32.mrf.mxu0 }
 0x4da   : > { %17382 = vst [vmem:[#allocation60_spill] sm:$0xff] %v14221_v8  ;;  %v6151_v58 = vpop.f32.mrf.mxu1  ;;  %v14224_v30 = vadd.f32 %v6137_v5, %v5802_v18  ;;  %v17387_v18 = vld [vmem:[#allocation131_spill] sm:$0xff] }
 0x4db   : > { %v5811_v45 = vpop.f32.mrf.mxu0  ;;  %9490 = vmatmul.mubr.msk.f32.gmra.mxu0 %vm844_vm4, %v17378_v51 }
 0x4dc   : > { %17383 = vst [vmem:[#allocation28_spill] sm:$0xff] %v14224_v30  ;;  %v6156_v40 = vpop.f32.mrf.mxu1  ;;  %9524 = vmatmul.mubr.msk.f32.gmra.mxu1 %vm844_vm4, %v17384_v44  ;;  %v14231_v29 = vadd.f32 %v6142_v26, %v5811_v45  ;;  %7009 = vmatprep.mubr.f32.mxu0 %v16719_v4 }
 0x4dd   : > { %7314 = vmatprep.mubr.f32.mxu1 %v16719_v4  ;;  %v5813_v33 = vpop.f32.mrf.mxu0 }
 0x4de   : > { %17385 = vst [vmem:[#allocation34_spill] sm:$0xff] %v14231_v29  ;;  %v6158_v28 = vpop.f32.mrf.mxu1  ;;  %v14234_v8 = vadd.f32 %v6144_v61, %v5813_v33  ;;  %v17390_v33 = vld [vmem:[#allocation133_spill] sm:$0xff] }
 0x4df   : > { %v5822_v30 = vpop.f32.mrf.mxu0  ;;  %9491 = vmatmul.mubr.msk.f32.gmra.mxu0 %vm844_vm4, %v17381_v49 }
 0x4e0   : > { %17386 = vst [vmem:[#allocation136_spill] sm:$0xff] %v14234_v8  ;;  %v6163_v5 = vpop.f32.mrf.mxu1  ;;  %9525 = vmatmul.mubr.msk.f32.gmra.mxu1 %vm844_vm4, %v17387_v18  ;;  %v14241_v51 = vadd.f32 %v6149_v53, %v5822_v30  ;;  %7016 = vmatprep.mubr.f32.mxu0 %v16719_v4 }
 0x4e1   : > { %7321 = vmatprep.mubr.f32.mxu1 %v16719_v4  ;;  %v5824_v26 = vpop.f32.mrf.mxu0 }
 0x4e2   : > { %17388 = vst [vmem:[#allocation69_spill] sm:$0xff] %v14241_v51  ;;  %v6165_v45 = vpop.f32.mrf.mxu1  ;;  %v14244_v29 = vadd.f32 %v6151_v58, %v5824_v26  ;;  %v17393_v26 = vld [vmem:[#allocation135_spill] sm:$0xff] }
 0x4e3   : > { %v5833_v8 = vpop.f32.mrf.mxu0  ;;  %9492 = vmatmul.mubr.msk.f32.gmra.mxu0 %vm844_vm4, %v17384_v44 }
 0x4e4   : > { %17389 = vst [vmem:[#allocation38_spill] sm:$0xff] %v14244_v29  ;;  %v6170_v61 = vpop.f32.mrf.mxu1  ;;  %9526 = vmatmul.mubr.msk.f32.gmra.mxu1 %vm844_vm4, %v17390_v33  ;;  %v14251_v49 = vadd.f32 %v6156_v40, %v5833_v8  ;;  %7023 = vmatprep.mubr.f32.mxu0 %v16719_v4 }
 0x4e5   : > { %7328 = vmatprep.mubr.f32.mxu1 %v16719_v4  ;;  %v5835_v53 = vpop.f32.mrf.mxu0 }
 0x4e6   : > { %17391 = vst [vmem:[#allocation46_spill] sm:$0xff] %v14251_v49  ;;  %v6172_v30 = vpop.f32.mrf.mxu1  ;;  %v14254_v51 = vadd.f32 %v6158_v28, %v5835_v53  ;;  %v17396_v53 = vld [vmem:[#allocation137_spill] sm:$0xff] }
 0x4e7   : > { %v5844_v29 = vpop.f32.mrf.mxu0  ;;  %9493 = vmatmul.mubr.msk.f32.gmra.mxu0 %vm844_vm4, %v17387_v18 }
 0x4e8   : > { %17392 = vst [vmem:[#allocation64_spill] sm:$0xff] %v14254_v51  ;;  %v6177_v58 = vpop.f32.mrf.mxu1  ;;  %9527 = vmatmul.mubr.msk.f32.gmra.mxu1 %vm844_vm4, %v17393_v26  ;;  %v14261_v44 = vadd.f32 %v6163_v5, %v5844_v29  ;;  %7030 = vmatprep.mubr.f32.mxu0 %v16719_v4 }
 0x4e9   : > { %7335 = vmatprep.mubr.f32.mxu1 %v16719_v4  ;;  %v5846_v40 = vpop.f32.mrf.mxu0 }
 0x4ea   : > { %17394 = vst [vmem:[#allocation138_spill] sm:$0xff] %v14261_v44  ;;  %v6179_v8 = vpop.f32.mrf.mxu1  ;;  %v14264_v49 = vadd.f32 %v6165_v45, %v5846_v40  ;;  %v17399_v40 = vld [vmem:[#allocation139_spill] sm:$0xff] }
 0x4eb   : > { %v5855_v51 = vpop.f32.mrf.mxu0  ;;  %9494 = vmatmul.mubr.msk.f32.gmra.mxu0 %vm844_vm4, %v17390_v33 }
 0x4ec   : > { %17395 = vst [vmem:[#allocation29_spill] sm:$0xff] %v14264_v49  ;;  %v6184_v28 = vpop.f32.mrf.mxu1  ;;  %9528 = vmatmul.mubr.msk.f32.gmra.mxu1 %vm844_vm4, %v17396_v53  ;;  %v14271_v18 = vadd.f32 %v6170_v61, %v5855_v51  ;;  %7037 = vmatprep.mubr.f32.mxu0 %v16719_v4 }
 0x4ed   : > { %7342 = vmatprep.mubr.f32.mxu1 %v16719_v4  ;;  %v5857_v5 = vpop.f32.mrf.mxu0 }
 0x4ee   : > { %17397 = vst [vmem:[#allocation66_spill] sm:$0xff] %v14271_v18  ;;  %v6186_v29 = vpop.f32.mrf.mxu1  ;;  %v14274_v44 = vadd.f32 %v6172_v30, %v5857_v5  ;;  %v17402_v5 = vld [vmem:[#allocation141_spill] sm:$0xff] }
 0x4ef   : > { %v5866_v49 = vpop.f32.mrf.mxu0  ;;  %9495 = vmatmul.mubr.msk.f32.gmra.mxu0 %vm844_vm4, %v17393_v26 }
 0x4f0   : > { %17398 = vst [vmem:[#allocation71_spill] sm:$0xff] %v14274_v44  ;;  %v6191_v45 = vpop.f32.mrf.mxu1  ;;  %9529 = vmatmul.mubr.msk.f32.gmra.mxu1 %vm844_vm4, %v17399_v40  ;;  %v14281_v33 = vadd.f32 %v6177_v58, %v5866_v49  ;;  %7044 = vmatprep.mubr.f32.mxu0 %v16719_v4 }
 0x4f1   : > { %7349 = vmatprep.mubr.f32.mxu1 %v16719_v4  ;;  %v5868_v61 = vpop.f32.mrf.mxu0 }
 0x4f2   : > { %17400 = vst [vmem:[#allocation68_spill] sm:$0xff] %v14281_v33  ;;  %v6193_v51 = vpop.f32.mrf.mxu1  ;;  %v14284_v18 = vadd.f32 %v6179_v8, %v5868_v61  ;;  %v17405_v61 = vld [vmem:[#allocation143_spill] sm:$0xff] }
 0x4f3   : > { %v5877_v44 = vpop.f32.mrf.mxu0  ;;  %9496 = vmatmul.mubr.msk.f32.gmra.mxu0 %vm844_vm4, %v17396_v53 }
 0x4f4   : > { %17401 = vst [vmem:[#allocation140_spill] sm:$0xff] %v14284_v18  ;;  %v6198_v30 = vpop.f32.mrf.mxu1  ;;  %9530 = vmatmul.mubr.msk.f32.gmra.mxu1 %vm844_vm4, %v17402_v5  ;;  %v14291_v26 = vadd.f32 %v6184_v28, %v5877_v44  ;;  %7051 = vmatprep.mubr.f32.mxu0 %v16719_v4 }
 0x4f5   : > { %7356 = vmatprep.mubr.f32.mxu1 %v16719_v4  ;;  %v5879_v58 = vpop.f32.mrf.mxu0 }
 0x4f6   : > { %17403 = vst [vmem:[#allocation47_spill] sm:$0xff] %v14291_v26  ;;  %v6200_v49 = vpop.f32.mrf.mxu1  ;;  %v14294_v33 = vadd.f32 %v6186_v29, %v5879_v58  ;;  %v17408_v58 = vld [vmem:[#allocation145_spill] sm:$0xff] }
 0x4f7   : > { %v5888_v18 = vpop.f32.mrf.mxu0  ;;  %9497 = vmatmul.mubr.msk.f32.gmra.mxu0 %vm844_vm4, %v17399_v40 }
 0x4f8   : > { %17404 = vst [vmem:[#allocation70_spill] sm:$0xff] %v14294_v33  ;;  %v6599_v8 = vpop.f32.mrf.mxu1  ;;  %9531 = vmatmul.mubr.msk.f32.gmra.mxu1 %vm844_vm4, %v17405_v61  ;;  %v14301_v53 = vadd.f32 %v6191_v45, %v5888_v18  ;;  %7058 = vmatprep.mubr.f32.mxu0 %v16719_v4 }
 0x4f9   : > { %7363 = vmatprep.mubr.f32.mxu1 %v16719_v4  ;;  %v5890_v28 = vpop.f32.mrf.mxu0 }
 0x4fa   : > { %17406 = vst [vmem:[#allocation73_spill] sm:$0xff] %v14301_v53  ;;  %v6601_v44 = vpop.f32.mrf.mxu1  ;;  %v14304_v26 = vadd.f32 %v6193_v51, %v5890_v28  ;;  %v17411_v28 = vld [vmem:[#allocation147_spill] sm:$0xff] }
 0x4fb   : > { %v5899_v33 = vpop.f32.mrf.mxu0  ;;  %9498 = vmatmul.mubr.msk.f32.gmra.mxu0 %vm844_vm4, %v17402_v5 }
 0x4fc   : > { %17407 = vst [vmem:[#allocation72_spill] sm:$0xff] %v14304_v26  ;;  %v6608_v29 = vpop.f32.mrf.mxu1  ;;  %9532 = vmatmul.mubr.msk.f32.gmra.mxu1 %vm844_vm4, %v17408_v58  ;;  %v14311_v40 = vadd.f32 %v6198_v30, %v5899_v33  ;;  %7065 = vmatprep.mubr.f32.mxu0 %v16719_v4 }
 0x4fd   : > { %7370 = vmatprep.mubr.f32.mxu1 %v16719_v4  ;;  %v5901_v45 = vpop.f32.mrf.mxu0 }
 0x4fe   : > { %17409 = vst [vmem:[#allocation142_spill] sm:$0xff] %v14311_v40  ;;  %v6610_v18 = vpop.f32.mrf.mxu1  ;;  %v14314_v53 = vadd.f32 %v6200_v49, %v5901_v45  ;;  %v17412_v45 = vld [vmem:[#allocation149_spill] sm:$0xff] }
 0x4ff   : > { %v6275_v26 = vpop.f32.mrf.mxu0  ;;  %9499 = vmatmul.mubr.msk.f32.gmra.mxu0 %vm844_vm4, %v17405_v61 }
 0x500   : > { %17410 = vst [vmem:[#allocation48_spill] sm:$0xff] %v14314_v53  ;;  %v6617_v51 = vpop.f32.mrf.mxu1  ;;  %9533 = vmatmul.mubr.msk.f32.gmra.mxu1 %vm844_vm4, %v17411_v28  ;;  %v6276_v5 = vadd.f32 %v6275_v26, %v14013_v12  ;;  %7072 = vmatprep.mubr.f32.mxu0 %v16719_v4 }
 0x501   : > { %7377 = vmatprep.mubr.f32.mxu1 %v16719_v4  ;;  %v6277_v30 = vpop.f32.mrf.mxu0 }
 0x502   : > { %v6619_v33 = vpop.f32.mrf.mxu1  ;;  %v6278_v40 = vadd.f32 %v6277_v30, %v14019_v2  ;;  %v14326_v53 = vadd.f32 %v6599_v8, %v6276_v5 }
 0x503   : > { %v6283_v17 = vpop.f32.mrf.mxu0  ;;  %9500 = vmatmul.mubr.msk.f32.gmra.mxu0 %vm844_vm4, %v17408_v58 }
 0x504   : > { %v6626_v49 = vpop.f32.mrf.mxu1  ;;  %9534 = vmatmul.mubr.msk.f32.gmra.mxu1 %vm844_vm4, %v17412_v45  ;;  %v6284_v12 = vadd.f32 %v6283_v17, %v14025_v39  ;;  %7079 = vmatprep.mubr.f32.mxu0 %v16719_v4  ;;  %v14333_v61 = vadd.f32 %v6601_v44, %v6278_v40 }
 0x505   : > { %7384 = vmatprep.mubr.f32.mxu1 %v16719_v4  ;;  %v6285_v2 = vpop.f32.mrf.mxu0 }
 0x506   : > { %v6628_v26 = vpop.f32.mrf.mxu1  ;;  %v6286_v30 = vadd.f32 %v6285_v2, %v14028_v54  ;;  %v14338_v8 = vadd.f32 %v6608_v29, %v6284_v12 }
 0x507   : > { %v6291_v5 = vpop.f32.mrf.mxu0  ;;  %9501 = vmatmul.mubr.msk.f32.gmra.mxu0 %vm844_vm4, %v17411_v28 }
 0x508   : > { %v6635_v1 = vpop.f32.mrf.mxu1  ;;  %9535 = vmatmul.mubr.msk.f32.gmra.mxu1 %vm844_vm4, %v13379_v52  ;;  %v6292_v39 = vadd.f32 %v6291_v5, %v14034_v46  ;;  %7086 = vmatprep.mubr.f32.mxu0 %v16719_v4  ;;  %v14345_v44 = vadd.f32 %v6610_v18, %v6286_v30 }
 0x509   : > { %7391 = vmatprep.mubr.f32.mxu1 %v16719_v4  ;;  %v6293_v54 = vpop.f32.mrf.mxu0 }
 0x50a   : > { %v6637_v17 = vpop.f32.mrf.mxu1  ;;  %v6294_v58 = vadd.f32 %v6293_v54, %v14037_v24  ;;  %v14350_v29 = vadd.f32 %v6617_v51, %v6292_v39 }
 0x50b   : > { %v6299_v12 = vpop.f32.mrf.mxu0  ;;  %9502 = vmatmul.mubr.msk.f32.gmra.mxu0 %vm844_vm4, %v17412_v45 }
 0x50c   : > { %v6644_v40 = vpop.f32.mrf.mxu1  ;;  %9536 = vmatmul.mubr.msk.f32.gmra.mxu1 %vm844_vm4, %v13403_v63  ;;  %v6300_v46 = vadd.f32 %v6299_v12, %v14043_v27  ;;  %7093 = vmatprep.mubr.f32.mxu0 %v16719_v4  ;;  %v14357_v18 = vadd.f32 %v6619_v33, %v6294_v58 }
 0x50d   : > { %7398 = vmatprep.mubr.f32.mxu1 %v16719_v4  ;;  %v6301_v24 = vpop.f32.mrf.mxu0 }
 0x50e   : > { %v6646_v28 = vpop.f32.mrf.mxu1  ;;  %v6302_v2 = vadd.f32 %v6301_v24, %v14046_v9  ;;  %v14362_v51 = vadd.f32 %v6626_v49, %v6300_v46 }
 0x50f   : > { %v6307_v5 = vpop.f32.mrf.mxu0  ;;  %9503 = vmatmul.mubr.msk.f32.gmra.mxu0 %vm844_vm4, %v13379_v52 }
 0x510   : > { %v6653_v30 = vpop.f32.mrf.mxu1  ;;  %9537 = vmatmul.mubr.msk.f32.gmra.mxu1 %vm844_vm4, %v13429_v15  ;;  %v6308_v27 = vadd.f32 %v6307_v5, %v14052_v23  ;;  %7100 = vmatprep.mubr.f32.mxu0 %v16719_v4  ;;  %v14369_v33 = vadd.f32 %v6628_v26, %v6302_v2 }
 0x511   : > { %7405 = vmatprep.mubr.f32.mxu1 %v16719_v4  ;;  %v6309_v9 = vpop.f32.mrf.mxu0 }
 0x512   : > { %v6655_v45 = vpop.f32.mrf.mxu1  ;;  %v6310_v39 = vadd.f32 %v6309_v9, %v14055_v14  ;;  %v14374_v49 = vadd.f32 %v6635_v1, %v6308_v27 }
 0x513   : > { %v6315_v58 = vpop.f32.mrf.mxu0  ;;  %9504 = vmatmul.mubr.msk.f32.gmra.mxu0 %vm844_vm4, %v13403_v63 }
 0x514   : > { %v6662_v54 = vpop.f32.mrf.mxu1  ;;  %9538 = vmatmul.mubr.msk.f32.gmra.mxu1 %vm844_vm4, %v13459_v0  ;;  %v6316_v52 = vadd.f32 %v6315_v58, %v14061_v41  ;;  %7107 = vmatprep.mubr.f32.mxu0 %v16719_v4  ;;  %v14381_v26 = vadd.f32 %v6637_v17, %v6310_v39 }
 0x515   : > { %7412 = vmatprep.mubr.f32.mxu1 %v16719_v4  ;;  %v6317_v14 = vpop.f32.mrf.mxu0 }
 0x516   : > { %v6664_v23 = vpop.f32.mrf.mxu1  ;;  %v6318_v12 = vadd.f32 %v6317_v14, %v14064_v19  ;;  %v14386_v1 = vadd.f32 %v6644_v40, %v6316_v52  ;;  %v17413_v40 = vld [vmem:[#allocation150_spill] sm:$0xff] }
 0x517   : > { %v6323_v24 = vpop.f32.mrf.mxu0  ;;  %9505 = vmatmul.mubr.msk.f32.gmra.mxu0 %vm844_vm4, %v13429_v15 }
 0x518   : > { %v6671_v46 = vpop.f32.mrf.mxu1  ;;  %9539 = vmatmul.mubr.msk.f32.gmra.mxu1 %vm844_vm4, %v13490_v42  ;;  %v6324_v63 = vadd.f32 %v6323_v24, %v14070_v22  ;;  %7114 = vmatprep.mubr.f32.mxu0 %v16719_v4  ;;  %v14395_v17 = vadd.f32 %v6646_v28, %v6318_v12 }
 0x519   : > { %7419 = vmatprep.mubr.f32.mxu1 %v16719_v4  ;;  %v6325_v19 = vpop.f32.mrf.mxu0 }
 0x51a   : > { %v14392_v41 = vpop.f32.mrf.mxu1  ;;  %v6326_v2 = vadd.f32 %v6325_v19, %v14073_v25  ;;  %v14400_v27 = vadd.f32 %v6653_v30, %v6324_v63 }
 0x51b   : > { %v6331_v15 = vpop.f32.mrf.mxu0  ;;  %9506 = vmatmul.mubr.msk.f32.gmra.mxu0 %vm844_vm4, %v13459_v0 }
 0x51c   : > { %v6680_v5 = vpop.f32.mrf.mxu1  ;;  %9540 = vmatmul.mubr.msk.f32.gmra.mxu1 %vm844_vm4, %v17413_v40  ;;  %v6332_v22 = vadd.f32 %v6331_v15, %v14079_v21  ;;  %7121 = vmatprep.mubr.f32.mxu0 %v16719_v4  ;;  %v14409_v28 = vadd.f32 %v6655_v45, %v6326_v2 }
 0x51d   : > { %7426 = vmatprep.mubr.f32.mxu1 %v16719_v4  ;;  %v6333_v25 = vpop.f32.mrf.mxu0 }
 0x51e   : > { %v14406_v9 = vpop.f32.mrf.mxu1  ;;  %v6334_v39 = vadd.f32 %v6333_v25, %v14082_v6  ;;  %v14414_v30 = vadd.f32 %v6662_v54, %v6332_v22 }
 0x51f   : > { %v6339_v0 = vpop.f32.mrf.mxu0  ;;  %9507 = vmatmul.mubr.msk.f32.gmra.mxu0 %vm844_vm4, %v13490_v42 }
 0x520   : > { %v6689_v58 = vpop.f32.mrf.mxu1  ;;  %9541 = vmatmul.mubr.msk.f32.gmra.mxu1 %vm844_vm4, %v13554_v56  ;;  %v6340_v21 = vadd.f32 %v6339_v0, %v14088_v60  ;;  %7128 = vmatprep.mubr.f32.mxu0 %v16719_v4  ;;  %v14423_v45 = vadd.f32 %v6664_v23, %v6334_v39 }
 0x521   : > { %7433 = vmatprep.mubr.f32.mxu1 %v16719_v4  ;;  %v14425_v6 = vpop.f32.mrf.mxu0 }
 0x522   : > { %v14420_v52 = vpop.f32.mrf.mxu1  ;;  %v14429_v54 = vadd.f32 %v6671_v46, %v6340_v21 }
 0x523   : > { %v6347_v12 = vpop.f32.mrf.mxu0  ;;  %9508 = vmatmul.mubr.msk.f32.gmra.mxu0 %vm844_vm4, %v17413_v40 }
 0x524   : > { %v6698_v14 = vpop.f32.mrf.mxu1  ;;  %9542 = vmatmul.mubr.msk.f32.gmra.mxu1 %vm844_vm4, %v13586_v35  ;;  %v6348_v42 = vadd.f32 %v6347_v12, %v14097_v7  ;;  %7135 = vmatprep.mubr.f32.mxu0 %v16719_v4 }
 0x525   : > { %7440 = vmatprep.mubr.f32.mxu1 %v16719_v4  ;;  %v14436_v23 = vpop.f32.mrf.mxu0 }
 0x526   : > { %v6700_v60 = vpop.f32.mrf.mxu1  ;;  %v14440_v63 = vadd.f32 %v6680_v5, %v6348_v42 }
 0x527   : > { %v6355_v46 = vpop.f32.mrf.mxu0  ;;  %9509 = vmatmul.mubr.msk.f32.gmra.mxu0 %vm844_vm4, %v13554_v56 }
 0x528   : > { %v6707_v24 = vpop.f32.mrf.mxu1  ;;  %9543 = vmatmul.mubr.msk.f32.gmra.mxu1 %vm844_vm4, %v13618_v11  ;;  %v6356_v19 = vadd.f32 %v6355_v46, %v14106_v38  ;;  %7142 = vmatprep.mubr.f32.mxu0 %v16719_v4 }
 0x529   : > { %7447 = vmatprep.mubr.f32.mxu1 %v16719_v4  ;;  %v14447_v2 = vpop.f32.mrf.mxu0 }
 0x52a   : > { %v6709_v7 = vpop.f32.mrf.mxu1  ;;  %v14451_v15 = vadd.f32 %v6689_v58, %v6356_v19 }
 0x52b   : > { %v6363_v5 = vpop.f32.mrf.mxu0  ;;  %9510 = vmatmul.mubr.msk.f32.gmra.mxu0 %vm844_vm4, %v13586_v35 }
 0x52c   : > { %v6716_v40 = vpop.f32.mrf.mxu1  ;;  %9544 = vmatmul.mubr.msk.f32.gmra.mxu1 %vm844_vm4, %v13646_v32  ;;  %v6364_v56 = vadd.f32 %v6363_v5, %v14115_v50  ;;  %7149 = vmatprep.mubr.f32.mxu0 %v16719_v4 }
 0x52d   : > { %7454 = vmatprep.mubr.f32.mxu1 %v16719_v4  ;;  %v6365_v22 = vpop.f32.mrf.mxu0 }
 0x52e   : > { %v6718_v38 = vpop.f32.mrf.mxu1  ;;  %v6366_v25 = vadd.f32 %v6365_v22, %v14118_v31  ;;  %v14461_v58 = vadd.f32 %v6698_v14, %v6364_v56 }
 0x52f   : > { %v6371_v0 = vpop.f32.mrf.mxu0  ;;  %9511 = vmatmul.mubr.msk.f32.gmra.mxu0 %vm844_vm4, %v13618_v11 }
 0x530   : > { %v6725_v39 = vpop.f32.mrf.mxu1  ;;  %9545 = vmatmul.mubr.msk.f32.gmra.mxu1 %vm844_vm4, %v13674_v59  ;;  %v6372_v35 = vadd.f32 %v6371_v0, %v14124_v10  ;;  %7156 = vmatprep.mubr.f32.mxu0 %v16719_v4  ;;  %v14468_v21 = vadd.f32 %v6700_v60, %v6366_v25 }
 0x531   : > { %7461 = vmatprep.mubr.f32.mxu1 %v16719_v4  ;;  %v6373_v31 = vpop.f32.mrf.mxu0 }
 0x532   : > { %v6727_v50 = vpop.f32.mrf.mxu1  ;;  %v6374_v12 = vadd.f32 %v6373_v31, %v14127_v62  ;;  %v14473_v14 = vadd.f32 %v6707_v24, %v6372_v35 }
 0x533   : > { %v6379_v46 = vpop.f32.mrf.mxu0  ;;  %9512 = vmatmul.mubr.msk.f32.gmra.mxu0 %vm844_vm4, %v13646_v32 }
 0x534   : > { %v6734_v42 = vpop.f32.mrf.mxu1  ;;  %9546 = vmatmul.mubr.msk.f32.gmra.mxu1 %vm844_vm4, %v13702_v43  ;;  %v6380_v11 = vadd.f32 %v6379_v46, %v14133_v20  ;;  %7163 = vmatprep.mubr.f32.mxu0 %v16719_v4  ;;  %v14479_v60 = vadd.f32 %v6709_v7, %v6374_v12 }
 0x535   : > { %v6381_v19 = vpop.f32.mrf.mxu0 }
 0x536   : > { %v6736_v10 = vpop.f32.mrf.mxu1  ;;  %v6382_v62 = vadd.f32 %v6381_v19, %v14136_v3  ;;  %v14482_v56 = vadd.f32 %v6716_v40, %v6380_v11 }
 0x537   : > { %v6387_v22 = vpop.f32.mrf.mxu0  ;;  %9513 = vmatmul.mubr.msk.f32.gmra.mxu0 %vm844_vm4, %v13674_v59 }
 0x538   : > { %v6743_v5 = vpop.f32.mrf.mxu1  ;;  %v6388_v24 = vadd.f32 %v6387_v22, %v14142_v37  ;;  %7170 = vmatprep.mubr.f32.mxu0 %v16719_v4  ;;  %v14488_v20 = vadd.f32 %v6718_v38, %v6382_v62 }
 0x539   : > { %v6389_v25 = vpop.f32.mrf.mxu0 }
 0x53a   : > { %v6745_v32 = vpop.f32.mrf.mxu1  ;;  %v6390_v7 = vadd.f32 %v6389_v25, %v14145_v47  ;;  %v14491_v35 = vadd.f32 %v6725_v39, %v6388_v24 }
 0x53b   : > { %v6395_v3 = vpop.f32.mrf.mxu0  ;;  %9514 = vmatmul.mubr.msk.f32.gmra.mxu0 %vm844_vm4, %v13702_v43 }
 0x53c   : > { %v6752_v0 = vpop.f32.mrf.mxu1  ;;  %v6396_v40 = vadd.f32 %v6395_v3, %v14151_v36  ;;  %v14496_v31 = vadd.f32 %v6727_v50, %v6390_v7 }
 0x53d   : > { %v6397_v37 = vpop.f32.mrf.mxu0 }
 0x53e   : > { %v6754_v59 = vpop.f32.mrf.mxu1  ;;  %v6398_v4 = vadd.f32 %v6397_v37, %v14154_v16  ;;  %v14499_v12 = vadd.f32 %v6734_v42, %v6396_v40  ;;  %v17415_v37 = vld [vmem:[#allocation132_spill] sm:$0xff] }
 0x53f   : > { %v6403_v46 = vpop.f32.mrf.mxu0 }
 0x540   : > { %v6761_v38 = vpop.f32.mrf.mxu1  ;;  %v6404_v47 = vadd.f32 %v6403_v46, %v14161_v48  ;;  %v14502_v11 = vadd.f32 %v6736_v10, %v6398_v4 }
 0x541   : > { %v6405_v19 = vpop.f32.mrf.mxu0 }
 0x542   : > { %v6763_v39 = vpop.f32.mrf.mxu1  ;;  %v6406_v43 = vadd.f32 %v6405_v19, %v14164_v13  ;;  %v14505_v36 = vadd.f32 %v6743_v5, %v6404_v47  ;;  %v17417_v47 = vld [vmem:[#allocation27_spill] sm:$0xff] }
 0x543   : > { %v6411_v50 = vpop.f32.mrf.mxu0 }
 0x544   : > { %v6770_v62 = vpop.f32.mrf.mxu1  ;;  %v6412_v22 = vadd.f32 %v6411_v50, %v14171_v57  ;;  %v14508_v16 = vadd.f32 %v6745_v32, %v6406_v43  ;;  %v17419_v50 = vld [vmem:[#allocation58_spill] sm:$0xff] }
 0x545   : > { %v6413_v42 = vpop.f32.mrf.mxu0 }
 0x546   : > { %v6772_v24 = vpop.f32.mrf.mxu1  ;;  %v6414_v25 = vadd.f32 %v6413_v42, %v14174_v55  ;;  %v14511_v48 = vadd.f32 %v6752_v0, %v6412_v22 }
 0x547   : > { %v6419_v10 = vpop.f32.mrf.mxu0 }
 0x548   : > { %v6779_v7 = vpop.f32.mrf.mxu1  ;;  %v6420_v3 = vadd.f32 %v6419_v10, %v14181_v34  ;;  %v14514_v13 = vadd.f32 %v6754_v59, %v6414_v25  ;;  %v17421_v25 = vld [vmem:[#allocation67_spill] sm:$0xff] }
 0x549   : > { %v6421_v5 = vpop.f32.mrf.mxu0 }
 0x54a   : > { %v6781_v40 = vpop.f32.mrf.mxu1  ;;  %17414 = vst [vmem:[#allocation74_spill] sm:$0xff] %v14514_v13  ;;  %v6422_v4 = vadd.f32 %v6421_v5, %v17415_v37  ;;  %v14517_v57 = vadd.f32 %v6761_v38, %v6420_v3  ;;  %v17423_v3 = vld [vmem:[#allocation43_spill] sm:$0xff] }
 0x54b   : > { %v6427_v32 = vpop.f32.mrf.mxu0 }
 0x54c   : > { %v6788_v46 = vpop.f32.mrf.mxu1  ;;  %17416 = vst [vmem:[#allocation31_spill] sm:$0xff] %v14517_v57  ;;  %v6428_v19 = vadd.f32 %v6427_v32, %v17417_v47  ;;  %v14520_v55 = vadd.f32 %v6763_v39, %v6422_v4  ;;  %v17425_v4 = vld [vmem:[#allocation134_spill] sm:$0xff] }
 0x54d   : > { %v6429_v0 = vpop.f32.mrf.mxu0 }
 0x54e   : > { %v6790_v43 = vpop.f32.mrf.mxu1  ;;  %17418 = vst [vmem:[#allocation76_spill] sm:$0xff] %v14520_v55  ;;  %v6430_v22 = vadd.f32 %v6429_v0, %v17419_v50  ;;  %v14523_v34 = vadd.f32 %v6770_v62, %v6428_v19  ;;  %v17427_v19 = vld [vmem:[#allocation45_spill] sm:$0xff] }
 0x54f   : > { %v6435_v59 = vpop.f32.mrf.mxu0 }
 0x550   : > { %v6797_v42 = vpop.f32.mrf.mxu1  ;;  %17420 = vst [vmem:[#allocation144_spill] sm:$0xff] %v14523_v34  ;;  %v6436_v10 = vadd.f32 %v6435_v59, %v17421_v25  ;;  %v14526_v5 = vadd.f32 %v6772_v24, %v6430_v22  ;;  %v17429_v22 = vld [vmem:[#allocation60_spill] sm:$0xff] }
 0x551   : > { %v6437_v38 = vpop.f32.mrf.mxu0 }
 0x552   : > { %v6799_v13 = vpop.f32.mrf.mxu1  ;;  %17422 = vst [vmem:[#allocation75_spill] sm:$0xff] %v14526_v5  ;;  %v6438_v37 = vadd.f32 %v6437_v38, %v17423_v3  ;;  %v14529_v32 = vadd.f32 %v6779_v7, %v6436_v10  ;;  %v17431_v10 = vld [vmem:[#allocation28_spill] sm:$0xff] }
 0x553   : > { %v6443_v39 = vpop.f32.mrf.mxu0 }
 0x554   : > { %v6806_v57 = vpop.f32.mrf.mxu1  ;;  %17424 = vst [vmem:[#allocation78_spill] sm:$0xff] %v14529_v32  ;;  %v6444_v47 = vadd.f32 %v6443_v39, %v17425_v4  ;;  %v14532_v0 = vadd.f32 %v6781_v40, %v6438_v37  ;;  %v17433_v37 = vld [vmem:[#allocation34_spill] sm:$0xff] }
 0x555   : > { %v6445_v62 = vpop.f32.mrf.mxu0 }
 0x556   : > { %v6808_v55 = vpop.f32.mrf.mxu1  ;;  %17426 = vst [vmem:[#allocation49_spill] sm:$0xff] %v14532_v0  ;;  %v6446_v50 = vadd.f32 %v6445_v62, %v17427_v19  ;;  %v14535_v59 = vadd.f32 %v6788_v46, %v6444_v47  ;;  %v17435_v47 = vld [vmem:[#allocation136_spill] sm:$0xff] }
 0x557   : > { %v6451_v24 = vpop.f32.mrf.mxu0 }
 0x558   : > { %v6815_v34 = vpop.f32.mrf.mxu1  ;;  %17428 = vst [vmem:[#allocation146_spill] sm:$0xff] %v14535_v59  ;;  %v6452_v25 = vadd.f32 %v6451_v24, %v17429_v22  ;;  %v14538_v38 = vadd.f32 %v6790_v43, %v6446_v50  ;;  %v17437_v50 = vld [vmem:[#allocation69_spill] sm:$0xff] }
 0x559   : > { %v6453_v7 = vpop.f32.mrf.mxu0 }
 0x55a   : > { %v6817_v5 = vpop.f32.mrf.mxu1  ;;  %17430 = vst [vmem:[#allocation18_spill] sm:$0xff] %v14538_v38  ;;  %v6454_v3 = vadd.f32 %v6453_v7, %v17431_v10  ;;  %v14541_v39 = vadd.f32 %v6797_v42, %v6452_v25  ;;  %v17439_v25 = vld [vmem:[#allocation38_spill] sm:$0xff] }
 0x55b   : > { %v6459_v40 = vpop.f32.mrf.mxu0 }
 0x55c   : > { %v6824_v32 = vpop.f32.mrf.mxu1  ;;  %17432 = vst [vmem:[#allocation82_spill] sm:$0xff] %v14541_v39  ;;  %v6460_v4 = vadd.f32 %v6459_v40, %v17433_v37  ;;  %v14544_v62 = vadd.f32 %v6799_v13, %v6454_v3  ;;  %v17441_v3 = vld [vmem:[#allocation46_spill] sm:$0xff] }
 0x55d   : > { %v6461_v46 = vpop.f32.mrf.mxu0 }
 0x55e   : > { %v6826_v0 = vpop.f32.mrf.mxu1  ;;  %17434 = vst [vmem:[#allocation19_spill] sm:$0xff] %v14544_v62  ;;  %v6462_v19 = vadd.f32 %v6461_v46, %v17435_v47  ;;  %v14547_v24 = vadd.f32 %v6806_v57, %v6460_v4  ;;  %v17443_v4 = vld [vmem:[#allocation64_spill] sm:$0xff] }
 0x55f   : > { %v6467_v43 = vpop.f32.mrf.mxu0 }
 0x560   : > { %v6833_v59 = vpop.f32.mrf.mxu1  ;;  %17436 = vst [vmem:[#allocation84_spill] sm:$0xff] %v14547_v24  ;;  %v6468_v22 = vadd.f32 %v6467_v43, %v17437_v50  ;;  %v14550_v7 = vadd.f32 %v6808_v55, %v6462_v19  ;;  %v17445_v19 = vld [vmem:[#allocation138_spill] sm:$0xff] }
 0x561   : > { %v6469_v42 = vpop.f32.mrf.mxu0 }
 0x562   : > { %v6835_v38 = vpop.f32.mrf.mxu1  ;;  %17438 = vst [vmem:[#allocation148_spill] sm:$0xff] %v14550_v7  ;;  %v6470_v10 = vadd.f32 %v6469_v42, %v17439_v25  ;;  %v14553_v40 = vadd.f32 %v6815_v34, %v6468_v22  ;;  %v17447_v22 = vld [vmem:[#allocation29_spill] sm:$0xff] }
 0x563   : > { %v6475_v13 = vpop.f32.mrf.mxu0 }
 0x564   : > { %v6842_v39 = vpop.f32.mrf.mxu1  ;;  %17440 = vst [vmem:[#allocation20_spill] sm:$0xff] %v14553_v40  ;;  %v6476_v37 = vadd.f32 %v6475_v13, %v17441_v3  ;;  %v14556_v46 = vadd.f32 %v6817_v5, %v6470_v10  ;;  %v17449_v10 = vld [vmem:[#allocation66_spill] sm:$0xff] }
 0x565   : > { %v6477_v57 = vpop.f32.mrf.mxu0 }
 0x566   : > { %v6844_v62 = vpop.f32.mrf.mxu1  ;;  %17442 = vst [vmem:[#allocation86_spill] sm:$0xff] %v14556_v46  ;;  %v6478_v47 = vadd.f32 %v6477_v57, %v17443_v4  ;;  %v14559_v43 = vadd.f32 %v6824_v32, %v6476_v37  ;;  %v17451_v37 = vld [vmem:[#allocation71_spill] sm:$0xff] }
 0x567   : > { %v6483_v55 = vpop.f32.mrf.mxu0 }
 0x568   : > { %v6851_v24 = vpop.f32.mrf.mxu1  ;;  %17444 = vst [vmem:[#allocation17_spill] sm:$0xff] %v14559_v43  ;;  %v6484_v50 = vadd.f32 %v6483_v55, %v17445_v19  ;;  %v14562_v42 = vadd.f32 %v6826_v0, %v6478_v47  ;;  %v17453_v47 = vld [vmem:[#allocation68_spill] sm:$0xff] }
 0x569   : > { %v6485_v34 = vpop.f32.mrf.mxu0 }
 0x56a   : > { %v6853_v7 = vpop.f32.mrf.mxu1  ;;  %17446 = vst [vmem:[#allocation80_spill] sm:$0xff] %v14562_v42  ;;  %v6486_v25 = vadd.f32 %v6485_v34, %v17447_v22  ;;  %v14565_v13 = vadd.f32 %v6833_v59, %v6484_v50  ;;  %v17455_v50 = vld [vmem:[#allocation140_spill] sm:$0xff] }
 0x56b   : > { %v6491_v5 = vpop.f32.mrf.mxu0 }
 0x56c   : > { %v6860_v40 = vpop.f32.mrf.mxu1  ;;  %17448 = vst [vmem:[#allocation32_spill] sm:$0xff] %v14565_v13  ;;  %v6492_v3 = vadd.f32 %v6491_v5, %v17449_v10  ;;  %v14568_v57 = vadd.f32 %v6835_v38, %v6486_v25  ;;  %v17457_v25 = vld [vmem:[#allocation47_spill] sm:$0xff] }
 0x56d   : > { %v6493_v32 = vpop.f32.mrf.mxu0 }
 0x56e   : > { %v6862_v46 = vpop.f32.mrf.mxu1  ;;  %17450 = vst [vmem:[#allocation77_spill] sm:$0xff] %v14568_v57  ;;  %v6494_v4 = vadd.f32 %v6493_v32, %v17451_v37  ;;  %v14571_v55 = vadd.f32 %v6842_v39, %v6492_v3  ;;  %v17459_v3 = vld [vmem:[#allocation70_spill] sm:$0xff] }
 0x56f   : > { %v6499_v0 = vpop.f32.mrf.mxu0 }
 0x570   : > { %v6869_v43 = vpop.f32.mrf.mxu1  ;;  %17452 = vst [vmem:[#allocation87_spill] sm:$0xff] %v14571_v55  ;;  %v6500_v19 = vadd.f32 %v6499_v0, %v17453_v47  ;;  %v14574_v34 = vadd.f32 %v6844_v62, %v6494_v4  ;;  %v17461_v4 = vld [vmem:[#allocation73_spill] sm:$0xff] }
 0x571   : > { %v6501_v59 = vpop.f32.mrf.mxu0 }
 0x572   : > { %v6871_v42 = vpop.f32.mrf.mxu1  ;;  %17454 = vst [vmem:[#allocation94_spill] sm:$0xff] %v14574_v34  ;;  %v6502_v22 = vadd.f32 %v6501_v59, %v17455_v50  ;;  %v14577_v5 = vadd.f32 %v6851_v24, %v6500_v19  ;;  %v17463_v19 = vld [vmem:[#allocation72_spill] sm:$0xff] }
 0x573   : > { %v6507_v38 = vpop.f32.mrf.mxu0 }
 0x574   : > { %v6878_v13 = vpop.f32.mrf.mxu1  ;;  %17456 = vst [vmem:[#allocation107_spill] sm:$0xff] %v14577_v5  ;;  %v6508_v10 = vadd.f32 %v6507_v38, %v17457_v25  ;;  %v14580_v32 = vadd.f32 %v6853_v7, %v6502_v22  ;;  %v17465_v22 = vld [vmem:[#allocation142_spill] sm:$0xff] }
 0x575   : > { %v6509_v39 = vpop.f32.mrf.mxu0 }
 0x576   : > { %v6880_v57 = vpop.f32.mrf.mxu1  ;;  %17458 = vst [vmem:[#allocation118_spill] sm:$0xff] %v14580_v32  ;;  %v6510_v37 = vadd.f32 %v6509_v39, %v17459_v3  ;;  %v14583_v0 = vadd.f32 %v6860_v40, %v6508_v10  ;;  %v17467_v10 = vld [vmem:[#allocation48_spill] sm:$0xff] }
 0x577   : > { %v6515_v62 = vpop.f32.mrf.mxu0 }
 0x578   : > { %v7247_v55 = vpop.f32.mrf.mxu1  ;;  %17460 = vst [vmem:[#allocation120_spill] sm:$0xff] %v14583_v0  ;;  %v6516_v47 = vadd.f32 %v6515_v62, %v17461_v4  ;;  %v14586_v59 = vadd.f32 %v6862_v46, %v6510_v37 }
 0x579   : > { %v6517_v24 = vpop.f32.mrf.mxu0 }
 0x57a   : > { %v7249_v34 = vpop.f32.mrf.mxu1  ;;  %17462 = vst [vmem:[#allocation123_spill] sm:$0xff] %v14586_v59  ;;  %v6518_v50 = vadd.f32 %v6517_v24, %v17463_v19  ;;  %v14589_v38 = vadd.f32 %v6869_v43, %v6516_v47 }
 0x57b   : > { %v6523_v7 = vpop.f32.mrf.mxu0 }
 0x57c   : > { %v7254_v5 = vpop.f32.mrf.mxu1  ;;  %17464 = vst [vmem:[#allocation79_spill] sm:$0xff] %v14589_v38  ;;  %v6524_v25 = vadd.f32 %v6523_v7, %v17465_v22  ;;  %v14592_v39 = vadd.f32 %v6871_v42, %v6518_v50  ;;  %v17470_v42 = vld [vmem:[#allocation55_spill] sm:$0xff] }
 0x57d   : > { %v6525_v40 = vpop.f32.mrf.mxu0 }
 0x57e   : > { %v7256_v32 = vpop.f32.mrf.mxu1  ;;  %17466 = vst [vmem:[#allocation125_spill] sm:$0xff] %v14592_v39  ;;  %v6526_v3 = vadd.f32 %v6525_v40, %v17467_v10  ;;  %v14595_v62 = vadd.f32 %v6878_v13, %v6524_v25  ;;  %v17471_v10 = vld [vmem:[#allocation56_spill] sm:$0xff] }
 0x57f   : > { %v6956_v46 = vpop.f32.mrf.mxu0 }
 0x580   : > { %v7261_v0 = vpop.f32.mrf.mxu1  ;;  %17468 = vst [vmem:[#allocation127_spill] sm:$0xff] %v14595_v62  ;;  %v6957_v37 = vadd.f32 %v6956_v46, %v14326_v53  ;;  %v14598_v24 = vadd.f32 %v6880_v57, %v6526_v3  ;;  %v17472_v46 = vld [vmem:[#allocation89_spill] sm:$0xff] }
 0x581   : > { %v6958_v43 = vpop.f32.mrf.mxu0 }
 0x582   : > { %v7263_v4 = vpop.f32.mrf.mxu1  ;;  %17469 = vst [vmem:[#allocation129_spill] sm:$0xff] %v14598_v24  ;;  %v7248_v47 = vadd.f32 %v7247_v55, %v6957_v37  ;;  %v6959_v19 = vadd.f32 %v6958_v43, %v14333_v61 }
 0x583   : > { %v6963_v22 = vpop.f32.mrf.mxu0 }
 0x584   : > { %v7268_v7 = vpop.f32.mrf.mxu1  ;;  %v14602_v50 = vmul.f32 %v17470_v42, %v7248_v47  ;;  %v7250_v39 = vadd.f32 %v7249_v34, %v6959_v19  ;;  %v6964_v40 = vadd.f32 %v6963_v22, %v14338_v8  ;;  %v17473_v19 = vld [vmem:[#allocation90_spill] sm:$0xff] }
 0x585   : > { %v6965_v25 = vpop.f32.mrf.mxu0 }
 0x586   : > { %v7270_v13 = vpop.f32.mrf.mxu1  ;;  %v14606_v62 = vmul.f32 %v17471_v10, %v7250_v39  ;;  %v7255_v53 = vadd.f32 %v7254_v5, %v6964_v40  ;;  %v6966_v57 = vadd.f32 %v6965_v25, %v14345_v44  ;;  %v17474_v10 = vld [vmem:[#allocation91_spill] sm:$0xff] }
 0x587   : > { %v6970_v55 = vpop.f32.mrf.mxu0 }
 0x588   : > { %v7275_v3 = vpop.f32.mrf.mxu1  ;;  %v14610_v61 = vmul.f32 %v17472_v46, %v7255_v53  ;;  %v7257_v37 = vadd.f32 %v7256_v32, %v6966_v57  ;;  %v6971_v47 = vadd.f32 %v6970_v55, %v14350_v29  ;;  %v17475_v57 = vld [vmem:[#allocation92_spill] sm:$0xff] }
 0x589   : > { %v6972_v34 = vpop.f32.mrf.mxu0 }
 0x58a   : > { %v7277_v43 = vpop.f32.mrf.mxu1  ;;  %v14614_v8 = vmul.f32 %v17473_v19, %v7257_v37  ;;  %v6973_v22 = vadd.f32 %v6972_v34, %v14357_v18  ;;  %v7262_v42 = vadd.f32 %v7261_v0, %v6971_v47  ;;  %v17476_v18 = vld [vmem:[#allocation93_spill] sm:$0xff] }
 0x58b   : > { %v6977_v5 = vpop.f32.mrf.mxu0 }
 0x58c   : > { %v7282_v39 = vpop.f32.mrf.mxu1  ;;  %v7264_v40 = vadd.f32 %v7263_v4, %v6973_v22  ;;  %v6978_v44 = vadd.f32 %v6977_v5, %v14362_v51  ;;  %v14619_v53 = vmul.f32 %v17474_v10, %v7262_v42  ;;  %v17477_v22 = vld [vmem:[#allocation95_spill] sm:$0xff] }
 0x58d   : > { %v6979_v32 = vpop.f32.mrf.mxu0 }
 0x58e   : > { %v7284_v25 = vpop.f32.mrf.mxu1  ;;  %v14622_v46 = vmul.f32 %v17475_v57, %v7264_v40  ;;  %v7269_v29 = vadd.f32 %v7268_v7, %v6978_v44  ;;  %v6980_v55 = vadd.f32 %v6979_v32, %v14369_v33  ;;  %v17478_v44 = vld [vmem:[#allocation96_spill] sm:$0xff] }
 0x58f   : > { %v6984_v19 = vpop.f32.mrf.mxu0 }
 0x590   : > { %v7289_v37 = vpop.f32.mrf.mxu1  ;;  %v14626_v34 = vmul.f32 %v17476_v18, %v7269_v29  ;;  %v7271_v0 = vadd.f32 %v7270_v13, %v6980_v55  ;;  %v6985_v4 = vadd.f32 %v6984_v19, %v14374_v49  ;;  %v17479_v18 = vld [vmem:[#allocation97_spill] sm:$0xff] }
 0x591   : > { %v6986_v47 = vpop.f32.mrf.mxu0 }
 0x592   : > { %v7291_v51 = vpop.f32.mrf.mxu1  ;;  %v14630_v42 = vmul.f32 %v17477_v22, %v7271_v0  ;;  %v7276_v5 = vadd.f32 %v7275_v3, %v6985_v4  ;;  %v6987_v40 = vadd.f32 %v6986_v47, %v14381_v26  ;;  %v17480_v4 = vld [vmem:[#allocation98_spill] sm:$0xff] }
 0x593   : > { %v6991_v7 = vpop.f32.mrf.mxu0 }
 0x594   : > { %v7296_v10 = vpop.f32.mrf.mxu1  ;;  %v14634_v33 = vmul.f32 %v17478_v44, %v7276_v5  ;;  %v6992_v32 = vadd.f32 %v6991_v7, %v14386_v1  ;;  %v7278_v29 = vadd.f32 %v7277_v43, %v6987_v40  ;;  %v17481_v1 = vld [vmem:[#allocation99_spill] sm:$0xff] }
 0x595   : > { %v6993_v13 = vpop.f32.mrf.mxu0 }
 0x596   : > { %v7298_v57 = vpop.f32.mrf.mxu1  ;;  %v7283_v55 = vadd.f32 %v7282_v39, %v6992_v32  ;;  %v6994_v49 = vadd.f32 %v6993_v13, %v14395_v17  ;;  %v14639_v0 = vmul.f32 %v17479_v18, %v7278_v29  ;;  %v17482_v32 = vld [vmem:[#allocation54_spill] sm:$0xff]  ;;  %v17483_v13 = vld [vmem:[#allocation100_spill] sm:$0xff] }
 0x597   : > { %v6998_v3 = vpop.f32.mrf.mxu0  ;;  %v6342_v29 = vadd.f32 %v14425_v6, %v17482_v32  ;;  %v17485_v32 = vld [vmem:[#allocation44_spill] sm:$0xff] }
 0x598   : > { %v7303_v19 = vpop.f32.mrf.mxu1  ;;  %v14642_v22 = vmul.f32 %v17480_v4, %v7283_v55  ;;  %v7285_v26 = vadd.f32 %v7284_v25, %v6994_v49  ;;  %v6999_v47 = vadd.f32 %v6998_v3, %v14400_v27  ;;  %v17484_v3 = vld [vmem:[#allocation101_spill] sm:$0xff] }
 0x599   : > { %v7000_v44 = vpop.f32.mrf.mxu0 }
 0x59a   : > { %v7305_v5 = vpop.f32.mrf.mxu1  ;;  %v14646_v7 = vmul.f32 %v17481_v1, %v7285_v26  ;;  %v7290_v43 = vadd.f32 %v7289_v37, %v6999_v47  ;;  %v7001_v39 = vadd.f32 %v7000_v44, %v14409_v28 }
 0x59b   : > { %v7005_v40 = vpop.f32.mrf.mxu0 }
 0x59c   : > { %v7310_v17 = vpop.f32.mrf.mxu1  ;;  %v14652_v18 = vmul.f32 %v17483_v13, %v7290_v43  ;;  %v7292_v55 = vadd.f32 %v7291_v51, %v7001_v39  ;;  %v7006_v27 = vadd.f32 %v7005_v40, %v14414_v30  ;;  %v6674_v43 = vadd.f32 %v14392_v41, %v6342_v29  ;;  %v17486_v39 = vld [vmem:[#allocation102_spill] sm:$0xff]  ;;  %v17487_v13 = vld [vmem:[#allocation103_spill] sm:$0xff] }
 0x59d   : > { %v7007_v49 = vpop.f32.mrf.mxu0  ;;  %v6350_v51 = vadd.f32 %v14436_v23, %v17485_v32 }
 0x59e   : > { %v7312_v25 = vpop.f32.mrf.mxu1  ;;  %v14656_v4 = vmul.f32 %v17484_v3, %v7292_v55  ;;  %v7008_v37 = vadd.f32 %v7007_v49, %v14423_v45  ;;  %v7297_v28 = vadd.f32 %v7296_v10, %v7006_v27  ;;  %v17489_v3 = vld [vmem:[#allocation104_spill] sm:$0xff] }
 0x59f   : > { %v7012_v47 = vpop.f32.mrf.mxu0 }
 0x5a0   : > { %v7317_v26 = vpop.f32.mrf.mxu1  ;;  %v7299_v44 = vadd.f32 %v7298_v57, %v7008_v37  ;;  %v7013_v1 = vadd.f32 %v7012_v47, %v14429_v54  ;;  %v14664_v30 = vmul.f32 %v17486_v39, %v7297_v28  ;;  %v17488_v57 = vld [vmem:[#allocation57_spill] sm:$0xff]  ;;  %v6683_v28 = vadd.f32 %v14406_v9, %v6350_v51 }
 0x5a1   : > { %v7014_v40 = vpop.f32.mrf.mxu0  ;;  %v6358_v54 = vadd.f32 %v14447_v2, %v17488_v57  ;;  %v14683_v2 = vand.u32 4294901760, %v14606_v62 }
 0x5a2   : > { %v7319_v6 = vpop.f32.mrf.mxu1  ;;  %v14667_v55 = vmul.f32 %v17487_v13, %v7299_v44  ;;  %v7304_v45 = vadd.f32 %v7303_v19, %v7013_v1  ;;  %v7015_v49 = vadd.f32 %v7014_v40, %v6674_v43  ;;  %v14677_v44 = vand.u32 4294901760, %v14602_v50  ;;  %v17491_v19 = vld [vmem:[#allocation105_spill] sm:$0xff] }
 0x5a3   : > { %v7019_v27 = vpop.f32.mrf.mxu0  ;;  %17492 = vst [vmem:[#allocation133_spill] sm:$0xff] %v14683_v2  ;;  %v6692_v51 = vadd.f32 %v14420_v52, %v6358_v54  ;;  %v14705_v52 = vsub.f32 %v14606_v62, %v14683_v2  ;;  %v14708_v54 = vand.u32 4294901760, %v14614_v8 }
 0x5a4   : > { %v7324_v10 = vpop.f32.mrf.mxu1  ;;  %v14672_v37 = vmul.f32 %v17489_v3, %v7304_v45  ;;  %v7306_v41 = vadd.f32 %v7305_v5, %v7015_v49  ;;  %v7020_v23 = vadd.f32 %v7019_v27, %v14440_v63  ;;  %17490 = vst [vmem:[#allocation131_spill] sm:$0xff] %v14677_v44  ;;  %v17493_v5 = vld [vmem:[#allocation106_spill] sm:$0xff]  ;;  %v14691_v45 = vand.u32 4294901760, %v14610_v61 }
 0x5a5   : > { %v7021_v47 = vpop.f32.mrf.mxu0  ;;  %v14694_v49 = vand.u32 4294901760, %v14622_v46  ;;  %v14701_v3 = vsub.f32 %v14602_v50, %v14677_v44  ;;  %17498 = vst [vmem:[#allocation143_spill] sm:$0xff] %v14705_v52  ;;  %17499 = vst [vmem:[#allocation145_spill] sm:$0xff] %v14708_v54  ;;  %v14717_v50 = vand.u32 4294901760, %v14639_v0  ;;  %v17518_v52 = vld [vmem:[#allocation112_spill] sm:$0xff] }
 0x5a6   : > { %v7326_v29 = vpop.f32.mrf.mxu1  ;;  %v14680_v1 = vmul.f32 %v17491_v19, %v7306_v41  ;;  %v7311_v43 = vadd.f32 %v7310_v17, %v7020_v23  ;;  %v7022_v39 = vadd.f32 %v7021_v47, %v6683_v28  ;;  %17494 = vst [vmem:[#allocation135_spill] sm:$0xff] %v14691_v45  ;;  %v14697_v17 = vand.u32 4294901760, %v14626_v34  ;;  %v17501_v47 = vld [vmem:[#allocation108_spill] sm:$0xff] }
 0x5a7   : > { %v7026_v40 = vpop.f32.mrf.mxu0  ;;  %17495 = vst [vmem:[#allocation137_spill] sm:$0xff] %v14694_v49  ;;  %17497 = vst [vmem:[#allocation141_spill] sm:$0xff] %v14701_v3  ;;  %v14711_v28 = vand.u32 4294901760, %v14630_v42  ;;  %v14821_v3 = vand.u32 4294901760, %v14656_v4 }
 0x5a8   : > { %v7331_v32 = vpop.f32.mrf.mxu1  ;;  %v14686_v13 = vmul.f32 %v17493_v5, %v7311_v43  ;;  %v7027_v63 = vadd.f32 %v7026_v40, %v14451_v15  ;;  %17496 = vst [vmem:[#allocation139_spill] sm:$0xff] %v14697_v17  ;;  %v7313_v27 = vadd.f32 %v7312_v25, %v7022_v39  ;;  %17502 = vst [vmem:[#allocation149_spill] sm:$0xff] %v14717_v50 }
 0x5a9   : > { %v7028_v57 = vpop.f32.mrf.mxu0  ;;  %17500 = vst [vmem:[#allocation147_spill] sm:$0xff] %v14711_v28  ;;  %v14725_v5 = vsub.f32 %v14610_v61, %v14691_v45  ;;  %17529 = vst [vmem:[#allocation68_spill] sm:$0xff] %v14821_v3 }
 0x5aa   : > { %v7333_v9 = vpop.f32.mrf.mxu1  ;;  %v7318_v41 = vadd.f32 %v7317_v26, %v7027_v63  ;;  %v7029_v15 = vadd.f32 %v7028_v57, %v6692_v51  ;;  %v14714_v25 = vmul.f32 %v17501_v47, %v7313_v27  ;;  %v17503_v26 = vld [vmem:[#allocation109_spill] sm:$0xff]  ;;  %v14728_v63 = vand.u32 4294901760, %v14619_v53 }
 0x5ab   : > { %v7033_v19 = vpop.f32.mrf.mxu0  ;;  %17504 = vst [vmem:[#allocation150_spill] sm:$0xff] %v14725_v5  ;;  %v14732_v51 = vsub.f32 %v14622_v46, %v14694_v49  ;;  %v14736_v27 = vsub.f32 %v14626_v34, %v14697_v17  ;;  %v14751_v46 = vsub.f32 %v14630_v42, %v14711_v28  ;;  %v14754_v34 = vand.u32 4294901760, %v14642_v22  ;;  %v17556_v49 = vld [vmem:[#allocation119_spill] sm:$0xff] }
 0x5ac   : > { %v7338_v23 = vpop.f32.mrf.mxu1  ;;  %v14720_v43 = vmul.f32 %v17503_v26, %v7318_v41  ;;  %v7320_v39 = vadd.f32 %v7319_v6, %v7029_v15  ;;  %v7034_v62 = vadd.f32 %v7033_v19, %v14461_v58  ;;  %17505 = vst [vmem:[#allocation132_spill] sm:$0xff] %v14728_v63  ;;  %v14739_v6 = vand.u32 4294901760, %v14634_v33  ;;  %v17509_v58 = vld [vmem:[#allocation110_spill] sm:$0xff] }
 0x5ad   : > { %17506 = vst [vmem:[#allocation27_spill] sm:$0xff] %v14732_v51  ;;  %17507 = vst [vmem:[#allocation58_spill] sm:$0xff] %v14736_v27  ;;  %v7035_v57 = vpop.f32.mrf.mxu0  ;;  %v14747_v19 = vsub.f32 %v14614_v8, %v14708_v54  ;;  %v14769_v42 = vsub.f32 %v14619_v53, %v14728_v63  ;;  %v14801_v53 = vand.u32 4294901760, %v14680_v1  ;;  %v14839_v51 = vand.u32 4294901760, %v14672_v37 }
 0x5ae   : > { %v7340_v40 = vpop.f32.mrf.mxu1  ;;  %17508 = vst [vmem:[#allocation67_spill] sm:$0xff] %v14739_v6  ;;  %v14742_v41 = vmul.f32 %v17509_v58, %v7320_v39  ;;  %v7325_v61 = vadd.f32 %v7324_v10, %v7034_v62  ;;  %v7036_v15 = vadd.f32 %v7035_v57, %v14468_v21  ;;  %17511 = vst [vmem:[#allocation134_spill] sm:$0xff] %v14751_v46  ;;  %v14762_v21 = vand.u32 4294901760, %v14646_v7  ;;  %v17515_v39 = vld [vmem:[#allocation111_spill] sm:$0xff] }
 0x5af   : > { %17510 = vst [vmem:[#allocation43_spill] sm:$0xff] %v14747_v19  ;;  %17512 = vst [vmem:[#allocation45_spill] sm:$0xff] %v14754_v34  ;;  %v7040_v26 = vpop.f32.mrf.mxu0  ;;  %v14759_v10 = vsub.f32 %v14639_v0, %v14717_v50  ;;  %v14776_v59 = vsub.f32 %v14634_v33, %v14739_v6  ;;  %v14843_v2 = vsub.f32 %v14680_v1, %v14801_v53 }
 0x5b0   : > { %v7345_v47 = vpop.f32.mrf.mxu1  ;;  %17514 = vst [vmem:[#allocation28_spill] sm:$0xff] %v14762_v21  ;;  %v14765_v8 = vmul.f32 %v17515_v39, %v7325_v61  ;;  %v7327_v62 = vadd.f32 %v7326_v29, %v7036_v15  ;;  %17516 = vst [vmem:[#allocation34_spill] sm:$0xff] %v14769_v42  ;;  %v7041_v58 = vadd.f32 %v7040_v26, %v14473_v14  ;;  %v14788_v26 = vand.u32 4294901760, %v14652_v18 }
 0x5b1   : > { %17513 = vst [vmem:[#allocation60_spill] sm:$0xff] %v14759_v10  ;;  %v7042_v38 = vpop.f32.mrf.mxu0  ;;  %17517 = vst [vmem:[#allocation136_spill] sm:$0xff] %v14776_v59  ;;  %v14785_v14 = vsub.f32 %v14642_v22, %v14754_v34  ;;  %v14798_v22 = vand.u32 4294901760, %v14667_v55  ;;  %v14859_v1 = vsub.f32 %v14656_v4, %v14821_v3 }
 0x5b2   : > { %v7347_v57 = vpop.f32.mrf.mxu1  ;;  %v14779_v61 = vmul.f32 %v17518_v52, %v7327_v62  ;;  %v7043_v29 = vadd.f32 %v7042_v38, %v14479_v60  ;;  %17520 = vst [vmem:[#allocation38_spill] sm:$0xff] %v14788_v26  ;;  %v7332_v39 = vadd.f32 %v7331_v32, %v7041_v58  ;;  %v14793_v52 = vsub.f32 %v14646_v7, %v14762_v21  ;;  %v17525_v58 = vld [vmem:[#allocation113_spill] sm:$0xff] }
 0x5b3   : > { %17519 = vst [vmem:[#allocation69_spill] sm:$0xff] %v14785_v14  ;;  %v7047_v0 = vpop.f32.mrf.mxu0  ;;  %17522 = vst [vmem:[#allocation64_spill] sm:$0xff] %v14798_v22  ;;  %v14804_v32 = vand.u32 4294901760, %v14686_v13  ;;  %v14818_v44 = vsub.f32 %v14652_v18, %v14788_v26 }
 0x5b4   : > { %v7352_v15 = vpop.f32.mrf.mxu1  ;;  %17521 = vst [vmem:[#allocation46_spill] sm:$0xff] %v14793_v52  ;;  %v7334_v62 = vadd.f32 %v7333_v9, %v7043_v29  ;;  %v7048_v60 = vadd.f32 %v7047_v0, %v14482_v56  ;;  %17523 = vst [vmem:[#allocation138_spill] sm:$0xff] %v14801_v53  ;;  %v14807_v33 = vmul.f32 %v17525_v58, %v7332_v39  ;;  %v14810_v9 = vand.u32 4294901760, %v14714_v25  ;;  %v17527_v56 = vld [vmem:[#allocation114_spill] sm:$0xff] }
 0x5b5   : > { %17524 = vst [vmem:[#allocation29_spill] sm:$0xff] %v14804_v32  ;;  %v7049_v7 = vpop.f32.mrf.mxu0  ;;  %17528 = vst [vmem:[#allocation71_spill] sm:$0xff] %v14818_v44  ;;  %v14824_v39 = vand.u32 4294901760, %v14720_v43 }
 0x5b6   : > { %v7354_v38 = vpop.f32.mrf.mxu1  ;;  %17526 = vst [vmem:[#allocation66_spill] sm:$0xff] %v14810_v9  ;;  %v14813_v0 = vmul.f32 %v17527_v56, %v7334_v62  ;;  %v7339_v29 = vadd.f32 %v7338_v23, %v7048_v60  ;;  %v7050_v24 = vadd.f32 %v7049_v7, %v14488_v20  ;;  %v14828_v62 = vand.u32 4294901760, %v14664_v30  ;;  %v17532_v23 = vld [vmem:[#allocation115_spill] sm:$0xff]  ;;  %17534 = vst [vmem:[#allocation73_spill] sm:$0xff] %v14839_v51 }
 0x5b7   : > { %17530 = vst [vmem:[#allocation140_spill] sm:$0xff] %v14824_v39  ;;  %v7054_v58 = vpop.f32.mrf.mxu0  ;;  %v14836_v56 = vsub.f32 %v14667_v55, %v14798_v22  ;;  %17535 = vst [vmem:[#allocation72_spill] sm:$0xff] %v14843_v2  ;;  %v17538_v55 = vld [vmem:[#allocation116_spill] sm:$0xff] }
 0x5b8   : > { %v7359_v5 = vpop.f32.mrf.mxu1  ;;  %17531 = vst [vmem:[#allocation47_spill] sm:$0xff] %v14828_v62  ;;  %v14831_v60 = vmul.f32 %v17532_v23, %v7339_v29  ;;  %v7341_v20 = vadd.f32 %v7340_v40, %v7050_v24  ;;  %v7055_v7 = vadd.f32 %v7054_v58, %v14491_v35  ;;  %v14848_v24 = vsub.f32 %v14686_v13, %v14804_v32 }
 0x5b9   : > { %17533 = vst [vmem:[#allocation70_spill] sm:$0xff] %v14836_v56  ;;  %v7056_v45 = vpop.f32.mrf.mxu0  ;;  %v14852_v35 = vsub.f32 %v14714_v25, %v14810_v9  ;;  %17539 = vst [vmem:[#allocation55_spill] sm:$0xff] %v14859_v1  ;;  %v14863_v23 = vsub.f32 %v14720_v43, %v14824_v39  ;;  %v14866_v13 = vand.u32 4294901760, %v14742_v41  ;;  %v14880_v43 = vsub.f32 %v14672_v37, %v14839_v51 }
 0x5ba   : > { %v7361_v18 = vpop.f32.mrf.mxu1  ;;  %17536 = vst [vmem:[#allocation142_spill] sm:$0xff] %v14848_v24  ;;  %v7560_v40 = vmul.f32 %v17538_v55, %v7341_v20  ;;  %v7346_v29 = vadd.f32 %v7345_v47, %v7055_v7  ;;  %v7057_v27 = vadd.f32 %v7056_v45, %v14496_v31  ;;  %v14871_v20 = vsub.f32 %v14664_v30, %v14828_v62  ;;  %v17544_v7 = vld [vmem:[#allocation117_spill] sm:$0xff] }
 0x5bb   : > { %17537 = vst [vmem:[#allocation48_spill] sm:$0xff] %v14852_v35  ;;  %17540 = vst [vmem:[#allocation56_spill] sm:$0xff] %v14863_v23  ;;  %v7061_v25 = vpop.f32.mrf.mxu0  ;;  %v14874_v47 = vand.u32 4294901760, %v14765_v8 }
 0x5bc   : > { %v14855_v58 = vpop.f32.mrf.mxu1  ;;  %17541 = vst [vmem:[#allocation89_spill] sm:$0xff] %v14866_v13  ;;  %17542 = vst [vmem:[#allocation90_spill] sm:$0xff] %v14871_v20  ;;  %v7561_v4 = vmul.f32 %v17544_v7, %v7346_v29  ;;  %v7062_v55 = vadd.f32 %v7061_v25, %v14499_v12  ;;  %v7348_v46 = vadd.f32 %v7347_v57, %v7057_v27  ;;  %v17548_v27 = vld [vmem:[#allocation122_spill] sm:$0xff]  ;;  %v14909_v29 = vand.u32 4294901760, %v14831_v60 }
 0x5bd   : > { %17543 = vst [vmem:[#allocation91_spill] sm:$0xff] %v14874_v47  ;;  %17545 = vst [vmem:[#allocation92_spill] sm:$0xff] %v14880_v43  ;;  %v7063_v63 = vpop.f32.mrf.mxu0  ;;  %v14891_v25 = vsub.f32 %v14742_v41, %v14866_v13  ;;  %v14906_v41 = vand.u32 4294901760, %v14807_v33 }
 0x5be   : > { %v7368_v54 = vpop.f32.mrf.mxu1  ;;  %v7353_v30 = vadd.f32 %v7352_v15, %v7062_v55  ;;  %v7064_v19 = vadd.f32 %v7063_v63, %v14502_v11  ;;  %v14893_v37 = vand.u32 4294901760, %v7561_v4  ;;  %v7562_v57 = vmul.f32 %v17548_v27, %v7348_v46  ;;  %v17550_v63 = vld [vmem:[#allocation59_spill] sm:$0xff]  ;;  %17552 = vst [vmem:[#allocation98_spill] sm:$0xff] %v14909_v29 }
 0x5bf   : > { %17546 = vst [vmem:[#allocation93_spill] sm:$0xff] %v14891_v25  ;;  %v7068_v7 = vpop.f32.mrf.mxu0  ;;  %v14899_v11 = vsub.f32 %v14765_v8, %v14874_v47  ;;  %17551 = vst [vmem:[#allocation97_spill] sm:$0xff] %v14906_v41  ;;  %v14911_v46 = vand.u32 4294901760, %v7560_v40  ;;  %v14945_v28 = vsub.f32 %v14831_v60, %v14909_v29  ;;  %v14954_v52 = vsub.f32 %v14807_v33, %v14906_v41  ;;  %v17571_v60 = vld [vmem:[#allocation74_spill] sm:$0xff] }
 0x5c0   : > { %v14885_v42 = vpop.f32.mrf.mxu1  ;;  %17547 = vst [vmem:[#allocation95_spill] sm:$0xff] %v14893_v37  ;;  %v7563_v15 = vmul.f32 %v17550_v63, %v7353_v30  ;;  %v7355_v55 = vadd.f32 %v7354_v38, %v7064_v19  ;;  %v7069_v31 = vadd.f32 %v7068_v7, %v14505_v36  ;;  %v14913_v27 = vand.u32 4294901760, %v7562_v57 }
 0x5c1   : > { %17549 = vst [vmem:[#allocation96_spill] sm:$0xff] %v14899_v11  ;;  %17553 = vst [vmem:[#allocation99_spill] sm:$0xff] %v14911_v46  ;;  %v7070_v45 = vpop.f32.mrf.mxu0  ;;  %v14922_v7 = vand.u32 4294901760, %v14779_v61  ;;  %v14925_v63 = vand.u32 4294901760, %v14813_v0  ;;  %v14928_v17 = vsub.f32 %v7561_v4, %v14893_v37  ;;  %v14948_v4 = vsub.f32 %v7560_v40, %v14911_v46  ;;  %v17577_v40 = vld [vmem:[#allocation76_spill] sm:$0xff] }
 0x5c2   : > { %v14903_v12 = vpop.f32.mrf.mxu1  ;;  %17554 = vst [vmem:[#allocation54_spill] sm:$0xff] %v14913_v27  ;;  %v14915_v8 = vand.u32 4294901760, %v7563_v15  ;;  %v7564_v30 = vmul.f32 %v17556_v49, %v7355_v55  ;;  %v7360_v19 = vadd.f32 %v7359_v5, %v7069_v31  ;;  %v7071_v36 = vadd.f32 %v7070_v45, %v14508_v16  ;;  %v17563_v16 = vld [vmem:[#allocation40_spill] sm:$0xff]  ;;  %17565 = vst [vmem:[#allocation106_spill] sm:$0xff] %v14945_v28 }
 0x5c3   : > { %17557 = vst [vmem:[#allocation101_spill] sm:$0xff] %v14922_v7  ;;  %17558 = vst [vmem:[#allocation44_spill] sm:$0xff] %v14925_v63  ;;  %v14931_v10 = vsub.f32 %v7562_v57, %v14913_v27  ;;  %v7075_v14 = vpop.f32.mrf.mxu0 }
 0x5c4   : > { %17555 = vst [vmem:[#allocation100_spill] sm:$0xff] %v14915_v8  ;;  %v14919_v38 = vpop.f32.mrf.mxu1  ;;  %17559 = vst [vmem:[#allocation102_spill] sm:$0xff] %v14928_v17  ;;  %v14934_v49 = vsub.f32 %v7563_v15, %v14915_v8  ;;  %v14936_v5 = vand.u32 4294901760, %v7564_v30  ;;  %v14939_v31 = vmul.f32 %v17563_v16, %v7360_v19  ;;  %v7362_v45 = vadd.f32 %v7361_v18, %v7071_v36  ;;  %v17569_v19 = vld [vmem:[#allocation30_spill] sm:$0xff] }
 0x5c5   : > { %17560 = vst [vmem:[#allocation103_spill] sm:$0xff] %v14931_v10  ;;  %17566 = vst [vmem:[#allocation108_spill] sm:$0xff] %v14948_v4  ;;  %v7076_v57 = vadd.f32 %v7075_v14, %v14511_v48  ;;  %v7077_v6 = vpop.f32.mrf.mxu0  ;;  %v14968_v48 = vsub.f32 %v14813_v0, %v14925_v63 }
 0x5c6   : > { %17561 = vst [vmem:[#allocation57_spill] sm:$0xff] %v14934_v49  ;;  %17562 = vst [vmem:[#allocation104_spill] sm:$0xff] %v14936_v5  ;;  %v14941_v55 = vpop.f32.mrf.mxu1  ;;  %v14957_v18 = vsub.f32 %v7564_v30, %v14936_v5  ;;  %v14960_v36 = vmul.f32 %v17569_v19, %v7362_v45  ;;  %v7078_v16 = vadd.f32 %v7077_v6, %v17571_v60  ;;  %7611 = vmatprep.subr.mxu0 %v14936_v5  ;;  %v17574_v19 = vld [vmem:[#allocation31_spill] sm:$0xff] }
 0x5c7   : > { %17564 = vst [vmem:[#allocation105_spill] sm:$0xff] %v14939_v31  ;;  %17567 = vst [vmem:[#allocation109_spill] sm:$0xff] %v14954_v52  ;;  %v7367_v14 = vadd.f32 %v14855_v58, %v7076_v57  ;;  %v7082_v33 = vpop.f32.mrf.mxu0  ;;  %7613 = vmatpush1.msra.mxu0 %v14915_v8  ;;  %v14976_v6 = vsub.f32 %v14779_v61, %v14922_v7  ;;  %v17575_v58 = vld [vmem:[#allocation50_spill] sm:$0xff] }
 0x5c8   : > { %17568 = vst [vmem:[#allocation110_spill] sm:$0xff] %v14957_v18  ;;  %17570 = vst [vmem:[#allocation111_spill] sm:$0xff] %v14960_v36  ;;  %v14963_v31 = vpop.f32.mrf.mxu1  ;;  %v7369_v45 = vadd.f32 %v7368_v54, %v7078_v16  ;;  %v7083_v60 = vadd.f32 %v7082_v33, %v17574_v19  ;;  %7615 = vmatprep.subr.mxu0 %v14913_v27  ;;  %v17576_v16 = vld [vmem:[#allocation42_spill] sm:$0xff]  ;;  %v17579_v54 = vand.u32 4294901760, %v14957_v18 }
 0x5c9   : > { %17572 = vst [vmem:[#allocation112_spill] sm:$0xff] %v14968_v48  ;;  %17573 = vst [vmem:[#allocation113_spill] sm:$0xff] %v14976_v6  ;;  %v14984_v57 = vmul.f32 %v17575_v58, %v7367_v14  ;;  %v7084_v8 = vpop.f32.mrf.mxu0  ;;  %7617 = vmatpush1.msra.mxu0 %v14893_v37  ;;  %v17578_v14 = vand.u32 4294901760, %v14934_v49 }
 0x5ca   : > { %v14979_v15 = vpop.f32.mrf.mxu1  ;;  %v14991_v33 = vmul.f32 %v17576_v16, %v7369_v45  ;;  %v7374_v19 = vadd.f32 %v14885_v42, %v7083_v60  ;;  %v7085_v27 = vadd.f32 %v7084_v8, %v17577_v40  ;;  %7619 = vmatprep.subr.mxu0 %v14911_v46  ;;  %v7758_v45 = vsub.f32 %v14957_v18, %v17579_v54  ;;  %v17581_v16 = vld [vmem:[#allocation51_spill] sm:$0xff]  ;;  %v17582_v46 = vld [vmem:[#allocation144_spill] sm:$0xff] }
 0x5cb   : > { %v7764_v58 = vsub.f32 %v14934_v49, %v17578_v14  ;;  %v7089_v30 = vpop.f32.mrf.mxu0  ;;  %7621 = vmatpush1.msra.mxu0 %v14909_v29  ;;  %v17580_v42 = vand.u32 4294901760, %v14931_v10  ;;  %v17583_v54 = vand.u32 4294901760, %v14928_v17 }
 0x5cc   : > { %v14995_v0 = vpop.f32.mrf.mxu1  ;;  %v15011_v61 = vmul.f32 %v17581_v16, %v7374_v19  ;;  %v7376_v14 = vadd.f32 %v14903_v12, %v7085_v27  ;;  %v7090_v37 = vadd.f32 %v7089_v30, %v17582_v46  ;;  %7623 = vmatprep.subr.mxu0 %v14925_v63  ;;  %v7759_v60 = vand.u32 4294901760, %v7758_v45  ;;  %v17585_v30 = vld [vmem:[#allocation121_spill] sm:$0xff] }
 0x5cd   : > { %v7770_v8 = vsub.f32 %v14931_v10, %v17580_v42  ;;  %v7776_v5 = vsub.f32 %v14928_v17, %v17583_v54  ;;  %v15022_v42 = vld.sshfl [vmem:[%s9961_s0] sm:$0x33 pattern:$0x76325410]  ;;  %v7091_v40 = vpop.f32.mrf.mxu0  ;;  %7625 = vmatpush1.msra.mxu0 %v14906_v41  ;;  %v17584_v19 = vand.u32 4294901760, %v14948_v4  ;;  %v7765_v17 = vand.u32 4294901760, %v7764_v58 }
 0x5ce   : > { %v15015_v29 = vpop.f32.mrf.mxu1  ;;  %v15031_v16 = vmul.f32 %v17585_v30, %v7376_v14  ;;  %v7381_v63 = vadd.f32 %v14919_v38, %v7090_v37  ;;  %7627 = vmatprep.subr.mxu0 %v14922_v7  ;;  %v17586_v45 = vand.u32 4294901760, %v14945_v28  ;;  %v17587_v10 = vld [vmem:[#allocation75_spill] sm:$0xff]  ;;  %7760 = vmatprep.subr.mxu1 %v7759_v60  ;;  %v17588_v14 = vand.u32 4294901760, %v14968_v48  ;;  %v17589_v30 = vld [vmem:[#allocation61_spill] sm:$0xff]  ;;  %v17590_v7 = vld [vmem:[#allocation78_spill] sm:$0xff] }
 0x5cf   : > { %v7782_v12 = vsub.f32 %v14948_v4, %v17584_v19  ;;  %v7092_v19 = vadd.f32 %v7091_v40, %v17587_v10  ;;  %v7096_v46 = vpop.f32.mrf.mxu0  ;;  %7629 = vmatpush1.msra.mxu0 %v14874_v47  ;;  %v7771_v27 = vand.u32 4294901760, %v7770_v8  ;;  %v7607_v38 = vcombine.high %v15022_v42, %v15022_v42  ;;  %7766 = vmatpush1.msra.mxu1 %v7765_v17 }
 0x5d0   : > { %v15034_v54 = vpop.f32.mrf.mxu1  ;;  %v7788_v41 = vsub.f32 %v14945_v28, %v17586_v45  ;;  %v7794_v37 = vsub.f32 %v14968_v48, %v17588_v14  ;;  %v15048_v58 = vmul.f32 %v17589_v30, %v7381_v63  ;;  %v7097_v4 = vadd.f32 %v7096_v46, %v17590_v7  ;;  %7631 = vmatprep.subr.mxu0 %v14866_v13  ;;  %v17594_v13 = vld [vmem:[#allocation49_spill] sm:$0xff] }
 0x5d1   : > { %v7777_v10 = vand.u32 4294901760, %v7776_v5  ;;  %v17591_v8 = vand.u32 4294901760, %v14954_v52  ;;  %v7383_v60 = vadd.f32 %v14941_v55, %v7092_v19  ;;  %7772 = vmatprep.subr.mxu1 %v7771_v27  ;;  %v7098_v14 = vpop.f32.mrf.mxu0  ;;  %7633 = vmatpush1.msra.mxu0 %v14824_v39  ;;  %v7783_v63 = vand.u32 4294901760, %v7782_v12  ;;  %v17596_v19 = vld [vmem:[#allocation35_spill] sm:$0xff] }
 0x5d2   : > { %v15051_v45 = vpop.f32.mrf.mxu1  ;;  %v17592_v30 = vand.u32 4294901760, %v14976_v6  ;;  %v17593_v7 = vand.u32 4294901760, %v14863_v23  ;;  %v7388_v5 = vadd.f32 %v14963_v31, %v7097_v4  ;;  %v7099_v47 = vadd.f32 %v7098_v14, %v17594_v13  ;;  %7635 = vmatprep.subr.mxu0 %v14810_v9  ;;  %v17599_v14 = vld [vmem:[#allocation22_spill] sm:$0xff] }
 0x5d3   : > { %v7800_v40 = vsub.f32 %v14954_v52, %v17591_v8  ;;  %7778 = vmatpush1.msra.mxu1 %v7777_v10  ;;  %v7789_v55 = vand.u32 4294901760, %v7788_v41  ;;  %v17595_v12 = vand.u32 4294901760, %v14899_v11  ;;  %v7103_v39 = vpop.f32.mrf.mxu0  ;;  %7637 = vmatpush1.msra.mxu0 %v14804_v32  ;;  %v7795_v31 = vand.u32 4294901760, %v7794_v37 }
 0x5d4   : > { %v7806_v17 = vsub.f32 %v14976_v6, %v17592_v30  ;;  %v7824_v46 = vsub.f32 %v14863_v23, %v17593_v7  ;;  %v15067_v8 = vpop.f32.mrf.mxu1  ;;  %v15074_v30 = vmul.f32 %v17596_v19, %v7383_v60  ;;  %7784 = vmatprep.subr.mxu1 %v7783_v63  ;;  %v17597_v13 = vand.u32 4294901760, %v14891_v25  ;;  %7639 = vmatprep.subr.mxu0 %v14801_v53 }
 0x5d5   : > { %v7812_v27 = vsub.f32 %v14899_v11, %v17595_v12  ;;  %v15080_v10 = vand.u32 4294901760, %v7607_v38  ;;  %v15083_v41 = vmul.f32 %v17599_v14, %v7388_v5  ;;  %v7390_v7 = vadd.f32 %v14979_v15, %v7099_v47  ;;  %v17600_v12 = vld [vmem:[#allocation146_spill] sm:$0xff]  ;;  %7790 = vmatpush1.msra.mxu1 %v7789_v55  ;;  %v7105_v37 = vpop.f32.mrf.mxu0  ;;  %7641 = vmatpush1.msra.mxu0 %v14839_v51 }
 0x5d6   : > { %v7818_v4 = vsub.f32 %v14891_v25, %v17597_v13  ;;  %v7104_v9 = vadd.f32 %v7103_v39, %v17600_v12  ;;  %v15087_v60 = vpop.f32.mrf.mxu1  ;;  %v7801_v63 = vand.u32 4294901760, %v7800_v40  ;;  %7796 = vmatprep.subr.mxu1 %v7795_v31  ;;  %v7807_v19 = vand.u32 4294901760, %v7806_v17  ;;  %v17603_v39 = vld [vmem:[#allocation81_spill] sm:$0xff]  ;;  %v17604_v55 = vld [vmem:[#allocation18_spill] sm:$0xff]  ;;  %7643 = vmatprep.subr.mxu0 %v14798_v22 }
 0x5d7   : > { %17598 = vst [vmem:[#allocation114_spill] sm:$0xff] %v15080_v10  ;;  %v17601_v13 = vand.u32 4294901760, %v14852_v35  ;;  %v17602_v5 = vand.u32 4294901760, %v14848_v24  ;;  %v15098_v15 = vmul.f32 %v17603_v39, %v7390_v7  ;;  %v7106_v12 = vadd.f32 %v7105_v37, %v17604_v55  ;;  %7645 = vmatpush1.msra.mxu0 %v14828_v62  ;;  %v17608_v55 = vld [vmem:[#allocation82_spill] sm:$0xff]  ;;  %v17611_v62 = vld [vmem:[#allocation19_spill] sm:$0xff]  ;;  %v17624_v22 = vld [vmem:[#allocation69_spill] sm:$0xff]  ;;  %8140 = vmatprep.mubr.f32.mxu1 %v15080_v10 }
 0x5d8   : > { %v7395_v40 = vadd.f32 %v14995_v0, %v7104_v9  ;;  %7802 = vmatpush1.msra.mxu1 %v7801_v63  ;;  %v15103_v17 = vpop.f32.mrf.mxu1  ;;  %v7813_v31 = vand.u32 4294901760, %v7812_v27  ;;  %v17605_v47 = vand.u32 4294901760, %v14843_v2  ;;  %v15111_v9 = vsub.f32 %v7607_v38, %v15080_v10  ;;  %v17607_v0 = vld [vmem:[#allocation33_spill] sm:$0xff]  ;;  %7647 = vmatprep.subr.mxu0 %v14821_v3  ;;  %v17666_v10 = vld [vmem:[#allocation87_spill] sm:$0xff] }
 0x5d9   : > { %v7830_v32 = vsub.f32 %v14852_v35, %v17601_v13  ;;  %v7836_v14 = vsub.f32 %v14848_v24, %v17602_v5  ;;  %7808 = vmatprep.subr.mxu1 %v7807_v19  ;;  %v7110_v13 = vpop.f32.mrf.mxu0  ;;  %v7819_v5 = vand.u32 4294901760, %v7818_v4  ;;  %v7397_v63 = vadd.f32 %v15015_v29, %v7106_v12  ;;  %v17610_v12 = vld [vmem:[#allocation36_spill] sm:$0xff]  ;;  %7649 = vmatpush1.msra.mxu0 %v14788_v26  ;;  %v17622_v26 = vld [vmem:[#allocation67_spill] sm:$0xff] }
 0x5da   : > { %v7842_v7 = vsub.f32 %v14843_v2, %v17605_v47  ;;  %17606 = vst [vmem:[#allocation115_spill] sm:$0xff] %v15111_v9  ;;  %v15114_v37 = vmul.f32 %v17607_v0, %v7395_v40  ;;  %7814 = vmatpush1.msra.mxu1 %v7813_v31  ;;  %v15118_v27 = vpop.f32.mrf.mxu1  ;;  %v7825_v4 = vand.u32 4294901760, %v7824_v46  ;;  %v7111_v47 = vadd.f32 %v7110_v13, %v17608_v55 }
 0x5db   : > { %7820 = vmatprep.subr.mxu1 %v7819_v5  ;;  %v7112_v38 = vpop.f32.mrf.mxu0  ;;  %v7831_v39 = vand.u32 4294901760, %v7830_v32  ;;  %v17609_v40 = vand.u32 4294901760, %v14880_v43  ;;  %v15128_v31 = vmul.f32 %v17610_v12, %v7397_v63  ;;  %v7837_v55 = vand.u32 4294901760, %v7836_v14  ;;  %7651 = vmatprep.subr.mxu0 %v14762_v21  ;;  %v17614_v14 = vld [vmem:[#allocation84_spill] sm:$0xff] }
 0x5dc   : > { %v7113_v46 = vadd.f32 %v7112_v38, %v17611_v62  ;;  %7826 = vmatpush1.msra.mxu1 %v7825_v4  ;;  %v15132_v13 = vpop.f32.mrf.mxu1  ;;  %v17612_v5 = vand.u32 4294901760, %v14836_v56  ;;  %v7402_v19 = vadd.f32 %v15034_v54, %v7111_v47  ;;  %v7843_v63 = vand.u32 4294901760, %v7842_v7  ;;  %7653 = vmatpush1.msra.mxu0 %v14754_v34  ;;  %v17616_v47 = vld [vmem:[#allocation52_spill] sm:$0xff] }
 0x5dd   : > { %v7848_v0 = vsub.f32 %v14880_v43, %v17609_v40  ;;  %7832 = vmatprep.subr.mxu1 %v7831_v39  ;;  %v7117_v40 = vpop.f32.mrf.mxu0  ;;  %v17613_v12 = vand.u32 4294901760, %v14871_v20  ;;  %v17615_v54 = vand.u32 4294901760, %v14859_v1  ;;  %7655 = vmatprep.subr.mxu0 %v14717_v50  ;;  %v17620_v34 = vld [vmem:[#allocation24_spill] sm:$0xff]  ;;  %v17623_v50 = vld [vmem:[#allocation147_spill] sm:$0xff]  ;;  %v17625_v51 = vand.u32 4294901760, %v17624_v22 }
 0x5de   : > { %v7854_v32 = vsub.f32 %v14836_v56, %v17612_v5  ;;  %v7404_v38 = vadd.f32 %v15051_v45, %v7113_v46  ;;  %v7118_v29 = vadd.f32 %v7117_v40, %v17614_v14  ;;  %7838 = vmatpush1.msra.mxu1 %v7837_v55  ;;  %v15146_v5 = vpop.f32.mrf.mxu1  ;;  %v15153_v21 = vmul.f32 %v17616_v47, %v7402_v19  ;;  %v17621_v19 = vld [vmem:[#allocation148_spill] sm:$0xff] }
 0x5df   : > { %v7860_v62 = vsub.f32 %v14871_v20, %v17613_v12  ;;  %v7866_v39 = vsub.f32 %v14859_v1, %v17615_v54  ;;  %7844 = vmatprep.subr.mxu1 %v7843_v63  ;;  %v7119_v45 = vpop.f32.mrf.mxu0  ;;  %v7849_v46 = vand.u32 4294901760, %v7848_v0  ;;  %v17617_v40 = vand.u32 4294901760, %v14818_v44  ;;  %v17618_v12 = vld [vmem:[#allocation46_spill] sm:$0xff]  ;;  %7657 = vmatpush1.msra.mxu0 %v17622_v26  ;;  %v17646_v20 = vld [vmem:[#allocation135_spill] sm:$0xff] }
 0x5e0   : > { %v17619_v14 = vand.u32 4294901760, %v17618_v12  ;;  %v15163_v54 = vmul.f32 %v17620_v34, %v7404_v38  ;;  %v7409_v7 = vadd.f32 %v15067_v8, %v7118_v29  ;;  %v7120_v47 = vadd.f32 %v7119_v45, %v17621_v19  ;;  %v15168_v63 = vpop.f32.mrf.mxu1  ;;  %7659 = vmatprep.subr.mxu0 %v17623_v50  ;;  %v17626_v34 = vld [vmem:[#allocation60_spill] sm:$0xff]  ;;  %v17629_v19 = vld [vmem:[#allocation83_spill] sm:$0xff] }
 0x5e1   : > { %v7872_v55 = vsub.f32 %v14818_v44, %v17617_v40  ;;  %v7855_v0 = vand.u32 4294901760, %v7854_v32  ;;  %7850 = vmatpush1.msra.mxu1 %v7849_v46  ;;  %v7124_v40 = vpop.f32.mrf.mxu0  ;;  %v7861_v3 = vand.u32 4294901760, %v7860_v62  ;;  %v17627_v38 = vand.u32 4294901760, %v17626_v34  ;;  %v17630_v46 = vld [vmem:[#allocation20_spill] sm:$0xff]  ;;  %v17631_v50 = vld [vmem:[#allocation139_spill] sm:$0xff] }
 0x5e2   : > { %v7878_v4 = vsub.f32 %v17618_v12, %v17619_v14  ;;  %v7884_v14 = vsub.f32 %v17624_v22, %v17625_v51  ;;  %v17628_v29 = vand.u32 4294901760, %v15111_v9  ;;  %v15181_v26 = vmul.f32 %v17629_v19, %v7409_v7  ;;  %7661 = vmatpush1.msra.mxu0 %v17631_v50  ;;  %v15186_v53 = vpop.f32.mrf.mxu1  ;;  %v17632_v22 = vld [vmem:[#allocation137_spill] sm:$0xff]  ;;  %v17634_v19 = vld [vmem:[#allocation34_spill] sm:$0xff] }
 0x5e3   : > { %v7890_v8 = vsub.f32 %v17626_v34, %v17627_v38  ;;  %v7411_v32 = vadd.f32 %v15087_v60, %v7120_v47  ;;  %7856 = vmatprep.subr.mxu1 %v7855_v0  ;;  %v7125_v62 = vadd.f32 %v7124_v40, %v17630_v46  ;;  %v7867_v51 = vand.u32 4294901760, %v7866_v39  ;;  %7663 = vmatprep.subr.mxu0 %v17632_v22  ;;  %v7126_v38 = vpop.f32.mrf.mxu0  ;;  %v17635_v60 = vld [vmem:[#allocation43_spill] sm:$0xff]  ;;  %v17636_v0 = vld [vmem:[#allocation124_spill] sm:$0xff] }
 0x5e4   : > { %v7741_v45 = vsub.f32 %v15111_v9, %v17628_v29  ;;  %7862 = vmatpush1.msra.mxu1 %v7861_v3  ;;  %v7873_v34 = vand.u32 4294901760, %v7872_v55  ;;  %v17633_v29 = vand.u32 4294901760, %v14776_v59  ;;  %v17637_v39 = vld [vmem:[#allocation132_spill] sm:$0xff]  ;;  %v15199_v3 = vpop.f32.mrf.mxu1  ;;  %v7879_v22 = vand.u32 4294901760, %v7878_v4  ;;  %v17638_v55 = vld [vmem:[#allocation134_spill] sm:$0xff]  ;;  %v17641_v9 = vld [vmem:[#allocation145_spill] sm:$0xff] }
 0x5e5   : > { %v15195_v40 = vmul.f32 %v17636_v0, %v7411_v32  ;;  %v7416_v46 = vadd.f32 %v15103_v17, %v7125_v62  ;;  %7868 = vmatprep.subr.mxu1 %v7867_v51  ;;  %7665 = vmatpush1.msra.mxu0 %v17637_v39  ;;  %v17639_v50 = vand.u32 4294901760, %v17638_v55  ;;  %v7131_v47 = vpop.f32.mrf.mxu0  ;;  %v7885_v32 = vand.u32 4294901760, %v7884_v14  ;;  %v17642_v0 = vld [vmem:[#allocation58_spill] sm:$0xff]  ;;  %v17645_v4 = vld [vmem:[#allocation17_spill] sm:$0xff] }
 0x5e6   : > { %v7896_v7 = vsub.f32 %v14776_v59, %v17633_v29  ;;  %v17640_v29 = vld [vmem:[#allocation86_spill] sm:$0xff]  ;;  %7874 = vmatpush1.msra.mxu1 %v7873_v34  ;;  %7667 = vmatprep.subr.mxu0 %v17641_v9  ;;  %v17643_v44 = vand.u32 4294901760, %v17642_v0  ;;  %v7742_v62 = vand.u32 4294901760, %v7741_v45  ;;  %v7132_v1 = vadd.f32 %v7131_v47, %v17645_v4  ;;  %v17647_v34 = vld [vmem:[#allocation27_spill] sm:$0xff]  ;;  %v17651_v47 = vld [vmem:[#allocation141_spill] sm:$0xff] }
 0x5e7   : > { %v7902_v12 = vsub.f32 %v17638_v55, %v17639_v50  ;;  %v7127_v59 = vadd.f32 %v7126_v38, %v17640_v29  ;;  %v17644_v51 = vld [vmem:[#allocation62_spill] sm:$0xff]  ;;  %7880 = vmatprep.subr.mxu1 %v7879_v22  ;;  %7669 = vmatpush1.msra.mxu0 %v17646_v20  ;;  %v7438_v50 = vpop.f32.mrf.mxu1  ;;  %v7891_v38 = vand.u32 4294901760, %v7890_v8  ;;  %v17648_v29 = vand.u32 4294901760, %v17647_v34  ;;  %v17649_v55 = vld [vmem:[#allocation133_spill] sm:$0xff]  ;;  %v17652_v8 = vld [vmem:[#allocation80_spill] sm:$0xff] }
 0x5e8   : > { %v7908_v17 = vsub.f32 %v17642_v0, %v17643_v44  ;;  %v15210_v39 = vmul.f32 %v17644_v51, %v7416_v46  ;;  %7886 = vmatpush1.msra.mxu1 %v7885_v32  ;;  %7671 = vmatprep.subr.mxu0 %v17649_v55  ;;  %v7133_v44 = vpop.f32.mrf.mxu0  ;;  %v7897_v45 = vand.u32 4294901760, %v7896_v7  ;;  %v17650_v46 = vand.u32 4294901760, %v17634_v19  ;;  %v17653_v0 = vld [vmem:[#allocation131_spill] sm:$0xff]  ;;  %v17655_v7 = vld [vmem:[#allocation53_spill] sm:$0xff]  ;;  %v17656_v51 = vld [vmem:[#allocation150_spill] sm:$0xff] }
 0x5e9   : > { %v7914_v9 = vsub.f32 %v17647_v34, %v17648_v29  ;;  %v7418_v14 = vadd.f32 %v15118_v27, %v7127_v59  ;;  %v7423_v4 = vadd.f32 %v15132_v13, %v7132_v1  ;;  %7892 = vmatprep.subr.mxu1 %v7891_v38  ;;  %v7134_v20 = vadd.f32 %v7133_v44, %v17652_v8  ;;  %v7443_v29 = vpop.f32.mrf.mxu1  ;;  %v17658_v13 = vld [vmem:[#allocation143_spill] sm:$0xff] }
 0x5ea   : > { %v7920_v22 = vsub.f32 %v17634_v19, %v17650_v46  ;;  %7673 = vmatpush1.msra.mxu0 %v17653_v0  ;;  %v7903_v59 = vand.u32 4294901760, %v7902_v12  ;;  %v17654_v27 = vand.u32 4294901760, %v17635_v60  ;;  %7898 = vmatpush1.msra.mxu1 %v7897_v45  ;;  %v7138_v46 = vpop.f32.mrf.mxu0  ;;  %v7909_v19 = vand.u32 4294901760, %v7908_v17  ;;  %v17660_v12 = vld [vmem:[#allocation21_spill] sm:$0xff] }
 0x5eb   : > { %v15230_v55 = vmul.f32 %v17655_v7, %v7418_v14  ;;  %v17657_v34 = vand.u32 4294901760, %v17656_v51  ;;  %v17659_v38 = vand.u32 4294901760, %v17658_v13  ;;  %7743 = vmatprep.mubr.f32.mxu0 %v7742_v62  ;;  %v15239_v8 = vmul.f32 %v17660_v12, %v7423_v4  ;;  %v17661_v14 = vld [vmem:[#allocation32_spill] sm:$0xff]  ;;  %v7445_v45 = vpop.f32.mrf.mxu1  ;;  %v17663_v62 = vld [vmem:[#allocation39_spill] sm:$0xff] }
 0x5ec   : > { %v7926_v32 = vsub.f32 %v17635_v60, %v17654_v27  ;;  %v7425_v27 = vadd.f32 %v15146_v5, %v7134_v20  ;;  %7904 = vmatprep.subr.mxu1 %v7903_v59  ;;  %v7139_v7 = vadd.f32 %v7138_v46, %v17661_v14  ;;  %v7915_v0 = vand.u32 4294901760, %v7914_v9  ;;  %v7140_v17 = vpop.f32.mrf.mxu0  ;;  %v17664_v20 = vld [vmem:[#allocation77_spill] sm:$0xff] }
 0x5ed   : > { %v7932_v1 = vsub.f32 %v17656_v51, %v17657_v34  ;;  %v7938_v44 = vsub.f32 %v17658_v13, %v17659_v38  ;;  %7910 = vmatpush1.msra.mxu1 %v7909_v19  ;;  %v7921_v60 = vand.u32 4294901760, %v7920_v22  ;;  %v17662_v34 = vand.u32 4294901760, %v17651_v47  ;;  %v7450_v9 = vpop.f32.mrf.mxu1  ;;  %v17665_v22 = vld [vmem:[#allocation126_spill] sm:$0xff] }
 0x5ee   : > { %v15248_v38 = vmul.f32 %v17663_v62, %v7425_v27  ;;  %v7430_v4 = vadd.f32 %v15168_v63, %v7139_v7  ;;  %7916 = vmatprep.subr.mxu1 %v7915_v0  ;;  %v7141_v5 = vadd.f32 %v7140_v17, %v17664_v20  ;;  %v7927_v59 = vand.u32 4294901760, %v7926_v32  ;;  %v7145_v19 = vpop.f32.mrf.mxu0  ;;  %v17667_v0 = vld [vmem:[#allocation23_spill] sm:$0xff] }
 0x5ef   : > { %v7944_v51 = vsub.f32 %v17651_v47, %v17662_v34  ;;  %7922 = vmatpush1.msra.mxu1 %v7921_v60  ;;  %v7933_v46 = vand.u32 4294901760, %v7932_v1  ;;  %v7939_v34 = vand.u32 4294901760, %v7938_v44  ;;  %v7146_v27 = vadd.f32 %v7145_v19, %v17666_v10  ;;  %v17668_v60 = vld [vmem:[#allocation94_spill] sm:$0xff]  ;;  %v7452_v17 = vpop.f32.mrf.mxu1  ;;  %v17670_v44 = vld [vmem:[#allocation85_spill] sm:$0xff]  ;;  %v17671_v19 = vld [vmem:[#allocation63_spill] sm:$0xff] }
 0x5f0   : > { %v15253_v12 = vmul.f32 %v17665_v22, %v7430_v4  ;;  %v7432_v14 = vadd.f32 %v15186_v53, %v7141_v5  ;;  %7928 = vmatprep.subr.mxu1 %v7927_v59  ;;  %v7147_v62 = vpop.f32.mrf.mxu0  ;;  %v17669_v53 = vld [vmem:[#allocation107_spill] sm:$0xff]  ;;  %v17672_v22 = vld [vmem:[#allocation118_spill] sm:$0xff]  ;;  %v15327_v56 = vand.u32 4294901760, %v15098_v15  ;;  %v15379_v48 = vand.u32 4294901760, %v15195_v40 }
 0x5f1   : > { %7934 = vmatpush1.msra.mxu1 %v7933_v46  ;;  %v7945_v63 = vand.u32 4294901760, %v7944_v51  ;;  %v7148_v32 = vadd.f32 %v7147_v62, %v17668_v60  ;;  %v7437_v1 = vadd.f32 %v15199_v3, %v7146_v27  ;;  %v17680_v47 = vld [vmem:[#allocation79_spill] sm:$0xff] }
 0x5f2   : > { %v15258_v7 = vmul.f32 %v17667_v0, %v7432_v14  ;;  %7940 = vmatprep.subr.mxu1 %v7939_v34  ;;  %v7152_v4 = vpop.f32.mrf.mxu0  ;;  %v7457_v34 = vpop.f32.mrf.mxu1  ;;  %v17673_v0 = vld [vmem:[#allocation88_spill] sm:$0xff]  ;;  %17698 = vst [vmem:[#allocation51_spill] sm:$0xff] %v15327_v56 }
 0x5f3   : > { %7946 = vmatpush1.msra.mxu1 %v7945_v63  ;;  %v7439_v20 = vadd.f32 %v7438_v50, %v7148_v32  ;;  %v7153_v5 = vadd.f32 %v7152_v4, %v17669_v53  ;;  %v15264_v59 = vmul.f32 %v17670_v44, %v7437_v1  ;;  %v17674_v63 = vld [vmem:[#allocation120_spill] sm:$0xff]  ;;  %v17676_v53 = vld [vmem:[#allocation105_spill] sm:$0xff] }
 0x5f4   : > { %v7154_v10 = vpop.f32.mrf.mxu0  ;;  %v17675_v32 = vld [vmem:[#allocation128_spill] sm:$0xff]  ;;  %v15276_v44 = vand.u32 4294901760, %v17676_v53  ;;  %v15382_v28 = vand.u32 4294901760, %v15258_v7 }
 0x5f5   : > { %v15267_v51 = vmul.f32 %v17671_v19, %v7439_v20  ;;  %v7444_v46 = vadd.f32 %v7443_v29, %v7153_v5  ;;  %v7155_v14 = vadd.f32 %v7154_v10, %v17672_v22  ;;  %v7459_v20 = vpop.f32.mrf.mxu1  ;;  %v17678_v19 = vld [vmem:[#allocation123_spill] sm:$0xff]  ;;  %v17679_v10 = vld [vmem:[#allocation25_spill] sm:$0xff] }
 0x5f6   : > { %v7159_v62 = vpop.f32.mrf.mxu0  ;;  %17677 = vst [vmem:[#allocation116_spill] sm:$0xff] %v15276_v44  ;;  %v15435_v18 = vsub.f32 %v15258_v7, %v15382_v28 }
 0x5f7   : > { %v15271_v3 = vmul.f32 %v17673_v0, %v7444_v46  ;;  %v7446_v27 = vadd.f32 %v7445_v45, %v7155_v14  ;;  %v7160_v50 = vadd.f32 %v7159_v62, %v17674_v63  ;;  %v15282_v46 = vand.u32 4294901760, %v15011_v61  ;;  %v17683_v0 = vld [vmem:[#allocation125_spill] sm:$0xff] }
 0x5f8   : > { %v7161_v60 = vpop.f32.mrf.mxu0  ;;  %v15285_v62 = vand.u32 4294901760, %v15022_v42  ;;  %v15290_v63 = vsub.f32 %v17676_v53, %v15276_v44  ;;  %v15368_v52 = vand.u32 4294901760, %v15267_v51  ;;  %17724 = vst [vmem:[#allocation86_spill] sm:$0xff] %v15435_v18 }
 0x5f9   : > { %v7590_v4 = vmul.f32 %v17675_v32, %v7446_v27  ;;  %v7451_v1 = vadd.f32 %v7450_v9, %v7160_v50  ;;  %v7162_v29 = vadd.f32 %v7161_v60, %v17678_v19  ;;  %17681 = vst [vmem:[#allocation117_spill] sm:$0xff] %v15282_v46  ;;  %v15293_v50 = vand.u32 4294901760, %v14960_v36  ;;  %v7464_v60 = vpop.f32.mrf.mxu1  ;;  %v17688_v19 = vld [vmem:[#allocation26_spill] sm:$0xff] }
 0x5fa   : > { %v7166_v5 = vpop.f32.mrf.mxu0  ;;  %17682 = vst [vmem:[#allocation122_spill] sm:$0xff] %v15285_v62  ;;  %17684 = vst [vmem:[#allocation59_spill] sm:$0xff] %v15290_v63  ;;  %v15306_v53 = vsub.f32 %v15011_v61, %v15282_v46  ;;  %v15324_v61 = vand.u32 4294901760, %v15083_v41  ;;  %v15400_v63 = vand.u32 4294901760, %v15230_v55  ;;  %v15403_v46 = vand.u32 4294901760, %v15253_v12 }
 0x5fb   : > { %v7591_v22 = vmul.f32 %v17679_v10, %v7451_v1  ;;  %v7167_v13 = vadd.f32 %v7166_v5, %v17680_v47  ;;  %v7453_v45 = vadd.f32 %v7452_v17, %v7162_v29  ;;  %17685 = vst [vmem:[#allocation119_spill] sm:$0xff] %v15293_v50  ;;  %v17686_v47 = vld [vmem:[#allocation37_spill] sm:$0xff]  ;;  %v15297_v17 = vand.u32 4294901760, %v14984_v57  ;;  %v7466_v43 = vpop.f32.mrf.mxu1 }
 0x5fc   : > { %v7168_v14 = vpop.f32.mrf.mxu0  ;;  %v15302_v10 = vand.u32 4294901760, %v14991_v33  ;;  %17691 = vst [vmem:[#allocation74_spill] sm:$0xff] %v15306_v53  ;;  %17697 = vst [vmem:[#allocation76_spill] sm:$0xff] %v15324_v61  ;;  %v15347_v23 = vand.u32 4294901760, %v7590_v4  ;;  %v15416_v44 = vsub.f32 %v15267_v51, %v15368_v52  ;;  %v15450_v53 = vsub.f32 %v15253_v12, %v15403_v46 }
 0x5fd   : > { %v7458_v9 = vadd.f32 %v7457_v34, %v7167_v13  ;;  %v7169_v27 = vadd.f32 %v7168_v14, %v17683_v0  ;;  %v7592_v32 = vmul.f32 %v17686_v47, %v7453_v45  ;;  %17687 = vst [vmem:[#allocation40_spill] sm:$0xff] %v15297_v17  ;;  %v17689_v13 = vld [vmem:[#allocation127_spill] sm:$0xff]  ;;  %v15309_v14 = vand.u32 4294901760, %v15031_v16 }
 0x5fe   : > { %v7173_v1 = vpop.f32.mrf.mxu0  ;;  %17690 = vst [vmem:[#allocation30_spill] sm:$0xff] %v15302_v10  ;;  %v15313_v0 = vsub.f32 %v15022_v42, %v15285_v62  ;;  %v15345_v35 = vand.u32 4294901760, %v7591_v22  ;;  %17707 = vst [vmem:[#allocation22_spill] sm:$0xff] %v15347_v23  ;;  %v15362_v62 = vand.u32 4294901760, %v15271_v3 }
 0x5ff   : > { %v7593_v29 = vmul.f32 %v17688_v19, %v7458_v9  ;;  %v7460_v5 = vadd.f32 %v7459_v20, %v7169_v27  ;;  %v7174_v34 = vadd.f32 %v7173_v1, %v17689_v13  ;;  %17692 = vst [vmem:[#allocation31_spill] sm:$0xff] %v15309_v14  ;;  %v15316_v9 = vand.u32 4294901760, %v15048_v58  ;;  %v17694_v20 = vld [vmem:[#allocation41_spill] sm:$0xff]  ;;  %17721 = vst [vmem:[#allocation20_spill] sm:$0xff] %v15416_v44 }
 0x600   : > { %v7175_v45 = vpop.f32.mrf.mxu0  ;;  %v17695_v1 = vld [vmem:[#allocation129_spill] sm:$0xff]  ;;  %v15321_v13 = vand.u32 4294901760, %v15074_v30  ;;  %v15331_v2 = vand.u32 4294901760, %v7592_v32  ;;  %17706 = vst [vmem:[#allocation35_spill] sm:$0xff] %v15345_v35  ;;  %17712 = vst [vmem:[#allocation33_spill] sm:$0xff] %v15362_v62  ;;  %v15388_v49 = vsub.f32 %v7591_v22, %v15345_v35  ;;  %v15407_v22 = vsub.f32 %v15271_v3, %v15362_v62 }
 0x601   : > { %17693 = vst [vmem:[#allocation50_spill] sm:$0xff] %v15316_v9  ;;  %v7594_v27 = vmul.f32 %v17694_v20, %v7460_v5  ;;  %v7465_v47 = vadd.f32 %v7464_v60, %v7174_v34  ;;  %v7176_v19 = vadd.f32 %v7175_v45, %v17695_v1  ;;  %v15329_v42 = vand.u32 4294901760, %v7593_v29  ;;  %v17702_v5 = vld [vmem:[#allocation130_spill] sm:$0xff] }
 0x602   : > { %17696 = vst [vmem:[#allocation42_spill] sm:$0xff] %v15321_v13  ;;  %17700 = vst [vmem:[#allocation121_spill] sm:$0xff] %v15331_v2  ;;  %v15337_v45 = vand.u32 4294901760, %v15114_v37  ;;  %v15340_v20 = vand.u32 4294901760, %v15128_v31  ;;  %v15343_v1 = vand.u32 4294901760, %v15153_v21  ;;  %v15422_v3 = vand.u32 4294901760, %v15239_v8 }
 0x603   : > { %17699 = vst [vmem:[#allocation144_spill] sm:$0xff] %v15329_v42  ;;  %v15333_v24 = vand.u32 4294901760, %v7594_v27  ;;  %v7595_v60 = vmul.f32 %v17702_v5, %v7465_v47  ;;  %v7467_v34 = vadd.f32 %v7466_v43, %v7176_v19  ;;  %v17710_v47 = vld [vmem:[#allocation65_spill] sm:$0xff]  ;;  %v15356_v19 = vand.u32 4294901760, %v15163_v54  ;;  %17717 = vst [vmem:[#allocation52_spill] sm:$0xff] %v15388_v49 }
 0x604   : > { %17703 = vst [vmem:[#allocation61_spill] sm:$0xff] %v15337_v45  ;;  %17704 = vst [vmem:[#allocation78_spill] sm:$0xff] %v15340_v20  ;;  %v15359_v5 = vand.u32 4294901760, %v15181_v26  ;;  %v15365_v6 = vsub.f32 %v7593_v29, %v15329_v42  ;;  %v15385_v29 = vand.u32 4294901760, %v15264_v59 }
 0x605   : > { %17701 = vst [vmem:[#allocation75_spill] sm:$0xff] %v15333_v24  ;;  %17705 = vst [vmem:[#allocation49_spill] sm:$0xff] %v15343_v1  ;;  %v15350_v25 = vsub.f32 %v7594_v27, %v15333_v24  ;;  %v15352_v11 = vand.u32 4294901760, %v7595_v60  ;;  %v7596_v43 = vmul.f32 %v17710_v47, %v7467_v34  ;;  %v15371_v27 = vsub.f32 %v7592_v32, %v15331_v2 }
 0x606   : > { %17711 = vst [vmem:[#allocation18_spill] sm:$0xff] %v15356_v19  ;;  %17713 = vst [vmem:[#allocation82_spill] sm:$0xff] %v15365_v6  ;;  %v15391_v32 = vsub.f32 %v7590_v4, %v15347_v23  ;;  %v17727_v7 = vand.u32 4294901760, %v15365_v6 }
 0x607   : > { %17708 = vst [vmem:[#allocation146_spill] sm:$0xff] %v15350_v25  ;;  %17709 = vst [vmem:[#allocation81_spill] sm:$0xff] %v15352_v11  ;;  %v15374_v34 = vsub.f32 %v7595_v60, %v15352_v11  ;;  %v15376_v47 = vand.u32 4294901760, %v7596_v43 }
 0x608   : > { %17714 = vst [vmem:[#allocation36_spill] sm:$0xff] %v15371_v27  ;;  %17718 = vst [vmem:[#allocation24_spill] sm:$0xff] %v15391_v32 }
 0x609   : > { %17715 = vst [vmem:[#allocation19_spill] sm:$0xff] %v15374_v34  ;;  %17716 = vst [vmem:[#allocation84_spill] sm:$0xff] %v15376_v47  ;;  %v15394_v60 = vsub.f32 %v7596_v43, %v15376_v47  ;;  %7675 = vmatprep.subr.mxu0 %v15376_v47  ;;  %v15412_v43 = vand.u32 4294901760, %v15248_v38  ;;  %v17723_v4 = vand.u32 4294901760, %v15374_v34 }
 0x60a   : > { %17720 = vst [vmem:[#allocation83_spill] sm:$0xff] %v15407_v22  ;;  %7677 = vmatpush2.msra.mxu0 %v15352_v11  ;;  %v15426_v11 = vsub.f32 %v15264_v59, %v15385_v29  ;;  %v17726_v59 = vand.u32 4294901760, %v15350_v25 }
 0x60b   : > { %17719 = vst [vmem:[#allocation148_spill] sm:$0xff] %v15394_v60  ;;  %7679 = vmatprep.subr.mxu0 %v15333_v24  ;;  %v7956_v51 = vsub.f32 %v15374_v34, %v17723_v4  ;;  %v17725_v47 = vand.u32 4294901760, %v15394_v60  ;;  %v15446_v4 = vand.u32 4294901760, %v15210_v39 }
 0x60c   : > { %17722 = vst [vmem:[#allocation124_spill] sm:$0xff] %v15426_v11  ;;  %7681 = vmatpush2.msra.mxu0 %v15329_v42  ;;  %v7962_v42 = vsub.f32 %v15350_v25, %v17726_v59  ;;  %v15459_v59 = vsub.f32 %v15248_v38, %v15412_v43  ;;  %v17728_v25 = vand.u32 4294901760, %v15371_v27 }
 0x60d   : > { %7683 = vmatprep.subr.mxu0 %v15331_v2  ;;  %v7950_v24 = vsub.f32 %v15394_v60, %v17725_v47  ;;  %v7968_v2 = vsub.f32 %v15365_v6, %v17727_v7  ;;  %v7957_v7 = vand.u32 4294901760, %v7956_v51  ;;  %v17729_v47 = vand.u32 4294901760, %v15388_v49 }
 0x60e   : > { %7685 = vmatpush2.msra.mxu0 %v15345_v35  ;;  %v7974_v12 = vsub.f32 %v15371_v27, %v17728_v25  ;;  %v15468_v35 = vsub.f32 %v15239_v8, %v15422_v3  ;;  %v7963_v25 = vand.u32 4294901760, %v7962_v42  ;;  %v17730_v8 = vand.u32 4294901760, %v15391_v32 }
 0x60f   : > { %7687 = vmatprep.subr.mxu0 %v15347_v23  ;;  %v7951_v36 = vand.u32 4294901760, %v7950_v24  ;;  %v7980_v38 = vsub.f32 %v15388_v49, %v17729_v47  ;;  %v15477_v24 = vsub.f32 %v15230_v55, %v15400_v63  ;;  %v7969_v47 = vand.u32 4294901760, %v7968_v2 }
 0x610   : > { %7689 = vmatpush2.msra.mxu0 %v15362_v62  ;;  %v7986_v34 = vsub.f32 %v15391_v32, %v17730_v8  ;;  %v15486_v62 = vsub.f32 %v15210_v39, %v15446_v4  ;;  %v17731_v55 = vand.u32 4294901760, %v15407_v22  ;;  %v15495_v42 = vsub.f32 %v15195_v40, %v15379_v48 }
 0x611   : > { %7691 = vmatprep.subr.mxu0 %v15368_v52  ;;  %7952 = vmatprep.subr.mxu1 %v7951_v36  ;;  %v7975_v8 = vand.u32 4294901760, %v7974_v12  ;;  %v17732_v39 = vand.u32 4294901760, %v15416_v44  ;;  %v17733_v40 = vand.u32 4294901760, %v15426_v11 }
 0x612   : > { %7693 = vmatpush2.msra.mxu0 %v15385_v29  ;;  %7958 = vmatpush2.msra.mxu1 %v7957_v7  ;;  %v7992_v23 = vsub.f32 %v15407_v22, %v17731_v55  ;;  %v15504_v7 = vsub.f32 %v15181_v26, %v15359_v5  ;;  %v7981_v55 = vand.u32 4294901760, %v7980_v38  ;;  %v17734_v26 = vand.u32 4294901760, %v15435_v18 }
 0x613   : > { %7695 = vmatprep.subr.mxu0 %v15382_v28  ;;  %7964 = vmatprep.subr.mxu1 %v7963_v25  ;;  %v7998_v51 = vsub.f32 %v15416_v44, %v17732_v39  ;;  %v8004_v36 = vsub.f32 %v15426_v11, %v17733_v40  ;;  %v15513_v25 = vsub.f32 %v15163_v54, %v15356_v19  ;;  %v7987_v39 = vand.u32 4294901760, %v7986_v34 }
 0x614   : > { %7697 = vmatpush2.msra.mxu0 %v15403_v46  ;;  %7970 = vmatpush2.msra.mxu1 %v7969_v47  ;;  %v8010_v2 = vsub.f32 %v15435_v18, %v17734_v26  ;;  %v15522_v47 = vsub.f32 %v15153_v21, %v15343_v1  ;;  %v7993_v40 = vand.u32 4294901760, %v7992_v23  ;;  %v17735_v54 = vand.u32 4294901760, %v15450_v53 }
 0x615   : > { %7699 = vmatprep.subr.mxu0 %v15412_v43  ;;  %7976 = vmatprep.subr.mxu1 %v7975_v8  ;;  %v15531_v8 = vsub.f32 %v15128_v31, %v15340_v20  ;;  %v7999_v26 = vand.u32 4294901760, %v7998_v51  ;;  %v17736_v21 = vand.u32 4294901760, %v15459_v59  ;;  %v17737_v31 = vand.u32 4294901760, %v15468_v35 }
 0x616   : > { %7701 = vmatpush2.msra.mxu0 %v15422_v3  ;;  %7982 = vmatpush2.msra.mxu1 %v7981_v55  ;;  %v8016_v12 = vsub.f32 %v15450_v53, %v17735_v54  ;;  %v15540_v55 = vsub.f32 %v15114_v37, %v15337_v45  ;;  %v8005_v54 = vand.u32 4294901760, %v8004_v36  ;;  %v17738_v37 = vand.u32 4294901760, %v15477_v24 }
 0x617   : > { %7703 = vmatprep.subr.mxu0 %v15400_v63  ;;  %7988 = vmatprep.subr.mxu1 %v7987_v39  ;;  %v8022_v38 = vsub.f32 %v15459_v59, %v17736_v21  ;;  %v8028_v34 = vsub.f32 %v15468_v35, %v17737_v31  ;;  %v15549_v39 = vsub.f32 %v15098_v15, %v15327_v56  ;;  %v8011_v21 = vand.u32 4294901760, %v8010_v2 }
 0x618   : > { %7705 = vmatpush2.msra.mxu0 %v15446_v4  ;;  %7994 = vmatpush2.msra.mxu1 %v7993_v40  ;;  %v8034_v23 = vsub.f32 %v15477_v24, %v17738_v37  ;;  %v15558_v40 = vsub.f32 %v15083_v41, %v15324_v61  ;;  %v8017_v31 = vand.u32 4294901760, %v8016_v12  ;;  %v17740_v15 = vand.u32 4294901760, %v15486_v62 }
 0x619   : > { %7707 = vmatprep.subr.mxu0 %v15379_v48  ;;  %8000 = vmatprep.subr.mxu1 %v7999_v26  ;;  %v15567_v26 = vsub.f32 %v15074_v30, %v15321_v13  ;;  %v8023_v37 = vand.u32 4294901760, %v8022_v38  ;;  %v17741_v41 = vand.u32 4294901760, %v15495_v42  ;;  %v17742_v30 = vand.u32 4294901760, %v15504_v7 }
 0x61a   : > { %17739 = vst [vmem:[#allocation62_spill] sm:$0xff] %v15558_v40  ;;  %7709 = vmatpush2.msra.mxu0 %v15359_v5  ;;  %8006 = vmatpush2.msra.mxu1 %v8005_v54  ;;  %v8040_v51 = vsub.f32 %v15486_v62, %v17740_v15  ;;  %v15576_v54 = vsub.f32 %v15048_v58, %v15316_v9  ;;  %v8029_v15 = vand.u32 4294901760, %v8028_v34  ;;  %v17744_v58 = vand.u32 4294901760, %v15513_v25 }
 0x61b   : > { %7711 = vmatprep.subr.mxu0 %v15356_v19  ;;  %8012 = vmatprep.subr.mxu1 %v8011_v21  ;;  %v8046_v36 = vsub.f32 %v15495_v42, %v17741_v41  ;;  %v8052_v2 = vsub.f32 %v15504_v7, %v17742_v30  ;;  %v15585_v21 = vsub.f32 %v15031_v16, %v15309_v14  ;;  %v8035_v41 = vand.u32 4294901760, %v8034_v23 }
 0x61c   : > { %7713 = vmatpush2.msra.mxu0 %v15343_v1  ;;  %8018 = vmatpush2.msra.mxu1 %v8017_v31  ;;  %v8058_v12 = vsub.f32 %v15513_v25, %v17744_v58  ;;  %v8041_v31 = vand.u32 4294901760, %v8040_v51  ;;  %v17745_v30 = vand.u32 4294901760, %v15522_v47  ;;  %v15600_v23 = vsub.f32 %v14991_v33, %v15302_v10 }
 0x61d   : > { %17743 = vst [vmem:[#allocation17_spill] sm:$0xff] %v15585_v21  ;;  %7715 = vmatprep.subr.mxu0 %v15340_v20  ;;  %8024 = vmatprep.subr.mxu1 %v8023_v37  ;;  %v8047_v37 = vand.u32 4294901760, %v8046_v36  ;;  %v17746_v58 = vand.u32 4294901760, %v15531_v8  ;;  %v8053_v20 = vand.u32 4294901760, %v8052_v2  ;;  %v17748_v33 = vand.u32 4294901760, %v15540_v55 }
 0x61e   : > { %7717 = vmatpush2.msra.mxu0 %v15337_v45  ;;  %8030 = vmatpush2.msra.mxu1 %v8029_v15  ;;  %v8064_v38 = vsub.f32 %v15522_v47, %v17745_v30  ;;  %v15609_v30 = vsub.f32 %v14984_v57, %v15297_v17  ;;  %v17751_v57 = vand.u32 4294901760, %v15549_v39  ;;  %v17755_v2 = vand.u32 4294901760, %v15567_v26 }
 0x61f   : > { %7719 = vmatprep.subr.mxu0 %v15327_v56  ;;  %8036 = vmatprep.subr.mxu1 %v8035_v41  ;;  %v8070_v51 = vsub.f32 %v15531_v8, %v17746_v58  ;;  %v8076_v16 = vsub.f32 %v15540_v55, %v17748_v33  ;;  %v17749_v41 = vld [vmem:[#allocation111_spill] sm:$0xff]  ;;  %v8059_v58 = vand.u32 4294901760, %v8058_v12  ;;  %v17752_v33 = vand.u32 4294901760, %v15558_v40 }
 0x620   : > { %17747 = vst [vmem:[#allocation80_spill] sm:$0xff] %v15609_v30  ;;  %7721 = vmatpush2.msra.mxu0 %v15324_v61  ;;  %8042 = vmatpush2.msra.mxu1 %v8041_v31  ;;  %v15618_v34 = vsub.f32 %v17749_v41, %v15293_v50  ;;  %v8082_v15 = vsub.f32 %v15549_v39, %v17751_v57  ;;  %v8065_v31 = vand.u32 4294901760, %v8064_v38  ;;  %v17753_v41 = vand.u32 4294901760, %v15313_v0  ;;  %v17756_v38 = vld [vmem:[#allocation117_spill] sm:$0xff]  ;;  %v17760_v12 = vld [vmem:[#allocation59_spill] sm:$0xff] }
 0x621   : > { %7723 = vmatprep.subr.mxu0 %v15321_v13  ;;  %8048 = vmatprep.subr.mxu1 %v8047_v37  ;;  %v8088_v36 = vsub.f32 %v15558_v40, %v17752_v33  ;;  %v17754_v37 = vld [vmem:[#allocation74_spill] sm:$0xff]  ;;  %v8071_v57 = vand.u32 4294901760, %v8070_v51  ;;  %v8077_v33 = vand.u32 4294901760, %v8076_v16  ;;  %v17757_v61 = vand.u32 4294901760, %v15576_v54 }
 0x622   : > { %17750 = vst [vmem:[#allocation53_spill] sm:$0xff] %v15618_v34  ;;  %7725 = vmatpush2.msra.mxu0 %v15316_v9  ;;  %8054 = vmatpush2.msra.mxu1 %v8053_v20  ;;  %v7747_v13 = vsub.f32 %v15313_v0, %v17753_v41  ;;  %v8094_v9 = vsub.f32 %v15567_v26, %v17755_v2  ;;  %v8083_v51 = vand.u32 4294901760, %v8082_v15  ;;  %v17762_v20 = vld [vmem:[#allocation116_spill] sm:$0xff] }
 0x623   : > { %7727 = vmatprep.subr.mxu0 %v15309_v14  ;;  %8060 = vmatprep.subr.mxu1 %v8059_v58  ;;  %v8100_v41 = vsub.f32 %v15576_v54, %v17757_v61  ;;  %v17758_v58 = vand.u32 4294901760, %v15585_v21  ;;  %v8089_v16 = vand.u32 4294901760, %v8088_v36 }
 0x624   : > { %7729 = vmatpush2.msra.mxu0 %v17756_v38  ;;  %8066 = vmatpush2.msra.mxu1 %v8065_v31  ;;  %v7748_v31 = vand.u32 4294901760, %v7747_v13  ;;  %v17759_v38 = vand.u32 4294901760, %v17754_v37  ;;  %v8095_v15 = vand.u32 4294901760, %v8094_v9  ;;  %v17763_v13 = vand.u32 4294901760, %v15609_v30 }
 0x625   : > { %7731 = vmatprep.subr.mxu0 %v15302_v10  ;;  %8072 = vmatprep.subr.mxu1 %v8071_v57  ;;  %v8106_v2 = vsub.f32 %v15585_v21, %v17758_v58  ;;  %v17761_v57 = vand.u32 4294901760, %v15600_v23 }
 0x626   : > { %7733 = vmatpush2.msra.mxu0 %v15297_v17  ;;  %8078 = vmatpush2.msra.mxu1 %v8077_v33  ;;  %v8112_v61 = vsub.f32 %v17754_v37, %v17759_v38  ;;  %v8101_v33 = vand.u32 4294901760, %v8100_v41  ;;  %v8124_v36 = vsub.f32 %v15609_v30, %v17763_v13  ;;  %v17764_v38 = vld [vmem:[#allocation110_spill] sm:$0xff]  ;;  %v17767_v41 = vld [vmem:[#allocation57_spill] sm:$0xff]  ;;  %v17768_v13 = vld [vmem:[#allocation103_spill] sm:$0xff] }
 0x627   : > { %7735 = vmatprep.subr.mxu0 %v15293_v50  ;;  %8084 = vmatprep.subr.mxu1 %v8083_v51  ;;  %v8118_v58 = vsub.f32 %v15600_v23, %v17761_v57  ;;  %v8107_v14 = vand.u32 4294901760, %v8106_v2  ;;  %v17765_v50 = vand.u32 4294901760, %v15618_v34  ;;  %v17766_v57 = vand.u32 4294901760, %v17760_v12  ;;  %v17769_v2 = vld [vmem:[#allocation102_spill] sm:$0xff] }
 0x628   : > { %7737 = vmatpush2.msra.mxu0 %v17762_v20  ;;  %8090 = vmatpush2.msra.mxu1 %v8089_v16  ;;  %v8113_v51 = vand.u32 4294901760, %v8112_v61  ;;  %v17771_v61 = vld [vmem:[#allocation106_spill] sm:$0xff] }
 0x629   : > { %8096 = vmatprep.subr.mxu1 %v8095_v15  ;;  %8150 = vmatprep.subr.mxu0 %v17764_v38  ;;  %v8130_v9 = vsub.f32 %v15618_v34, %v17765_v50  ;;  %v8136_v16 = vsub.f32 %v17760_v12, %v17766_v57  ;;  %v8119_v20 = vand.u32 4294901760, %v8118_v58  ;;  %v8125_v15 = vand.u32 4294901760, %v8124_v36  ;;  %v17770_v50 = vld [vmem:[#allocation108_spill] sm:$0xff]  ;;  %v17776_v36 = vld [vmem:[#allocation122_spill] sm:$0xff]  ;;  %v17779_v57 = vld [vmem:[#allocation93_spill] sm:$0xff] }
 0x62a   : > { %7749 = vmatmul.mubr.f32.vlgmr.msra.gmra.mxu0 %v7748_v31  ;;  %8102 = vmatpush2.msra.mxu1 %v8101_v33  ;;  %v17772_v33 = vld [vmem:[#allocation112_spill] sm:$0xff] }
 0x62b   : > { %8153 = vmatpush1.msra.mxu0 %v17767_v41  ;;  %8108 = vmatprep.subr.mxu1 %v8107_v14  ;;  %v8131_v17 = vand.u32 4294901760, %v8130_v9  ;;  %v8137_v31 = vand.u32 4294901760, %v8136_v16  ;;  %v17773_v14 = vld [vmem:[#allocation109_spill] sm:$0xff]  ;;  %v17774_v58 = vld [vmem:[#allocation104_spill] sm:$0xff]  ;;  %v17780_v16 = vld [vmem:[#allocation54_spill] sm:$0xff] }
 0x62c   : > { %8156 = vmatprep.subr.mxu0 %v17768_v13  ;;  %8114 = vmatpush2.msra.mxu1 %v8113_v51  ;;  %v17775_v51 = vld [vmem:[#allocation113_spill] sm:$0xff]  ;;  %v17778_v9 = vld [vmem:[#allocation100_spill] sm:$0xff] }
 0x62d   : > { %8159 = vmatpush1.msra.mxu0 %v17769_v2  ;;  %8120 = vmatprep.subr.mxu1 %v8119_v20  ;;  %v17777_v20 = vld [vmem:[#allocation96_spill] sm:$0xff] }
 0x62e   : > { %8162 = vmatprep.subr.mxu0 %v17770_v50  ;;  %8126 = vmatpush2.msra.mxu1 %v8125_v15  ;;  %v17782_v15 = vld [vmem:[#allocation95_spill] sm:$0xff] }
 0x62f   : > { %8165 = vmatpush1.msra.mxu0 %v17771_v61  ;;  %8132 = vmatprep.subr.mxu1 %v8131_v17  ;;  %v17781_v17 = vld [vmem:[#allocation56_spill] sm:$0xff] }
 0x630   : > { %8168 = vmatprep.subr.mxu0 %v17772_v33  ;;  %8138 = vmatpush2.msra.mxu1 %v8137_v31  ;;  %v17783_v31 = vld [vmem:[#allocation48_spill] sm:$0xff] }
 0x631   : > { %8171 = vmatpush1.msra.mxu0 %v17773_v14  ;;  %8352 = vmatprep.subr.mxu1 %v17774_v58  ;;  %v17784_v14 = vld [vmem:[#allocation99_spill] sm:$0xff]  ;;  %v17785_v58 = vld [vmem:[#allocation142_spill] sm:$0xff] }
 0x632   : > { %8174 = vmatprep.subr.mxu0 %v17775_v51  ;;  %8142 = vmatmul.mubr.f32.vlgmr.msra.gmra.mxu1 %v17776_v36  ;;  %v17786_v51 = vld [vmem:[#allocation98_spill] sm:$0xff]  ;;  %v17787_v36 = vld [vmem:[#allocation72_spill] sm:$0xff] }
 0x633   : > { %8177 = vmatpush1.msra.mxu0 %v17777_v20  ;;  %8354 = vmatpush1.msra.mxu1 %v17778_v9  ;;  %v17788_v20 = vld [vmem:[#allocation44_spill] sm:$0xff] }
 0x634   : > { %8180 = vmatprep.subr.mxu0 %v17779_v57  ;;  %8356 = vmatprep.subr.mxu1 %v17780_v16  ;;  %v17789_v9 = vld [vmem:[#allocation92_spill] sm:$0xff]  ;;  %v17790_v57 = vld [vmem:[#allocation97_spill] sm:$0xff]  ;;  %v17791_v16 = vld [vmem:[#allocation70_spill] sm:$0xff] }
 0x635   : > { %8183 = vmatpush1.msra.mxu0 %v17781_v17  ;;  %8358 = vmatpush1.msra.mxu1 %v17782_v15  ;;  %v17792_v17 = vld [vmem:[#allocation101_spill] sm:$0xff]  ;;  %v17793_v15 = vld [vmem:[#allocation90_spill] sm:$0xff] }
 0x636   : > { %8186 = vmatprep.subr.mxu0 %v17783_v31  ;;  %8360 = vmatprep.subr.mxu1 %v17784_v14  ;;  %v17794_v31 = vld [vmem:[#allocation91_spill] sm:$0xff] }
 0x637   : > { %8189 = vmatpush1.msra.mxu0 %v17785_v58  ;;  %8362 = vmatpush1.msra.mxu1 %v17786_v51  ;;  %v17795_v14 = vld [vmem:[#allocation55_spill] sm:$0xff]  ;;  %v17796_v58 = vld [vmem:[#allocation89_spill] sm:$0xff] }
 0x638   : > { %8192 = vmatprep.subr.mxu0 %v17787_v36  ;;  %8364 = vmatprep.subr.mxu1 %v17788_v20  ;;  %v17797_v51 = vld [vmem:[#allocation71_spill] sm:$0xff]  ;;  %v17798_v36 = vld [vmem:[#allocation140_spill] sm:$0xff]  ;;  %v17799_v20 = vld [vmem:[#allocation46_spill] sm:$0xff] }
 0x639   : > { %8195 = vmatpush1.msra.mxu0 %v17789_v9  ;;  %8366 = vmatpush1.msra.mxu1 %v17790_v57  ;;  %v17800_v9 = vld [vmem:[#allocation66_spill] sm:$0xff]  ;;  %v17801_v57 = vld [vmem:[#allocation69_spill] sm:$0xff] }
 0x63a   : > { %8198 = vmatprep.subr.mxu0 %v17791_v16  ;;  %8368 = vmatprep.subr.mxu1 %v17792_v17  ;;  %v17802_v16 = vld [vmem:[#allocation29_spill] sm:$0xff]  ;;  %v17803_v17 = vld [vmem:[#allocation60_spill] sm:$0xff] }
 0x63b   : > { %8201 = vmatpush1.msra.mxu0 %v17793_v15  ;;  %8370 = vmatpush1.msra.mxu1 %v17794_v31  ;;  %v17804_v15 = vld [vmem:[#allocation138_spill] sm:$0xff]  ;;  %v17805_v31 = vld [vmem:[#allocation136_spill] sm:$0xff] }
 0x63c   : > { %8204 = vmatprep.subr.mxu0 %v17795_v14  ;;  %8372 = vmatprep.subr.mxu1 %v17796_v58  ;;  %v17806_v14 = vld [vmem:[#allocation73_spill] sm:$0xff]  ;;  %v17807_v58 = vld [vmem:[#allocation134_spill] sm:$0xff] }
 0x63d   : > { %8207 = vmatpush1.msra.mxu0 %v17797_v51  ;;  %8374 = vmatpush1.msra.mxu1 %v17798_v36  ;;  %v17808_v51 = vld [vmem:[#allocation64_spill] sm:$0xff]  ;;  %v17809_v36 = vld [vmem:[#allocation58_spill] sm:$0xff] }
 0x63e   : > { %8210 = vmatprep.subr.mxu0 %v17799_v20  ;;  %8376 = vmatprep.subr.mxu1 %v17800_v9  ;;  %v17810_v20 = vld [vmem:[#allocation47_spill] sm:$0xff] }
 0x63f   : > { %8213 = vmatpush1.msra.mxu0 %v17801_v57  ;;  %8378 = vmatpush1.msra.mxu1 %v17802_v16  ;;  %v17811_v9 = vld [vmem:[#allocation27_spill] sm:$0xff]  ;;  %v17812_v57 = vld [vmem:[#allocation68_spill] sm:$0xff]  ;;  %v17813_v16 = vld [vmem:[#allocation34_spill] sm:$0xff] }
 0x640   : > { %8216 = vmatprep.subr.mxu0 %v17803_v17  ;;  %8380 = vmatprep.subr.mxu1 %v17804_v15  ;;  %v17814_v17 = vld [vmem:[#allocation38_spill] sm:$0xff]  ;;  %v17815_v15 = vld [vmem:[#allocation43_spill] sm:$0xff] }
 0x641   : > { %8219 = vmatpush1.msra.mxu0 %v17805_v31  ;;  %8382 = vmatpush1.msra.mxu1 %v17806_v14  ;;  %v17816_v31 = vld [vmem:[#allocation28_spill] sm:$0xff]  ;;  %v17817_v14 = vld [vmem:[#allocation150_spill] sm:$0xff] }
 0x642   : > { %8222 = vmatprep.subr.mxu0 %v17807_v58  ;;  %8384 = vmatprep.subr.mxu1 %v17808_v51  ;;  %v17818_v58 = vld [vmem:[#allocation45_spill] sm:$0xff]  ;;  %v17819_v51 = vld [vmem:[#allocation143_spill] sm:$0xff] }
 0x643   : > { %8225 = vmatpush1.msra.mxu0 %v17809_v36  ;;  %8386 = vmatpush1.msra.mxu1 %v17810_v20  ;;  %v17820_v36 = vld [vmem:[#allocation149_spill] sm:$0xff] }
 0x644   : > { %8228 = vmatprep.subr.mxu0 %v17811_v9  ;;  %8388 = vmatprep.subr.mxu1 %v17812_v57  ;;  %v17821_v20 = vld [vmem:[#allocation141_spill] sm:$0xff]  ;;  %v17822_v9 = vld [vmem:[#allocation67_spill] sm:$0xff] }
 0x645   : > { %8231 = vmatpush1.msra.mxu0 %v17813_v16  ;;  %8390 = vmatpush1.msra.mxu1 %v17814_v17  ;;  %v17823_v16 = vld [vmem:[#allocation147_spill] sm:$0xff] }
 0x646   : > { %8234 = vmatprep.subr.mxu0 %v17815_v15  ;;  %8392 = vmatprep.subr.mxu1 %v17816_v31  ;;  %v17824_v17 = vld [vmem:[#allocation19_spill] sm:$0xff]  ;;  %v17826_v31 = vld [vmem:[#allocation146_spill] sm:$0xff] }
 0x647   : > { %8237 = vmatpush1.msra.mxu0 %v17817_v14  ;;  %8394 = vmatpush1.msra.mxu1 %v17818_v58  ;;  %v17825_v15 = vld [vmem:[#allocation139_spill] sm:$0xff]  ;;  %v17827_v14 = vld [vmem:[#allocation137_spill] sm:$0xff] }
 0x648   : > { %8240 = vmatprep.subr.mxu0 %v17819_v51  ;;  %8396 = vmatprep.subr.mxu1 %v17820_v36  ;;  %v17828_v51 = vld [vmem:[#allocation132_spill] sm:$0xff] }
 0x649   : > { %8243 = vmatpush1.msra.mxu0 %v17821_v20  ;;  %8398 = vmatpush1.msra.mxu1 %v17822_v9  ;;  %v17829_v20 = vld [vmem:[#allocation145_spill] sm:$0xff] }
 0x64a   : > { %8246 = vmatprep.subr.mxu0 %v15394_v60  ;;  %8400 = vmatprep.subr.mxu1 %v17823_v16  ;;  %v17830_v60 = vld [vmem:[#allocation135_spill] sm:$0xff] }
 0x64b   : > { %8249 = vmatpush2.msra.mxu0 %v17824_v17  ;;  %8402 = vmatpush1.msra.mxu1 %v17825_v15  ;;  %v17831_v17 = vld [vmem:[#allocation133_spill] sm:$0xff] }
 0x64c   : > { %8252 = vmatprep.subr.mxu0 %v17826_v31  ;;  %8404 = vmatprep.subr.mxu1 %v17827_v14  ;;  %v17832_v31 = vld [vmem:[#allocation131_spill] sm:$0xff] }
 0x64d   : > { %8255 = vmatpush2.msra.mxu0 %v15365_v6  ;;  %8406 = vmatpush1.msra.mxu1 %v17828_v51  ;;  %v17833_v6 = vld [vmem:[#allocation84_spill] sm:$0xff] }
 0x64e   : > { %8258 = vmatprep.subr.mxu0 %v15371_v27  ;;  %8408 = vmatprep.subr.mxu1 %v17829_v20  ;;  %v17834_v27 = vld [vmem:[#allocation81_spill] sm:$0xff] }
 0x64f   : > { %8261 = vmatpush2.msra.mxu0 %v15388_v49  ;;  %8410 = vmatpush1.msra.mxu1 %v17830_v60  ;;  %v17835_v49 = vld [vmem:[#allocation75_spill] sm:$0xff] }
 0x650   : > { %8264 = vmatprep.subr.mxu0 %v15391_v32  ;;  %8412 = vmatprep.subr.mxu1 %v17831_v17  ;;  %v17836_v32 = vld [vmem:[#allocation144_spill] sm:$0xff] }
 0x651   : > { %8267 = vmatpush2.msra.mxu0 %v15407_v22  ;;  %8414 = vmatpush1.msra.mxu1 %v17832_v31  ;;  %v17837_v22 = vld [vmem:[#allocation121_spill] sm:$0xff] }
 0x652   : > { %8270 = vmatprep.subr.mxu0 %v15416_v44  ;;  %8416 = vmatprep.subr.mxu1 %v17833_v6  ;;  %v17838_v44 = vld [vmem:[#allocation35_spill] sm:$0xff] }
 0x653   : > { %8273 = vmatpush2.msra.mxu0 %v15426_v11  ;;  %8418 = vmatpush2.msra.mxu1 %v17834_v27  ;;  %v17839_v11 = vld [vmem:[#allocation22_spill] sm:$0xff] }
 0x654   : > { %8276 = vmatprep.subr.mxu0 %v15435_v18  ;;  %8420 = vmatprep.subr.mxu1 %v17835_v49  ;;  %v17840_v18 = vld [vmem:[#allocation33_spill] sm:$0xff] }
 0x655   : > { %8279 = vmatpush2.msra.mxu0 %v15450_v53  ;;  %8422 = vmatpush2.msra.mxu1 %v17836_v32 }
 0x656   : > { %8282 = vmatprep.subr.mxu0 %v15459_v59  ;;  %8424 = vmatprep.subr.mxu1 %v17837_v22 }
 0x657   : > { %8285 = vmatpush2.msra.mxu0 %v15468_v35  ;;  %8426 = vmatpush2.msra.mxu1 %v17838_v44 }
 0x658   : > { %8288 = vmatprep.subr.mxu0 %v15477_v24  ;;  %8428 = vmatprep.subr.mxu1 %v17839_v11 }
 0x659   : > { %8291 = vmatpush2.msra.mxu0 %v15486_v62  ;;  %8430 = vmatpush2.msra.mxu1 %v17840_v18 }
 0x65a   : > { %8294 = vmatprep.subr.mxu0 %v15495_v42  ;;  %8432 = vmatprep.subr.mxu1 %v15368_v52 }
 0x65b   : > { %8297 = vmatpush2.msra.mxu0 %v15504_v7  ;;  %8434 = vmatpush2.msra.mxu1 %v15385_v29 }
 0x65c   : > { %8300 = vmatprep.subr.mxu0 %v15513_v25  ;;  %8436 = vmatprep.subr.mxu1 %v15382_v28 }
 0x65d   : > { %8303 = vmatpush2.msra.mxu0 %v15522_v47  ;;  %8438 = vmatpush2.msra.mxu1 %v15403_v46 }
 0x65e   : > { %8306 = vmatprep.subr.mxu0 %v15531_v8  ;;  %8440 = vmatprep.subr.mxu1 %v15412_v43 }
 0x65f   : > { %8309 = vmatpush2.msra.mxu0 %v15540_v55  ;;  %8442 = vmatpush2.msra.mxu1 %v15422_v3 }
 0x660   : > { %8312 = vmatprep.subr.mxu0 %v15549_v39  ;;  %8444 = vmatprep.subr.mxu1 %v15400_v63 }
 0x661   : > { %8315 = vmatpush2.msra.mxu0 %v15558_v40  ;;  %8446 = vmatpush2.msra.mxu1 %v15446_v4  ;;  %v17841_v40 = vld [vmem:[#allocation78_spill] sm:$0xff] }
 0x662   : > { %8318 = vmatprep.subr.mxu0 %v15567_v26  ;;  %8448 = vmatprep.subr.mxu1 %v15379_v48 }
 0x663   : > { %8321 = vmatpush2.msra.mxu0 %v15576_v54  ;;  %8450 = vmatpush2.msra.mxu1 %v15359_v5 }
 0x664   : > { %8324 = vmatprep.subr.mxu0 %v15585_v21  ;;  %8452 = vmatprep.subr.mxu1 %v15356_v19  ;;  %v17842_v21 = vld [vmem:[#allocation115_spill] sm:$0xff]  ;;  %v17843_v19 = vld [vmem:[#allocation76_spill] sm:$0xff] }
 0x665   : > { %8327 = vmatpush2.msra.mxu0 %v17754_v37  ;;  %8454 = vmatpush2.msra.mxu1 %v15343_v1  ;;  %v17844_v1 = vld [vmem:[#allocation42_spill] sm:$0xff] }
 0x666   : > { %8330 = vmatprep.subr.mxu0 %v15600_v23  ;;  %8456 = vmatprep.subr.mxu1 %v17841_v40  ;;  %v17845_v40 = vand.u32 4294901760, %v17764_v38  ;;  %v17852_v38 = vand.u32 4294901760, %v17770_v50  ;;  %v17861_v50 = vand.u32 4294901760, %v15313_v0 }
 0x667   : > { %8333 = vmatpush2.msra.mxu0 %v15609_v30  ;;  %8458 = vmatpush2.msra.mxu1 %v15337_v45  ;;  %v17846_v30 = vld [vmem:[#allocation50_spill] sm:$0xff]  ;;  %v17847_v45 = vand.u32 4294901760, %v17767_v41  ;;  %v17854_v41 = vand.u32 4294901760, %v17771_v61  ;;  %v17864_v61 = vld [vmem:[#allocation104_spill] sm:$0xff] }
 0x668   : > { %8336 = vmatprep.subr.mxu0 %v15618_v34  ;;  %8460 = vmatprep.subr.mxu1 %v15327_v56  ;;  %v17848_v34 = vld [vmem:[#allocation31_spill] sm:$0xff]  ;;  %v17850_v56 = vld [vmem:[#allocation117_spill] sm:$0xff] }
 0x669   : > { %8339 = vmatpush2.msra.mxu0 %v17760_v12  ;;  %8342 = vmatprep.mubr.f32.mxu0 %v17842_v21  ;;  %v17849_v12 = vand.u32 4294901760, %v17768_v13  ;;  %v17856_v13 = vand.u32 4294901760, %v17772_v33  ;;  %v17867_v33 = vld [vmem:[#allocation100_spill] sm:$0xff] }
 0x66a   : > { %8462 = vmatpush2.msra.mxu1 %v17843_v19  ;;  %8345 = vmatmul.mubr.f32.vlgmr.msra.gmra.mxu0 %v15313_v0  ;;  %v17851_v19 = vand.u32 4294901760, %v17769_v2  ;;  %v17858_v2 = vand.u32 4294901760, %v17842_v21  ;;  %v17870_v21 = vld [vmem:[#allocation54_spill] sm:$0xff]  ;;  %v17873_v0 = vld [vmem:[#allocation95_spill] sm:$0xff] }
 0x66b   : > { %8464 = vmatprep.subr.mxu1 %v17844_v1  ;;  %8495 = vmatprep.subr.mxu0 %v17845_v40  ;;  %v17853_v40 = vld [vmem:[#allocation40_spill] sm:$0xff] }
 0x66c   : > { %8466 = vmatpush2.msra.mxu1 %v17846_v30  ;;  %8499 = vmatpush1.msra.mxu0 %v17847_v45  ;;  %v17855_v45 = vld [vmem:[#allocation119_spill] sm:$0xff] }
 0x66d   : > { %8468 = vmatprep.subr.mxu1 %v17848_v34  ;;  %8503 = vmatprep.subr.mxu0 %v17849_v12  ;;  %v17857_v12 = vld [vmem:[#allocation116_spill] sm:$0xff] }
 0x66e   : > { %8470 = vmatpush2.msra.mxu1 %v17850_v56  ;;  %8507 = vmatpush1.msra.mxu0 %v17851_v19  ;;  %v17859_v19 = vld [vmem:[#allocation109_spill] sm:$0xff] }
 0x66f   : > { %8472 = vmatprep.subr.mxu1 %v15302_v10  ;;  %8511 = vmatprep.subr.mxu0 %v17852_v38  ;;  %v17860_v10 = vand.u32 4294901760, %v17859_v19  ;;  %v17862_v38 = vld [vmem:[#allocation113_spill] sm:$0xff]  ;;  %v17874_v19 = vld [vmem:[#allocation48_spill] sm:$0xff] }
 0x670   : > { %8474 = vmatpush2.msra.mxu1 %v17853_v40  ;;  %8515 = vmatpush1.msra.mxu0 %v17854_v41  ;;  %v17863_v40 = vand.u32 4294901760, %v17862_v38  ;;  %v17865_v41 = vld [vmem:[#allocation96_spill] sm:$0xff]  ;;  %v17877_v38 = vld [vmem:[#allocation142_spill] sm:$0xff] }
 0x671   : > { %8476 = vmatprep.subr.mxu1 %v17855_v45  ;;  %8519 = vmatprep.subr.mxu0 %v17856_v13  ;;  %v17866_v45 = vand.u32 4294901760, %v17865_v41  ;;  %v17868_v13 = vld [vmem:[#allocation93_spill] sm:$0xff]  ;;  %v17880_v41 = vld [vmem:[#allocation72_spill] sm:$0xff] }
 0x672   : > { %8478 = vmatpush2.msra.mxu1 %v17857_v12  ;;  %8482 = vmatprep.mubr.f32.mxu1 %v17858_v2  ;;  %v17869_v12 = vand.u32 4294901760, %v17868_v13  ;;  %v17871_v2 = vld [vmem:[#allocation56_spill] sm:$0xff] }
 0x673   : > { %8523 = vmatpush1.msra.mxu0 %v17860_v10  ;;  %8486 = vmatmul.mubr.f32.vlgmr.msra.gmra.mxu1 %v17861_v50  ;;  %v17872_v10 = vand.u32 4294901760, %v17871_v2  ;;  %v17875_v50 = vand.u32 4294901760, %v17874_v19  ;;  %v17883_v13 = vld [vmem:[#allocation92_spill] sm:$0xff]  ;;  %v17885_v2 = vld [vmem:[#allocation97_spill] sm:$0xff] }
 0x674   : > { %8527 = vmatprep.subr.mxu0 %v17863_v40  ;;  %8758 = vmatprep.subr.mxu1 %v17864_v61  ;;  %v17876_v40 = vld [vmem:[#allocation99_spill] sm:$0xff]  ;;  %v17878_v61 = vand.u32 4294901760, %v17877_v38  ;;  %v17888_v19 = vld [vmem:[#allocation101_spill] sm:$0xff] }
 0x675   : > { %8531 = vmatpush1.msra.mxu0 %v17866_v45  ;;  %8760 = vmatpush1.msra.mxu1 %v17867_v33  ;;  %v17879_v45 = vld [vmem:[#allocation98_spill] sm:$0xff]  ;;  %v17881_v33 = vand.u32 4294901760, %v17880_v41  ;;  %v17891_v38 = vld [vmem:[#allocation91_spill] sm:$0xff]  ;;  %v17894_v41 = vld [vmem:[#allocation89_spill] sm:$0xff] }
 0x676   : > { %8535 = vmatprep.subr.mxu0 %v17869_v12  ;;  %8762 = vmatprep.subr.mxu1 %v17870_v21  ;;  %v17882_v12 = vld [vmem:[#allocation44_spill] sm:$0xff]  ;;  %v17884_v21 = vand.u32 4294901760, %v17883_v13 }
 0x677   : > { %8539 = vmatpush1.msra.mxu0 %v17872_v10  ;;  %8764 = vmatpush1.msra.mxu1 %v17873_v0  ;;  %v17886_v10 = vld [vmem:[#allocation70_spill] sm:$0xff]  ;;  %v17897_v13 = vld [vmem:[#allocation140_spill] sm:$0xff] }
 0x678   : > { %8543 = vmatprep.subr.mxu0 %v17875_v50  ;;  %8766 = vmatprep.subr.mxu1 %v17876_v40  ;;  %v17887_v0 = vand.u32 4294901760, %v17886_v10  ;;  %v17889_v50 = vld [vmem:[#allocation90_spill] sm:$0xff] }
 0x679   : > { %8547 = vmatpush1.msra.mxu0 %v17878_v61  ;;  %8768 = vmatpush1.msra.mxu1 %v17879_v45  ;;  %v17890_v40 = vand.u32 4294901760, %v17889_v50  ;;  %v17892_v61 = vld [vmem:[#allocation55_spill] sm:$0xff]  ;;  %v17900_v10 = vld [vmem:[#allocation66_spill] sm:$0xff]  ;;  %v17903_v50 = vld [vmem:[#allocation29_spill] sm:$0xff] }
 0x67a   : > { %8551 = vmatprep.subr.mxu0 %v17881_v33  ;;  %8770 = vmatprep.subr.mxu1 %v17882_v12  ;;  %v17893_v45 = vand.u32 4294901760, %v17892_v61  ;;  %v17895_v33 = vld [vmem:[#allocation71_spill] sm:$0xff]  ;;  %v17906_v61 = vld [vmem:[#allocation138_spill] sm:$0xff] }
 0x67b   : > { %8555 = vmatpush1.msra.mxu0 %v17884_v21  ;;  %8772 = vmatpush1.msra.mxu1 %v17885_v2  ;;  %v17896_v12 = vand.u32 4294901760, %v17895_v33  ;;  %v17898_v21 = vld [vmem:[#allocation46_spill] sm:$0xff]  ;;  %v17909_v33 = vld [vmem:[#allocation73_spill] sm:$0xff] }
 0x67c   : > { %8559 = vmatprep.subr.mxu0 %v17887_v0  ;;  %8774 = vmatprep.subr.mxu1 %v17888_v19  ;;  %v17899_v2 = vand.u32 4294901760, %v17898_v21  ;;  %v17901_v0 = vld [vmem:[#allocation69_spill] sm:$0xff]  ;;  %v17912_v21 = vld [vmem:[#allocation64_spill] sm:$0xff] }
 0x67d   : > { %8563 = vmatpush1.msra.mxu0 %v17890_v40  ;;  %8776 = vmatpush1.msra.mxu1 %v17891_v38  ;;  %v17902_v19 = vand.u32 4294901760, %v17901_v0  ;;  %v17904_v40 = vld [vmem:[#allocation60_spill] sm:$0xff]  ;;  %v17915_v0 = vld [vmem:[#allocation47_spill] sm:$0xff] }
 0x67e   : > { %8567 = vmatprep.subr.mxu0 %v17893_v45  ;;  %8778 = vmatprep.subr.mxu1 %v17894_v41  ;;  %v17905_v38 = vand.u32 4294901760, %v17904_v40  ;;  %v17907_v45 = vld [vmem:[#allocation136_spill] sm:$0xff]  ;;  %v17918_v40 = vld [vmem:[#allocation34_spill] sm:$0xff] }
 0x67f   : > { %8571 = vmatpush1.msra.mxu0 %v17896_v12  ;;  %8780 = vmatpush1.msra.mxu1 %v17897_v13  ;;  %v17908_v41 = vand.u32 4294901760, %v17907_v45  ;;  %v17910_v12 = vld [vmem:[#allocation134_spill] sm:$0xff]  ;;  %v17921_v45 = vld [vmem:[#allocation43_spill] sm:$0xff] }
 0x680   : > { %8575 = vmatprep.subr.mxu0 %v17899_v2  ;;  %8782 = vmatprep.subr.mxu1 %v17900_v10  ;;  %v17911_v13 = vand.u32 4294901760, %v17910_v12  ;;  %v17913_v2 = vld [vmem:[#allocation58_spill] sm:$0xff] }
 0x681   : > { %8579 = vmatpush1.msra.mxu0 %v17902_v19  ;;  %8784 = vmatpush1.msra.mxu1 %v17903_v50  ;;  %v17914_v10 = vand.u32 4294901760, %v17913_v2  ;;  %v17916_v19 = vld [vmem:[#allocation27_spill] sm:$0xff]  ;;  %v17924_v12 = vld [vmem:[#allocation150_spill] sm:$0xff] }
 0x682   : > { %8583 = vmatprep.subr.mxu0 %v17905_v38  ;;  %8786 = vmatprep.subr.mxu1 %v17906_v61  ;;  %v17917_v50 = vand.u32 4294901760, %v17916_v19  ;;  %v17919_v38 = vand.u32 4294901760, %v17918_v40  ;;  %v17920_v61 = vld [vmem:[#allocation38_spill] sm:$0xff] }
 0x683   : > { %8587 = vmatpush1.msra.mxu0 %v17908_v41  ;;  %8788 = vmatpush1.msra.mxu1 %v17909_v33  ;;  %v17922_v41 = vand.u32 4294901760, %v17921_v45  ;;  %v17923_v33 = vld [vmem:[#allocation28_spill] sm:$0xff] }
 0x684   : > { %8591 = vmatprep.subr.mxu0 %v17911_v13  ;;  %8790 = vmatprep.subr.mxu1 %v17912_v21  ;;  %v17925_v13 = vand.u32 4294901760, %v17924_v12  ;;  %v17926_v21 = vld [vmem:[#allocation143_spill] sm:$0xff] }
 0x685   : > { %8595 = vmatpush1.msra.mxu0 %v17914_v10  ;;  %8792 = vmatpush1.msra.mxu1 %v17915_v0  ;;  %v17927_v2 = vand.u32 4294901760, %v17926_v21  ;;  %v17930_v0 = vld [vmem:[#allocation148_spill] sm:$0xff] }
 0x686   : > { %8599 = vmatprep.subr.mxu0 %v17917_v50  ;;  %8794 = vmatprep.subr.mxu1 %v17812_v57  ;;  %v17928_v57 = vld [vmem:[#allocation141_spill] sm:$0xff]  ;;  %v17931_v19 = vand.u32 4294901760, %v17930_v0  ;;  %v17932_v50 = vld [vmem:[#allocation19_spill] sm:$0xff] }
 0x687   : > { %8603 = vmatpush1.msra.mxu0 %v17919_v38  ;;  %8796 = vmatpush1.msra.mxu1 %v17920_v61  ;;  %v17929_v10 = vand.u32 4294901760, %v17928_v57  ;;  %v17933_v40 = vand.u32 4294901760, %v17932_v50  ;;  %v17988_v57 = vld [vmem:[#allocation119_spill] sm:$0xff] }
 0x688   : > { %8607 = vmatprep.subr.mxu0 %v17922_v41  ;;  %8798 = vmatprep.subr.mxu1 %v17923_v33 }
 0x689   : > { %8611 = vmatpush1.msra.mxu0 %v17925_v13  ;;  %8800 = vmatpush1.msra.mxu1 %v17818_v58  ;;  %v17934_v58 = vld [vmem:[#allocation146_spill] sm:$0xff] }
 0x68a   : > { %8615 = vmatprep.subr.mxu0 %v17927_v2  ;;  %8802 = vmatprep.subr.mxu1 %v17820_v36  ;;  %v17935_v38 = vand.u32 4294901760, %v17934_v58  ;;  %v17936_v36 = vld [vmem:[#allocation82_spill] sm:$0xff] }
 0x68b   : > { %8619 = vmatpush1.msra.mxu0 %v17929_v10  ;;  %8804 = vmatpush1.msra.mxu1 %v17822_v9  ;;  %v17937_v61 = vand.u32 4294901760, %v17936_v36  ;;  %v17938_v9 = vld [vmem:[#allocation36_spill] sm:$0xff]  ;;  %v9806_v36 = vmov 1983009808  }
 0x68c   : > { %8623 = vmatprep.subr.mxu0 %v17931_v19  ;;  %8806 = vmatprep.subr.mxu1 %v17823_v16  ;;  %v17939_v45 = vand.u32 4294901760, %v17938_v9  ;;  %v17940_v16 = vld [vmem:[#allocation52_spill] sm:$0xff] }
 0x68d   : > { %8627 = vmatpush2.msra.mxu0 %v17933_v40  ;;  %8808 = vmatpush1.msra.mxu1 %v17825_v15  ;;  %v17941_v41 = vand.u32 4294901760, %v17940_v16  ;;  %v17942_v15 = vld [vmem:[#allocation24_spill] sm:$0xff] }
 0x68e   : > { %8631 = vmatprep.subr.mxu0 %v17935_v38  ;;  %8810 = vmatprep.subr.mxu1 %v17827_v14  ;;  %v17943_v33 = vand.u32 4294901760, %v17942_v15  ;;  %v17944_v14 = vld [vmem:[#allocation83_spill] sm:$0xff]  ;;  %v17989_v10 = vld [vmem:[#allocation116_spill] sm:$0xff] }
 0x68f   : > { %8635 = vmatpush2.msra.mxu0 %v17937_v61  ;;  %8812 = vmatpush1.msra.mxu1 %v17828_v51  ;;  %v17945_v12 = vand.u32 4294901760, %v17944_v14  ;;  %v17946_v51 = vld [vmem:[#allocation20_spill] sm:$0xff]  ;;  %v8898_v61 = vunpack.c.l.s4 %v9806_v36 }
 0x690   : > { %8639 = vmatprep.subr.mxu0 %v17939_v45  ;;  %8814 = vmatprep.subr.mxu1 %v17829_v20  ;;  %v17947_v13 = vand.u32 4294901760, %v17946_v51  ;;  %v17948_v20 = vld [vmem:[#allocation124_spill] sm:$0xff] }
 0x691   : > { %8643 = vmatpush2.msra.mxu0 %v17941_v41  ;;  %8816 = vmatpush1.msra.mxu1 %v17830_v60  ;;  %v17949_v21 = vand.u32 4294901760, %v17948_v20  ;;  %v17950_v60 = vld [vmem:[#allocation86_spill] sm:$0xff]  ;;  %v8899_v14 = vunpack.c.0.s8 %v8898_v61 }
 0x692   : > { %8647 = vmatprep.subr.mxu0 %v17943_v33  ;;  %8818 = vmatprep.subr.mxu1 %v17831_v17  ;;  %v17951_v2 = vand.u32 4294901760, %v17950_v60  ;;  %v17952_v17 = vand.u32 4294901760, %v15450_v53  ;;  %v17957_v53 = vand.u32 4294901760, %v15495_v42 }
 0x693   : > { %8651 = vmatpush2.msra.mxu0 %v17945_v12  ;;  %8820 = vmatpush1.msra.mxu1 %v17832_v31  ;;  %v17953_v31 = vand.u32 4294901760, %v15459_v59  ;;  %v17972_v59 = vld [vmem:[#allocation49_spill] sm:$0xff] }
 0x694   : > { %8655 = vmatprep.subr.mxu0 %v17947_v13  ;;  %8822 = vmatprep.subr.mxu1 %v17833_v6  ;;  %v17954_v6 = vand.u32 4294901760, %v15468_v35  ;;  %v17958_v35 = vand.u32 4294901760, %v15504_v7  ;;  %v17977_v7 = vld [vmem:[#allocation61_spill] sm:$0xff] }
 0x695   : > { %8659 = vmatpush2.msra.mxu0 %v17949_v21  ;;  %8824 = vmatpush2.msra.mxu1 %v17834_v27  ;;  %v17955_v27 = vand.u32 4294901760, %v15477_v24  ;;  %v17974_v24 = vld [vmem:[#allocation78_spill] sm:$0xff] }
 0x696   : > { %8663 = vmatprep.subr.mxu0 %v17951_v2  ;;  %8826 = vmatprep.subr.mxu1 %v17835_v49  ;;  %v17956_v49 = vand.u32 4294901760, %v15486_v62  ;;  %v17963_v62 = vand.u32 4294901760, %v15549_v39  ;;  %v17983_v39 = vld [vmem:[#allocation114_spill] sm:$0xff]  ;;  %v17990_v2 = vld [vmem:[#allocation16_spill] sm:$0xff] }
 0x697   : > { %8667 = vmatpush2.msra.mxu0 %v17952_v17  ;;  %8828 = vmatpush2.msra.mxu1 %v17836_v32  ;;  %v17967_v32 = vand.u32 4294901760, %v15576_v54  ;;  %v17985_v54 = vld [vmem:[#allocation122_spill] sm:$0xff]  ;;  %v8902_v17 = vsub.s32 %v8899_v14, %v17990_v2 }
 0x698   : > { %8671 = vmatprep.subr.mxu0 %v17953_v31  ;;  %8830 = vmatprep.subr.mxu1 %v17837_v22  ;;  %v17968_v22 = vld [vmem:[#allocation17_spill] sm:$0xff] }
 0x699   : > { %8675 = vmatpush2.msra.mxu0 %v17954_v6  ;;  %8832 = vmatpush2.msra.mxu1 %v17838_v44  ;;  %v17959_v44 = vand.u32 4294901760, %v15513_v25  ;;  %v7597_v6 = vld [vmem:[#allocation2] sm:$0xf] }
 0x69a   : > { %8679 = vmatprep.subr.mxu0 %v17955_v27  ;;  %8834 = vmatprep.subr.mxu1 %v17839_v11  ;;  %v17960_v11 = vand.u32 4294901760, %v15522_v47  ;;  %v17980_v47 = vld [vmem:[#allocation51_spill] sm:$0xff] }
 0x69b   : > { %8683 = vmatpush2.msra.mxu0 %v17956_v49  ;;  %8836 = vmatpush2.msra.mxu1 %v17840_v18  ;;  %v17961_v18 = vand.u32 4294901760, %v15531_v8  ;;  %v17981_v8 = vld [vmem:[#allocation59_spill] sm:$0xff] }
 0x69c   : > { %8687 = vmatprep.subr.mxu0 %v17957_v53  ;;  %8838 = vmatprep.subr.mxu1 %v15368_v52  ;;  %v17962_v52 = vand.u32 4294901760, %v15540_v55  ;;  %v17982_v55 = vand.u32 4294901760, %v17981_v8 }
 0x69d   : > { %8691 = vmatpush2.msra.mxu0 %v17958_v35  ;;  %8840 = vmatpush2.msra.mxu1 %v15385_v29 }
 0x69e   : > { %8695 = vmatprep.subr.mxu0 %v17959_v44  ;;  %8842 = vmatprep.subr.mxu1 %v15382_v28  ;;  %v17964_v28 = vld [vmem:[#allocation62_spill] sm:$0xff] }
 0x69f   : > { %8699 = vmatpush2.msra.mxu0 %v17960_v11  ;;  %8844 = vmatpush2.msra.mxu1 %v15403_v46  ;;  %v17965_v29 = vand.u32 4294901760, %v17964_v28  ;;  %v17966_v46 = vand.u32 4294901760, %v15567_v26  ;;  %v17984_v26 = vld [vmem:[#allocation76_spill] sm:$0xff] }
 0x6a0   : > { %8703 = vmatprep.subr.mxu0 %v17961_v18  ;;  %8846 = vmatprep.subr.mxu1 %v15412_v43  ;;  %v17969_v43 = vand.u32 4294901760, %v17968_v22 }
 0x6a1   : > { %8707 = vmatpush2.msra.mxu0 %v17962_v52  ;;  %8848 = vmatpush2.msra.mxu1 %v15422_v3  ;;  %v17970_v3 = vld [vmem:[#allocation18_spill] sm:$0xff] }
 0x6a2   : > { %8711 = vmatprep.subr.mxu0 %v17963_v62  ;;  %8850 = vmatprep.subr.mxu1 %v15400_v63  ;;  %v17971_v63 = vand.u32 4294901760, %v17754_v37  ;;  %v17987_v37 = vld [vmem:[#allocation40_spill] sm:$0xff] }
 0x6a3   : > { %8715 = vmatpush2.msra.mxu0 %v17965_v29  ;;  %8852 = vmatpush2.msra.mxu1 %v15446_v4  ;;  %v17973_v4 = vand.u32 4294901760, %v15600_v23  ;;  %v17986_v23 = vld [vmem:[#allocation30_spill] sm:$0xff] }
 0x6a4   : > { %8719 = vmatprep.subr.mxu0 %v17966_v46  ;;  %8854 = vmatprep.subr.mxu1 %v15379_v48  ;;  %v17975_v48 = vld [vmem:[#allocation80_spill] sm:$0xff] }
 0x6a5   : > { %8723 = vmatpush2.msra.mxu0 %v17967_v32  ;;  %8856 = vmatpush2.msra.mxu1 %v15359_v5  ;;  %v17976_v42 = vand.u32 4294901760, %v17975_v48  ;;  %v17978_v5 = vld [vmem:[#allocation53_spill] sm:$0xff] }
 0x6a6   : > { %8727 = vmatprep.subr.mxu0 %v17969_v43  ;;  %8858 = vmatprep.subr.mxu1 %v17970_v3  ;;  %v17979_v25 = vand.u32 4294901760, %v17978_v5 }
 0x6a7   : > { %8731 = vmatpush2.msra.mxu0 %v17971_v63  ;;  %8860 = vmatpush2.msra.mxu1 %v17972_v59 }
 0x6a8   : > { %8735 = vmatprep.subr.mxu0 %v17973_v4  ;;  %8862 = vmatprep.subr.mxu1 %v17974_v24 }
 0x6a9   : > { %8739 = vmatpush2.msra.mxu0 %v17976_v42  ;;  %8864 = vmatpush2.msra.mxu1 %v17977_v7 }
 0x6aa   : > { %8743 = vmatprep.subr.mxu0 %v17979_v25  ;;  %8866 = vmatprep.subr.mxu1 %v17980_v47 }
 0x6ab   : > { %8747 = vmatpush2.msra.mxu0 %v17982_v55  ;;  %8749 = vmatprep.mubr.f32.mxu0 %v17983_v39 }
 0x6ac   : > { %8868 = vmatpush2.msra.mxu1 %v17984_v26  ;;  %8751 = vmatmul.mubr.f32.vlgmr.msra.gmra.mxu0 %v17985_v54 }
 0x6ad   : > { %8870 = vmatprep.subr.mxu1 %v17844_v1  ;;  %8886 = vmatprep.mubr.f32.mxu1 %v17983_v39 }
 0x6ae   : > { %8872 = vmatpush2.msra.mxu1 %v17846_v30 }
 0x6af   : > { %8874 = vmatprep.subr.mxu1 %v17848_v34 }
 0x6b0   : > { %8876 = vmatpush2.msra.mxu1 %v17850_v56 }
 0x6b1   : > { %8878 = vmatprep.subr.mxu1 %v17986_v23 }
 0x6b2   : > { %8880 = vmatpush2.msra.mxu1 %v17987_v37 }
 0x6b3   : > { %8882 = vmatprep.subr.mxu1 %v17988_v57 }
 0x6b4   : > { %8884 = vmatpush2.msra.mxu1 %v17989_v10 }
 0x6b5   : > { %8888 = vmatmul.mubr.f32.vlgmr.msra.gmra.mxu1 %v17985_v54 }
 0x6ea   : > { %v7750_v0 = vpop.f32.mrf.mxu0 }
 0x6ec   : > { %v7752_v19 = vpop.f32.mrf.mxu0 }
 0x6f2   : > { %v8143_v1 = vpop.f32.mrf.mxu1 }
 0x6f3   : > { %v8144_v38 = vadd.f32 %v8143_v1, %v7750_v0 }
 0x6f4   : > { %v8145_v40 = vpop.f32.mrf.mxu1 }
 0x6f5   : > { %v8146_v56 = vadd.f32 %v8145_v40, %v7752_v19 }
 0x72a   : > { %v8346_v50 = vpop.f32.mrf.mxu0 }
 0x72b   : > { %v8347_v45 = vadd.f32 %v8346_v50, %v8144_v38 }
 0x72c   : > { %v8348_v30 = vpop.f32.mrf.mxu0 }
 0x72d   : > { %v8349_v16 = vadd.f32 %v8348_v30, %v8146_v56 }
 0x733   : > { %v8487_v58 = vpop.f32.mrf.mxu1 }
 0x734   : > { %v8488_v15 = vadd.f32 %v8487_v58, %v8347_v45 }
 0x735   : > { %v8489_v9 = vpop.f32.mrf.mxu1 }
 0x736   : > { %v8490_v33 = vadd.f32 %v8489_v9, %v8349_v16 }
 0x76c   : > { %v8752_v34 = vpop.f32.mrf.mxu0 }
 0x76d   : > { %v8753_v51 = vadd.f32 %v8752_v34, %v8488_v15 }
 0x76e   : > { %v8754_v41 = vpop.f32.mrf.mxu0 }
 0x76f   : > { %v8755_v13 = vadd.f32 %v8754_v41, %v8490_v33 }
 0x775   : > { %v8889_v12 = vpop.f32.mrf.mxu1 }
 0x776   : > { %v8890_v21 = vadd.f32 %v8889_v12, %v8753_v51 }
 0x777   : > { %v8891_v20 = vpop.f32.mrf.mxu1 }
 0x778   : > { %v8892_v60 = vadd.f32 %v8891_v20, %v8755_v13 }
 0x77a   : > { %v8896_v31 = vcombine.low %v8890_v21, %v8892_v60 }
 0x77c   : > { %v8903_v27 = vrot.slane %v8896_v31, %v8902_v17  ;;  %8910 = sbr.rel (%p9548_p4) target bundleno = 1935 (0x78f), region = 44 }
 0x77e   : > { %v8905_v49 = vadd.f32 %v8903_v27, %v7597_v6 }
 0x780   : > { %8906 = vst [vmem:[#allocation2] sm:$0xf] %v8905_v49 }
 0x781   : > { %v9807_v35 = vmov 1966171168   ;;  %v17991_v18 = vld [vmem:[#allocation16_spill] sm:$0xff]  ;;  %v17992_v62 = vld [vmem:[#allocation15_spill] sm:$0xff]  ;;  %v17993_v29 = vlaneseq }
 0x782   : > { %v8913_v44 = vunpack.c.l.s4 %v9807_v35 }
 0x783   : > { %vm8930_vm4 = vcmp.lt.s32.totalorder %v17993_v29, 256 }
 0x784   : > { %v8914_v11 = vunpack.c.0.s8 %v8913_v44 }
 0x786   : > { %v8917_v52 = vsub.s32 %v8914_v11, %v17991_v18 }
 0x787   : > { %v8947_v53 = vld [vmem:[#allocation2] sm:$0xf] }
 0x788   : > { %8948 = vst [vmem:[%s321_s1] sm:$0xf] %v8947_v53  ;;  %v8918_v28 = vrot.slane %v17992_v62, %v8917_v52 }
 0x78a   : > { %v8925_v46 = vrot.slane %v8918_v28, %v8917_v52  ;;  %v8933_v32 = vcombine.high %v8918_v28, %v8918_v28 }
 0x78c   : > { %v8926_v22 = vcombine.high %v8925_v46, %v8925_v46  ;;  %9550 = vst.msk [vmem:[%s9951_s28 + $0x2] ss:$4 sm:$0x3] %vm8930_vm4, %v8925_v46  ;;  %v8940_v43 = vrot.slane %v8933_v32, %v8917_v52 }
 0x78e   : > { %8932 = vst.msk [vmem:[%s9951_s28] ss:$4 sm:$0x3] %vm8930_vm4, %v8926_v22  ;;  %9549 = vst.msk [vmem:[%s9951_s28 + $0x1] ss:$4 sm:$0x3] %vm8930_vm4, %v8940_v43 }
 0x78f PF: > { %s9553_s0 = sshll.u32 %s9783_s23, 2  ;;  %s8979_s21 = sshll.u32 %s321_s1, 4  ;;  %s8980_s21 = int_to_ptr.vmem [resolvable:$true] %s8979_s21 }
 0x790   : > { %s8975_s20 = sadd.s32 %s9553_s0, %s9926_s16  ;;  %s17994_s15 = sand.u32 1, %s9767_s19  }
 0x791   : > { %s9554_s24 = sshll.u32 %s8975_s20, 5  ;;  %s8959_s10 = scalar_lea.sflag [#allocation4], %s17994_s15 }
 0x792   : > { %s8977_s14 = scalar_lea.hbm %s16068_s5, %s9554_s24  ;;  %s9691_s11 = scalar_lea.vmem %s8980_s21, 64 }
 0x793   : > { %p9692_p5 = scmp.ne.s32.totalorder %s8980_s21, %s9691_s11  ;;  %s9808_s22 = smov [#allocation3]  }
 0x794   : > { %s9695_s28 = sshll.u32 %s9808_s22, 4  ;;  %s9696_s28 = int_to_ptr.vmem [resolvable:$false] %s9695_s28 }
 0x795   : > { %p9693_p8 = pnand %p9692_p5, %p9901_p6  ;;  %s9697_s23 = scalar_lea.vmem %s9696_s28, 128 }
 0x796   : > { %p9698_p10 = scmp.lt.s32.totalorder %s8980_s21, %s9696_s28  ;;  %p9699_p11 = scmp.lt.s32.totalorder %s9697_s23, %s9691_s11 }
 0x797   : > { %p9694_p9 = pneg %p9693_p8 }
 0x798   : > { %p9700_p12 = por %p9699_p11, %p9698_p10 }
 0x79a   : > { %p9701_p13 = pnand %p9700_p12, %p9694_p9 }
 0x79c   : > { %9704 = shalt.err (!%p9701_p13)
}
 0x79d   : > { %s9705_s1 = scalar_lea.hbm %s8977_s14, 64  ;;  %s9709_s29 = scalar_lea.hbm %s16068_s5, 256 }
 0x79e   : > { %p9706_p0 = scmp.ne.s32.totalorder %s8977_s14, %s9705_s1  ;;  %p9710_p3 = scmp.lt.s32.totalorder %s8977_s14, %s16068_s5 }
 0x79f   : > { %p9711_p4 = scmp.lt.s32.totalorder %s9709_s29, %s9705_s1 }
 0x7a0   : > { %p9707_p1 = pnand %p9706_p0, %p9901_p6 }
 0x7a1   : > { %p9712_p5 = por %p9711_p4, %p9710_p3 }
 0x7a2   : > { %p9708_p2 = pneg %p9707_p1 }
 0x7a4   : > { %p9713_p8 = pnand %p9712_p5, %p9708_p2 }
 0x7a6   : > { %9716 = shalt.err (!%p9713_p8)
}
 0x7a7   : > { %9559 = dma.vmem_to_hbm [thread:$0]  (%p9901_p6), %s8980_s21, 64, %s8977_s14, %s8959_s10  }
 0x7a8 PF: > { %p9565_p9 = scmp.ge.s32.totalorder %s9799_s27, 2  ;;  %s9003_s25 = sand.u32 1, %s9763_s18  }
 0x7a9   : > { %s9004_s26 = scalar_lea.sflag [#allocation4], %s9003_s25 }
 0x7aa   : > { %p9562_p10 = pnand %p9565_p9, %p9908_p7 }
 0x7ac   : > { %p9563_p11 = pneg %p9562_p10 }
 0x7ae   : > { %9758 = dma.done.wait (%p9563_p11), %s9004_s26, 64  }
 0x7af   : > { %9760 = vsyncadd (%p9563_p11), %s9004_s26, 4294967232  ;;  %s19_s27 = sadd.s32 1, %s9799_s27   ;;  %s17996_s13 = sld [smem:[#allocation6_spill]] }
 0x7b0   : > { %p16_p12 = scmp.ge.s32.totalorder %s19_s27, 10   ;;  %s17997_s20 = sld [smem:[#allocation14_spill]] }
 0x7b1   : > { %s17998_s21 = sld [smem:[#allocation7_spill]]  ;;  %s18004_s18 = smov %s9767_s19 }
 0x7b2   : > { %s17999_s22 = sld [smem:[#allocation8_spill]]  ;;  %18 = sbr.rel (!%p16_p12) target bundleno = 9 (0x9), region = 102 }
 0x7b3   : > { %s18000_s23 = sld [smem:[#allocation9_spill]] }
 0x7b4   : > { %s18001_s24 = sld [smem:[#allocation10_spill]] }
 0x7b5   : > { %s18002_s25 = sld [smem:[#allocation11_spill]]  ;;  %s18005_s19 = smov %s17996_s13 }
 0x7b6   : > { %s18003_s26 = sld [smem:[#allocation13_spill]] }
 0x7b7   :  { %9009 = vsyncpa [#allocation4], 1 }
 0x7b8   :  { %9011 = vsyncpa [#allocation4 + $0x1], 1 }

</bundles_post_ra>
